<compile_context>
chip_gen: v7x
topology: tpu7x:2x2x1
jax: 0.10.0
libtpu: 0.0.40
codegen_flags: <defaults>
</compile_context>

<pallas_src>
import functools
import math

import jax
import jax.numpy as jnp
from jax.experimental import pallas as pl
from jax.experimental.pallas import tpu as pltpu

NUM_RELATIONS = 4        # RGCNConv(num_relations=4)
MAX_DEGREE = 10          # PyG MFConv default max_degree
BF16 = jnp.bfloat16


def _tpu_vmem_capacity_bytes():
    try:
        return int(pltpu.get_tpu_info().vmem_capacity_bytes)
    except Exception:
        return 64 * 1024 * 1024          # conservative fallback (v7x per-core VMEM)


_VMEM_CAP = _tpu_vmem_capacity_bytes()
# ~3/4 of physical VMEM, capped well below 128 MiB (v5e/v6e ~96 MiB, v7x ~48 MiB).
VMEM_LIMIT_BYTES = min(_VMEM_CAP * 3 // 4, 112 * 1024 * 1024)
# deeper source-node (K) panels when more VMEM is available.
DEFAULT_TILE_K = 1024 if _VMEM_CAP >= 96 * 1024 * 1024 else 512


def _round_up(v, m):
    return (v + m - 1) // m * m


# -----------------------------------------------------------------------------
# Pallas kernels
# -----------------------------------------------------------------------------
def _embed_kernel(x_ref, w_ref, b_ref, o_ref):
    # Linear(F -> H) + fused ReLU (every consumer wants relu'd features).
    h = jnp.dot(x_ref[...], w_ref[...], preferred_element_type=jnp.float32) + b_ref[...]
    o_ref[...] = jnp.maximum(h, 0.0).astype(o_ref.dtype)


def _rgcn_pre_kernel(g_ref, wrel_ref, wroot_ref, b_ref, gw_ref, gw0_ref):
    # Fold RGCN relation weights into the source features:
    #   gw[r]  = relu_h @ W_r            (bf16, streamed by the aggregation kernel)
    #   gw0    = relu_h @ W_root + bias  (f32 root term, per destination tile)
    g = g_ref[...]                                             # already ReLU'd bf16
    for r in range(NUM_RELATIONS):
        gw_ref[r] = jnp.dot(g, wrel_ref[r],
                            preferred_element_type=jnp.float32).astype(gw_ref.dtype)
    gw0_ref[...] = jnp.dot(g, wroot_ref[...],
                           preferred_element_type=jnp.float32) + b_ref[...]


def _rgcn_agg_kernel(a_ref, gw_ref, gw0_ref, inv_ref, o_ref, acc_ref):
    # RGCNConv (mean aggregation over 4 relations) for one (row tile, source tile) step.
    # a_ref:   (R, tile_n, tile_k) int8 raw edge counts
    # gw_ref:  (R, tile_k, H) bf16 pre-multiplied source features (relu_h @ W_r)
    # gw0_ref: (tile_n, H) f32 root term (+bias);  inv_ref: (tile_n, R) f32 1/deg scales
    k = pl.program_id(1)

    @pl.when(k == 0)
    def _():
        acc_ref[...] = jnp.zeros_like(acc_ref)

    a = a_ref[...].astype(BF16)                                # counts are exact in bf16
    acc_ref[...] += jnp.einsum('rnk,rkh->rnh', a, gw_ref[...],
                               preferred_element_type=jnp.float32)

    @pl.when(k == pl.num_programs(1) - 1)
    def _():
        inv = inv_ref[...]                                     # f32 mean-normalisation
        out = gw0_ref[...]
        for r in range(NUM_RELATIONS):
            out = out + inv[:, r:r + 1] * acc_ref[r]
        # fused ReLU: RGCN output always feeds MFConv through a ReLU
        o_ref[...] = jnp.maximum(out, 0.0).astype(o_ref.dtype)


def _mfconv_kernel(apply_relu, a_ref, gsrc_ref, gdst_ref, deg_ref,
                   wl_ref, wr_ref, bl_ref, o_ref, acc_ref):
    # MFConv (degree-dependent weights) for one (row tile, source tile) step.
    # a_ref: (tile_n, tile_k) int8 counts; gsrc/gdst: bf16 relu'd features;
    # deg_ref: (tile_n, D+1) exact one-hot; wl/wr: (H, (D+1)*H); bl: (1, (D+1)*H) f32.
    k = pl.program_id(1)

    @pl.when(k == 0)
    def _():
        acc_ref[...] = jnp.zeros_like(acc_ref)

    acc_ref[...] += jnp.dot(a_ref[...].astype(BF16), gsrc_ref[...],
                            preferred_element_type=jnp.float32)

    @pl.when(k == pl.num_programs(1) - 1)
    def _():
        H = o_ref.shape[-1]
        hs = acc_ref[...].astype(BF16)                         # sum of neighbour features
        # matmul-then-mask: one lane-dense slab, then degree-one-hot block selection
        slab = (jnp.dot(hs, wl_ref[...], preferred_element_type=jnp.float32)
                + jnp.dot(gdst_ref[...], wr_ref[...], preferred_element_type=jnp.float32)
                + bl_ref[...])                                 # (tile_n, (D+1)*H) f32
        deg = deg_ref[...].astype(jnp.float32)                 # (tile_n, D+1) one-hot
        out = deg[:, 0:1] * slab[:, 0:H]
        for d in range(1, MAX_DEGREE + 1):
            out = out + deg[:, d:d + 1] * slab[:, d * H:(d + 1) * H]
        if apply_relu:                                         # fused ReLU for non-last blocks
            out = jnp.maximum(out, 0.0)
        o_ref[...] = out.astype(o_ref.dtype)


def _head_kernel(pool_ref, h_ref, w1_ref, b1_ref, w2_ref, b2_ref, o_ref, acc_ref):
    # global add-pool (tiled over node tiles) + Linear -> ReLU -> Linear.
    i = pl.program_id(0)

    @pl.when(i == 0)
    def _():
        acc_ref[...] = jnp.zeros_like(acc_ref)

    acc_ref[...] += jnp.dot(pool_ref[...], h_ref[...],
                            preferred_element_type=jnp.float32)

    @pl.when(i == pl.num_programs(0) - 1)
    def _():
        pooled = acc_ref[...].astype(BF16)
        z = jnp.maximum(jnp.dot(pooled, w1_ref[...],
                                preferred_element_type=jnp.float32) + b1_ref[...],
                        0.0).astype(BF16)
        o_ref[...] = (jnp.dot(z, w2_ref[...], preferred_element_type=jnp.float32)
                      + b2_ref[...]).astype(o_ref.dtype)


# -----------------------------------------------------------------------------
# Plain-JAX glue: graph -> dense operators, parameter init, pallas_call wrappers
# -----------------------------------------------------------------------------
def build_graph_operators(edge_index, edge_attr, batch, num_nodes, num_graphs,
                          num_graphs_pad, n_pad):
    src, dst = edge_index[0], edge_index[1]
    rel = jnp.argmax(edge_attr, axis=-1)                       # edge_attr.argmax(-1)

    # raw per-relation edge counts: streamed to the kernels as int8 (exact),
    # the RGCN 1/deg mean normalisation stays in f32 as a row scale.
    a_rel_cnt = jnp.zeros((NUM_RELATIONS, n_pad, n_pad),
                          jnp.int32).at[rel, dst, src].add(1)
    cnt = jnp.sum(a_rel_cnt, axis=-1)                          # (R, n_pad)
    inv_cnt = (1.0 / jnp.maximum(cnt, 1).astype(jnp.float32)).T    # (n_pad, R) f32

    a_sum_cnt = jnp.zeros((n_pad, n_pad), jnp.int32).at[dst, src].add(1)
    deg = jnp.minimum(jnp.sum(a_sum_cnt, axis=-1), MAX_DEGREE)
    deg_oh = jax.nn.one_hot(deg, MAX_DEGREE + 1, dtype=BF16)       # exact 0/1

    # global_add_pool matrix; padded nodes map to graph id == num_graphs, whose row is
    # sliced off / ignored, so padded-node garbage never reaches the real outputs.
    batch_pad = jnp.full((n_pad,), num_graphs, jnp.int32).at[:num_nodes].set(batch)
    pool = (batch_pad[None, :] == jnp.arange(num_graphs_pad)[:, None]).astype(BF16)

    return (a_rel_cnt.astype(jnp.int8), inv_cnt,
            a_sum_cnt.astype(jnp.int8), deg_oh, pool)


def init_params(key, n_node_features, n_hidden, n_output, num_blocks):
    def dense(k, shape, scale=0.1):
        return scale * jax.random.normal(k, shape, jnp.float32)

    keys = iter(jax.random.split(key, 8 + 8 * num_blocks))
    p = {
        "emb_w": dense(next(keys), (n_node_features, n_hidden)),
        "emb_b": dense(next(keys), (1, n_hidden)),
        "blocks": [],
        "head_w1": dense(next(keys), (n_hidden, n_hidden)),
        "head_b1": dense(next(keys), (1, n_hidden)),
        "head_w2": dense(next(keys), (n_hidden, n_output)),
        "head_b2": dense(next(keys), (1, n_output)),
    }
    for _ in range(num_blocks):
        p["blocks"].append({
            "rgcn_root": dense(next(keys), (n_hidden, n_hidden)),
            "rgcn_w": dense(next(keys), (NUM_RELATIONS, n_hidden, n_hidden)),
            "rgcn_b": dense(next(keys), (1, n_hidden)),
            "mf_wl": dense(next(keys), (MAX_DEGREE + 1, n_hidden, n_hidden)),
            "mf_bl": dense(next(keys), (MAX_DEGREE + 1, n_hidden)),
            "mf_wr": dense(next(keys), (MAX_DEGREE + 1, n_hidden, n_hidden)),
        })
    return p


@functools.partial(jax.jit, static_argnames=("num_graphs", "tile_n", "tile_k"))
def gnn_forward(x, edge_index, edge_attr, batch, params, *, num_graphs,
                tile_n=128, tile_k=None):
    if tile_k is None:
        tile_k = DEFAULT_TILE_K
    num_nodes, n_feat = x.shape
    n_hidden = params["emb_w"].shape[1]
    n_output = params["head_w2"].shape[1]
    n_blocks = len(params["blocks"])

    # node tiles: multiples of 128 keep int8/bf16 blocks lane- and sublane-aligned on all
    # generations; the source-node (K) axis is tiled so VMEM use is independent of N.
    n_pad_base = _round_up(num_nodes, 128)
    tile_n = min(max(128, _round_up(tile_n, 128)), n_pad_base)
    tile_k = min(max(128, _round_up(tile_k, 128)), n_pad_base)
    n_pad = _round_up(num_nodes, math.lcm(tile_n, tile_k))
    n_tiles = n_pad // tile_n
    k_tiles = n_pad // tile_k
    g_pad = _round_up(num_graphs, 16)
    d1 = MAX_DEGREE + 1

    a_rel_i8, inv_cnt, a_sum_i8, deg_oh, pool_b = build_graph_operators(
        edge_index, edge_attr, batch, num_nodes, num_graphs, g_pad, n_pad)
    x_pad = jnp.zeros((n_pad, n_feat), BF16).at[:num_nodes].set(x.astype(BF16))

    cp_row = pltpu.CompilerParams(dimension_semantics=("parallel",),
                                  vmem_limit_bytes=VMEM_LIMIT_BYTES)
    cp_row_k = pltpu.CompilerParams(dimension_semantics=("parallel", "arbitrary"),
                                    vmem_limit_bytes=VMEM_LIMIT_BYTES)
    cp_seq = pltpu.CompilerParams(dimension_semantics=("arbitrary",),
                                  vmem_limit_bytes=VMEM_LIMIT_BYTES)

    def row_spec(cols):
        return pl.BlockSpec((tile_n, cols), lambda i: (i, 0))

    def full2d(r, c):
        return pl.BlockSpec((r, c), lambda i: (0, 0))

    # ---- node embedding (+ fused ReLU) ---------------------------------------
    h = pl.pallas_call(
        _embed_kernel,
        out_shape=jax.ShapeDtypeStruct((n_pad, n_hidden), BF16),
        grid=(n_tiles,),
        in_specs=[row_spec(n_feat), full2d(n_feat, n_hidden), full2d(1, n_hidden)],
        out_specs=row_spec(n_hidden),
        compiler_params=cp_row,
    )(x_pad, params["emb_w"].astype(BF16), params["emb_b"])

    # ---- [RGCNConv -> ReLU -> MFConv (-> ReLU)] x num_blocks -----------------
    # (the leading ReLU of each block is fused into the producing kernel above)
    for bi, blk in enumerate(params["blocks"]):
        # small pre-kernel: fold relation/root weights into the source features
        gw, gw0 = pl.pallas_call(
            _rgcn_pre_kernel,
            out_shape=(jax.ShapeDtypeStruct((NUM_RELATIONS, n_pad, n_hidden), BF16),
                       jax.ShapeDtypeStruct((n_pad, n_hidden), jnp.float32)),
            grid=(n_tiles,),
            in_specs=[row_spec(n_hidden),
                      pl.BlockSpec((NUM_RELATIONS, n_hidden, n_hidden),
                                   lambda i: (0, 0, 0)),
                      full2d(n_hidden, n_hidden),
                      full2d(1, n_hidden)],
            out_specs=[pl.BlockSpec((NUM_RELATIONS, tile_n, n_hidden),
                                    lambda i: (0, i, 0)),
                       row_spec(n_hidden)],
            compiler_params=cp_row,
        )(h, blk["rgcn_w"].astype(BF16), blk["rgcn_root"].astype(BF16), blk["rgcn_b"])

        # RGCN aggregation: int8 counts streamed, K-tiled, f32 mean-normalised, ReLU fused
        h = pl.pallas_call(
            _rgcn_agg_kernel,
            out_shape=jax.ShapeDtypeStruct((n_pad, n_hidden), BF16),
            grid=(n_tiles, k_tiles),
            in_specs=[pl.BlockSpec((NUM_RELATIONS, tile_n, tile_k),
                                   lambda i, k: (0, i, k)),
                      pl.BlockSpec((NUM_RELATIONS, tile_k, n_hidden),
                                   lambda i, k: (0, k, 0)),
                      pl.BlockSpec((tile_n, n_hidden), lambda i, k: (i, 0)),
                      pl.BlockSpec((tile_n, NUM_RELATIONS), lambda i, k: (i, 0))],
            out_specs=pl.BlockSpec((tile_n, n_hidden), lambda i, k: (i, 0)),
            scratch_shapes=[pltpu.VMEM((NUM_RELATIONS, tile_n, n_hidden), jnp.float32)],
            compiler_params=cp_row_k,
        )(a_rel_i8, gw, gw0, inv_cnt)

        # MFConv: int8 count aggregation (K-tiled), matmul-then-mask epilogue
        wl_flat = jnp.transpose(blk["mf_wl"], (1, 0, 2)).reshape(n_hidden, d1 * n_hidden)
        wr_flat = jnp.transpose(blk["mf_wr"], (1, 0, 2)).reshape(n_hidden, d1 * n_hidden)
        bl_flat = blk["mf_bl"].reshape(1, d1 * n_hidden)
        apply_relu = bi < n_blocks - 1          # last MFConv feeds add-pool un-ReLU'd
        h = pl.pallas_call(
            functools.partial(_mfconv_kernel, apply_relu),
            out_shape=jax.ShapeDtypeStruct((n_pad, n_hidden), BF16),
            grid=(n_tiles, k_tiles),
            in_specs=[pl.BlockSpec((tile_n, tile_k), lambda i, k: (i, k)),
                      pl.BlockSpec((tile_k, n_hidden), lambda i, k: (k, 0)),
                      pl.BlockSpec((tile_n, n_hidden), lambda i, k: (i, 0)),
                      pl.BlockSpec((tile_n, d1), lambda i, k: (i, 0)),
                      pl.BlockSpec((n_hidden, d1 * n_hidden), lambda i, k: (0, 0)),
                      pl.BlockSpec((n_hidden, d1 * n_hidden), lambda i, k: (0, 0)),
                      pl.BlockSpec((1, d1 * n_hidden), lambda i, k: (0, 0))],
            out_specs=pl.BlockSpec((tile_n, n_hidden), lambda i, k: (i, 0)),
            scratch_shapes=[pltpu.VMEM((tile_n, n_hidden), jnp.float32)],
            compiler_params=cp_row_k,
        )(a_sum_i8, h, h, deg_oh,
          wl_flat.astype(BF16), wr_flat.astype(BF16), bl_flat)

    # ---- global add pool + MLP head (tiled over node tiles) -------------------
    out = pl.pallas_call(
        _head_kernel,
        out_shape=jax.ShapeDtypeStruct((g_pad, n_output), jnp.float32),
        grid=(n_tiles,),
        in_specs=[pl.BlockSpec((g_pad, tile_n), lambda i: (0, i)),
                  row_spec(n_hidden),
                  full2d(n_hidden, n_hidden), full2d(1, n_hidden),
                  full2d(n_hidden, n_output), full2d(1, n_output)],
        out_specs=pl.BlockSpec((g_pad, n_output), lambda i: (0, 0)),
        scratch_shapes=[pltpu.VMEM((g_pad, n_hidden), jnp.float32)],
        compiler_params=cp_seq,
    )(pool_b, h,
      params["head_w1"].astype(BF16), params["head_b1"],
      params["head_w2"].astype(BF16), params["head_b2"])
    return out[:num_graphs]


# Pure-JAX reference mirroring the kernel numerics (bf16 operands, f32 accumulation,
# int-count aggregation + f32 mean-normalisation), with the original per-relation /
# per-degree loop structure.
def gnn_reference(x, edge_index, edge_attr, batch, params, num_graphs):
    num_nodes = x.shape[0]
    src, dst = edge_index[0], edge_index[1]
    rel = jnp.argmax(edge_attr, axis=-1)

    a_rel = jnp.zeros((NUM_RELATIONS, num_nodes, num_nodes),
                      jnp.float32).at[rel, dst, src].add(1.0)
    inv_cnt = 1.0 / jnp.maximum(jnp.sum(a_rel, axis=-1), 1.0)          # (R, N)
    a_sum = jnp.zeros((num_nodes, num_nodes), jnp.float32).at[dst, src].add(1.0)
    deg = jnp.minimum(jnp.sum(a_sum, axis=-1).astype(jnp.int32), MAX_DEGREE)
    deg_oh = jax.nn.one_hot(deg, MAX_DEGREE + 1, dtype=jnp.float32)
    pool = (batch[None, :] == jnp.arange(num_graphs)[:, None]).astype(BF16)

    a_rel_b = a_rel.astype(BF16)
    a_sum_b = a_sum.astype(BF16)

    def dotf(a, b):
        return jnp.dot(a, b, preferred_element_type=jnp.float32)

    h = dotf(x.astype(BF16), params["emb_w"].astype(BF16)) + params["emb_b"]
    for blk in params["blocks"]:
        g = jnp.maximum(h, 0.0).astype(BF16)                   # ReLU -> RGCNConv
        out = dotf(g, blk["rgcn_root"].astype(BF16)) + blk["rgcn_b"]
        for r in range(NUM_RELATIONS):
            gw_r = dotf(g, blk["rgcn_w"][r].astype(BF16)).astype(BF16)
            out = out + inv_cnt[r][:, None] * dotf(a_rel_b[r], gw_r)
        g = jnp.maximum(out, 0.0).astype(BF16)                 # ReLU -> MFConv
        hs = dotf(a_sum_b, g).astype(BF16)
        out = jnp.zeros((num_nodes, g.shape[1]), jnp.float32)
        for d in range(MAX_DEGREE + 1):
            contrib = (dotf(hs, blk["mf_wl"][d].astype(BF16))
                       + blk["mf_bl"][d][None, :]
                       + dotf(g, blk["mf_wr"][d].astype(BF16)))
            out = out + deg_oh[:, d:d + 1] * contrib
        h = out                                                # un-ReLU'd MFConv output

    pooled = dotf(pool, h.astype(BF16)).astype(BF16)
    z = jnp.maximum(dotf(pooled, params["head_w1"].astype(BF16))
                    + params["head_b1"], 0.0).astype(BF16)
    return dotf(z, params["head_w2"].astype(BF16)) + params["head_b2"]


if __name__ == "__main__":
    # small synthetic graph batch
    N_NODE_FEATURES = 4
    N_EDGE_FEATURES = NUM_RELATIONS
    N_HIDDEN = 32
    N_OUTPUT = 3
    NUM_BLOCKS = 2
    NUM_NODES = 30           # not a tile multiple -> exercises node padding
    NUM_EDGES = 80
    NUM_GRAPHS = 2

    key = jax.random.PRNGKey(0)
    kx, ke, ka, kp = jax.random.split(key, 4)

    x = jax.random.normal(kx, (NUM_NODES, N_NODE_FEATURES), jnp.float32)
    edge_index = jax.random.randint(ke, (2, NUM_EDGES), 0, NUM_NODES, jnp.int32)
    edge_attr = jax.random.normal(ka, (NUM_EDGES, N_EDGE_FEATURES), jnp.float32)
    batch = jnp.concatenate([jnp.zeros((NUM_NODES // 2,), jnp.int32),
                             jnp.ones((NUM_NODES - NUM_NODES // 2,), jnp.int32)])

    params = init_params(kp, N_NODE_FEATURES, N_HIDDEN, N_OUTPUT, NUM_BLOCKS)

    out = gnn_forward(x, edge_index, edge_attr, batch, params, num_graphs=NUM_GRAPHS)
    out = jax.block_until_ready(out)

    ref = gnn_reference(x, edge_index, edge_attr, batch, params, NUM_GRAPHS)
    assert out.shape == (NUM_GRAPHS, N_OUTPUT)
    assert jnp.allclose(out, jnp.asarray(ref), rtol=2e-2, atol=2e-2), (out, ref)

    print("KERNEL_OK")
</pallas_src>

<mosaic_0001>
module attributes {stable_mosaic.version = 11 : i64} {
  func.func private @main(%arg0: i32) attributes {dimension_semantics = [#tpu.dimension_semantics<core_parallel>], iteration_bounds = array<i64: 2>, tpu.core_type = #tpu.core_type<sc_scalar_subcore>, window_params = []} {
    return
  }
}

module attributes {stable_mosaic.version = 11 : i64} {
  func.func private @main(%arg0: i32) attributes {dimension_semantics = [#tpu.dimension_semantics<core_parallel>], iteration_bounds = array<i64: 2>, tpu.core_type = #tpu.core_type<sc_scalar_subcore>, window_params = []} {
    return
  }
}

module attributes {stable_mosaic.version = 11 : i64} {
  func.func @_rgcn_pre_kernel(%arg0: i32, %arg1: memref<128x32xbf16, #tpu.memory_space<vmem>>, %arg2: memref<4x32x32xbf16, #tpu.memory_space<vmem>>, %arg3: memref<32x32xbf16, #tpu.memory_space<vmem>>, %arg4: memref<1x32xf32, #tpu.memory_space<vmem>>, %arg5: memref<4x128x32xbf16, #tpu.memory_space<vmem>>, %arg6: memref<128x32xf32, #tpu.memory_space<vmem>>) attributes {dimension_semantics = [#tpu.dimension_semantics<parallel>], iteration_bounds = array<i64: 1>, scalar_prefetch = 0 : i64, scratch_operands = 0 : i64, tpu.core_type = #tpu.core_type<tc>, window_params = [{transform_indices = @transform_0, window_bounds = array<i64: 128, 32>}, {pipeline_mode = #tpu.pipeline_mode<synchronous>, transform_indices = @transform_1, window_bounds = array<i64: 4, 32, 32>}, {pipeline_mode = #tpu.pipeline_mode<synchronous>, transform_indices = @transform_2, window_bounds = array<i64: 32, 32>}, {pipeline_mode = #tpu.pipeline_mode<synchronous>, transform_indices = @transform_3, window_bounds = array<i64: 1, 32>}, {transform_indices = @transform_4, window_bounds = array<i64: 4, 128, 32>}, {transform_indices = @transform_5, window_bounds = array<i64: 128, 32>}]} {
    %c0 = arith.constant 0 : index
    %c0_0 = arith.constant 0 : index
    %0 = vector.load %arg1[%c0, %c0_0] : memref<128x32xbf16, #tpu.memory_space<vmem>>, vector<128x32xbf16>
    %c0_1 = arith.constant 0 : index
    %c0_2 = arith.constant 0 : index
    %c0_3 = arith.constant 0 : index
    %1 = vector.load %arg2[%c0_1, %c0_2, %c0_3] : memref<4x32x32xbf16, #tpu.memory_space<vmem>>, vector<1x32x32xbf16>
    %2 = vector.shape_cast %1 : vector<1x32x32xbf16> to vector<32x32xbf16>
    %cst = arith.constant dense<0.000000e+00> : vector<128x32xf32>
    %3 = tpu.matmul %0, %2, %cst {dimension_numbers = #tpu.dot_dimension_numbers<[1], [0], [0], [1], [0, 0, 1, 1], [], []>} : vector<128x32xbf16>, vector<32x32xbf16>, vector<128x32xf32> -> vector<128x32xf32>
    %4 = arith.truncf %3 : vector<128x32xf32> to vector<128x32xbf16>
    %c0_4 = arith.constant 0 : index
    %c0_5 = arith.constant 0 : index
    %c0_6 = arith.constant 0 : index
    %5 = vector.load %arg5[%c0_4, %c0_5, %c0_6] : memref<4x128x32xbf16, #tpu.memory_space<vmem>>, vector<1x128x32xbf16>
    %6 = vector.shape_cast %5 : vector<1x128x32xbf16> to vector<128x32xbf16>
    %7 = vector.shape_cast %4 : vector<128x32xbf16> to vector<1x128x32xbf16>
    tpu.vector_store %arg5[%c0_4, %c0_5, %c0_6], %7 {strides = array<i32>} : memref<4x128x32xbf16, #tpu.memory_space<vmem>>, vector<1x128x32xbf16>,
    %c1 = arith.constant 1 : index
    %c0_7 = arith.constant 0 : index
    %c0_8 = arith.constant 0 : index
    %8 = vector.load %arg2[%c1, %c0_7, %c0_8] : memref<4x32x32xbf16, #tpu.memory_space<vmem>>, vector<1x32x32xbf16>
    %9 = vector.shape_cast %8 : vector<1x32x32xbf16> to vector<32x32xbf16>
    %cst_9 = arith.constant dense<0.000000e+00> : vector<128x32xf32>
    %10 = tpu.matmul %0, %9, %cst_9 {dimension_numbers = #tpu.dot_dimension_numbers<[1], [0], [0], [1], [0, 0, 1, 1], [], []>} : vector<128x32xbf16>, vector<32x32xbf16>, vector<128x32xf32> -> vector<128x32xf32>
    %11 = arith.truncf %10 : vector<128x32xf32> to vector<128x32xbf16>
    %c1_10 = arith.constant 1 : index
    %c0_11 = arith.constant 0 : index
    %c0_12 = arith.constant 0 : index
    %12 = vector.load %arg5[%c1_10, %c0_11, %c0_12] : memref<4x128x32xbf16, #tpu.memory_space<vmem>>, vector<1x128x32xbf16>
    %13 = vector.shape_cast %12 : vector<1x128x32xbf16> to vector<128x32xbf16>
    %14 = vector.shape_cast %11 : vector<128x32xbf16> to vector<1x128x32xbf16>
    tpu.vector_store %arg5[%c1_10, %c0_11, %c0_12], %14 {strides = array<i32>} : memref<4x128x32xbf16, #tpu.memory_space<vmem>>, vector<1x128x32xbf16>,
    %c2 = arith.constant 2 : index
    %c0_13 = arith.constant 0 : index
    %c0_14 = arith.constant 0 : index
    %15 = vector.load %arg2[%c2, %c0_13, %c0_14] : memref<4x32x32xbf16, #tpu.memory_space<vmem>>, vector<1x32x32xbf16>
    %16 = vector.shape_cast %15 : vector<1x32x32xbf16> to vector<32x32xbf16>
    %cst_15 = arith.constant dense<0.000000e+00> : vector<128x32xf32>
    %17 = tpu.matmul %0, %16, %cst_15 {dimension_numbers = #tpu.dot_dimension_numbers<[1], [0], [0], [1], [0, 0, 1, 1], [], []>} : vector<128x32xbf16>, vector<32x32xbf16>, vector<128x32xf32> -> vector<128x32xf32>
    %18 = arith.truncf %17 : vector<128x32xf32> to vector<128x32xbf16>
    %c2_16 = arith.constant 2 : index
    %c0_17 = arith.constant 0 : index
    %c0_18 = arith.constant 0 : index
    %19 = vector.load %arg5[%c2_16, %c0_17, %c0_18] : memref<4x128x32xbf16, #tpu.memory_space<vmem>>, vector<1x128x32xbf16>
    %20 = vector.shape_cast %19 : vector<1x128x32xbf16> to vector<128x32xbf16>
    %21 = vector.shape_cast %18 : vector<128x32xbf16> to vector<1x128x32xbf16>
    tpu.vector_store %arg5[%c2_16, %c0_17, %c0_18], %21 {strides = array<i32>} : memref<4x128x32xbf16, #tpu.memory_space<vmem>>, vector<1x128x32xbf16>,
    %c3 = arith.constant 3 : index
    %c0_19 = arith.constant 0 : index
    %c0_20 = arith.constant 0 : index
    %22 = vector.load %arg2[%c3, %c0_19, %c0_20] : memref<4x32x32xbf16, #tpu.memory_space<vmem>>, vector<1x32x32xbf16>
    %23 = vector.shape_cast %22 : vector<1x32x32xbf16> to vector<32x32xbf16>
    %cst_21 = arith.constant dense<0.000000e+00> : vector<128x32xf32>
    %24 = tpu.matmul %0, %23, %cst_21 {dimension_numbers = #tpu.dot_dimension_numbers<[1], [0], [0], [1], [0, 0, 1, 1], [], []>} : vector<128x32xbf16>, vector<32x32xbf16>, vector<128x32xf32> -> vector<128x32xf32>
    %25 = arith.truncf %24 : vector<128x32xf32> to vector<128x32xbf16>
    %c3_22 = arith.constant 3 : index
    %c0_23 = arith.constant 0 : index
    %c0_24 = arith.constant 0 : index
    %26 = vector.load %arg5[%c3_22, %c0_23, %c0_24] : memref<4x128x32xbf16, #tpu.memory_space<vmem>>, vector<1x128x32xbf16>
    %27 = vector.shape_cast %26 : vector<1x128x32xbf16> to vector<128x32xbf16>
    %28 = vector.shape_cast %25 : vector<128x32xbf16> to vector<1x128x32xbf16>
    tpu.vector_store %arg5[%c3_22, %c0_23, %c0_24], %28 {strides = array<i32>} : memref<4x128x32xbf16, #tpu.memory_space<vmem>>, vector<1x128x32xbf16>,
    %c0_25 = arith.constant 0 : index
    %c0_26 = arith.constant 0 : index
    %29 = vector.load %arg3[%c0_25, %c0_26] : memref<32x32xbf16, #tpu.memory_space<vmem>>, vector<32x32xbf16>
    %cst_27 = arith.constant dense<0.000000e+00> : vector<128x32xf32>
    %30 = tpu.matmul %0, %29, %cst_27 {dimension_numbers = #tpu.dot_dimension_numbers<[1], [0], [0], [1], [0, 0, 1, 1], [], []>} : vector<128x32xbf16>, vector<32x32xbf16>, vector<128x32xf32> -> vector<128x32xf32>
    %c0_28 = arith.constant 0 : index
    %c0_29 = arith.constant 0 : index
    %31 = vector.load %arg4[%c0_28, %c0_29] : memref<1x32xf32, #tpu.memory_space<vmem>>, vector<1x32xf32>
    %32 = vector.broadcast %31 : vector<1x32xf32> to vector<128x32xf32>
    %33 = arith.addf %30, %32 : vector<128x32xf32>
    %c0_30 = arith.constant 0 : index
    %c0_31 = arith.constant 0 : index
    %34 = vector.load %arg6[%c0_30, %c0_31] : memref<128x32xf32, #tpu.memory_space<vmem>>, vector<128x32xf32>
    tpu.vector_store %arg6[%c0_30, %c0_31], %33 {strides = array<i32>} : memref<128x32xf32, #tpu.memory_space<vmem>>, vector<128x32xf32>,
    return
  }
  func.func @transform_0(%arg0: i32) -> (i32, i32) {
    %c0_i32 = arith.constant 0 : i32
    %c0_i32_0 = arith.constant 0 : i32
    return %arg0, %c0_i32 : i32, i32
  }
  func.func @transform_1(%arg0: i32) -> (i32, i32, i32) {
    %c0_i32 = arith.constant 0 : i32
    %c0_i32_0 = arith.constant 0 : i32
    %c0_i32_1 = arith.constant 0 : i32
    %c0_i32_2 = arith.constant 0 : i32
    return %c0_i32, %c0_i32_0, %c0_i32_1 : i32, i32, i32
  }
  func.func @transform_2(%arg0: i32) -> (i32, i32) {
    %c0_i32 = arith.constant 0 : i32
    %c0_i32_0 = arith.constant 0 : i32
    %c0_i32_1 = arith.constant 0 : i32
    return %c0_i32, %c0_i32_0 : i32, i32
  }
  func.func @transform_3(%arg0: i32) -> (i32, i32) {
    %c0_i32 = arith.constant 0 : i32
    %c0_i32_0 = arith.constant 0 : i32
    %c0_i32_1 = arith.constant 0 : i32
    return %c0_i32, %c0_i32_0 : i32, i32
  }
  func.func @transform_4(%arg0: i32) -> (i32, i32, i32) {
    %c0_i32 = arith.constant 0 : i32
    %c0_i32_0 = arith.constant 0 : i32
    %c0_i32_1 = arith.constant 0 : i32
    return %c0_i32, %arg0, %c0_i32_0 : i32, i32, i32
  }
  func.func @transform_5(%arg0: i32) -> (i32, i32) {
    %c0_i32 = arith.constant 0 : i32
    %c0_i32_0 = arith.constant 0 : i32
    return %arg0, %c0_i32 : i32, i32
  }
}

module attributes {stable_mosaic.version = 11 : i64} {
  func.func @_embed_kernel(%arg0: i32, %arg1: memref<128x4xbf16, #tpu.memory_space<vmem>>, %arg2: memref<4x32xbf16, #tpu.memory_space<vmem>>, %arg3: memref<1x32xf32, #tpu.memory_space<vmem>>, %arg4: memref<128x32xbf16, #tpu.memory_space<vmem>>) attributes {dimension_semantics = [#tpu.dimension_semantics<parallel>], iteration_bounds = array<i64: 1>, scalar_prefetch = 0 : i64, scratch_operands = 0 : i64, tpu.core_type = #tpu.core_type<tc>, window_params = [{transform_indices = @transform_0, window_bounds = array<i64: 128, 4>}, {pipeline_mode = #tpu.pipeline_mode<synchronous>, transform_indices = @transform_1, window_bounds = array<i64: 4, 32>}, {pipeline_mode = #tpu.pipeline_mode<synchronous>, transform_indices = @transform_2, window_bounds = array<i64: 1, 32>}, {transform_indices = @transform_3, window_bounds = array<i64: 128, 32>}]} {
    %c0 = arith.constant 0 : index
    %c0_0 = arith.constant 0 : index
    %0 = vector.load %arg1[%c0, %c0_0] : memref<128x4xbf16, #tpu.memory_space<vmem>>, vector<128x4xbf16>
    %c0_1 = arith.constant 0 : index
    %c0_2 = arith.constant 0 : index
    %1 = vector.load %arg2[%c0_1, %c0_2] : memref<4x32xbf16, #tpu.memory_space<vmem>>, vector<4x32xbf16>
    %cst = arith.constant dense<0.000000e+00> : vector<128x32xf32>
    %2 = tpu.matmul %0, %1, %cst {dimension_numbers = #tpu.dot_dimension_numbers<[1], [0], [0], [1], [0, 0, 1, 1], [], []>} : vector<128x4xbf16>, vector<4x32xbf16>, vector<128x32xf32> -> vector<128x32xf32>
    %c0_3 = arith.constant 0 : index
    %c0_4 = arith.constant 0 : index
    %3 = vector.load %arg3[%c0_3, %c0_4] : memref<1x32xf32, #tpu.memory_space<vmem>>, vector<1x32xf32>
    %4 = vector.broadcast %3 : vector<1x32xf32> to vector<128x32xf32>
    %5 = arith.addf %2, %4 : vector<128x32xf32>
    %cst_5 = arith.constant 0.000000e+00 : f32
    %6 = vector.broadcast %cst_5 : f32 to vector<128x32xf32>
    %7 = arith.maximumf %5, %6 : vector<128x32xf32>
    %8 = arith.truncf %7 : vector<128x32xf32> to vector<128x32xbf16>
    %c0_6 = arith.constant 0 : index
    %c0_7 = arith.constant 0 : index
    %9 = vector.load %arg4[%c0_6, %c0_7] : memref<128x32xbf16, #tpu.memory_space<vmem>>, vector<128x32xbf16>
    tpu.vector_store %arg4[%c0_6, %c0_7], %8 {strides = array<i32>} : memref<128x32xbf16, #tpu.memory_space<vmem>>, vector<128x32xbf16>,
    return
  }
  func.func @transform_0(%arg0: i32) -> (i32, i32) {
    %c0_i32 = arith.constant 0 : i32
    %c0_i32_0 = arith.constant 0 : i32
    return %arg0, %c0_i32 : i32, i32
  }
  func.func @transform_1(%arg0: i32) -> (i32, i32) {
    %c0_i32 = arith.constant 0 : i32
    %c0_i32_0 = arith.constant 0 : i32
    %c0_i32_1 = arith.constant 0 : i32
    return %c0_i32, %c0_i32_0 : i32, i32
  }
  func.func @transform_2(%arg0: i32) -> (i32, i32) {
    %c0_i32 = arith.constant 0 : i32
    %c0_i32_0 = arith.constant 0 : i32
    %c0_i32_1 = arith.constant 0 : i32
    return %c0_i32, %c0_i32_0 : i32, i32
  }
  func.func @transform_3(%arg0: i32) -> (i32, i32) {
    %c0_i32 = arith.constant 0 : i32
    %c0_i32_0 = arith.constant 0 : i32
    return %arg0, %c0_i32 : i32, i32
  }
}

module attributes {stable_mosaic.version = 11 : i64} {
  func.func @_rgcn_agg_kernel(%arg0: i32, %arg1: i32, %arg2: memref<4x128x128xi8, #tpu.memory_space<vmem>>, %arg3: memref<4x128x32xbf16, #tpu.memory_space<vmem>>, %arg4: memref<128x32xf32, #tpu.memory_space<vmem>>, %arg5: memref<128x4xf32, #tpu.memory_space<vmem>>, %arg6: memref<128x32xbf16, #tpu.memory_space<vmem>>, %arg7: memref<4x128x32xf32, #tpu.memory_space<vmem>>) attributes {dimension_semantics = [#tpu.dimension_semantics<parallel>, #tpu.dimension_semantics<arbitrary>], iteration_bounds = array<i64: 1, 1>, scalar_prefetch = 0 : i64, scratch_operands = 1 : i64, tpu.core_type = #tpu.core_type<tc>, window_params = [{transform_indices = @transform_0, window_bounds = array<i64: 4, 128, 128>}, {transform_indices = @transform_1, window_bounds = array<i64: 4, 128, 32>}, {transform_indices = @transform_2, window_bounds = array<i64: 128, 32>}, {transform_indices = @transform_3, window_bounds = array<i64: 128, 4>}, {transform_indices = @transform_4, window_bounds = array<i64: 128, 32>}]} {
    %c0_i32 = arith.constant 0 : i32
    %0 = arith.cmpi eq, %arg1, %c0_i32 : i32
    %1 = arith.extui %0 : i1 to i32
    %c0_i32_0 = arith.constant 0 : i32
    %2 = arith.cmpi ne, %1, %c0_i32_0 : i32
    scf.if %2 {
      %cst_14 = arith.constant 0.000000e+00 : f32
      %13 = vector.broadcast %cst_14 : f32 to vector<4x128x32xf32>
      %c0_15 = arith.constant 0 : index
      %c0_16 = arith.constant 0 : index
      %c0_17 = arith.constant 0 : index
      %14 = vector.load %arg7[%c0_15, %c0_16, %c0_17] : memref<4x128x32xf32, #tpu.memory_space<vmem>>, vector<4x128x32xf32>
      tpu.vector_store %arg7[%c0_15, %c0_16, %c0_17], %13 {strides = array<i32>} : memref<4x128x32xf32, #tpu.memory_space<vmem>>, vector<4x128x32xf32>,
    } else {
    }
    %c0 = arith.constant 0 : index
    %c0_1 = arith.constant 0 : index
    %c0_2 = arith.constant 0 : index
    %3 = vector.load %arg2[%c0, %c0_1, %c0_2] : memref<4x128x128xi8, #tpu.memory_space<vmem>>, vector<4x128x128xi8>
    %4 = arith.sitofp %3 : vector<4x128x128xi8> to vector<4x128x128xbf16>
    %c0_3 = arith.constant 0 : index
    %c0_4 = arith.constant 0 : index
    %c0_5 = arith.constant 0 : index
    %5 = vector.load %arg7[%c0_3, %c0_4, %c0_5] : memref<4x128x32xf32, #tpu.memory_space<vmem>>, vector<4x128x32xf32>
    %c0_6 = arith.constant 0 : index
    %c0_7 = arith.constant 0 : index
    %c0_8 = arith.constant 0 : index
    %6 = vector.load %arg3[%c0_6, %c0_7, %c0_8] : memref<4x128x32xbf16, #tpu.memory_space<vmem>>, vector<4x128x32xbf16>
    "tpu.trace_start"() <{level = 10 : i32, message = "rnk,rkh->rnh"}> : () -> ()
    %cst = arith.constant dense<0.000000e+00> : vector<4x128x32xf32>
    %7 = tpu.matmul %4, %6, %cst {dimension_numbers = #tpu.dot_dimension_numbers<[2], [1], [1], [2], [0, 0, 0, 1, 1, 2], [0], [0]>} : vector<4x128x128xbf16>, vector<4x128x32xbf16>, vector<4x128x32xf32> -> vector<4x128x32xf32>
    "tpu.trace_stop"() : () -> ()
    %8 = arith.addf %5, %7 : vector<4x128x32xf32>
    %c0_9 = arith.constant 0 : index
    %c0_10 = arith.constant 0 : index
    %c0_11 = arith.constant 0 : index
    %9 = vector.load %arg7[%c0_9, %c0_10, %c0_11] : memref<4x128x32xf32, #tpu.memory_space<vmem>>, vector<4x128x32xf32>
    tpu.vector_store %arg7[%c0_9, %c0_10, %c0_11], %8 {strides = array<i32>} : memref<4x128x32xf32, #tpu.memory_space<vmem>>, vector<4x128x32xf32>,
    %c0_i32_12 = arith.constant 0 : i32
    %10 = arith.cmpi eq, %arg1, %c0_i32_12 : i32
    %11 = arith.extui %10 : i1 to i32
    %c0_i32_13 = arith.constant 0 : i32
    %12 = arith.cmpi ne, %11, %c0_i32_13 : i32
    scf.if %12 {
      %c0_14 = arith.constant 0 : index
      %c0_15 = arith.constant 0 : index
      %13 = vector.load %arg5[%c0_14, %c0_15] : memref<128x4xf32, #tpu.memory_space<vmem>>, vector<128x4xf32>
      %c0_16 = arith.constant 0 : index
      %c0_17 = arith.constant 0 : index
      %14 = vector.load %arg4[%c0_16, %c0_17] : memref<128x32xf32, #tpu.memory_space<vmem>>, vector<128x32xf32>
      %15 = vector.extract_strided_slice %13 {offsets = [0, 0], sizes = [128, 1], strides = [1, 1]} : vector<128x4xf32> to vector<128x1xf32>
      %c0_18 = arith.constant 0 : index
      %c0_19 = arith.constant 0 : index
      %c0_20 = arith.constant 0 : index
      %16 = vector.load %arg7[%c0_18, %c0_19, %c0_20] : memref<4x128x32xf32, #tpu.memory_space<vmem>>, vector<1x128x32xf32>
      %17 = vector.shape_cast %16 : vector<1x128x32xf32> to vector<128x32xf32>
      %18 = vector.broadcast %15 : vector<128x1xf32> to vector<128x32xf32>
      %19 = arith.mulf %18, %17 : vector<128x32xf32>
      %20 = arith.addf %14, %19 : vector<128x32xf32>
      %21 = vector.extract_strided_slice %13 {offsets = [0, 1], sizes = [128, 1], strides = [1, 1]} : vector<128x4xf32> to vector<128x1xf32>
      %c1 = arith.constant 1 : index
      %c0_21 = arith.constant 0 : index
      %c0_22 = arith.constant 0 : index
      %22 = vector.load %arg7[%c1, %c0_21, %c0_22] : memref<4x128x32xf32, #tpu.memory_space<vmem>>, vector<1x128x32xf32>
      %23 = vector.shape_cast %22 : vector<1x128x32xf32> to vector<128x32xf32>
      %24 = vector.broadcast %21 : vector<128x1xf32> to vector<128x32xf32>
      %25 = arith.mulf %24, %23 : vector<128x32xf32>
      %26 = arith.addf %20, %25 : vector<128x32xf32>
      %27 = vector.extract_strided_slice %13 {offsets = [0, 2], sizes = [128, 1], strides = [1, 1]} : vector<128x4xf32> to vector<128x1xf32>
      %c2 = arith.constant 2 : index
      %c0_23 = arith.constant 0 : index
      %c0_24 = arith.constant 0 : index
      %28 = vector.load %arg7[%c2, %c0_23, %c0_24] : memref<4x128x32xf32, #tpu.memory_space<vmem>>, vector<1x128x32xf32>
      %29 = vector.shape_cast %28 : vector<1x128x32xf32> to vector<128x32xf32>
      %30 = vector.broadcast %27 : vector<128x1xf32> to vector<128x32xf32>
      %31 = arith.mulf %30, %29 : vector<128x32xf32>
      %32 = arith.addf %26, %31 : vector<128x32xf32>
      %33 = vector.extract_strided_slice %13 {offsets = [0, 3], sizes = [128, 1], strides = [1, 1]} : vector<128x4xf32> to vector<128x1xf32>
      %c3 = arith.constant 3 : index
      %c0_25 = arith.constant 0 : index
      %c0_26 = arith.constant 0 : index
      %34 = vector.load %arg7[%c3, %c0_25, %c0_26] : memref<4x128x32xf32, #tpu.memory_space<vmem>>, vector<1x128x32xf32>
      %35 = vector.shape_cast %34 : vector<1x128x32xf32> to vector<128x32xf32>
      %36 = vector.broadcast %33 : vector<128x1xf32> to vector<128x32xf32>
      %37 = arith.mulf %36, %35 : vector<128x32xf32>
      %38 = arith.addf %32, %37 : vector<128x32xf32>
      %cst_27 = arith.constant 0.000000e+00 : f32
      %39 = vector.broadcast %cst_27 : f32 to vector<128x32xf32>
      %40 = arith.maximumf %38, %39 : vector<128x32xf32>
      %41 = arith.truncf %40 : vector<128x32xf32> to vector<128x32xbf16>
      %c0_28 = arith.constant 0 : index
      %c0_29 = arith.constant 0 : index
      %42 = vector.load %arg6[%c0_28, %c0_29] : memref<128x32xbf16, #tpu.memory_space<vmem>>, vector<128x32xbf16>
      tpu.vector_store %arg6[%c0_28, %c0_29], %41 {strides = array<i32>} : memref<128x32xbf16, #tpu.memory_space<vmem>>, vector<128x32xbf16>,
    } else {
    }
    return
  }
  func.func @transform_0(%arg0: i32, %arg1: i32) -> (i32, i32, i32) {
    %c0_i32 = arith.constant 0 : i32
    %c0_i32_0 = arith.constant 0 : i32
    return %c0_i32, %arg0, %arg1 : i32, i32, i32
  }
  func.func @transform_1(%arg0: i32, %arg1: i32) -> (i32, i32, i32) {
    %c0_i32 = arith.constant 0 : i32
    %c0_i32_0 = arith.constant 0 : i32
    %c0_i32_1 = arith.constant 0 : i32
    return %c0_i32, %arg1, %c0_i32_0 : i32, i32, i32
  }
  func.func @transform_2(%arg0: i32, %arg1: i32) -> (i32, i32) {
    %c0_i32 = arith.constant 0 : i32
    %c0_i32_0 = arith.constant 0 : i32
    return %arg0, %c0_i32 : i32, i32
  }
  func.func @transform_3(%arg0: i32, %arg1: i32) -> (i32, i32) {
    %c0_i32 = arith.constant 0 : i32
    %c0_i32_0 = arith.constant 0 : i32
    return %arg0, %c0_i32 : i32, i32
  }
  func.func @transform_4(%arg0: i32, %arg1: i32) -> (i32, i32) {
    %c0_i32 = arith.constant 0 : i32
    %c0_i32_0 = arith.constant 0 : i32
    return %arg0, %c0_i32 : i32, i32
  }
}

module attributes {stable_mosaic.version = 11 : i64} {
  func.func @_mfconv_kernel(%arg0: i32, %arg1: i32, %arg2: memref<128x128xi8, #tpu.memory_space<vmem>>, %arg3: memref<128x32xbf16, #tpu.memory_space<vmem>>, %arg4: memref<128x32xbf16, #tpu.memory_space<vmem>>, %arg5: memref<128x11xbf16, #tpu.memory_space<vmem>>, %arg6: memref<32x352xbf16, #tpu.memory_space<vmem>>, %arg7: memref<32x352xbf16, #tpu.memory_space<vmem>>, %arg8: memref<1x352xf32, #tpu.memory_space<vmem>>, %arg9: memref<128x32xbf16, #tpu.memory_space<vmem>>, %arg10: memref<128x32xf32, #tpu.memory_space<vmem>>) attributes {dimension_semantics = [#tpu.dimension_semantics<parallel>, #tpu.dimension_semantics<arbitrary>], iteration_bounds = array<i64: 1, 1>, scalar_prefetch = 0 : i64, scratch_operands = 1 : i64, tpu.core_type = #tpu.core_type<tc>, window_params = [{transform_indices = @transform_0, window_bounds = array<i64: 128, 128>}, {transform_indices = @transform_1, window_bounds = array<i64: 128, 32>}, {transform_indices = @transform_2, window_bounds = array<i64: 128, 32>}, {transform_indices = @transform_3, window_bounds = array<i64: 128, 11>}, {pipeline_mode = #tpu.pipeline_mode<synchronous>, transform_indices = @transform_4, window_bounds = array<i64: 32, 352>}, {pipeline_mode = #tpu.pipeline_mode<synchronous>, transform_indices = @transform_5, window_bounds = array<i64: 32, 352>}, {pipeline_mode = #tpu.pipeline_mode<synchronous>, transform_indices = @transform_6, window_bounds = array<i64: 1, 352>}, {transform_indices = @transform_7, window_bounds = array<i64: 128, 32>}]} {
    %c0_i32 = arith.constant 0 : i32
    %0 = arith.cmpi eq, %arg1, %c0_i32 : i32
    %1 = arith.extui %0 : i1 to i32
    %c0_i32_0 = arith.constant 0 : i32
    %2 = arith.cmpi ne, %1, %c0_i32_0 : i32
    scf.if %2 {
      %cst_10 = arith.constant 0.000000e+00 : f32
      %13 = vector.broadcast %cst_10 : f32 to vector<128x32xf32>
      %c0_11 = arith.constant 0 : index
      %c0_12 = arith.constant 0 : index
      %14 = vector.load %arg10[%c0_11, %c0_12] : memref<128x32xf32, #tpu.memory_space<vmem>>, vector<128x32xf32>
      tpu.vector_store %arg10[%c0_11, %c0_12], %13 {strides = array<i32>} : memref<128x32xf32, #tpu.memory_space<vmem>>, vector<128x32xf32>,
    } else {
    }
    %c0 = arith.constant 0 : index
    %c0_1 = arith.constant 0 : index
    %3 = vector.load %arg10[%c0, %c0_1] : memref<128x32xf32, #tpu.memory_space<vmem>>, vector<128x32xf32>
    %c0_2 = arith.constant 0 : index
    %c0_3 = arith.constant 0 : index
    %4 = vector.load %arg2[%c0_2, %c0_3] : memref<128x128xi8, #tpu.memory_space<vmem>>, vector<128x128xi8>
    %5 = arith.sitofp %4 : vector<128x128xi8> to vector<128x128xbf16>
    %c0_4 = arith.constant 0 : index
    %c0_5 = arith.constant 0 : index
    %6 = vector.load %arg3[%c0_4, %c0_5] : memref<128x32xbf16, #tpu.memory_space<vmem>>, vector<128x32xbf16>
    %cst = arith.constant dense<0.000000e+00> : vector<128x32xf32>
    %7 = tpu.matmul %5, %6, %cst {dimension_numbers = #tpu.dot_dimension_numbers<[1], [0], [0], [1], [0, 0, 1, 1], [], []>} : vector<128x128xbf16>, vector<128x32xbf16>, vector<128x32xf32> -> vector<128x32xf32>
    %8 = arith.addf %3, %7 : vector<128x32xf32>
    %c0_6 = arith.constant 0 : index
    %c0_7 = arith.constant 0 : index
    %9 = vector.load %arg10[%c0_6, %c0_7] : memref<128x32xf32, #tpu.memory_space<vmem>>, vector<128x32xf32>
    tpu.vector_store %arg10[%c0_6, %c0_7], %8 {strides = array<i32>} : memref<128x32xf32, #tpu.memory_space<vmem>>, vector<128x32xf32>,
    %c0_i32_8 = arith.constant 0 : i32
    %10 = arith.cmpi eq, %arg1, %c0_i32_8 : i32
    %11 = arith.extui %10 : i1 to i32
    %c0_i32_9 = arith.constant 0 : i32
    %12 = arith.cmpi ne, %11, %c0_i32_9 : i32
    scf.if %12 {
      %c0_10 = arith.constant 0 : index
      %c0_11 = arith.constant 0 : index
      %13 = vector.load %arg10[%c0_10, %c0_11] : memref<128x32xf32, #tpu.memory_space<vmem>>, vector<128x32xf32>
      %14 = arith.truncf %13 : vector<128x32xf32> to vector<128x32xbf16>
      %c0_12 = arith.constant 0 : index
      %c0_13 = arith.constant 0 : index
      %15 = vector.load %arg6[%c0_12, %c0_13] : memref<32x352xbf16, #tpu.memory_space<vmem>>, vector<32x352xbf16>
      %cst_14 = arith.constant dense<0.000000e+00> : vector<128x352xf32>
      %16 = tpu.matmul %14, %15, %cst_14 {dimension_numbers = #tpu.dot_dimension_numbers<[1], [0], [0], [1], [0, 0, 1, 1], [], []>} : vector<128x32xbf16>, vector<32x352xbf16>, vector<128x352xf32> -> vector<128x352xf32>
      %c0_15 = arith.constant 0 : index
      %c0_16 = arith.constant 0 : index
      %17 = vector.load %arg4[%c0_15, %c0_16] : memref<128x32xbf16, #tpu.memory_space<vmem>>, vector<128x32xbf16>
      %c0_17 = arith.constant 0 : index
      %c0_18 = arith.constant 0 : index
      %18 = vector.load %arg7[%c0_17, %c0_18] : memref<32x352xbf16, #tpu.memory_space<vmem>>, vector<32x352xbf16>
      %cst_19 = arith.constant dense<0.000000e+00> : vector<128x352xf32>
      %19 = tpu.matmul %17, %18, %cst_19 {dimension_numbers = #tpu.dot_dimension_numbers<[1], [0], [0], [1], [0, 0, 1, 1], [], []>} : vector<128x32xbf16>, vector<32x352xbf16>, vector<128x352xf32> -> vector<128x352xf32>
      %20 = arith.addf %16, %19 : vector<128x352xf32>
      %c0_20 = arith.constant 0 : index
      %c0_21 = arith.constant 0 : index
      %21 = vector.load %arg8[%c0_20, %c0_21] : memref<1x352xf32, #tpu.memory_space<vmem>>, vector<1x352xf32>
      %22 = vector.broadcast %21 : vector<1x352xf32> to vector<128x352xf32>
      %23 = arith.addf %20, %22 : vector<128x352xf32>
      %c0_22 = arith.constant 0 : index
      %c0_23 = arith.constant 0 : index
      %24 = vector.load %arg5[%c0_22, %c0_23] : memref<128x11xbf16, #tpu.memory_space<vmem>>, vector<128x11xbf16>
      %25 = arith.extf %24 : vector<128x11xbf16> to vector<128x11xf32>
      %26 = vector.extract_strided_slice %25 {offsets = [0, 0], sizes = [128, 1], strides = [1, 1]} : vector<128x11xf32> to vector<128x1xf32>
      %27 = vector.extract_strided_slice %23 {offsets = [0, 0], sizes = [128, 32], strides = [1, 1]} : vector<128x352xf32> to vector<128x32xf32>
      %28 = vector.broadcast %26 : vector<128x1xf32> to vector<128x32xf32>
      %29 = arith.mulf %28, %27 : vector<128x32xf32>
      %30 = vector.extract_strided_slice %25 {offsets = [0, 1], sizes = [128, 1], strides = [1, 1]} : vector<128x11xf32> to vector<128x1xf32>
      %31 = vector.extract_strided_slice %23 {offsets = [0, 32], sizes = [128, 32], strides = [1, 1]} : vector<128x352xf32> to vector<128x32xf32>
      %32 = vector.broadcast %30 : vector<128x1xf32> to vector<128x32xf32>
      %33 = arith.mulf %32, %31 : vector<128x32xf32>
      %34 = arith.addf %29, %33 : vector<128x32xf32>
      %35 = vector.extract_strided_slice %25 {offsets = [0, 2], sizes = [128, 1], strides = [1, 1]} : vector<128x11xf32> to vector<128x1xf32>
      %36 = vector.extract_strided_slice %23 {offsets = [0, 64], sizes = [128, 32], strides = [1, 1]} : vector<128x352xf32> to vector<128x32xf32>
      %37 = vector.broadcast %35 : vector<128x1xf32> to vector<128x32xf32>
      %38 = arith.mulf %37, %36 : vector<128x32xf32>
      %39 = arith.addf %34, %38 : vector<128x32xf32>
      %40 = vector.extract_strided_slice %25 {offsets = [0, 3], sizes = [128, 1], strides = [1, 1]} : vector<128x11xf32> to vector<128x1xf32>
      %41 = vector.extract_strided_slice %23 {offsets = [0, 96], sizes = [128, 32], strides = [1, 1]} : vector<128x352xf32> to vector<128x32xf32>
      %42 = vector.broadcast %40 : vector<128x1xf32> to vector<128x32xf32>
      %43 = arith.mulf %42, %41 : vector<128x32xf32>
      %44 = arith.addf %39, %43 : vector<128x32xf32>
      %45 = vector.extract_strided_slice %25 {offsets = [0, 4], sizes = [128, 1], strides = [1, 1]} : vector<128x11xf32> to vector<128x1xf32>
      %46 = vector.extract_strided_slice %23 {offsets = [0, 128], sizes = [128, 32], strides = [1, 1]} : vector<128x352xf32> to vector<128x32xf32>
      %47 = vector.broadcast %45 : vector<128x1xf32> to vector<128x32xf32>
      %48 = arith.mulf %47, %46 : vector<128x32xf32>
      %49 = arith.addf %44, %48 : vector<128x32xf32>
      %50 = vector.extract_strided_slice %25 {offsets = [0, 5], sizes = [128, 1], strides = [1, 1]} : vector<128x11xf32> to vector<128x1xf32>
      %51 = vector.extract_strided_slice %23 {offsets = [0, 160], sizes = [128, 32], strides = [1, 1]} : vector<128x352xf32> to vector<128x32xf32>
      %52 = vector.broadcast %50 : vector<128x1xf32> to vector<128x32xf32>
      %53 = arith.mulf %52, %51 : vector<128x32xf32>
      %54 = arith.addf %49, %53 : vector<128x32xf32>
      %55 = vector.extract_strided_slice %25 {offsets = [0, 6], sizes = [128, 1], strides = [1, 1]} : vector<128x11xf32> to vector<128x1xf32>
      %56 = vector.extract_strided_slice %23 {offsets = [0, 192], sizes = [128, 32], strides = [1, 1]} : vector<128x352xf32> to vector<128x32xf32>
      %57 = vector.broadcast %55 : vector<128x1xf32> to vector<128x32xf32>
      %58 = arith.mulf %57, %56 : vector<128x32xf32>
      %59 = arith.addf %54, %58 : vector<128x32xf32>
      %60 = vector.extract_strided_slice %25 {offsets = [0, 7], sizes = [128, 1], strides = [1, 1]} : vector<128x11xf32> to vector<128x1xf32>
      %61 = vector.extract_strided_slice %23 {offsets = [0, 224], sizes = [128, 32], strides = [1, 1]} : vector<128x352xf32> to vector<128x32xf32>
      %62 = vector.broadcast %60 : vector<128x1xf32> to vector<128x32xf32>
      %63 = arith.mulf %62, %61 : vector<128x32xf32>
      %64 = arith.addf %59, %63 : vector<128x32xf32>
      %65 = vector.extract_strided_slice %25 {offsets = [0, 8], sizes = [128, 1], strides = [1, 1]} : vector<128x11xf32> to vector<128x1xf32>
      %66 = vector.extract_strided_slice %23 {offsets = [0, 256], sizes = [128, 32], strides = [1, 1]} : vector<128x352xf32> to vector<128x32xf32>
      %67 = vector.broadcast %65 : vector<128x1xf32> to vector<128x32xf32>
      %68 = arith.mulf %67, %66 : vector<128x32xf32>
      %69 = arith.addf %64, %68 : vector<128x32xf32>
      %70 = vector.extract_strided_slice %25 {offsets = [0, 9], sizes = [128, 1], strides = [1, 1]} : vector<128x11xf32> to vector<128x1xf32>
      %71 = vector.extract_strided_slice %23 {offsets = [0, 288], sizes = [128, 32], strides = [1, 1]} : vector<128x352xf32> to vector<128x32xf32>
      %72 = vector.broadcast %70 : vector<128x1xf32> to vector<128x32xf32>
      %73 = arith.mulf %72, %71 : vector<128x32xf32>
      %74 = arith.addf %69, %73 : vector<128x32xf32>
      %75 = vector.extract_strided_slice %25 {offsets = [0, 10], sizes = [128, 1], strides = [1, 1]} : vector<128x11xf32> to vector<128x1xf32>
      %76 = vector.extract_strided_slice %23 {offsets = [0, 320], sizes = [128, 32], strides = [1, 1]} : vector<128x352xf32> to vector<128x32xf32>
      %77 = vector.broadcast %75 : vector<128x1xf32> to vector<128x32xf32>
      %78 = arith.mulf %77, %76 : vector<128x32xf32>
      %79 = arith.addf %74, %78 : vector<128x32xf32>
      %cst_24 = arith.constant 0.000000e+00 : f32
      %80 = vector.broadcast %cst_24 : f32 to vector<128x32xf32>
      %81 = arith.maximumf %79, %80 : vector<128x32xf32>
      %82 = arith.truncf %81 : vector<128x32xf32> to vector<128x32xbf16>
      %c0_25 = arith.constant 0 : index
      %c0_26 = arith.constant 0 : index
      %83 = vector.load %arg9[%c0_25, %c0_26] : memref<128x32xbf16, #tpu.memory_space<vmem>>, vector<128x32xbf16>
      tpu.vector_store %arg9[%c0_25, %c0_26], %82 {strides = array<i32>} : memref<128x32xbf16, #tpu.memory_space<vmem>>, vector<128x32xbf16>,
    } else {
    }
    return
  }
  func.func @transform_0(%arg0: i32, %arg1: i32) -> (i32, i32) {
    %c0_i32 = arith.constant 0 : i32
    return %arg0, %arg1 : i32, i32
  }
  func.func @transform_1(%arg0: i32, %arg1: i32) -> (i32, i32) {
    %c0_i32 = arith.constant 0 : i32
    %c0_i32_0 = arith.constant 0 : i32
    return %arg1, %c0_i32 : i32, i32
  }
  func.func @transform_2(%arg0: i32, %arg1: i32) -> (i32, i32) {
    %c0_i32 = arith.constant 0 : i32
    %c0_i32_0 = arith.constant 0 : i32
    return %arg0, %c0_i32 : i32, i32
  }
  func.func @transform_3(%arg0: i32, %arg1: i32) -> (i32, i32) {
    %c0_i32 = arith.constant 0 : i32
    %c0_i32_0 = arith.constant 0 : i32
    return %arg0, %c0_i32 : i32, i32
  }
  func.func @transform_4(%arg0: i32, %arg1: i32) -> (i32, i32) {
    %c0_i32 = arith.constant 0 : i32
    %c0_i32_0 = arith.constant 0 : i32
    %c0_i32_1 = arith.constant 0 : i32
    return %c0_i32, %c0_i32_0 : i32, i32
  }
  func.func @transform_5(%arg0: i32, %arg1: i32) -> (i32, i32) {
    %c0_i32 = arith.constant 0 : i32
    %c0_i32_0 = arith.constant 0 : i32
    %c0_i32_1 = arith.constant 0 : i32
    return %c0_i32, %c0_i32_0 : i32, i32
  }
  func.func @transform_6(%arg0: i32, %arg1: i32) -> (i32, i32) {
    %c0_i32 = arith.constant 0 : i32
    %c0_i32_0 = arith.constant 0 : i32
    %c0_i32_1 = arith.constant 0 : i32
    return %c0_i32, %c0_i32_0 : i32, i32
  }
  func.func @transform_7(%arg0: i32, %arg1: i32) -> (i32, i32) {
    %c0_i32 = arith.constant 0 : i32
    %c0_i32_0 = arith.constant 0 : i32
    return %arg0, %c0_i32 : i32, i32
  }
}

module attributes {stable_mosaic.version = 11 : i64} {
  func.func @_mfconv_kernel(%arg0: i32, %arg1: i32, %arg2: memref<128x128xi8, #tpu.memory_space<vmem>>, %arg3: memref<128x32xbf16, #tpu.memory_space<vmem>>, %arg4: memref<128x32xbf16, #tpu.memory_space<vmem>>, %arg5: memref<128x11xbf16, #tpu.memory_space<vmem>>, %arg6: memref<32x352xbf16, #tpu.memory_space<vmem>>, %arg7: memref<32x352xbf16, #tpu.memory_space<vmem>>, %arg8: memref<1x352xf32, #tpu.memory_space<vmem>>, %arg9: memref<128x32xbf16, #tpu.memory_space<vmem>>, %arg10: memref<128x32xf32, #tpu.memory_space<vmem>>) attributes {dimension_semantics = [#tpu.dimension_semantics<parallel>, #tpu.dimension_semantics<arbitrary>], iteration_bounds = array<i64: 1, 1>, scalar_prefetch = 0 : i64, scratch_operands = 1 : i64, tpu.core_type = #tpu.core_type<tc>, window_params = [{transform_indices = @transform_0, window_bounds = array<i64: 128, 128>}, {transform_indices = @transform_1, window_bounds = array<i64: 128, 32>}, {transform_indices = @transform_2, window_bounds = array<i64: 128, 32>}, {transform_indices = @transform_3, window_bounds = array<i64: 128, 11>}, {pipeline_mode = #tpu.pipeline_mode<synchronous>, transform_indices = @transform_4, window_bounds = array<i64: 32, 352>}, {pipeline_mode = #tpu.pipeline_mode<synchronous>, transform_indices = @transform_5, window_bounds = array<i64: 32, 352>}, {pipeline_mode = #tpu.pipeline_mode<synchronous>, transform_indices = @transform_6, window_bounds = array<i64: 1, 352>}, {transform_indices = @transform_7, window_bounds = array<i64: 128, 32>}]} {
    %c0_i32 = arith.constant 0 : i32
    %0 = arith.cmpi eq, %arg1, %c0_i32 : i32
    %1 = arith.extui %0 : i1 to i32
    %c0_i32_0 = arith.constant 0 : i32
    %2 = arith.cmpi ne, %1, %c0_i32_0 : i32
    scf.if %2 {
      %cst_10 = arith.constant 0.000000e+00 : f32
      %13 = vector.broadcast %cst_10 : f32 to vector<128x32xf32>
      %c0_11 = arith.constant 0 : index
      %c0_12 = arith.constant 0 : index
      %14 = vector.load %arg10[%c0_11, %c0_12] : memref<128x32xf32, #tpu.memory_space<vmem>>, vector<128x32xf32>
      tpu.vector_store %arg10[%c0_11, %c0_12], %13 {strides = array<i32>} : memref<128x32xf32, #tpu.memory_space<vmem>>, vector<128x32xf32>,
    } else {
    }
    %c0 = arith.constant 0 : index
    %c0_1 = arith.constant 0 : index
    %3 = vector.load %arg10[%c0, %c0_1] : memref<128x32xf32, #tpu.memory_space<vmem>>, vector<128x32xf32>
    %c0_2 = arith.constant 0 : index
    %c0_3 = arith.constant 0 : index
    %4 = vector.load %arg2[%c0_2, %c0_3] : memref<128x128xi8, #tpu.memory_space<vmem>>, vector<128x128xi8>
    %5 = arith.sitofp %4 : vector<128x128xi8> to vector<128x128xbf16>
    %c0_4 = arith.constant 0 : index
    %c0_5 = arith.constant 0 : index
    %6 = vector.load %arg3[%c0_4, %c0_5] : memref<128x32xbf16, #tpu.memory_space<vmem>>, vector<128x32xbf16>
    %cst = arith.constant dense<0.000000e+00> : vector<128x32xf32>
    %7 = tpu.matmul %5, %6, %cst {dimension_numbers = #tpu.dot_dimension_numbers<[1], [0], [0], [1], [0, 0, 1, 1], [], []>} : vector<128x128xbf16>, vector<128x32xbf16>, vector<128x32xf32> -> vector<128x32xf32>
    %8 = arith.addf %3, %7 : vector<128x32xf32>
    %c0_6 = arith.constant 0 : index
    %c0_7 = arith.constant 0 : index
    %9 = vector.load %arg10[%c0_6, %c0_7] : memref<128x32xf32, #tpu.memory_space<vmem>>, vector<128x32xf32>
    tpu.vector_store %arg10[%c0_6, %c0_7], %8 {strides = array<i32>} : memref<128x32xf32, #tpu.memory_space<vmem>>, vector<128x32xf32>,
    %c0_i32_8 = arith.constant 0 : i32
    %10 = arith.cmpi eq, %arg1, %c0_i32_8 : i32
    %11 = arith.extui %10 : i1 to i32
    %c0_i32_9 = arith.constant 0 : i32
    %12 = arith.cmpi ne, %11, %c0_i32_9 : i32
    scf.if %12 {
      %c0_10 = arith.constant 0 : index
      %c0_11 = arith.constant 0 : index
      %13 = vector.load %arg10[%c0_10, %c0_11] : memref<128x32xf32, #tpu.memory_space<vmem>>, vector<128x32xf32>
      %14 = arith.truncf %13 : vector<128x32xf32> to vector<128x32xbf16>
      %c0_12 = arith.constant 0 : index
      %c0_13 = arith.constant 0 : index
      %15 = vector.load %arg6[%c0_12, %c0_13] : memref<32x352xbf16, #tpu.memory_space<vmem>>, vector<32x352xbf16>
      %cst_14 = arith.constant dense<0.000000e+00> : vector<128x352xf32>
      %16 = tpu.matmul %14, %15, %cst_14 {dimension_numbers = #tpu.dot_dimension_numbers<[1], [0], [0], [1], [0, 0, 1, 1], [], []>} : vector<128x32xbf16>, vector<32x352xbf16>, vector<128x352xf32> -> vector<128x352xf32>
      %c0_15 = arith.constant 0 : index
      %c0_16 = arith.constant 0 : index
      %17 = vector.load %arg4[%c0_15, %c0_16] : memref<128x32xbf16, #tpu.memory_space<vmem>>, vector<128x32xbf16>
      %c0_17 = arith.constant 0 : index
      %c0_18 = arith.constant 0 : index
      %18 = vector.load %arg7[%c0_17, %c0_18] : memref<32x352xbf16, #tpu.memory_space<vmem>>, vector<32x352xbf16>
      %cst_19 = arith.constant dense<0.000000e+00> : vector<128x352xf32>
      %19 = tpu.matmul %17, %18, %cst_19 {dimension_numbers = #tpu.dot_dimension_numbers<[1], [0], [0], [1], [0, 0, 1, 1], [], []>} : vector<128x32xbf16>, vector<32x352xbf16>, vector<128x352xf32> -> vector<128x352xf32>
      %20 = arith.addf %16, %19 : vector<128x352xf32>
      %c0_20 = arith.constant 0 : index
      %c0_21 = arith.constant 0 : index
      %21 = vector.load %arg8[%c0_20, %c0_21] : memref<1x352xf32, #tpu.memory_space<vmem>>, vector<1x352xf32>
      %22 = vector.broadcast %21 : vector<1x352xf32> to vector<128x352xf32>
      %23 = arith.addf %20, %22 : vector<128x352xf32>
      %c0_22 = arith.constant 0 : index
      %c0_23 = arith.constant 0 : index
      %24 = vector.load %arg5[%c0_22, %c0_23] : memref<128x11xbf16, #tpu.memory_space<vmem>>, vector<128x11xbf16>
      %25 = arith.extf %24 : vector<128x11xbf16> to vector<128x11xf32>
      %26 = vector.extract_strided_slice %25 {offsets = [0, 0], sizes = [128, 1], strides = [1, 1]} : vector<128x11xf32> to vector<128x1xf32>
      %27 = vector.extract_strided_slice %23 {offsets = [0, 0], sizes = [128, 32], strides = [1, 1]} : vector<128x352xf32> to vector<128x32xf32>
      %28 = vector.broadcast %26 : vector<128x1xf32> to vector<128x32xf32>
      %29 = arith.mulf %28, %27 : vector<128x32xf32>
      %30 = vector.extract_strided_slice %25 {offsets = [0, 1], sizes = [128, 1], strides = [1, 1]} : vector<128x11xf32> to vector<128x1xf32>
      %31 = vector.extract_strided_slice %23 {offsets = [0, 32], sizes = [128, 32], strides = [1, 1]} : vector<128x352xf32> to vector<128x32xf32>
      %32 = vector.broadcast %30 : vector<128x1xf32> to vector<128x32xf32>
      %33 = arith.mulf %32, %31 : vector<128x32xf32>
      %34 = arith.addf %29, %33 : vector<128x32xf32>
      %35 = vector.extract_strided_slice %25 {offsets = [0, 2], sizes = [128, 1], strides = [1, 1]} : vector<128x11xf32> to vector<128x1xf32>
      %36 = vector.extract_strided_slice %23 {offsets = [0, 64], sizes = [128, 32], strides = [1, 1]} : vector<128x352xf32> to vector<128x32xf32>
      %37 = vector.broadcast %35 : vector<128x1xf32> to vector<128x32xf32>
      %38 = arith.mulf %37, %36 : vector<128x32xf32>
      %39 = arith.addf %34, %38 : vector<128x32xf32>
      %40 = vector.extract_strided_slice %25 {offsets = [0, 3], sizes = [128, 1], strides = [1, 1]} : vector<128x11xf32> to vector<128x1xf32>
      %41 = vector.extract_strided_slice %23 {offsets = [0, 96], sizes = [128, 32], strides = [1, 1]} : vector<128x352xf32> to vector<128x32xf32>
      %42 = vector.broadcast %40 : vector<128x1xf32> to vector<128x32xf32>
      %43 = arith.mulf %42, %41 : vector<128x32xf32>
      %44 = arith.addf %39, %43 : vector<128x32xf32>
      %45 = vector.extract_strided_slice %25 {offsets = [0, 4], sizes = [128, 1], strides = [1, 1]} : vector<128x11xf32> to vector<128x1xf32>
      %46 = vector.extract_strided_slice %23 {offsets = [0, 128], sizes = [128, 32], strides = [1, 1]} : vector<128x352xf32> to vector<128x32xf32>
      %47 = vector.broadcast %45 : vector<128x1xf32> to vector<128x32xf32>
      %48 = arith.mulf %47, %46 : vector<128x32xf32>
      %49 = arith.addf %44, %48 : vector<128x32xf32>
      %50 = vector.extract_strided_slice %25 {offsets = [0, 5], sizes = [128, 1], strides = [1, 1]} : vector<128x11xf32> to vector<128x1xf32>
      %51 = vector.extract_strided_slice %23 {offsets = [0, 160], sizes = [128, 32], strides = [1, 1]} : vector<128x352xf32> to vector<128x32xf32>
      %52 = vector.broadcast %50 : vector<128x1xf32> to vector<128x32xf32>
      %53 = arith.mulf %52, %51 : vector<128x32xf32>
      %54 = arith.addf %49, %53 : vector<128x32xf32>
      %55 = vector.extract_strided_slice %25 {offsets = [0, 6], sizes = [128, 1], strides = [1, 1]} : vector<128x11xf32> to vector<128x1xf32>
      %56 = vector.extract_strided_slice %23 {offsets = [0, 192], sizes = [128, 32], strides = [1, 1]} : vector<128x352xf32> to vector<128x32xf32>
      %57 = vector.broadcast %55 : vector<128x1xf32> to vector<128x32xf32>
      %58 = arith.mulf %57, %56 : vector<128x32xf32>
      %59 = arith.addf %54, %58 : vector<128x32xf32>
      %60 = vector.extract_strided_slice %25 {offsets = [0, 7], sizes = [128, 1], strides = [1, 1]} : vector<128x11xf32> to vector<128x1xf32>
      %61 = vector.extract_strided_slice %23 {offsets = [0, 224], sizes = [128, 32], strides = [1, 1]} : vector<128x352xf32> to vector<128x32xf32>
      %62 = vector.broadcast %60 : vector<128x1xf32> to vector<128x32xf32>
      %63 = arith.mulf %62, %61 : vector<128x32xf32>
      %64 = arith.addf %59, %63 : vector<128x32xf32>
      %65 = vector.extract_strided_slice %25 {offsets = [0, 8], sizes = [128, 1], strides = [1, 1]} : vector<128x11xf32> to vector<128x1xf32>
      %66 = vector.extract_strided_slice %23 {offsets = [0, 256], sizes = [128, 32], strides = [1, 1]} : vector<128x352xf32> to vector<128x32xf32>
      %67 = vector.broadcast %65 : vector<128x1xf32> to vector<128x32xf32>
      %68 = arith.mulf %67, %66 : vector<128x32xf32>
      %69 = arith.addf %64, %68 : vector<128x32xf32>
      %70 = vector.extract_strided_slice %25 {offsets = [0, 9], sizes = [128, 1], strides = [1, 1]} : vector<128x11xf32> to vector<128x1xf32>
      %71 = vector.extract_strided_slice %23 {offsets = [0, 288], sizes = [128, 32], strides = [1, 1]} : vector<128x352xf32> to vector<128x32xf32>
      %72 = vector.broadcast %70 : vector<128x1xf32> to vector<128x32xf32>
      %73 = arith.mulf %72, %71 : vector<128x32xf32>
      %74 = arith.addf %69, %73 : vector<128x32xf32>
      %75 = vector.extract_strided_slice %25 {offsets = [0, 10], sizes = [128, 1], strides = [1, 1]} : vector<128x11xf32> to vector<128x1xf32>
      %76 = vector.extract_strided_slice %23 {offsets = [0, 320], sizes = [128, 32], strides = [1, 1]} : vector<128x352xf32> to vector<128x32xf32>
      %77 = vector.broadcast %75 : vector<128x1xf32> to vector<128x32xf32>
      %78 = arith.mulf %77, %76 : vector<128x32xf32>
      %79 = arith.addf %74, %78 : vector<128x32xf32>
      %80 = arith.truncf %79 : vector<128x32xf32> to vector<128x32xbf16>
      %c0_24 = arith.constant 0 : index
      %c0_25 = arith.constant 0 : index
      %81 = vector.load %arg9[%c0_24, %c0_25] : memref<128x32xbf16, #tpu.memory_space<vmem>>, vector<128x32xbf16>
      tpu.vector_store %arg9[%c0_24, %c0_25], %80 {strides = array<i32>} : memref<128x32xbf16, #tpu.memory_space<vmem>>, vector<128x32xbf16>,
    } else {
    }
    return
  }
  func.func @transform_0(%arg0: i32, %arg1: i32) -> (i32, i32) {
    %c0_i32 = arith.constant 0 : i32
    return %arg0, %arg1 : i32, i32
  }
  func.func @transform_1(%arg0: i32, %arg1: i32) -> (i32, i32) {
    %c0_i32 = arith.constant 0 : i32
    %c0_i32_0 = arith.constant 0 : i32
    return %arg1, %c0_i32 : i32, i32
  }
  func.func @transform_2(%arg0: i32, %arg1: i32) -> (i32, i32) {
    %c0_i32 = arith.constant 0 : i32
    %c0_i32_0 = arith.constant 0 : i32
    return %arg0, %c0_i32 : i32, i32
  }
  func.func @transform_3(%arg0: i32, %arg1: i32) -> (i32, i32) {
    %c0_i32 = arith.constant 0 : i32
    %c0_i32_0 = arith.constant 0 : i32
    return %arg0, %c0_i32 : i32, i32
  }
  func.func @transform_4(%arg0: i32, %arg1: i32) -> (i32, i32) {
    %c0_i32 = arith.constant 0 : i32
    %c0_i32_0 = arith.constant 0 : i32
    %c0_i32_1 = arith.constant 0 : i32
    return %c0_i32, %c0_i32_0 : i32, i32
  }
  func.func @transform_5(%arg0: i32, %arg1: i32) -> (i32, i32) {
    %c0_i32 = arith.constant 0 : i32
    %c0_i32_0 = arith.constant 0 : i32
    %c0_i32_1 = arith.constant 0 : i32
    return %c0_i32, %c0_i32_0 : i32, i32
  }
  func.func @transform_6(%arg0: i32, %arg1: i32) -> (i32, i32) {
    %c0_i32 = arith.constant 0 : i32
    %c0_i32_0 = arith.constant 0 : i32
    %c0_i32_1 = arith.constant 0 : i32
    return %c0_i32, %c0_i32_0 : i32, i32
  }
  func.func @transform_7(%arg0: i32, %arg1: i32) -> (i32, i32) {
    %c0_i32 = arith.constant 0 : i32
    %c0_i32_0 = arith.constant 0 : i32
    return %arg0, %c0_i32 : i32, i32
  }
}

module attributes {stable_mosaic.version = 11 : i64} {
  func.func @_head_kernel(%arg0: i32, %arg1: memref<16x128xbf16, #tpu.memory_space<vmem>>, %arg2: memref<128x32xbf16, #tpu.memory_space<vmem>>, %arg3: memref<32x32xbf16, #tpu.memory_space<vmem>>, %arg4: memref<1x32xf32, #tpu.memory_space<vmem>>, %arg5: memref<32x3xbf16, #tpu.memory_space<vmem>>, %arg6: memref<1x3xf32, #tpu.memory_space<vmem>>, %arg7: memref<16x3xf32, #tpu.memory_space<vmem>>, %arg8: memref<16x32xf32, #tpu.memory_space<vmem>>) attributes {dimension_semantics = [#tpu.dimension_semantics<arbitrary>], iteration_bounds = array<i64: 1>, scalar_prefetch = 0 : i64, scratch_operands = 1 : i64, tpu.core_type = #tpu.core_type<tc>, window_params = [{transform_indices = @transform_0, window_bounds = array<i64: 16, 128>}, {transform_indices = @transform_1, window_bounds = array<i64: 128, 32>}, {pipeline_mode = #tpu.pipeline_mode<synchronous>, transform_indices = @transform_2, window_bounds = array<i64: 32, 32>}, {pipeline_mode = #tpu.pipeline_mode<synchronous>, transform_indices = @transform_3, window_bounds = array<i64: 1, 32>}, {pipeline_mode = #tpu.pipeline_mode<synchronous>, transform_indices = @transform_4, window_bounds = array<i64: 32, 3>}, {pipeline_mode = #tpu.pipeline_mode<synchronous>, transform_indices = @transform_5, window_bounds = array<i64: 1, 3>}, {pipeline_mode = #tpu.pipeline_mode<synchronous>, transform_indices = @transform_6, window_bounds = array<i64: 16, 3>}]} {
    %c0_i32 = arith.constant 0 : i32
    %0 = arith.cmpi eq, %arg0, %c0_i32 : i32
    %1 = arith.extui %0 : i1 to i32
    %c0_i32_0 = arith.constant 0 : i32
    %2 = arith.cmpi ne, %1, %c0_i32_0 : i32
    scf.if %2 {
      %cst_10 = arith.constant 0.000000e+00 : f32
      %12 = vector.broadcast %cst_10 : f32 to vector<16x32xf32>
      %c0_11 = arith.constant 0 : index
      %c0_12 = arith.constant 0 : index
      %13 = vector.load %arg8[%c0_11, %c0_12] : memref<16x32xf32, #tpu.memory_space<vmem>>, vector<16x32xf32>
      tpu.vector_store %arg8[%c0_11, %c0_12], %12 {strides = array<i32>} : memref<16x32xf32, #tpu.memory_space<vmem>>, vector<16x32xf32>,
    } else {
    }
    %c0 = arith.constant 0 : index
    %c0_1 = arith.constant 0 : index
    %3 = vector.load %arg8[%c0, %c0_1] : memref<16x32xf32, #tpu.memory_space<vmem>>, vector<16x32xf32>
    %c0_2 = arith.constant 0 : index
    %c0_3 = arith.constant 0 : index
    %4 = vector.load %arg1[%c0_2, %c0_3] : memref<16x128xbf16, #tpu.memory_space<vmem>>, vector<16x128xbf16>
    %c0_4 = arith.constant 0 : index
    %c0_5 = arith.constant 0 : index
    %5 = vector.load %arg2[%c0_4, %c0_5] : memref<128x32xbf16, #tpu.memory_space<vmem>>, vector<128x32xbf16>
    %cst = arith.constant dense<0.000000e+00> : vector<16x32xf32>
    %6 = tpu.matmul %4, %5, %cst {dimension_numbers = #tpu.dot_dimension_numbers<[1], [0], [0], [1], [0, 0, 1, 1], [], []>} : vector<16x128xbf16>, vector<128x32xbf16>, vector<16x32xf32> -> vector<16x32xf32>
    %7 = arith.addf %3, %6 : vector<16x32xf32>
    %c0_6 = arith.constant 0 : index
    %c0_7 = arith.constant 0 : index
    %8 = vector.load %arg8[%c0_6, %c0_7] : memref<16x32xf32, #tpu.memory_space<vmem>>, vector<16x32xf32>
    tpu.vector_store %arg8[%c0_6, %c0_7], %7 {strides = array<i32>} : memref<16x32xf32, #tpu.memory_space<vmem>>, vector<16x32xf32>,
    %c0_i32_8 = arith.constant 0 : i32
    %9 = arith.cmpi eq, %arg0, %c0_i32_8 : i32
    %10 = arith.extui %9 : i1 to i32
    %c0_i32_9 = arith.constant 0 : i32
    %11 = arith.cmpi ne, %10, %c0_i32_9 : i32
    scf.if %11 {
      %c0_10 = arith.constant 0 : index
      %c0_11 = arith.constant 0 : index
      %12 = vector.load %arg8[%c0_10, %c0_11] : memref<16x32xf32, #tpu.memory_space<vmem>>, vector<16x32xf32>
      %13 = arith.truncf %12 : vector<16x32xf32> to vector<16x32xbf16>
      %c0_12 = arith.constant 0 : index
      %c0_13 = arith.constant 0 : index
      %14 = vector.load %arg3[%c0_12, %c0_13] : memref<32x32xbf16, #tpu.memory_space<vmem>>, vector<32x32xbf16>
      %cst_14 = arith.constant dense<0.000000e+00> : vector<16x32xf32>
      %15 = tpu.matmul %13, %14, %cst_14 {dimension_numbers = #tpu.dot_dimension_numbers<[1], [0], [0], [1], [0, 0, 1, 1], [], []>} : vector<16x32xbf16>, vector<32x32xbf16>, vector<16x32xf32> -> vector<16x32xf32>
      %c0_15 = arith.constant 0 : index
      %c0_16 = arith.constant 0 : index
      %16 = vector.load %arg4[%c0_15, %c0_16] : memref<1x32xf32, #tpu.memory_space<vmem>>, vector<1x32xf32>
      %17 = vector.broadcast %16 : vector<1x32xf32> to vector<16x32xf32>
      %18 = arith.addf %15, %17 : vector<16x32xf32>
      %cst_17 = arith.constant 0.000000e+00 : f32
      %19 = vector.broadcast %cst_17 : f32 to vector<16x32xf32>
      %20 = arith.maximumf %18, %19 : vector<16x32xf32>
      %21 = arith.truncf %20 : vector<16x32xf32> to vector<16x32xbf16>
      %c0_18 = arith.constant 0 : index
      %c0_19 = arith.constant 0 : index
      %22 = vector.load %arg5[%c0_18, %c0_19] : memref<32x3xbf16, #tpu.memory_space<vmem>>, vector<32x3xbf16>
      %cst_20 = arith.constant dense<0.000000e+00> : vector<16x3xf32>
      %23 = tpu.matmul %21, %22, %cst_20 {dimension_numbers = #tpu.dot_dimension_numbers<[1], [0], [0], [1], [0, 0, 1, 1], [], []>} : vector<16x32xbf16>, vector<32x3xbf16>, vector<16x3xf32> -> vector<16x3xf32>
      %c0_21 = arith.constant 0 : index
      %c0_22 = arith.constant 0 : index
      %24 = vector.load %arg6[%c0_21, %c0_22] : memref<1x3xf32, #tpu.memory_space<vmem>>, vector<1x3xf32>
      %25 = vector.broadcast %24 : vector<1x3xf32> to vector<16x3xf32>
      %26 = arith.addf %23, %25 : vector<16x3xf32>
      %c0_23 = arith.constant 0 : index
      %c0_24 = arith.constant 0 : index
      %27 = vector.load %arg7[%c0_23, %c0_24] : memref<16x3xf32, #tpu.memory_space<vmem>>, vector<16x3xf32>
      tpu.vector_store %arg7[%c0_23, %c0_24], %26 {strides = array<i32>} : memref<16x3xf32, #tpu.memory_space<vmem>>, vector<16x3xf32>,
    } else {
    }
    return
  }
  func.func @transform_0(%arg0: i32) -> (i32, i32) {
    %c0_i32 = arith.constant 0 : i32
    %c0_i32_0 = arith.constant 0 : i32
    return %c0_i32, %arg0 : i32, i32
  }
  func.func @transform_1(%arg0: i32) -> (i32, i32) {
    %c0_i32 = arith.constant 0 : i32
    %c0_i32_0 = arith.constant 0 : i32
    return %arg0, %c0_i32 : i32, i32
  }
  func.func @transform_2(%arg0: i32) -> (i32, i32) {
    %c0_i32 = arith.constant 0 : i32
    %c0_i32_0 = arith.constant 0 : i32
    %c0_i32_1 = arith.constant 0 : i32
    return %c0_i32, %c0_i32_0 : i32, i32
  }
  func.func @transform_3(%arg0: i32) -> (i32, i32) {
    %c0_i32 = arith.constant 0 : i32
    %c0_i32_0 = arith.constant 0 : i32
    %c0_i32_1 = arith.constant 0 : i32
    return %c0_i32, %c0_i32_0 : i32, i32
  }
  func.func @transform_4(%arg0: i32) -> (i32, i32) {
    %c0_i32 = arith.constant 0 : i32
    %c0_i32_0 = arith.constant 0 : i32
    %c0_i32_1 = arith.constant 0 : i32
    return %c0_i32, %c0_i32_0 : i32, i32
  }
  func.func @transform_5(%arg0: i32) -> (i32, i32) {
    %c0_i32 = arith.constant 0 : i32
    %c0_i32_0 = arith.constant 0 : i32
    %c0_i32_1 = arith.constant 0 : i32
    return %c0_i32, %c0_i32_0 : i32, i32
  }
  func.func @transform_6(%arg0: i32) -> (i32, i32) {
    %c0_i32 = arith.constant 0 : i32
    %c0_i32_0 = arith.constant 0 : i32
    %c0_i32_1 = arith.constant 0 : i32
    return %c0_i32, %c0_i32_0 : i32, i32
  }
}

</mosaic_0001>

<bundles_post_ra>
// kernel: gnn_forward.8
= control target key start
LH: loop header
LB: loop body
LE: loop exit
PB: predicated region body
PF: predicated region fallthrough
CT: control target
= control target key end

     0   :  { %vm104_vm0 = vcmask 1041408   ;;  %vm79_vm1 = vcmask 31744   ;;  %vm285_vm2 = vcmask 257024   ;;  %s534_s1 = inlined_call_operand.vmem [shape: bf16[4,32], index: 1, kind: input, shape index: {}]   ;;  %s535_s0 = inlined_call_operand.vmem [shape: bf16[128,4], index: 0, kind: input, shape index: {}]   ;;  %s536_s2 = inlined_call_operand.vmem [shape: f32[1,32], index: 2, kind: input, shape index: {}]   ;;  %s537_s3 = inlined_call_operand.vmem [shape: bf16[128,32], index: 3, kind: output, shape index: {}]  }
   0x1   :  { %v31_v0 = vld [vmem:[%s534_s1] sm:$0x3]  ;;  %v388_v4 = vld [vmem:[%s535_s0 + $0x8] sm:$0xff]   ;;  %v390_v6 = vld [vmem:[%s535_s0 + $0x10] sm:$0xff]  }
   0x2   :  { %384 = vmatprep.subr.msk.bf16.mxu0 %vm104_vm0, %v31_v0  ;;  %385 = vmatprep.subr.msk.bf16.mxu1 %vm104_vm0, %v31_v0  ;;  %v106_v1 = vsel %vm104_vm0, %v31_v0, 0  ;;  %v386_v2 = vld [vmem:[%s535_s0] sm:$0xff]   ;;  %v389_v5 = vld [vmem:[%s535_s0 + $0x28] sm:$0xff]   ;;  %v391_v7 = vld [vmem:[%s535_s0 + $0x30] sm:$0xff]  }
   0x3   :  { %365 = vmatpush3.bf16.msra.mxu0 %v106_v1  ;;  %383 = vmatpush3.bf16.msra.mxu1 %v106_v1  ;;  %v387_v3 = vld [vmem:[%s535_s0 + $0x20] sm:$0xff]   ;;  %v392_v8 = vld [vmem:[%s535_s0 + $0x18] sm:$0xff]  }
   0x4   :  { %366 = vmatprep.mubr.msk.bf16.mxu0 %vm79_vm1, %v386_v2  ;;  %374 = vmatprep.mubr.msk.bf16.mxu1 %vm79_vm1, %v387_v3  ;;  %v393_v9 = vld [vmem:[%s535_s0 + $0x38] sm:$0xff]   ;;  %v452_v10 = vld [vmem:[%s536_s2] ss:$0 sm:$0xff] }
   0x6   :  { %367 = vmatmul.mubr.msk.bf16.vlgmr.msra.gmra.mrb[0].mxu0 %vm79_vm1, %v388_v4  ;;  %375 = vmatmul.mubr.msk.bf16.vlgmr.msra.gmra.mrb[0].mxu1 %vm79_vm1, %v389_v5 }
   0x7   :  { %370 = vmatprep.mubr.msk.bf16.mxu0 %vm79_vm1, %v390_v6  ;;  %378 = vmatprep.mubr.msk.bf16.mxu1 %vm79_vm1, %v391_v7 }
   0xe   :  { %371 = vmatmul.mubr.msk.bf16.gmra.mrb[4].mxu0 %vm79_vm1, %v392_v8  ;;  %379 = vmatmul.mubr.msk.bf16.gmra.mrb[4].mxu1 %vm79_vm1, %v393_v9 }
  0xd9   :  { %v368_v11 = vpop.f32.mrb[0].mxu0  ;;  %v376_v13 = vpop.f32.mrb[0].mxu1 }
  0xda   :  { %v151_v12 = vadd.f32 %v368_v11, %v452_v10  ;;  %v142_v14 = vpop.f32.mrb[1].mxu0  ;;  %v183_v15 = vadd.f32 %v376_v13, %v452_v10  ;;  %v174_v17 = vpop.f32.mrb[1].mxu1 }
  0xdb   :  { %v143_v16 = vadd.f32 %v452_v10, %v142_v14  ;;  %v369_v18 = vpop.f32.mrb[2].mxu0  ;;  %v175_v20 = vadd.f32 %v452_v10, %v174_v17  ;;  %v377_v22 = vpop.f32.mrb[2].mxu1 }
  0xdc   :  { %v207_v19 = vmax.f32 %v151_v12, 0.0  ;;  %v154_v21 = vadd.f32 %v369_v18, %v452_v10  ;;  %v145_v23 = vpop.f32.mrb[3].mxu0  ;;  %v215_v24 = vmax.f32 %v183_v15, 0.0  ;;  %v186_v26 = vadd.f32 %v377_v22, %v452_v10  ;;  %v177_v28 = vpop.f32.mrb[3].mxu1 }
  0xdd   :  { %v205_v25 = vmax.f32 %v143_v16, 0.0  ;;  %v146_v27 = vadd.f32 %v452_v10, %v145_v23  ;;  %v213_v30 = vmax.f32 %v175_v20, 0.0  ;;  %v178_v32 = vadd.f32 %v452_v10, %v177_v28 }
  0xde   :  { %v341_v29 = vpack.c.bf16 %v207_v19, %v207_v19  ;;  %v208_v31 = vmax.f32 %v154_v21, 0.0  ;;  %v349_v33 = vpack.c.bf16 %v215_v24, %v215_v24  ;;  %v216_v35 = vmax.f32 %v186_v26, 0.0 }
  0xdf   :  { %v339_v34 = vpack.c.bf16 %v205_v25, %v205_v25  ;;  %v206_v36 = vmax.f32 %v146_v27, 0.0  ;;  %v347_v37 = vpack.c.bf16 %v213_v30, %v213_v30  ;;  %v214_v39 = vmax.f32 %v178_v32, 0.0 }
  0xe0   :  { %288 = vst.msk [vmem:[%s537_s3 + $0x8] sm:$0xf] %vm285_vm2, %v341_v29  ;;  %v342_v38 = vpack.c.bf16 %v208_v31, %v208_v31  ;;  %296 = vst.msk [vmem:[%s537_s3 + $0x28] sm:$0xf] %vm285_vm2, %v349_v33  ;;  %v350_v40 = vpack.c.bf16 %v216_v35, %v216_v35 }
  0xe1   :  { %286 = vst.msk [vmem:[%s537_s3] sm:$0xf] %vm285_vm2, %v339_v34  ;;  %v340_v41 = vpack.c.bf16 %v206_v36, %v206_v36  ;;  %v372_v42 = vpop.f32.mrb[4].mxu0  ;;  %294 = vst.msk [vmem:[%s537_s3 + $0x20] sm:$0xf] %vm285_vm2, %v347_v37  ;;  %v348_v43 = vpack.c.bf16 %v214_v39, %v214_v39  ;;  %v380_v45 = vpop.f32.mrb[4].mxu1 }
  0xe2   :  { %289 = vst.msk [vmem:[%s537_s3 + $0xc] sm:$0xf] %vm285_vm2, %v342_v38  ;;  %v167_v44 = vadd.f32 %v372_v42, %v452_v10  ;;  %v158_v46 = vpop.f32.mrb[5].mxu0  ;;  %297 = vst.msk [vmem:[%s537_s3 + $0x2c] sm:$0xf] %vm285_vm2, %v350_v40  ;;  %v199_v47 = vadd.f32 %v380_v45, %v452_v10  ;;  %v190_v49 = vpop.f32.mrb[5].mxu1 }
  0xe3   :  { %287 = vst.msk [vmem:[%s537_s3 + $0x4] sm:$0xf] %vm285_vm2, %v340_v41  ;;  %v159_v48 = vadd.f32 %v452_v10, %v158_v46  ;;  %v373_v50 = vpop.f32.mrb[6].mxu0  ;;  %295 = vst.msk [vmem:[%s537_s3 + $0x24] sm:$0xf] %vm285_vm2, %v348_v43  ;;  %v191_v52 = vadd.f32 %v452_v10, %v190_v49  ;;  %v381_v54 = vpop.f32.mrb[6].mxu1 }
  0xe4   :  { %v211_v51 = vmax.f32 %v167_v44, 0.0  ;;  %v170_v53 = vadd.f32 %v373_v50, %v452_v10  ;;  %v161_v55 = vpop.f32.mrb[7].mxu0  ;;  %v219_v56 = vmax.f32 %v199_v47, 0.0  ;;  %v202_v58 = vadd.f32 %v381_v54, %v452_v10  ;;  %v193_v60 = vpop.f32.mrb[7].mxu1 }
  0xe5   :  { %v209_v57 = vmax.f32 %v159_v48, 0.0  ;;  %v162_v59 = vadd.f32 %v452_v10, %v161_v55  ;;  %v217_v62 = vmax.f32 %v191_v52, 0.0  ;;  %v194_v0 = vadd.f32 %v452_v10, %v193_v60 }
  0xe6   :  { %v345_v61 = vpack.c.bf16 %v211_v51, %v211_v51  ;;  %v212_v63 = vmax.f32 %v170_v53, 0.0  ;;  %v353_v1 = vpack.c.bf16 %v219_v56, %v219_v56  ;;  %v220_v3 = vmax.f32 %v202_v58, 0.0 }
  0xe7   :  { %v343_v2 = vpack.c.bf16 %v209_v57, %v209_v57  ;;  %v210_v4 = vmax.f32 %v162_v59, 0.0  ;;  %v351_v5 = vpack.c.bf16 %v217_v62, %v217_v62  ;;  %v218_v7 = vmax.f32 %v194_v0, 0.0 }
  0xe8   :  { %292 = vst.msk [vmem:[%s537_s3 + $0x18] sm:$0xf] %vm285_vm2, %v345_v61  ;;  %v346_v6 = vpack.c.bf16 %v212_v63, %v212_v63  ;;  %300 = vst.msk [vmem:[%s537_s3 + $0x38] sm:$0xf] %vm285_vm2, %v353_v1  ;;  %v354_v8 = vpack.c.bf16 %v220_v3, %v220_v3 }
  0xe9   :  { %290 = vst.msk [vmem:[%s537_s3 + $0x10] sm:$0xf] %vm285_vm2, %v343_v2  ;;  %v344_v9 = vpack.c.bf16 %v210_v4, %v210_v4  ;;  %298 = vst.msk [vmem:[%s537_s3 + $0x30] sm:$0xf] %vm285_vm2, %v351_v5  ;;  %v352_v10 = vpack.c.bf16 %v218_v7, %v218_v7 }
  0xea   :  { %293 = vst.msk [vmem:[%s537_s3 + $0x1c] sm:$0xf] %vm285_vm2, %v346_v6  ;;  %301 = vst.msk [vmem:[%s537_s3 + $0x3c] sm:$0xf] %vm285_vm2, %v354_v8 }
  0xeb   :  { %291 = vst.msk [vmem:[%s537_s3 + $0x14] sm:$0xf] %vm285_vm2, %v344_v9  ;;  %299 = vst.msk [vmem:[%s537_s3 + $0x34] sm:$0xf] %vm285_vm2, %v352_v10 }

// kernel: gnn_forward.9
= control target key start
LH: loop header
LB: loop body
LE: loop exit
PB: predicated region body
PF: predicated region fallthrough
CT: control target
= control target key end

     0   :  { %vm92_vm0 = vcmask 261120   ;;  %vm278_vm1 = vcmask 257024   ;;  %s1929_s1 = inlined_call_operand.vmem [shape: bf16[4,32,32], index: 1, kind: input, shape index: {}]   ;;  %s1930_s0 = inlined_call_operand.vmem [shape: bf16[128,32], index: 0, kind: input, shape index: {}]   ;;  %s1931_s2 = inlined_call_operand.vmem [shape: bf16[32,32], index: 2, kind: input, shape index: {}]   ;;  %s1932_s4 = inlined_call_operand.vmem [shape: bf16[4,128,32], index: 4, kind: output, shape index: {0}]   ;;  %s1933_s3 = inlined_call_operand.vmem [shape: f32[1,32], index: 3, kind: input, shape index: {}]   ;;  %s1934_s5 = inlined_call_operand.vmem [shape: f32[128,32], index: 5, kind: output, shape index: {1}]  }
   0x1   :  { %v1425_v0 = vld [vmem:[%s1929_s1] sm:$0xff]   ;;  %v1426_v1 = vld [vmem:[%s1929_s1 + $0x8] sm:$0xff]   ;;  %v1431_v6 = vld [vmem:[%s1929_s1 + $0x10] sm:$0xff]  }
   0x2   :  { %1321 = vmatprep.subr.bf16.mxu0 %v1425_v0  ;;  %1421 = vmatprep.subr.bf16.mxu1 %v1425_v0  ;;  %v1482_v2 = vld [vmem:[%s1930_s0] sm:$0xff]   ;;  %v1429_v4 = vld [vmem:[%s1930_s0 + $0x8] sm:$0xff]   ;;  %v1433_v8 = vld [vmem:[%s1930_s0 + $0x10] sm:$0xff]  }
   0x3   :  { %1322 = vmatpush3.bf16.msra.mxu0 %v1425_v0  ;;  %1423 = vmatpush3.bf16.msra.mxu1 %v1425_v0  ;;  %v1487_v3 = vld [vmem:[%s1930_s0 + $0x20] sm:$0xff]   ;;  %v1499_v5 = vld [vmem:[%s1930_s0 + $0x28] sm:$0xff]   ;;  %v1434_v9 = vld [vmem:[%s1930_s0 + $0x30] sm:$0xff]  }
   0x4   :  { %1323 = vmatprep.subr.bf16.mxu0 %v1426_v1  ;;  %1422 = vmatprep.subr.bf16.mxu1 %v1426_v1  ;;  %v1432_v7 = vld [vmem:[%s1929_s1 + $0x20] sm:$0xff]   ;;  %v1435_v10 = vld [vmem:[%s1930_s0 + $0x18] sm:$0xff]   ;;  %v1438_v13 = vld [vmem:[%s1929_s1 + $0x28] sm:$0xff]  }
   0x5   :  { %1325 = vmatprep.mubr.msk.bf16.mxu0 %vm92_vm0, %v1482_v2  ;;  %1333 = vmatprep.mubr.msk.bf16.mxu1 %vm92_vm0, %v1487_v3  ;;  %v1436_v11 = vld [vmem:[%s1930_s0 + $0x38] sm:$0xff]   ;;  %v1439_v14 = vld [vmem:[%s1929_s1 + $0x30] sm:$0xff]   ;;  %v1440_v15 = vld [vmem:[%s1931_s2] sm:$0xff]  }
   0x6   :  { %v1437_v12 = vld [vmem:[%s1929_s1 + $0x18] sm:$0xff]   ;;  %v1442_v17 = vld [vmem:[%s1931_s2 + $0x8] sm:$0xff]  }
   0x7   :  { %1324 = vmatpush3.bf16.msra.mxu0 %v1426_v1  ;;  %1424 = vmatpush3.bf16.msra.mxu1 %v1426_v1  ;;  %v1441_v16 = vld [vmem:[%s1929_s1 + $0x38] sm:$0xff]  }
   0x8   :  { %1341 = vmatprep.subr.bf16.mxu1 %v1431_v6  ;;  %1361 = vmatprep.subr.bf16.mxu0 %v1432_v7 }
   0xa   :  { %1326 = vmatmul.mubr.msk.bf16.vlgmr.msra.gmra.mrb[0].mxu0 %vm92_vm0, %v1429_v4  ;;  %1334 = vmatmul.mubr.msk.bf16.vlgmr.msra.gmra.mrb[0].mxu1 %vm92_vm0, %v1499_v5 }
   0xb   :  { %1342 = vmatpush3.bf16.msra.mxu1 %v1431_v6  ;;  %1362 = vmatpush3.bf16.msra.mxu0 %v1432_v7 }
   0xc   :  { %1329 = vmatprep.mubr.msk.bf16.mxu0 %vm92_vm0, %v1433_v8  ;;  %1337 = vmatprep.mubr.msk.bf16.mxu1 %vm92_vm0, %v1434_v9 }
   0xd   :  { %1343 = vmatprep.subr.bf16.mxu1 %v1437_v12  ;;  %1363 = vmatprep.subr.bf16.mxu0 %v1438_v13 }
   0xf   :  { %1344 = vmatpush3.bf16.msra.mxu1 %v1437_v12  ;;  %1364 = vmatpush3.bf16.msra.mxu0 %v1438_v13 }
  0x10   :  { %1381 = vmatprep.subr.bf16.mxu1 %v1439_v14  ;;  %1401 = vmatprep.subr.bf16.mxu0 %v1440_v15 }
  0x12   :  { %1330 = vmatmul.mubr.msk.bf16.gmra.mrb[4].mxu0 %vm92_vm0, %v1435_v10  ;;  %1338 = vmatmul.mubr.msk.bf16.gmra.mrb[4].mxu1 %vm92_vm0, %v1436_v11 }
  0x13   :  { %1345 = vmatprep.mubr.msk.bf16.mxu1 %vm92_vm0, %v1482_v2  ;;  %1365 = vmatprep.mubr.msk.bf16.mxu0 %vm92_vm0, %v1482_v2 }
  0x1a   :  { %1346 = vmatmul.mubr.msk.bf16.vlgmr.msra.gmra.mrb[8].mxu1 %vm92_vm0, %v1429_v4  ;;  %1366 = vmatmul.mubr.msk.bf16.vlgmr.msra.gmra.mrb[8].mxu0 %vm92_vm0, %v1429_v4 }
  0x1b   :  { %1382 = vmatpush3.bf16.msra.mxu1 %v1439_v14  ;;  %1402 = vmatpush3.bf16.msra.mxu0 %v1440_v15 }
  0x1c   :  { %1349 = vmatprep.mubr.msk.bf16.mxu1 %vm92_vm0, %v1433_v8  ;;  %1369 = vmatprep.mubr.msk.bf16.mxu0 %vm92_vm0, %v1433_v8 }
  0x1d   :  { %1383 = vmatprep.subr.bf16.mxu1 %v1441_v16  ;;  %1403 = vmatprep.subr.bf16.mxu0 %v1442_v17 }
  0x1f   :  { %1384 = vmatpush3.bf16.msra.mxu1 %v1441_v16  ;;  %1404 = vmatpush3.bf16.msra.mxu0 %v1442_v17 }
  0x22   :  { %1350 = vmatmul.mubr.msk.bf16.gmra.mrb[12].mxu1 %vm92_vm0, %v1435_v10  ;;  %1370 = vmatmul.mubr.msk.bf16.gmra.mrb[12].mxu0 %vm92_vm0, %v1435_v10 }
  0x23   :  { %1353 = vmatprep.mubr.msk.bf16.mxu1 %vm92_vm0, %v1487_v3  ;;  %1373 = vmatprep.mubr.msk.bf16.mxu0 %vm92_vm0, %v1487_v3 }
  0x2a   :  { %1354 = vmatmul.mubr.msk.bf16.gmra.mrb[16].mxu1 %vm92_vm0, %v1499_v5  ;;  %1374 = vmatmul.mubr.msk.bf16.gmra.mrb[16].mxu0 %vm92_vm0, %v1499_v5 }
  0x2b   :  { %1357 = vmatprep.mubr.msk.bf16.mxu1 %vm92_vm0, %v1434_v9  ;;  %1377 = vmatprep.mubr.msk.bf16.mxu0 %vm92_vm0, %v1434_v9 }
  0x32   :  { %1358 = vmatmul.mubr.msk.bf16.gmra.mrb[20].mxu1 %vm92_vm0, %v1436_v11  ;;  %1378 = vmatmul.mubr.msk.bf16.gmra.mrb[20].mxu0 %vm92_vm0, %v1436_v11 }
  0x33   :  { %1385 = vmatprep.mubr.msk.bf16.mxu1 %vm92_vm0, %v1482_v2  ;;  %1405 = vmatprep.mubr.msk.bf16.mxu0 %vm92_vm0, %v1482_v2 }
  0x3a   :  { %1386 = vmatmul.mubr.msk.bf16.vlgmr.msra.gmra.mrb[24].mxu1 %vm92_vm0, %v1429_v4  ;;  %1406 = vmatmul.mubr.msk.bf16.vlgmr.msra.gmra.mrb[24].mxu0 %vm92_vm0, %v1429_v4 }
  0x3b   :  { %1389 = vmatprep.mubr.msk.bf16.mxu1 %vm92_vm0, %v1433_v8  ;;  %1409 = vmatprep.mubr.msk.bf16.mxu0 %vm92_vm0, %v1433_v8 }
  0x42   :  { %1390 = vmatmul.mubr.msk.bf16.gmra.mrb[28].mxu1 %vm92_vm0, %v1435_v10  ;;  %1410 = vmatmul.mubr.msk.bf16.gmra.mrb[28].mxu0 %vm92_vm0, %v1435_v10 }
  0x43   :  { %1393 = vmatprep.mubr.msk.bf16.mxu1 %vm92_vm0, %v1487_v3  ;;  %1413 = vmatprep.mubr.msk.bf16.mxu0 %vm92_vm0, %v1487_v3 }
  0x4a   :  { %1394 = vmatmul.mubr.msk.bf16.gmra.mrb[32].mxu1 %vm92_vm0, %v1499_v5  ;;  %1414 = vmatmul.mubr.msk.bf16.gmra.mrb[32].mxu0 %vm92_vm0, %v1499_v5 }
  0x4b   :  { %1397 = vmatprep.mubr.msk.bf16.mxu1 %vm92_vm0, %v1434_v9  ;;  %1417 = vmatprep.mubr.msk.bf16.mxu0 %vm92_vm0, %v1434_v9 }
  0x52   :  { %1398 = vmatmul.mubr.msk.bf16.gmra.mrb[36].mxu1 %vm92_vm0, %v1436_v11  ;;  %1418 = vmatmul.mubr.msk.bf16.gmra.mrb[36].mxu0 %vm92_vm0, %v1436_v11 }
  0xdd   :  { %v1327_v18 = vpop.f32.mrb[0].mxu0  ;;  %v1335_v19 = vpop.f32.mrb[0].mxu1 }
  0xde   :  { %v1209_v20 = vpack.c.bf16 %v1327_v18, %v1327_v18  ;;  %v1217_v21 = vpack.c.bf16 %v1335_v19, %v1335_v19  ;;  %v151_v22 = vpop.f32.mrb[1].mxu0  ;;  %v183_v23 = vpop.f32.mrb[1].mxu1 }
  0xdf   :  { %v1207_v24 = vpack.c.bf16 %v151_v22, %v151_v22  ;;  %v1215_v25 = vpack.c.bf16 %v183_v23, %v183_v23  ;;  %v1328_v26 = vpop.f32.mrb[2].mxu0  ;;  %v1336_v27 = vpop.f32.mrb[2].mxu1 }
  0xe0   :  { %281 = vst.msk [vmem:[%s1932_s4 + $0x8] sm:$0xf] %vm278_vm1, %v1209_v20  ;;  %289 = vst.msk [vmem:[%s1932_s4 + $0x28] sm:$0xf] %vm278_vm1, %v1217_v21  ;;  %v1210_v28 = vpack.c.bf16 %v1328_v26, %v1328_v26  ;;  %v1218_v29 = vpack.c.bf16 %v1336_v27, %v1336_v27  ;;  %v154_v30 = vpop.f32.mrb[3].mxu0  ;;  %v186_v31 = vpop.f32.mrb[3].mxu1 }
  0xe1   :  { %279 = vst.msk [vmem:[%s1932_s4] sm:$0xf] %vm278_vm1, %v1207_v24  ;;  %287 = vst.msk [vmem:[%s1932_s4 + $0x20] sm:$0xf] %vm278_vm1, %v1215_v25  ;;  %v1208_v32 = vpack.c.bf16 %v154_v30, %v154_v30  ;;  %v1216_v33 = vpack.c.bf16 %v186_v31, %v186_v31 }
  0xe2   :  { %282 = vst.msk [vmem:[%s1932_s4 + $0xc] sm:$0xf] %vm278_vm1, %v1210_v28  ;;  %290 = vst.msk [vmem:[%s1932_s4 + $0x2c] sm:$0xf] %vm278_vm1, %v1218_v29 }
  0xe3   :  { %280 = vst.msk [vmem:[%s1932_s4 + $0x4] sm:$0xf] %vm278_vm1, %v1208_v32  ;;  %288 = vst.msk [vmem:[%s1932_s4 + $0x24] sm:$0xf] %vm278_vm1, %v1216_v33 }
  0xe5   :  { %v1331_v34 = vpop.f32.mrb[4].mxu0  ;;  %v1339_v35 = vpop.f32.mrb[4].mxu1 }
  0xe6   :  { %v1213_v36 = vpack.c.bf16 %v1331_v34, %v1331_v34  ;;  %v1221_v37 = vpack.c.bf16 %v1339_v35, %v1339_v35  ;;  %v167_v38 = vpop.f32.mrb[5].mxu0  ;;  %v199_v39 = vpop.f32.mrb[5].mxu1 }
  0xe7   :  { %v1211_v40 = vpack.c.bf16 %v167_v38, %v167_v38  ;;  %v1219_v41 = vpack.c.bf16 %v199_v39, %v199_v39  ;;  %v1332_v42 = vpop.f32.mrb[6].mxu0  ;;  %v1340_v43 = vpop.f32.mrb[6].mxu1 }
  0xe8   :  { %285 = vst.msk [vmem:[%s1932_s4 + $0x18] sm:$0xf] %vm278_vm1, %v1213_v36  ;;  %293 = vst.msk [vmem:[%s1932_s4 + $0x38] sm:$0xf] %vm278_vm1, %v1221_v37  ;;  %v1214_v44 = vpack.c.bf16 %v1332_v42, %v1332_v42  ;;  %v1222_v45 = vpack.c.bf16 %v1340_v43, %v1340_v43  ;;  %v170_v46 = vpop.f32.mrb[7].mxu0  ;;  %v202_v47 = vpop.f32.mrb[7].mxu1 }
  0xe9   :  { %283 = vst.msk [vmem:[%s1932_s4 + $0x10] sm:$0xf] %vm278_vm1, %v1211_v40  ;;  %291 = vst.msk [vmem:[%s1932_s4 + $0x30] sm:$0xf] %vm278_vm1, %v1219_v41  ;;  %v1212_v48 = vpack.c.bf16 %v170_v46, %v170_v46  ;;  %v1220_v49 = vpack.c.bf16 %v202_v47, %v202_v47 }
  0xea   :  { %286 = vst.msk [vmem:[%s1932_s4 + $0x1c] sm:$0xf] %vm278_vm1, %v1214_v44  ;;  %294 = vst.msk [vmem:[%s1932_s4 + $0x3c] sm:$0xf] %vm278_vm1, %v1222_v45 }
  0xeb   :  { %284 = vst.msk [vmem:[%s1932_s4 + $0x14] sm:$0xf] %vm278_vm1, %v1212_v48  ;;  %292 = vst.msk [vmem:[%s1932_s4 + $0x34] sm:$0xf] %vm278_vm1, %v1220_v49 }
  0xed   :  { %v1347_v50 = vpop.f32.mrb[8].mxu1  ;;  %v1367_v51 = vpop.f32.mrb[8].mxu0 }
  0xee   :  { %v1225_v52 = vpack.c.bf16 %v1347_v50, %v1347_v50  ;;  %v1241_v53 = vpack.c.bf16 %v1367_v51, %v1367_v51  ;;  %v346_v54 = vpop.f32.mrb[9].mxu1  ;;  %v541_v55 = vpop.f32.mrb[9].mxu0  ;;  %v1783_v50 = vld [vmem:[%s1933_s3] ss:$0 sm:$0xff] }
  0xef   :  { %v1223_v56 = vpack.c.bf16 %v346_v54, %v346_v54  ;;  %v1239_v57 = vpack.c.bf16 %v541_v55, %v541_v55  ;;  %v1348_v58 = vpop.f32.mrb[10].mxu1  ;;  %v1368_v59 = vpop.f32.mrb[10].mxu0 }
  0xf0   :  { %1090 = vst.msk [vmem:[%s1932_s4 + $0x48] sm:$0xf] %vm278_vm1, %v1225_v52  ;;  %1136 = vst.msk [vmem:[%s1932_s4 + $0x88] sm:$0xf] %vm278_vm1, %v1241_v53  ;;  %v1226_v60 = vpack.c.bf16 %v1348_v58, %v1348_v58  ;;  %v1242_v61 = vpack.c.bf16 %v1368_v59, %v1368_v59  ;;  %v349_v62 = vpop.f32.mrb[11].mxu1  ;;  %v544_v63 = vpop.f32.mrb[11].mxu0 }
  0xf1   :  { %1088 = vst.msk [vmem:[%s1932_s4 + $0x40] sm:$0xf] %vm278_vm1, %v1223_v56  ;;  %1134 = vst.msk [vmem:[%s1932_s4 + $0x80] sm:$0xf] %vm278_vm1, %v1239_v57  ;;  %v1224_v0 = vpack.c.bf16 %v349_v62, %v349_v62  ;;  %v1240_v1 = vpack.c.bf16 %v544_v63, %v544_v63 }
  0xf2   :  { %1091 = vst.msk [vmem:[%s1932_s4 + $0x4c] sm:$0xf] %vm278_vm1, %v1226_v60  ;;  %1137 = vst.msk [vmem:[%s1932_s4 + $0x8c] sm:$0xf] %vm278_vm1, %v1242_v61 }
  0xf3   :  { %1089 = vst.msk [vmem:[%s1932_s4 + $0x44] sm:$0xf] %vm278_vm1, %v1224_v0  ;;  %1135 = vst.msk [vmem:[%s1932_s4 + $0x84] sm:$0xf] %vm278_vm1, %v1240_v1 }
  0xf5   :  { %v1351_v2 = vpop.f32.mrb[12].mxu1  ;;  %v1371_v3 = vpop.f32.mrb[12].mxu0 }
  0xf6   :  { %v1229_v4 = vpack.c.bf16 %v1351_v2, %v1351_v2  ;;  %v1245_v5 = vpack.c.bf16 %v1371_v3, %v1371_v3  ;;  %v362_v6 = vpop.f32.mrb[13].mxu1  ;;  %v557_v7 = vpop.f32.mrb[13].mxu0 }
  0xf7   :  { %v1227_v8 = vpack.c.bf16 %v362_v6, %v362_v6  ;;  %v1243_v9 = vpack.c.bf16 %v557_v7, %v557_v7  ;;  %v1352_v10 = vpop.f32.mrb[14].mxu1  ;;  %v1372_v11 = vpop.f32.mrb[14].mxu0 }
  0xf8   :  { %1094 = vst.msk [vmem:[%s1932_s4 + $0x58] sm:$0xf] %vm278_vm1, %v1229_v4  ;;  %1140 = vst.msk [vmem:[%s1932_s4 + $0x98] sm:$0xf] %vm278_vm1, %v1245_v5  ;;  %v1230_v12 = vpack.c.bf16 %v1352_v10, %v1352_v10  ;;  %v1246_v13 = vpack.c.bf16 %v1372_v11, %v1372_v11  ;;  %v365_v14 = vpop.f32.mrb[15].mxu1  ;;  %v560_v15 = vpop.f32.mrb[15].mxu0 }
  0xf9   :  { %1092 = vst.msk [vmem:[%s1932_s4 + $0x50] sm:$0xf] %vm278_vm1, %v1227_v8  ;;  %1138 = vst.msk [vmem:[%s1932_s4 + $0x90] sm:$0xf] %vm278_vm1, %v1243_v9  ;;  %v1228_v16 = vpack.c.bf16 %v365_v14, %v365_v14  ;;  %v1244_v17 = vpack.c.bf16 %v560_v15, %v560_v15 }
  0xfa   :  { %1095 = vst.msk [vmem:[%s1932_s4 + $0x5c] sm:$0xf] %vm278_vm1, %v1230_v12  ;;  %1141 = vst.msk [vmem:[%s1932_s4 + $0x9c] sm:$0xf] %vm278_vm1, %v1246_v13 }
  0xfb   :  { %1093 = vst.msk [vmem:[%s1932_s4 + $0x54] sm:$0xf] %vm278_vm1, %v1228_v16  ;;  %1139 = vst.msk [vmem:[%s1932_s4 + $0x94] sm:$0xf] %vm278_vm1, %v1244_v17 }
  0xfd   :  { %v1355_v18 = vpop.f32.mrb[16].mxu1  ;;  %v1375_v19 = vpop.f32.mrb[16].mxu0 }
  0xfe   :  { %v1233_v20 = vpack.c.bf16 %v1355_v18, %v1355_v18  ;;  %v1249_v21 = vpack.c.bf16 %v1375_v19, %v1375_v19  ;;  %v378_v22 = vpop.f32.mrb[17].mxu1  ;;  %v573_v23 = vpop.f32.mrb[17].mxu0 }
  0xff   :  { %v1231_v24 = vpack.c.bf16 %v378_v22, %v378_v22  ;;  %v1247_v25 = vpack.c.bf16 %v573_v23, %v573_v23  ;;  %v1356_v26 = vpop.f32.mrb[18].mxu1  ;;  %v1376_v27 = vpop.f32.mrb[18].mxu0 }
 0x100   :  { %1098 = vst.msk [vmem:[%s1932_s4 + $0x68] sm:$0xf] %vm278_vm1, %v1233_v20  ;;  %1144 = vst.msk [vmem:[%s1932_s4 + $0xa8] sm:$0xf] %vm278_vm1, %v1249_v21  ;;  %v1234_v28 = vpack.c.bf16 %v1356_v26, %v1356_v26  ;;  %v1250_v29 = vpack.c.bf16 %v1376_v27, %v1376_v27  ;;  %v381_v30 = vpop.f32.mrb[19].mxu1  ;;  %v576_v31 = vpop.f32.mrb[19].mxu0 }
 0x101   :  { %1096 = vst.msk [vmem:[%s1932_s4 + $0x60] sm:$0xf] %vm278_vm1, %v1231_v24  ;;  %1142 = vst.msk [vmem:[%s1932_s4 + $0xa0] sm:$0xf] %vm278_vm1, %v1247_v25  ;;  %v1232_v32 = vpack.c.bf16 %v381_v30, %v381_v30  ;;  %v1248_v33 = vpack.c.bf16 %v576_v31, %v576_v31 }
 0x102   :  { %1099 = vst.msk [vmem:[%s1932_s4 + $0x6c] sm:$0xf] %vm278_vm1, %v1234_v28  ;;  %1145 = vst.msk [vmem:[%s1932_s4 + $0xac] sm:$0xf] %vm278_vm1, %v1250_v29 }
 0x103   :  { %1097 = vst.msk [vmem:[%s1932_s4 + $0x64] sm:$0xf] %vm278_vm1, %v1232_v32  ;;  %1143 = vst.msk [vmem:[%s1932_s4 + $0xa4] sm:$0xf] %vm278_vm1, %v1248_v33 }
 0x105   :  { %v1359_v34 = vpop.f32.mrb[20].mxu1  ;;  %v1379_v35 = vpop.f32.mrb[20].mxu0 }
 0x106   :  { %v1237_v36 = vpack.c.bf16 %v1359_v34, %v1359_v34  ;;  %v1253_v37 = vpack.c.bf16 %v1379_v35, %v1379_v35  ;;  %v394_v38 = vpop.f32.mrb[21].mxu1  ;;  %v589_v39 = vpop.f32.mrb[21].mxu0 }
 0x107   :  { %v1235_v40 = vpack.c.bf16 %v394_v38, %v394_v38  ;;  %v1251_v41 = vpack.c.bf16 %v589_v39, %v589_v39  ;;  %v1360_v42 = vpop.f32.mrb[22].mxu1  ;;  %v1380_v43 = vpop.f32.mrb[22].mxu0 }
 0x108   :  { %1102 = vst.msk [vmem:[%s1932_s4 + $0x78] sm:$0xf] %vm278_vm1, %v1237_v36  ;;  %1148 = vst.msk [vmem:[%s1932_s4 + $0xb8] sm:$0xf] %vm278_vm1, %v1253_v37  ;;  %v1238_v44 = vpack.c.bf16 %v1360_v42, %v1360_v42  ;;  %v1254_v45 = vpack.c.bf16 %v1380_v43, %v1380_v43  ;;  %v397_v46 = vpop.f32.mrb[23].mxu1  ;;  %v592_v47 = vpop.f32.mrb[23].mxu0 }
 0x109   :  { %1100 = vst.msk [vmem:[%s1932_s4 + $0x70] sm:$0xf] %vm278_vm1, %v1235_v40  ;;  %1146 = vst.msk [vmem:[%s1932_s4 + $0xb0] sm:$0xf] %vm278_vm1, %v1251_v41  ;;  %v1236_v48 = vpack.c.bf16 %v397_v46, %v397_v46  ;;  %v1252_v49 = vpack.c.bf16 %v592_v47, %v592_v47 }
 0x10a   :  { %1103 = vst.msk [vmem:[%s1932_s4 + $0x7c] sm:$0xf] %vm278_vm1, %v1238_v44  ;;  %1149 = vst.msk [vmem:[%s1932_s4 + $0xbc] sm:$0xf] %vm278_vm1, %v1254_v45 }
 0x10b   :  { %1101 = vst.msk [vmem:[%s1932_s4 + $0x74] sm:$0xf] %vm278_vm1, %v1236_v48  ;;  %1147 = vst.msk [vmem:[%s1932_s4 + $0xb4] sm:$0xf] %vm278_vm1, %v1252_v49 }
 0x10d   :  { %v1387_v51 = vpop.f32.mrb[24].mxu1  ;;  %v1407_v52 = vpop.f32.mrb[24].mxu0 }
 0x10e   :  { %v1257_v53 = vpack.c.bf16 %v1387_v51, %v1387_v51  ;;  %v946_v54 = vadd.f32 %v1407_v52, %v1783_v50  ;;  %v736_v55 = vpop.f32.mrb[25].mxu1  ;;  %v937_v56 = vpop.f32.mrb[25].mxu0 }
 0x10f   :  { %v1255_v57 = vpack.c.bf16 %v736_v55, %v736_v55  ;;  %v938_v58 = vadd.f32 %v1783_v50, %v937_v56  ;;  %v1388_v59 = vpop.f32.mrb[26].mxu1  ;;  %v1408_v60 = vpop.f32.mrb[26].mxu0 }
 0x110   :  { %1182 = vst.msk [vmem:[%s1932_s4 + $0xc8] sm:$0xf] %vm278_vm1, %v1257_v53  ;;  %v1258_v61 = vpack.c.bf16 %v1388_v59, %v1388_v59  ;;  %v949_v62 = vadd.f32 %v1408_v60, %v1783_v50  ;;  %v739_v63 = vpop.f32.mrb[27].mxu1  ;;  %v940_v0 = vpop.f32.mrb[27].mxu0 }
 0x111   :  { %1002 = vst.msk [vmem:[%s1934_s5 + $0x10] sm:$0xff] %vm92_vm0, %v946_v54  ;;  %1000 = vst.msk [vmem:[%s1934_s5] sm:$0xff] %vm92_vm0, %v938_v58  ;;  %v1256_v1 = vpack.c.bf16 %v739_v63, %v739_v63  ;;  %v941_v2 = vadd.f32 %v1783_v50, %v940_v0 }
 0x112   :  { %1180 = vst.msk [vmem:[%s1932_s4 + $0xc0] sm:$0xf] %vm278_vm1, %v1255_v57  ;;  %1183 = vst.msk [vmem:[%s1932_s4 + $0xcc] sm:$0xf] %vm278_vm1, %v1258_v61 }
 0x113   :  { %1003 = vst.msk [vmem:[%s1934_s5 + $0x18] sm:$0xff] %vm92_vm0, %v949_v62  ;;  %1001 = vst.msk [vmem:[%s1934_s5 + $0x8] sm:$0xff] %vm92_vm0, %v941_v2 }
 0x114   :  { %1181 = vst.msk [vmem:[%s1932_s4 + $0xc4] sm:$0xf] %vm278_vm1, %v1256_v1 }
 0x115   :  { %v1391_v3 = vpop.f32.mrb[28].mxu1  ;;  %v1411_v4 = vpop.f32.mrb[28].mxu0 }
 0x116   :  { %v1261_v5 = vpack.c.bf16 %v1391_v3, %v1391_v3  ;;  %v962_v6 = vadd.f32 %v1411_v4, %v1783_v50  ;;  %v752_v7 = vpop.f32.mrb[29].mxu1  ;;  %v953_v8 = vpop.f32.mrb[29].mxu0 }
 0x117   :  { %v1259_v9 = vpack.c.bf16 %v752_v7, %v752_v7  ;;  %v954_v10 = vadd.f32 %v1783_v50, %v953_v8  ;;  %v1392_v11 = vpop.f32.mrb[30].mxu1  ;;  %v1412_v12 = vpop.f32.mrb[30].mxu0 }
 0x118   :  { %1186 = vst.msk [vmem:[%s1932_s4 + $0xd8] sm:$0xf] %vm278_vm1, %v1261_v5  ;;  %v1262_v13 = vpack.c.bf16 %v1392_v11, %v1392_v11  ;;  %v965_v14 = vadd.f32 %v1412_v12, %v1783_v50  ;;  %v755_v15 = vpop.f32.mrb[31].mxu1  ;;  %v956_v16 = vpop.f32.mrb[31].mxu0 }
 0x119   :  { %1006 = vst.msk [vmem:[%s1934_s5 + $0x30] sm:$0xff] %vm92_vm0, %v962_v6  ;;  %1004 = vst.msk [vmem:[%s1934_s5 + $0x20] sm:$0xff] %vm92_vm0, %v954_v10  ;;  %v1260_v17 = vpack.c.bf16 %v755_v15, %v755_v15  ;;  %v957_v18 = vadd.f32 %v1783_v50, %v956_v16 }
 0x11a   :  { %1184 = vst.msk [vmem:[%s1932_s4 + $0xd0] sm:$0xf] %vm278_vm1, %v1259_v9  ;;  %1187 = vst.msk [vmem:[%s1932_s4 + $0xdc] sm:$0xf] %vm278_vm1, %v1262_v13 }
 0x11b   :  { %1007 = vst.msk [vmem:[%s1934_s5 + $0x38] sm:$0xff] %vm92_vm0, %v965_v14  ;;  %1005 = vst.msk [vmem:[%s1934_s5 + $0x28] sm:$0xff] %vm92_vm0, %v957_v18 }
 0x11c   :  { %1185 = vst.msk [vmem:[%s1932_s4 + $0xd4] sm:$0xf] %vm278_vm1, %v1260_v17 }
 0x11d   :  { %v1395_v19 = vpop.f32.mrb[32].mxu1  ;;  %v1415_v20 = vpop.f32.mrb[32].mxu0 }
 0x11e   :  { %v1265_v21 = vpack.c.bf16 %v1395_v19, %v1395_v19  ;;  %v978_v22 = vadd.f32 %v1415_v20, %v1783_v50  ;;  %v768_v23 = vpop.f32.mrb[33].mxu1  ;;  %v969_v24 = vpop.f32.mrb[33].mxu0 }
 0x11f   :  { %v1263_v25 = vpack.c.bf16 %v768_v23, %v768_v23  ;;  %v970_v26 = vadd.f32 %v1783_v50, %v969_v24  ;;  %v1396_v27 = vpop.f32.mrb[34].mxu1  ;;  %v1416_v28 = vpop.f32.mrb[34].mxu0 }
 0x120   :  { %1190 = vst.msk [vmem:[%s1932_s4 + $0xe8] sm:$0xf] %vm278_vm1, %v1265_v21  ;;  %v1266_v29 = vpack.c.bf16 %v1396_v27, %v1396_v27  ;;  %v981_v30 = vadd.f32 %v1416_v28, %v1783_v50  ;;  %v771_v31 = vpop.f32.mrb[35].mxu1  ;;  %v972_v32 = vpop.f32.mrb[35].mxu0 }
 0x121   :  { %1010 = vst.msk [vmem:[%s1934_s5 + $0x50] sm:$0xff] %vm92_vm0, %v978_v22  ;;  %1008 = vst.msk [vmem:[%s1934_s5 + $0x40] sm:$0xff] %vm92_vm0, %v970_v26  ;;  %v1264_v33 = vpack.c.bf16 %v771_v31, %v771_v31  ;;  %v973_v34 = vadd.f32 %v1783_v50, %v972_v32 }
 0x122   :  { %1188 = vst.msk [vmem:[%s1932_s4 + $0xe0] sm:$0xf] %vm278_vm1, %v1263_v25  ;;  %1191 = vst.msk [vmem:[%s1932_s4 + $0xec] sm:$0xf] %vm278_vm1, %v1266_v29 }
 0x123   :  { %1011 = vst.msk [vmem:[%s1934_s5 + $0x58] sm:$0xff] %vm92_vm0, %v981_v30  ;;  %1009 = vst.msk [vmem:[%s1934_s5 + $0x48] sm:$0xff] %vm92_vm0, %v973_v34 }
 0x124   :  { %1189 = vst.msk [vmem:[%s1932_s4 + $0xe4] sm:$0xf] %vm278_vm1, %v1264_v33 }
 0x125   :  { %v1399_v35 = vpop.f32.mrb[36].mxu1  ;;  %v1419_v36 = vpop.f32.mrb[36].mxu0 }
 0x126   :  { %v1269_v37 = vpack.c.bf16 %v1399_v35, %v1399_v35  ;;  %v994_v38 = vadd.f32 %v1419_v36, %v1783_v50  ;;  %v784_v39 = vpop.f32.mrb[37].mxu1  ;;  %v985_v40 = vpop.f32.mrb[37].mxu0 }
 0x127   :  { %v1267_v41 = vpack.c.bf16 %v784_v39, %v784_v39  ;;  %v986_v42 = vadd.f32 %v1783_v50, %v985_v40  ;;  %v1400_v43 = vpop.f32.mrb[38].mxu1  ;;  %v1420_v44 = vpop.f32.mrb[38].mxu0 }
 0x128   :  { %1194 = vst.msk [vmem:[%s1932_s4 + $0xf8] sm:$0xf] %vm278_vm1, %v1269_v37  ;;  %v1270_v45 = vpack.c.bf16 %v1400_v43, %v1400_v43  ;;  %v997_v46 = vadd.f32 %v1420_v44, %v1783_v50  ;;  %v787_v47 = vpop.f32.mrb[39].mxu1  ;;  %v988_v48 = vpop.f32.mrb[39].mxu0 }
 0x129   :  { %1014 = vst.msk [vmem:[%s1934_s5 + $0x70] sm:$0xff] %vm92_vm0, %v994_v38  ;;  %1012 = vst.msk [vmem:[%s1934_s5 + $0x60] sm:$0xff] %vm92_vm0, %v986_v42  ;;  %v1268_v49 = vpack.c.bf16 %v787_v47, %v787_v47  ;;  %v989_v51 = vadd.f32 %v1783_v50, %v988_v48 }
 0x12a   :  { %1192 = vst.msk [vmem:[%s1932_s4 + $0xf0] sm:$0xf] %vm278_vm1, %v1267_v41  ;;  %1195 = vst.msk [vmem:[%s1932_s4 + $0xfc] sm:$0xf] %vm278_vm1, %v1270_v45 }
 0x12b   :  { %1015 = vst.msk [vmem:[%s1934_s5 + $0x78] sm:$0xff] %vm92_vm0, %v997_v46  ;;  %1013 = vst.msk [vmem:[%s1934_s5 + $0x68] sm:$0xff] %vm92_vm0, %v989_v51 }
 0x12c   :  { %1193 = vst.msk [vmem:[%s1932_s4 + $0xf4] sm:$0xf] %vm278_vm1, %v1268_v49 }

// kernel: gnn_forward.15
= control target key start
LH: loop header
LB: loop body
LE: loop exit
PB: predicated region body
PF: predicated region fallthrough
CT: control target
= control target key end

     0   :  { %vm28_vm0 = vcmask 261120   ;;  %v384_v0 = vmov 0.0   ;;  %vm385_vm1 = vmmov 0   ;;  %vm294_vm2 = vcmask 23552   ;;  %s481_s1 = inlined_call_operand.vmem [shape: bf16[128,32], index: 1, kind: input, shape index: {}]   ;;  %s482_s0 = inlined_call_operand.vmem [shape: bf16[16,128], index: 0, kind: input, shape index: {}]   ;;  %s483_s2 = inlined_call_operand.vmem [shape: bf16[32,32], index: 2, kind: input, shape index: {}]   ;;  %s484_s4 = inlined_call_operand.vmem [shape: bf16[32,3], index: 4, kind: input, shape index: {}]   ;;  %s485_s3 = inlined_call_operand.vmem [shape: f32[1,32], index: 3, kind: input, shape index: {}]   ;;  %s486_s5 = inlined_call_operand.vmem [shape: f32[1,3], index: 5, kind: input, shape index: {}]   ;;  %s487_s6 = inlined_call_operand.vmem [shape: f32[16,3], index: 6, kind: output, shape index: {}]  }
   0x1   :  { %333 = vmatprep.subr.bf16.mxu0 %v384_v0  ;;  %v371_v1 = vld [vmem:[%s481_s1] sm:$0xff]   ;;  %349 = vmatprep.mubr.msk.bf16.mxu0 %vm385_vm1, %v384_v0  ;;  %29 = vst.msk [vmem:[#allocation2] sm:$0xff] %vm28_vm0, %v384_v0  ;;  %30 = vst.msk [vmem:[#allocation2 + $0x8] sm:$0xff] %vm28_vm0, %v384_v0  ;;  %v372_v2 = vld [vmem:[%s481_s1 + $0x8] sm:$0xff]  }
   0x2   :  { %353 = vmatprep.subr.bf16.mxu1 %v384_v0  ;;  %357 = vmatprep.mubr.msk.bf16.mxu1 %vm385_vm1, %v384_v0  ;;  %v373_v3 = vld [vmem:[%s481_s1 + $0x10] sm:$0xff]   ;;  %v374_v4 = vld [vmem:[%s481_s1 + $0x18] sm:$0xff]   ;;  %v375_v5 = vld [vmem:[%s481_s1 + $0x20] sm:$0xff]  }
   0x3   :  { %334 = vmatpush3.bf16.msra.mxu0 %v371_v1  ;;  %v376_v6 = vld [vmem:[%s481_s1 + $0x28] sm:$0xff]   ;;  %v377_v7 = vld [vmem:[%s481_s1 + $0x30] sm:$0xff]   ;;  %v378_v8 = vld [vmem:[%s481_s1 + $0x38] sm:$0xff]  }
   0x4   :  { %335 = vmatprep.subr.bf16.mxu0 %v384_v0  ;;  %v379_v9 = vld [vmem:[%s482_s0] sm:$0xff]   ;;  %v381_v11 = vld [vmem:[%s483_s2 + $0x8] sm:$0xff]  }
   0x5   :  { %v380_v10 = vld [vmem:[%s483_s2] sm:$0xff]   ;;  %v383_v24 = vld [vmem:[%s484_s4 + $0x8] sm:$0xff]  }
   0x6   :  { %354 = vmatpush3.bf16.msra.mxu1 %v380_v10  ;;  %v382_v23 = vld [vmem:[%s484_s4] sm:$0xff]  }
   0x7   :  { %336 = vmatpush3.bf16.msra.mxu0 %v372_v2  ;;  %355 = vmatprep.subr.bf16.mxu1 %v384_v0  ;;  %v310_v25 = vld [vmem:[%s485_s3] ss:$0 sm:$0xff] }
   0x8   :  { %337 = vmatprep.subr.bf16.mxu0 %v384_v0  ;;  %v31_v12 = vld [vmem:[#allocation2] sm:$0xff]  ;;  %v32_v14 = vld [vmem:[#allocation2 + $0x8] sm:$0xff]  ;;  %v314_v35 = vld [vmem:[%s486_s5] ss:$0 sm:$0xff] }
   0xa   :  { %356 = vmatpush3.bf16.msra.mxu1 %v381_v11 }
   0xb   :  { %338 = vmatpush3.bf16.msra.mxu0 %v373_v3  ;;  %361 = vmatprep.subr.bf16.mxu1 %v384_v0 }
   0xc   :  { %339 = vmatprep.subr.bf16.mxu0 %v384_v0 }
   0xf   :  { %340 = vmatpush3.bf16.msra.mxu0 %v374_v4 }
  0x10   :  { %341 = vmatprep.subr.bf16.mxu0 %v384_v0 }
  0x13   :  { %342 = vmatpush3.bf16.msra.mxu0 %v375_v5 }
  0x14   :  { %343 = vmatprep.subr.bf16.mxu0 %v384_v0 }
  0x17   :  { %344 = vmatpush3.bf16.msra.mxu0 %v376_v6 }
  0x18   :  { %345 = vmatprep.subr.bf16.mxu0 %v384_v0 }
  0x1b   :  { %346 = vmatpush3.bf16.msra.mxu0 %v377_v7 }
  0x1c   :  { %347 = vmatprep.subr.bf16.mxu0 %v384_v0 }
  0x1f   :  { %348 = vmatpush3.bf16.msra.mxu0 %v378_v8 }
  0x22   :  { %350 = vmatmul.mubr.bf16.vlgmr.msra.gmra.mrb[0].mxu0 %v379_v9 }
  0xf5   :  { %v139_v13 = vpop.f32.mrb[0].mxu0 }
  0xf6   :  { %v146_v15 = vadd.f32 %v139_v13, %v31_v12  ;;  %v351_v16 = vpop.f32.mrb[1].mxu0 }
  0xf7   :  { %v142_v17 = vpop.f32.mrb[2].mxu0 }
  0xf8   :  { %149 = vst.msk [vmem:[#allocation2] sm:$0xff] %vm28_vm0, %v146_v15  ;;  %v147_v18 = vadd.f32 %v142_v17, %v32_v14  ;;  %v352_v19 = vpop.f32.mrb[3].mxu0 }
  0xfa   :  { %150 = vst.msk [vmem:[#allocation2 + $0x8] sm:$0xff] %vm28_vm0, %v147_v18 }
  0xff   :  { %v154_v20 = vld [vmem:[#allocation2] sm:$0xff] }
 0x101   :  { %v155_v21 = vld [vmem:[#allocation2 + $0x8] sm:$0xff] }
 0x102   :  { %v156_v22 = vpack.c.bf16 %v155_v21, %v154_v20 }
 0x104   :  { %358 = vmatmul.mubr.msk.bf16.vlgmr.msra.gmra.mrb[0].mxu1 %vm28_vm0, %v156_v22 }
 0x105   :  { %365 = vmatprep.mubr.msk.bf16.mxu1 %vm385_vm1, %v384_v0  ;;  %362 = vmatpush3.bf16.msra.mxu1 %v382_v23 }
 0x106   :  { %363 = vmatprep.subr.bf16.mxu1 %v384_v0 }
 0x109   :  { %364 = vmatpush3.bf16.msra.mxu1 %v383_v24 }
 0x1d7   :  { %v217_v26 = vpop.f32.mrb[0].mxu1 }
 0x1d8   :  { %v218_v27 = vadd.f32 %v310_v25, %v217_v26  ;;  %v359_v28 = vpop.f32.mrb[1].mxu1 }
 0x1d9   :  { %v220_v29 = vpop.f32.mrb[2].mxu1 }
 0x1da   :  { %v221_v30 = vadd.f32 %v310_v25, %v220_v29  ;;  %v360_v31 = vpop.f32.mrb[3].mxu1  ;;  %v224_v32 = vmax.f32 %v218_v27, 0.0 }
 0x1dc   :  { %v225_v33 = vmax.f32 %v221_v30, 0.0 }
 0x1de   :  { %v226_v34 = vpack.c.bf16 %v225_v33, %v224_v32 }
 0x1e0   :  { %366 = vmatmul.mubr.msk.bf16.vlgmr.msra.gmra.mrb[4].mxu1 %vm28_vm0, %v226_v34 }
 0x2b3   :  { %v287_v36 = vpop.f32.mrb[4].mxu1 }
 0x2b4   :  { %v288_v37 = vadd.f32 %v314_v35, %v287_v36  ;;  %v367_v38 = vpop.f32.mrb[5].mxu1 }
 0x2b5   :  { %v290_v39 = vpop.f32.mrb[6].mxu1 }
 0x2b6   :  { %295 = vst.msk [vmem:[%s487_s6] sm:$0xff] %vm294_vm2, %v288_v37  ;;  %v291_v40 = vadd.f32 %v314_v35, %v290_v39  ;;  %v368_v41 = vpop.f32.mrb[7].mxu1 }
 0x2b8   :  { %296 = vst.msk [vmem:[%s487_s6 + $0x8] sm:$0xff] %vm294_vm2, %v291_v40 }

// kernel: gnn_forward.10
= control target key start
LH: loop header
LB: loop body
LE: loop exit
PB: predicated region body
PF: predicated region fallthrough
CT: control target
= control target key end

     0   :  { %v1876_v1 = vmov 0   ;;  %vm22_vm0 = vcmask 261120   ;;  %vm1554_vm1 = vcmask 257024   ;;  %s2720_s1 = inlined_call_operand.vmem [shape: bf16[4,128,32], index: 1, kind: input, shape index: {}]   ;;  %s2721_s3 = inlined_call_operand.vmem [shape: f32[128,4], index: 3, kind: input, shape index: {}]   ;;  %s2722_s0 = inlined_call_operand.vmem [shape: s8[4,128,128], index: 0, kind: input, shape index: {}]   ;;  %s2723_s2 = inlined_call_operand.vmem [shape: f32[128,32], index: 2, kind: input, shape index: {}]   ;;  %s2724_s4 = inlined_call_operand.vmem [shape: bf16[128,32], index: 4, kind: output, shape index: {}]  }
   0x1   :  { %v1844_v0 = vld [vmem:[%s2720_s1] sm:$0xff]   ;;  %1837 = vset.pattern.permute.xlu1 %v1876_v1  ;;  %1836 = vset.pattern.permute.xlu0 %v1876_v1  ;;  %v1846_v3 = vld [vmem:[%s2720_s1 + $0x8] sm:$0xff]   ;;  %v1848_v5 = vld [vmem:[%s2720_s1 + $0x10] sm:$0xff]  }
   0x2   :  { %v1845_v2 = vld [vmem:[%s2720_s1 + $0x40] sm:$0xff]   ;;  %1703 = vmatprep.subr.bf16.mxu0 %v1844_v0  ;;  %v1847_v4 = vld [vmem:[%s2720_s1 + $0x48] sm:$0xff]   ;;  %v1849_v6 = vld [vmem:[%s2720_s1 + $0x50] sm:$0xff]  }
   0x3   :  { %1735 = vmatprep.subr.bf16.mxu1 %v1845_v2  ;;  %1704 = vmatpush3.bf16.msra.mxu0 %v1844_v0  ;;  %v1850_v7 = vld [vmem:[%s2720_s1 + $0x18] sm:$0xff]   ;;  %v1852_v9 = vld [vmem:[%s2720_s1 + $0x20] sm:$0xff]   ;;  %v1939_v11 = vld [vmem:[%s2721_s3 + $0x10] sm:$0xff]  ;;  %v1877_v0 = vmov 1  }
   0x4   :  { %1736 = vmatpush3.bf16.msra.mxu1 %v1845_v2  ;;  %1705 = vmatprep.subr.bf16.mxu0 %v1846_v3  ;;  %v1851_v8 = vld [vmem:[%s2720_s1 + $0x58] sm:$0xff]   ;;  %v1853_v10 = vld [vmem:[%s2720_s1 + $0x60] sm:$0xff]   ;;  %v1854_v12 = vld [vmem:[%s2720_s1 + $0x28] sm:$0xff]  }
   0x5   :  { %1737 = vmatprep.subr.bf16.mxu1 %v1847_v4  ;;  %1035 = vperm.xlu1 %1837, %v1939_v11   ;;  %v1855_v13 = vld [vmem:[%s2720_s1 + $0x68] sm:$0xff]   ;;  %v1951_v14 = vld [vmem:[%s2721_s3 + $0x18] sm:$0xff]  ;;  %v87_v15 = vld [vmem:[%s2722_s0] sm:$0xff] }
   0x6   :  { %v103_v16 = vunpack.c.l.s8.bf16 %v87_v15  ;;  %v91_v17 = vld [vmem:[%s2722_s0 + $0x20] sm:$0xff]  ;;  %v1856_v19 = vld [vmem:[%s2720_s1 + $0x30] sm:$0xff]   ;;  %v1966_v20 = vld [vmem:[%s2721_s3 + $0x28] sm:$0xff]  ;;  %v104_v31 = vunpack.c.h.s8.bf16 %v87_v15 }
   0x7   :  { %1706 = vmatpush3.bf16.msra.mxu0 %v1846_v3  ;;  %v111_v18 = vunpack.c.l.s8.bf16 %v91_v17  ;;  %v1857_v21 = vld [vmem:[%s2720_s1 + $0x70] sm:$0xff]   ;;  %v1974_v22 = vld [vmem:[%s2721_s3] sm:$0xff]  ;;  %v1858_v23 = vld [vmem:[%s2720_s1 + $0x38] sm:$0xff]   ;;  %v112_v33 = vunpack.c.h.s8.bf16 %v91_v17 }
   0x8   :  { %1738 = vmatpush3.bf16.msra.mxu1 %v1847_v4  ;;  %1707 = vmatprep.subr.bf16.mxu0 %v1848_v5  ;;  %v1983_v24 = vld [vmem:[%s2721_s3 + $0x38] sm:$0xff]  ;;  %v1992_v26 = vld [vmem:[%s2721_s3 + $0x8] sm:$0xff]  ;;  %v1860_v27 = vld [vmem:[%s2720_s1 + $0x80] sm:$0xff]  }
   0x9   :  { %1739 = vmatprep.subr.bf16.mxu1 %v1849_v6  ;;  %1040 = vperm.xlu1 %1837, %v1951_v14   ;;  %v1859_v25 = vld [vmem:[%s2720_s1 + $0x78] sm:$0xff]   ;;  %v1861_v28 = vld [vmem:[%s2720_s1 + $0xc0] sm:$0xff]   ;;  %v2004_v29 = vld [vmem:[%s2721_s3 + $0x48] sm:$0xff] }
   0xa   :  { %1719 = vmatprep.mubr.bf16.mxu0 %v103_v16  ;;  %1751 = vmatprep.mubr.bf16.mxu1 %v111_v18  ;;  %v88_v30 = vld [vmem:[%s2722_s0 + $0x8] sm:$0xff]  ;;  %v2013_v32 = vld [vmem:[%s2721_s3 + $0x20] sm:$0xff]  ;;  %v1864_v39 = vld [vmem:[%s2720_s1 + $0x90] sm:$0xff]  }
   0xb   :  { %1708 = vmatpush3.bf16.msra.mxu0 %v1848_v5  ;;  %1025 = vperm.xlu0 %1836, %v1974_v22   ;;  %v92_v34 = vld [vmem:[%s2722_s0 + $0x28] sm:$0xff]  ;;  %v105_v37 = vunpack.c.l.s8.bf16 %v88_v30  ;;  %v2032_v40 = vld [vmem:[%s2721_s3 + $0x58] sm:$0xff]  ;;  %v2037_v41 = vld [vmem:[%s2721_s3 + $0x30] sm:$0xff]  ;;  %v106_v43 = vunpack.c.h.s8.bf16 %v88_v30 }
   0xc   :  { %1740 = vmatpush3.bf16.msra.mxu1 %v1849_v6  ;;  %1709 = vmatprep.subr.bf16.mxu0 %v1850_v7  ;;  %v1862_v35 = vld [vmem:[%s2720_s1 + $0x88] sm:$0xff]   ;;  %v113_v38 = vunpack.c.l.s8.bf16 %v92_v34  ;;  %v1865_v42 = vld [vmem:[%s2720_s1 + $0xd0] sm:$0xff]   ;;  %v114_v45 = vunpack.c.h.s8.bf16 %v92_v34  ;;  %v1866_v48 = vld [vmem:[%s2720_s1 + $0x98] sm:$0xff]  }
   0xd   :  { %1741 = vmatprep.subr.bf16.mxu1 %v1851_v8  ;;  %1050 = vperm.xlu1 %1837, %v1966_v20   ;;  %v1863_v36 = vld [vmem:[%s2720_s1 + $0xc8] sm:$0xff]   ;;  %v89_v44 = vld [vmem:[%s2722_s0 + $0x10] sm:$0xff]  ;;  %v1867_v49 = vld [vmem:[%s2720_s1 + $0xd8] sm:$0xff]  }
   0xe   :  { %v93_v46 = vld [vmem:[%s2722_s0 + $0x30] sm:$0xff]  ;;  %v2052_v47 = vld [vmem:[%s2721_s3 + $0x68] sm:$0xff]  ;;  %v107_v50 = vunpack.c.l.s8.bf16 %v89_v44  ;;  %v2065_v52 = vld [vmem:[%s2721_s3 + $0x78] sm:$0xff]  ;;  %v108_v56 = vunpack.c.h.s8.bf16 %v89_v44  ;;  %v1878_v44 = vmov 2  }
   0xf   :  { %1710 = vmatpush3.bf16.msra.mxu0 %v1850_v7  ;;  %1030 = vperm.xlu0 %1836, %v1992_v26   ;;  %v115_v51 = vunpack.c.l.s8.bf16 %v93_v46  ;;  %v1868_v53 = vld [vmem:[%s2720_s1 + $0xa0] sm:$0xff]   ;;  %v90_v57 = vld [vmem:[%s2722_s0 + $0x18] sm:$0xff]  ;;  %v116_v58 = vunpack.c.h.s8.bf16 %v93_v46  ;;  %v1870_v60 = vld [vmem:[%s2720_s1 + $0xa8] sm:$0xff]   ;;  %v1880_v46 = vmov 3  }
  0x10   :  { %1742 = vmatpush3.bf16.msra.mxu1 %v1851_v8  ;;  %1711 = vmatprep.subr.bf16.mxu0 %v1852_v9  ;;  %v2073_v54 = vld [vmem:[%s2721_s3 + $0x40] sm:$0xff]  ;;  %v94_v59 = vld [vmem:[%s2722_s0 + $0x38] sm:$0xff]  ;;  %v1871_v61 = vld [vmem:[%s2720_s1 + $0xe8] sm:$0xff]   ;;  %v109_v62 = vunpack.c.l.s8.bf16 %v90_v57  ;;  %v110_v4 = vunpack.c.h.s8.bf16 %v90_v57 }
  0x11   :  { %1743 = vmatprep.subr.bf16.mxu1 %v1853_v10  ;;  %1060 = vperm.xlu1 %1837, %v1983_v24   ;;  %v1869_v55 = vld [vmem:[%s2720_s1 + $0xe0] sm:$0xff]   ;;  %v117_v63 = vunpack.c.l.s8.bf16 %v94_v59  ;;  %v2095_v1 = vld [vmem:[%s2721_s3 + $0x50] sm:$0xff]  ;;  %v118_v5 = vunpack.c.h.s8.bf16 %v94_v59  ;;  %v96_v16 = vld [vmem:[%s2722_s0 + $0x48] sm:$0xff] }
  0x12   :  { %v1872_v2 = vld [vmem:[%s2720_s1 + $0xb0] sm:$0xff]   ;;  %v2108_v6 = vld [vmem:[%s2721_s3 + $0x60] sm:$0xff]  ;;  %v100_v18 = vld [vmem:[%s2722_s0 + $0x68] sm:$0xff] }
  0x13   :  { %1712 = vmatpush3.bf16.msra.mxu0 %v1852_v9  ;;  %1045 = vperm.xlu0 %1836, %v2013_v32   ;;  %v1873_v3 = vld [vmem:[%s2720_s1 + $0xf0] sm:$0xff]   ;;  %v95_v7 = vld [vmem:[%s2722_s0 + $0x40] sm:$0xff]  ;;  %v1874_v9 = vld [vmem:[%s2720_s1 + $0xb8] sm:$0xff]   ;;  %v130_v30 = vunpack.c.h.s8.bf16 %v100_v18 }
  0x14   :  { %1744 = vmatpush3.bf16.msra.mxu1 %v1853_v10  ;;  %1713 = vmatprep.subr.bf16.mxu0 %v1854_v12  ;;  %v99_v8 = vld [vmem:[%s2722_s0 + $0x60] sm:$0xff]  ;;  %v1875_v10 = vld [vmem:[%s2720_s1 + $0xf8] sm:$0xff]   ;;  %v2126_v15 = vld [vmem:[%s2721_s3 + $0x70] sm:$0xff]  ;;  %v120_v17 = vunpack.c.h.s8.bf16 %v95_v7 }
  0x15   :  { %1745 = vmatprep.subr.bf16.mxu1 %v1855_v13  ;;  %1070 = vperm.xlu1 %1837, %v2004_v29   ;;  %v98_v34 = vld [vmem:[%s2722_s0 + $0x58] sm:$0xff] }
  0x17   :  { %1714 = vmatpush3.bf16.msra.mxu0 %v1854_v12  ;;  %1055 = vperm.xlu0 %1836, %v2037_v41   ;;  %v119_v12 = vunpack.c.l.s8.bf16 %v95_v7 }
  0x18   :  { %1746 = vmatpush3.bf16.msra.mxu1 %v1855_v13  ;;  %1715 = vmatprep.subr.bf16.mxu0 %v1856_v19  ;;  %v127_v13 = vunpack.c.l.s8.bf16 %v99_v8 }
  0x19   :  { %1747 = vmatprep.subr.bf16.mxu1 %v1857_v21  ;;  %1080 = vperm.xlu1 %1837, %v2032_v40  }
  0x1b   :  { %1716 = vmatpush3.bf16.msra.mxu0 %v1856_v19  ;;  %1065 = vperm.xlu0 %1836, %v2073_v54   ;;  %v128_v19 = vunpack.c.h.s8.bf16 %v99_v8 }
  0x1c   :  { %1748 = vmatpush3.bf16.msra.mxu1 %v1857_v21  ;;  %1717 = vmatprep.subr.bf16.mxu0 %v1858_v23  ;;  %v121_v21 = vunpack.c.l.s8.bf16 %v96_v16 }
  0x1d   :  { %1749 = vmatprep.subr.bf16.mxu1 %v1859_v25  ;;  %1090 = vperm.xlu1 %1837, %v2052_v47  }
  0x1f   :  { %1718 = vmatpush3.bf16.msra.mxu0 %v1858_v23  ;;  %1075 = vperm.xlu0 %1836, %v2095_v1   ;;  %v129_v23 = vunpack.c.l.s8.bf16 %v100_v18 }
  0x20   :  { %1750 = vmatpush3.bf16.msra.mxu1 %v1859_v25  ;;  %1767 = vmatprep.subr.bf16.mxu0 %v1860_v27  ;;  %v97_v25 = vld [vmem:[%s2722_s0 + $0x50] sm:$0xff] }
  0x21   :  { %1799 = vmatprep.subr.bf16.mxu1 %v1861_v28  ;;  %1100 = vperm.xlu1 %1837, %v2065_v52  }
  0x22   :  { %1720 = vmatmul.mubr.bf16.vlgmr.msra.gmra.mrb[0].mxu0 %v104_v31  ;;  %v123_v31 = vunpack.c.l.s8.bf16 %v97_v25 }
  0x23   :  { %1752 = vmatmul.mubr.bf16.vlgmr.msra.gmra.mrb[0].mxu1 %v112_v33  ;;  %1768 = vmatpush3.bf16.msra.mxu0 %v1860_v27  ;;  %v101_v27 = vld [vmem:[%s2722_s0 + $0x70] sm:$0xff] }
  0x24   :  { %1800 = vmatpush3.bf16.msra.mxu1 %v1861_v28  ;;  %1769 = vmatprep.subr.bf16.mxu0 %v1862_v35  ;;  %v122_v28 = vunpack.c.h.s8.bf16 %v96_v16  ;;  %v131_v33 = vunpack.c.l.s8.bf16 %v101_v27 }
  0x25   :  { %1801 = vmatprep.subr.bf16.mxu1 %v1863_v36  ;;  %1723 = vmatprep.mubr.bf16.mxu0 %v105_v37  ;;  %v132_v37 = vunpack.c.h.s8.bf16 %v101_v27 }
  0x26   :  { %1755 = vmatprep.mubr.bf16.mxu1 %v113_v38  ;;  %1839 = vset.pattern.permute.xlu1 %v1877_v0  ;;  %v125_v38 = vunpack.c.l.s8.bf16 %v98_v34 }
  0x27   :  { %1770 = vmatpush3.bf16.msra.mxu0 %v1862_v35  ;;  %1157 = vperm.xlu1 %1839, %v1992_v26   ;;  %v102_v35 = vld [vmem:[%s2722_s0 + $0x78] sm:$0xff] }
  0x28   :  { %1802 = vmatpush3.bf16.msra.mxu1 %v1863_v36  ;;  %1771 = vmatprep.subr.bf16.mxu0 %v1864_v39  ;;  %v124_v36 = vunpack.c.h.s8.bf16 %v97_v25 }
  0x29   :  { %1803 = vmatprep.subr.bf16.mxu1 %v1865_v42  ;;  %1085 = vperm.xlu0 %1836, %v2108_v6  }
  0x2a   :  { %1724 = vmatmul.mubr.bf16.gmra.mrb[4].mxu0 %v106_v43  ;;  %v134_v43 = vunpack.c.h.s8.bf16 %v102_v35 }
  0x2b   :  { %1756 = vmatmul.mubr.bf16.gmra.mrb[4].mxu1 %v114_v45  ;;  %1772 = vmatpush3.bf16.msra.mxu0 %v1864_v39  ;;  %v133_v39 = vunpack.c.l.s8.bf16 %v102_v35  ;;  %v1879_v45 = vmov 0.0  }
  0x2c   :  { %1804 = vmatpush3.bf16.msra.mxu1 %v1865_v42  ;;  %1773 = vmatprep.subr.bf16.mxu0 %v1866_v48  ;;  %v126_v42 = vunpack.c.h.s8.bf16 %v98_v34  ;;  %25 = vst.msk [vmem:[#allocation2 + $0x10] sm:$0xff] %vm22_vm0, %v1879_v45  ;;  %23 = vst.msk [vmem:[#allocation2] sm:$0xff] %vm22_vm0, %v1879_v45 }
  0x2d   :  { %1805 = vmatprep.subr.bf16.mxu1 %v1867_v49  ;;  %1727 = vmatprep.mubr.bf16.mxu0 %v107_v50  ;;  %24 = vst.msk [vmem:[#allocation2 + $0x8] sm:$0xff] %vm22_vm0, %v1879_v45  ;;  %26 = vst.msk [vmem:[#allocation2 + $0x18] sm:$0xff] %vm22_vm0, %v1879_v45 }
  0x2e   :  { %1759 = vmatprep.mubr.bf16.mxu1 %v115_v51  ;;  %1161 = vperm.xlu1 %1839, %v1939_v11   ;;  %27 = vst.msk [vmem:[#allocation2 + $0x20] sm:$0xff] %vm22_vm0, %v1879_v45  ;;  %28 = vst.msk [vmem:[#allocation2 + $0x28] sm:$0xff] %vm22_vm0, %v1879_v45 }
  0x2f   :  { %1774 = vmatpush3.bf16.msra.mxu0 %v1866_v48  ;;  %1095 = vperm.xlu0 %1836, %v2126_v15   ;;  %29 = vst.msk [vmem:[#allocation2 + $0x30] sm:$0xff] %vm22_vm0, %v1879_v45  ;;  %30 = vst.msk [vmem:[#allocation2 + $0x38] sm:$0xff] %vm22_vm0, %v1879_v45 }
  0x30   :  { %1806 = vmatpush3.bf16.msra.mxu1 %v1867_v49  ;;  %1775 = vmatprep.subr.bf16.mxu0 %v1868_v53  ;;  %31 = vst.msk [vmem:[#allocation2 + $0x40] sm:$0xff] %vm22_vm0, %v1879_v45  ;;  %32 = vst.msk [vmem:[#allocation2 + $0x48] sm:$0xff] %vm22_vm0, %v1879_v45 }
  0x31   :  { %1807 = vmatprep.subr.bf16.mxu1 %v1869_v55  ;;  %33 = vst.msk [vmem:[#allocation2 + $0x50] sm:$0xff] %vm22_vm0, %v1879_v45  ;;  %34 = vst.msk [vmem:[#allocation2 + $0x58] sm:$0xff] %vm22_vm0, %v1879_v45 }
  0x32   :  { %1728 = vmatmul.mubr.bf16.gmra.mrb[8].mxu0 %v108_v56  ;;  %1169 = vperm.xlu1 %1839, %v2013_v32   ;;  %35 = vst.msk [vmem:[#allocation2 + $0x60] sm:$0xff] %vm22_vm0, %v1879_v45  ;;  %36 = vst.msk [vmem:[#allocation2 + $0x68] sm:$0xff] %vm22_vm0, %v1879_v45 }
  0x33   :  { %1760 = vmatmul.mubr.bf16.gmra.mrb[8].mxu1 %v116_v58  ;;  %1776 = vmatpush3.bf16.msra.mxu0 %v1868_v53  ;;  %37 = vst.msk [vmem:[#allocation2 + $0x70] sm:$0xff] %vm22_vm0, %v1879_v45  ;;  %38 = vst.msk [vmem:[#allocation2 + $0x78] sm:$0xff] %vm22_vm0, %v1879_v45 }
  0x34   :  { %1808 = vmatpush3.bf16.msra.mxu1 %v1869_v55  ;;  %1777 = vmatprep.subr.bf16.mxu0 %v1870_v60  ;;  %39 = vst.msk [vmem:[#allocation2 + $0x80] sm:$0xff] %vm22_vm0, %v1879_v45  ;;  %40 = vst.msk [vmem:[#allocation2 + $0x88] sm:$0xff] %vm22_vm0, %v1879_v45  ;;  %v138_v27 = vld [vmem:[#allocation2 + $0x18] sm:$0xff]  ;;  %v136_v35 = vld [vmem:[#allocation2 + $0x8] sm:$0xff] }
  0x35   :  { %1809 = vmatprep.subr.bf16.mxu1 %v1871_v61  ;;  %1731 = vmatprep.mubr.bf16.mxu0 %v109_v62  ;;  %41 = vst.msk [vmem:[#allocation2 + $0x90] sm:$0xff] %vm22_vm0, %v1879_v45  ;;  %42 = vst.msk [vmem:[#allocation2 + $0x98] sm:$0xff] %vm22_vm0, %v1879_v45 }
  0x36   :  { %1763 = vmatprep.mubr.bf16.mxu1 %v117_v63  ;;  %1838 = vset.pattern.permute.xlu0 %v1877_v0  ;;  %43 = vst.msk [vmem:[#allocation2 + $0xa0] sm:$0xff] %vm22_vm0, %v1879_v45  ;;  %44 = vst.msk [vmem:[#allocation2 + $0xa8] sm:$0xff] %vm22_vm0, %v1879_v45 }
  0x37   :  { %1778 = vmatpush3.bf16.msra.mxu0 %v1870_v60  ;;  %1153 = vperm.xlu0 %1838, %v1974_v22   ;;  %45 = vst.msk [vmem:[#allocation2 + $0xb0] sm:$0xff] %vm22_vm0, %v1879_v45  ;;  %46 = vst.msk [vmem:[#allocation2 + $0xb8] sm:$0xff] %vm22_vm0, %v1879_v45 }
  0x38   :  { %1810 = vmatpush3.bf16.msra.mxu1 %v1871_v61  ;;  %1779 = vmatprep.subr.bf16.mxu0 %v1872_v2  ;;  %47 = vst.msk [vmem:[#allocation2 + $0xc0] sm:$0xff] %vm22_vm0, %v1879_v45  ;;  %48 = vst.msk [vmem:[#allocation2 + $0xc8] sm:$0xff] %vm22_vm0, %v1879_v45 }
  0x39   :  { %1811 = vmatprep.subr.bf16.mxu1 %v1873_v3  ;;  %1177 = vperm.xlu1 %1839, %v2037_v41   ;;  %49 = vst.msk [vmem:[#allocation2 + $0xd0] sm:$0xff] %vm22_vm0, %v1879_v45  ;;  %50 = vst.msk [vmem:[#allocation2 + $0xd8] sm:$0xff] %vm22_vm0, %v1879_v45 }
  0x3a   :  { %1732 = vmatmul.mubr.bf16.gmra.mrb[12].mxu0 %v110_v4  ;;  %51 = vst.msk [vmem:[#allocation2 + $0xe0] sm:$0xff] %vm22_vm0, %v1879_v45  ;;  %52 = vst.msk [vmem:[#allocation2 + $0xe8] sm:$0xff] %vm22_vm0, %v1879_v45 }
  0x3b   :  { %1764 = vmatmul.mubr.bf16.gmra.mrb[12].mxu1 %v118_v5  ;;  %1780 = vmatpush3.bf16.msra.mxu0 %v1872_v2  ;;  %53 = vst.msk [vmem:[#allocation2 + $0xf0] sm:$0xff] %vm22_vm0, %v1879_v45  ;;  %54 = vst.msk [vmem:[#allocation2 + $0xf8] sm:$0xff] %vm22_vm0, %v1879_v45  ;;  %v151_v25 = vld [vmem:[#allocation2 + $0x80] sm:$0xff] }
  0x3c   :  { %1812 = vmatpush3.bf16.msra.mxu1 %v1873_v3  ;;  %1781 = vmatprep.subr.bf16.mxu0 %v1874_v9  ;;  %55 = vst.msk [vmem:[#allocation2 + $0x100] sm:$0xff] %vm22_vm0, %v1879_v45  ;;  %56 = vst.msk [vmem:[#allocation2 + $0x108] sm:$0xff] %vm22_vm0, %v1879_v45  ;;  %v154_v34 = vld [vmem:[#allocation2 + $0x98] sm:$0xff] }
  0x3d   :  { %1813 = vmatprep.subr.bf16.mxu1 %v1875_v10  ;;  %1783 = vmatprep.mubr.bf16.mxu0 %v119_v12  ;;  %57 = vst.msk [vmem:[#allocation2 + $0x110] sm:$0xff] %vm22_vm0, %v1879_v45  ;;  %58 = vst.msk [vmem:[#allocation2 + $0x118] sm:$0xff] %vm22_vm0, %v1879_v45 }
  0x3e   :  { %1815 = vmatprep.mubr.bf16.mxu1 %v127_v13  ;;  %1165 = vperm.xlu0 %1838, %v1951_v14   ;;  %59 = vst.msk [vmem:[#allocation2 + $0x120] sm:$0xff] %vm22_vm0, %v1879_v45  ;;  %60 = vst.msk [vmem:[#allocation2 + $0x128] sm:$0xff] %vm22_vm0, %v1879_v45 }
  0x3f   :  { %1782 = vmatpush3.bf16.msra.mxu0 %v1874_v9  ;;  %1185 = vperm.xlu1 %1839, %v2073_v54   ;;  %61 = vst.msk [vmem:[#allocation2 + $0x130] sm:$0xff] %vm22_vm0, %v1879_v45  ;;  %62 = vst.msk [vmem:[#allocation2 + $0x138] sm:$0xff] %vm22_vm0, %v1879_v45 }
  0x40   :  { %1814 = vmatpush3.bf16.msra.mxu1 %v1875_v10  ;;  %63 = vst.msk [vmem:[#allocation2 + $0x140] sm:$0xff] %vm22_vm0, %v1879_v45  ;;  %64 = vst.msk [vmem:[#allocation2 + $0x148] sm:$0xff] %vm22_vm0, %v1879_v45 }
  0x41   :  { %65 = vst.msk [vmem:[#allocation2 + $0x150] sm:$0xff] %vm22_vm0, %v1879_v45  ;;  %66 = vst.msk [vmem:[#allocation2 + $0x158] sm:$0xff] %vm22_vm0, %v1879_v45 }
  0x42   :  { %1784 = vmatmul.mubr.bf16.vlgmr.msra.gmra.mrb[16].mxu0 %v120_v17  ;;  %1173 = vperm.xlu0 %1838, %v1966_v20   ;;  %67 = vst.msk [vmem:[#allocation2 + $0x160] sm:$0xff] %vm22_vm0, %v1879_v45  ;;  %68 = vst.msk [vmem:[#allocation2 + $0x168] sm:$0xff] %vm22_vm0, %v1879_v45  ;;  %v137_v17 = vld [vmem:[#allocation2 + $0x10] sm:$0xff] }
  0x43   :  { %1816 = vmatmul.mubr.bf16.vlgmr.msra.gmra.mrb[16].mxu1 %v128_v19  ;;  %1787 = vmatprep.mubr.bf16.mxu0 %v121_v21  ;;  %69 = vst.msk [vmem:[#allocation2 + $0x170] sm:$0xff] %vm22_vm0, %v1879_v45  ;;  %70 = vst.msk [vmem:[#allocation2 + $0x178] sm:$0xff] %vm22_vm0, %v1879_v45  ;;  %v153_v19 = vld [vmem:[#allocation2 + $0x90] sm:$0xff]  ;;  %v135_v21 = vld [vmem:[#allocation2] sm:$0xff] }
  0x44   :  { %1819 = vmatprep.mubr.bf16.mxu1 %v129_v23  ;;  %1193 = vperm.xlu1 %1839, %v2095_v1   ;;  %71 = vst.msk [vmem:[#allocation2 + $0x180] sm:$0xff] %vm22_vm0, %v1879_v45  ;;  %72 = vst.msk [vmem:[#allocation2 + $0x188] sm:$0xff] %vm22_vm0, %v1879_v45 }
  0x45   :  { %73 = vst.msk [vmem:[#allocation2 + $0x190] sm:$0xff] %vm22_vm0, %v1879_v45  ;;  %74 = vst.msk [vmem:[#allocation2 + $0x198] sm:$0xff] %vm22_vm0, %v1879_v45 }
  0x46   :  { %1181 = vperm.xlu0 %1838, %v1983_v24   ;;  %75 = vst.msk [vmem:[#allocation2 + $0x1a0] sm:$0xff] %vm22_vm0, %v1879_v45  ;;  %76 = vst.msk [vmem:[#allocation2 + $0x1a8] sm:$0xff] %vm22_vm0, %v1879_v45 }
  0x47   :  { %77 = vst.msk [vmem:[#allocation2 + $0x1b0] sm:$0xff] %vm22_vm0, %v1879_v45  ;;  %78 = vst.msk [vmem:[#allocation2 + $0x1b8] sm:$0xff] %vm22_vm0, %v1879_v45 }
  0x48   :  { %1201 = vperm.xlu1 %1839, %v2108_v6   ;;  %79 = vst.msk [vmem:[#allocation2 + $0x1c0] sm:$0xff] %vm22_vm0, %v1879_v45  ;;  %80 = vst.msk [vmem:[#allocation2 + $0x1c8] sm:$0xff] %vm22_vm0, %v1879_v45 }
  0x49   :  { %81 = vst.msk [vmem:[#allocation2 + $0x1d0] sm:$0xff] %vm22_vm0, %v1879_v45  ;;  %82 = vst.msk [vmem:[#allocation2 + $0x1d8] sm:$0xff] %vm22_vm0, %v1879_v45 }
  0x4a   :  { %1788 = vmatmul.mubr.bf16.gmra.mrb[20].mxu0 %v122_v28  ;;  %1189 = vperm.xlu0 %1838, %v2004_v29   ;;  %83 = vst.msk [vmem:[#allocation2 + $0x1e0] sm:$0xff] %vm22_vm0, %v1879_v45  ;;  %84 = vst.msk [vmem:[#allocation2 + $0x1e8] sm:$0xff] %vm22_vm0, %v1879_v45 }
  0x4b   :  { %1820 = vmatmul.mubr.bf16.gmra.mrb[20].mxu1 %v130_v30  ;;  %1791 = vmatprep.mubr.bf16.mxu0 %v123_v31  ;;  %85 = vst.msk [vmem:[#allocation2 + $0x1f0] sm:$0xff] %vm22_vm0, %v1879_v45  ;;  %86 = vst.msk [vmem:[#allocation2 + $0x1f8] sm:$0xff] %vm22_vm0, %v1879_v45 }
  0x4c   :  { %1823 = vmatprep.mubr.bf16.mxu1 %v131_v33  ;;  %1209 = vperm.xlu1 %1839, %v2126_v15  }
  0x4e   :  { %1197 = vperm.xlu0 %1838, %v2032_v40  }
  0x50   :  { %1840 = vset.pattern.permute.xlu1 %v1878_v44 }
  0x51   :  { %1266 = vperm.xlu1 %1840, %v1974_v22  }
  0x52   :  { %1792 = vmatmul.mubr.bf16.gmra.mrb[24].mxu0 %v124_v36  ;;  %1205 = vperm.xlu0 %1838, %v2052_v47  }
  0x53   :  { %1824 = vmatmul.mubr.bf16.gmra.mrb[24].mxu1 %v132_v37  ;;  %1795 = vmatprep.mubr.bf16.mxu0 %v125_v38 }
  0x54   :  { %1827 = vmatprep.mubr.bf16.mxu1 %v133_v39 }
  0x55   :  { %1274 = vperm.xlu1 %1840, %v1939_v11  }
  0x56   :  { %1213 = vperm.xlu0 %1838, %v2065_v52  }
  0x59   :  { %1278 = vperm.xlu1 %1840, %v1951_v14  }
  0x5a   :  { %1796 = vmatmul.mubr.bf16.gmra.mrb[28].mxu0 %v126_v42  ;;  %1841 = vset.pattern.permute.xlu0 %v1878_v44  ;;  %v152_v42 = vld [vmem:[#allocation2 + $0x88] sm:$0xff] }
  0x5b   :  { %1828 = vmatmul.mubr.bf16.gmra.mrb[28].mxu1 %v134_v43  ;;  %1270 = vperm.xlu0 %1841, %v1992_v26  }
  0x5d   :  { %1286 = vperm.xlu1 %1840, %v1966_v20  }
  0x5f   :  { %1282 = vperm.xlu0 %1841, %v2013_v32  }
  0x61   :  { %1294 = vperm.xlu1 %1840, %v1983_v24  }
  0x63   :  { %1290 = vperm.xlu0 %1841, %v2037_v41  }
  0x65   :  { %1302 = vperm.xlu1 %1840, %v2004_v29  }
  0x67   :  { %1298 = vperm.xlu0 %1841, %v2073_v54  }
  0x69   :  { %1310 = vperm.xlu1 %1840, %v2032_v40  }
  0x6b   :  { %1306 = vperm.xlu0 %1841, %v2095_v1  }
  0x6d   :  { %1318 = vperm.xlu1 %1840, %v2052_v47  }
  0x6f   :  { %1314 = vperm.xlu0 %1841, %v2108_v6  }
  0x71   :  { %1326 = vperm.xlu1 %1840, %v2065_v52  }
  0x73   :  { %1322 = vperm.xlu0 %1841, %v2126_v15  }
  0x75   :  { %1843 = vset.pattern.permute.xlu1 %v1880_v46 }
  0x76   :  { %1383 = vperm.xlu1 %1843, %v1992_v26  }
  0x77   :  { %1842 = vset.pattern.permute.xlu0 %v1880_v46 }
  0x78   :  { %1379 = vperm.xlu0 %1842, %v1974_v22  }
  0x7a   :  { %1387 = vperm.xlu1 %1843, %v1939_v11  }
  0x7c   :  { %1391 = vperm.xlu0 %1842, %v1951_v14  }
  0x7e   :  { %1395 = vperm.xlu1 %1843, %v2013_v32  }
  0x80   :  { %1399 = vperm.xlu0 %1842, %v1966_v20  }
  0x82   :  { %1403 = vperm.xlu1 %1843, %v2037_v41  }
  0x84   :  { %1407 = vperm.xlu0 %1842, %v1983_v24   ;;  %v2314_v48 = vpop.permute.xlu1 %1035 }
  0x86   :  { %1411 = vperm.xlu1 %1843, %v2073_v54  }
  0x88   :  { %1415 = vperm.xlu0 %1842, %v2004_v29   ;;  %v2318_v26 = vpop.permute.xlu1 %1040 }
  0x8a   :  { %1419 = vperm.xlu1 %1843, %v2095_v1   ;;  %v2325_v14 = vpop.permute.xlu0 %1025 }
  0x8c   :  { %1423 = vperm.xlu0 %1842, %v2032_v40   ;;  %v2322_v11 = vpop.permute.xlu1 %1050 }
  0x8e   :  { %1427 = vperm.xlu1 %1843, %v2108_v6   ;;  %v2331_v22 = vpop.permute.xlu0 %1030 }
  0x90   :  { %1431 = vperm.xlu0 %1842, %v2052_v47   ;;  %v2328_v20 = vpop.permute.xlu1 %1060 }
  0x92   :  { %1435 = vperm.xlu1 %1843, %v2126_v15   ;;  %v2336_v29 = vpop.permute.xlu0 %1045 }
  0x94   :  { %1439 = vperm.xlu0 %1842, %v2065_v52   ;;  %v2334_v24 = vpop.permute.xlu1 %1070 }
  0x96   :  { %v2340_v40 = vpop.permute.xlu0 %1055 }
  0x98   :  { %v2338_v32 = vpop.permute.xlu1 %1080 }
  0x9a   :  { %v2344_v49 = vpop.permute.xlu0 %1065 }
  0x9c   :  { %v2342_v41 = vpop.permute.xlu1 %1090 }
  0x9d   :  { %2725 = vst [vmem:[#allocation3_spill] sm:$0xff] %v2342_v41 }
  0x9e   :  { %v2348_v50 = vpop.permute.xlu0 %1075 }
  0xa0   :  { %v2346_v47 = vpop.permute.xlu1 %1100 }
  0xa6   :  { %v2350_v51 = vpop.permute.xlu1 %1157 }
  0xa8   :  { %v2352_v53 = vpop.permute.xlu0 %1085 }
  0xad   :  { %v2354_v52 = vpop.permute.xlu1 %1161 }
  0xae   :  { %v2356_v54 = vpop.permute.xlu0 %1095 }
  0xb1   :  { %v2358_v55 = vpop.permute.xlu1 %1169 }
  0xb6   :  { %v2360_v56 = vpop.permute.xlu0 %1153 }
  0xb8   :  { %v2362_v57 = vpop.permute.xlu1 %1177 }
  0xbd   :  { %v2364_v58 = vpop.permute.xlu0 %1165 }
  0xbe   :  { %v2366_v59 = vpop.permute.xlu1 %1185 }
  0xc1   :  { %v2368_v60 = vpop.permute.xlu0 %1173 }
  0xc3   :  { %v2370_v61 = vpop.permute.xlu1 %1193 }
  0xc5   :  { %v2372_v62 = vpop.permute.xlu0 %1181 }
  0xc7   :  { %v2374_v63 = vpop.permute.xlu1 %1201 }
  0xc8   :  { %2726 = vst [vmem:[#allocation4_spill] sm:$0xff] %v2374_v63  ;;  %v164_v63 = vld [vmem:[#allocation2 + $0xe8] sm:$0xff] }
  0xc9   :  { %v2376_v0 = vpop.permute.xlu0 %1189 }
  0xcb   :  { %v2378_v1 = vpop.permute.xlu1 %1209 }
  0xcd   :  { %v2380_v2 = vpop.permute.xlu0 %1197 }
  0xd0   :  { %v2382_v3 = vpop.permute.xlu1 %1266 }
  0xd1   :  { %v2384_v4 = vpop.permute.xlu0 %1205 }
  0xd2   :  { %2727 = vst [vmem:[#allocation5_spill] sm:$0xff] %v2384_v4 }
  0xd4   :  { %v2386_v5 = vpop.permute.xlu1 %1274 }
  0xd5   :  { %v2388_v6 = vpop.permute.xlu0 %1213 }
  0xd6   :  { %2728 = vst [vmem:[#allocation6_spill] sm:$0xff] %v2388_v6 }
  0xd8   :  { %v2390_v7 = vpop.permute.xlu1 %1278 }
  0xda   :  { %v2392_v8 = vpop.permute.xlu0 %1270 }
  0xdb   :  { %2729 = vst [vmem:[#allocation7_spill] sm:$0xff] %v2392_v8 }
  0xdc   :  { %v2394_v9 = vpop.permute.xlu1 %1286 }
  0xdd   :  { %2730 = vst [vmem:[#allocation8_spill] sm:$0xff] %v2394_v9 }
  0xde   :  { %v2396_v10 = vpop.permute.xlu0 %1282 }
  0xdf   :  { %2731 = vst [vmem:[#allocation9_spill] sm:$0xff] %v2396_v10 }
  0xe0   :  { %v2398_v12 = vpop.permute.xlu1 %1294 }
  0xe1   :  { %2732 = vst [vmem:[#allocation10_spill] sm:$0xff] %v2398_v12 }
  0xe2   :  { %v2400_v13 = vpop.permute.xlu0 %1290 }
  0xe3   :  { %2733 = vst [vmem:[#allocation11_spill] sm:$0xff] %v2400_v13 }
  0xe4   :  { %v2402_v15 = vpop.permute.xlu1 %1302 }
  0xe5   :  { %2734 = vst [vmem:[#allocation12_spill] sm:$0xff] %v2402_v15 }
  0xe6   :  { %v2404_v16 = vpop.permute.xlu0 %1298 }
  0xe7   :  { %2735 = vst [vmem:[#allocation13_spill] sm:$0xff] %v2404_v16 }
  0xe8   :  { %v2406_v18 = vpop.permute.xlu1 %1310 }
  0xe9   :  { %2736 = vst [vmem:[#allocation14_spill] sm:$0xff] %v2406_v18 }
  0xea   :  { %v2408_v28 = vpop.permute.xlu0 %1306 }
  0xeb   :  { %2737 = vst [vmem:[#allocation15_spill] sm:$0xff] %v2408_v28 }
  0xf5   :  { %v1721_v23 = vpop.f32.mrb[0].mxu0 }
  0xf6   :  { %v845_v30 = vadd.f32 %v1721_v23, %v137_v17  ;;  %v1753_v31 = vpop.f32.mrb[0].mxu1  ;;  %v345_v33 = vpop.f32.mrb[1].mxu0 }
  0xf7   :  { %v861_v36 = vadd.f32 %v1753_v31, %v153_v19  ;;  %v843_v37 = vadd.f32 %v345_v33, %v135_v21  ;;  %v490_v38 = vpop.f32.mrb[1].mxu1  ;;  %v1722_v39 = vpop.f32.mrb[2].mxu0 }
  0xf8   :  { %910 = vst.msk [vmem:[#allocation2 + $0x10] sm:$0xff] %vm22_vm0, %v845_v30  ;;  %v859_v43 = vadd.f32 %v490_v38, %v151_v25  ;;  %v846_v44 = vadd.f32 %v1722_v39, %v138_v27  ;;  %v1754_v45 = vpop.f32.mrb[2].mxu1  ;;  %v348_v46 = vpop.f32.mrb[3].mxu0  ;;  %v141_v25 = vld [vmem:[#allocation2 + $0x30] sm:$0xff]  ;;  %v139_v30 = vld [vmem:[#allocation2 + $0x20] sm:$0xff]  ;;  %v140_v39 = vld [vmem:[#allocation2 + $0x28] sm:$0xff] }
  0xf9   :  { %926 = vst.msk [vmem:[#allocation2 + $0x90] sm:$0xff] %vm22_vm0, %v861_v36  ;;  %908 = vst.msk [vmem:[#allocation2] sm:$0xff] %vm22_vm0, %v843_v37  ;;  %v862_v17 = vadd.f32 %v1754_v45, %v154_v34  ;;  %v844_v23 = vadd.f32 %v348_v46, %v136_v35  ;;  %v493_v4 = vpop.f32.mrb[3].mxu1  ;;  %v2416_v21 = vpop.permute.xlu1 %1318  ;;  %v157_v27 = vld [vmem:[#allocation2 + $0xb0] sm:$0xff]  ;;  %v155_v34 = vld [vmem:[#allocation2 + $0xa0] sm:$0xff] }
  0xfa   :  { %924 = vst.msk [vmem:[#allocation2 + $0x80] sm:$0xff] %vm22_vm0, %v859_v43  ;;  %911 = vst.msk [vmem:[#allocation2 + $0x18] sm:$0xff] %vm22_vm0, %v846_v44  ;;  %v860_v19 = vadd.f32 %v493_v4, %v152_v42  ;;  %v2420_v31 = vpop.permute.xlu0 %1314  ;;  %v142_v35 = vld [vmem:[#allocation2 + $0x38] sm:$0xff]  ;;  %v156_v46 = vld [vmem:[#allocation2 + $0xa8] sm:$0xff] }
  0xfb   :  { %927 = vst.msk [vmem:[#allocation2 + $0x98] sm:$0xff] %vm22_vm0, %v862_v17  ;;  %2738 = vst [vmem:[#allocation16_spill] sm:$0xff] %v2416_v21  ;;  %v158_v4 = vld [vmem:[#allocation2 + $0xb8] sm:$0xff] }
  0xfc   :  { %909 = vst.msk [vmem:[#allocation2 + $0x8] sm:$0xff] %vm22_vm0, %v844_v23  ;;  %925 = vst.msk [vmem:[#allocation2 + $0x88] sm:$0xff] %vm22_vm0, %v860_v19 }
  0xfd   :  { %2739 = vst [vmem:[#allocation17_spill] sm:$0xff] %v2420_v31  ;;  %v1725_v33 = vpop.f32.mrb[4].mxu0  ;;  %v2423_v6 = vpop.permute.xlu1 %1326 }
  0xfe   :  { %v849_v36 = vadd.f32 %v1725_v33, %v141_v25  ;;  %v1757_v37 = vpop.f32.mrb[4].mxu1  ;;  %v361_v38 = vpop.f32.mrb[5].mxu0  ;;  %2740 = vst [vmem:[#allocation18_spill] sm:$0xff] %v2423_v6 }
  0xff   :  { %v865_v42 = vadd.f32 %v1757_v37, %v157_v27  ;;  %v847_v43 = vadd.f32 %v361_v38, %v139_v30  ;;  %v506_v44 = vpop.f32.mrb[5].mxu1  ;;  %v1726_v45 = vpop.f32.mrb[6].mxu0  ;;  %v145_v30 = vld [vmem:[#allocation2 + $0x50] sm:$0xff]  ;;  %v159_v38 = vld [vmem:[#allocation2 + $0xc0] sm:$0xff] }
 0x100   :  { %914 = vst.msk [vmem:[#allocation2 + $0x30] sm:$0xff] %vm22_vm0, %v849_v36  ;;  %v863_v17 = vadd.f32 %v506_v44, %v155_v34  ;;  %v850_v23 = vadd.f32 %v1726_v45, %v142_v35  ;;  %v1758_v19 = vpop.f32.mrb[6].mxu1  ;;  %v364_v21 = vpop.f32.mrb[7].mxu0  ;;  %v161_v35 = vld [vmem:[#allocation2 + $0xd0] sm:$0xff]  ;;  %v143_v36 = vld [vmem:[#allocation2 + $0x40] sm:$0xff]  ;;  %v144_v44 = vld [vmem:[#allocation2 + $0x48] sm:$0xff] }
 0x101   :  { %930 = vst.msk [vmem:[#allocation2 + $0xb0] sm:$0xff] %vm22_vm0, %v865_v42  ;;  %912 = vst.msk [vmem:[#allocation2 + $0x20] sm:$0xff] %vm22_vm0, %v847_v43  ;;  %v866_v25 = vadd.f32 %v1758_v19, %v158_v4  ;;  %v848_v33 = vadd.f32 %v364_v21, %v140_v39  ;;  %v509_v31 = vpop.f32.mrb[7].mxu1  ;;  %v2432_v34 = vpop.permute.xlu0 %1322  ;;  %v146_v4 = vld [vmem:[#allocation2 + $0x58] sm:$0xff]  ;;  %v160_v19 = vld [vmem:[#allocation2 + $0xc8] sm:$0xff] }
 0x102   :  { %928 = vst.msk [vmem:[#allocation2 + $0xa0] sm:$0xff] %vm22_vm0, %v863_v17  ;;  %915 = vst.msk [vmem:[#allocation2 + $0x38] sm:$0xff] %vm22_vm0, %v850_v23  ;;  %v864_v27 = vadd.f32 %v509_v31, %v156_v46  ;;  %v2434_v37 = vpop.permute.xlu1 %1383  ;;  %v162_v31 = vld [vmem:[#allocation2 + $0xd8] sm:$0xff]  ;;  %v1009_v41 = vld [vmem:[#allocation2 + $0x10] sm:$0xff] }
 0x103   :  { %931 = vst.msk [vmem:[#allocation2 + $0xb8] sm:$0xff] %vm22_vm0, %v866_v25  ;;  %913 = vst.msk [vmem:[#allocation2 + $0x28] sm:$0xff] %vm22_vm0, %v848_v33  ;;  %v1007_v15 = vld [vmem:[#allocation2] sm:$0xff]  ;;  %v1138_v18 = vld [vmem:[#allocation2 + $0x90] sm:$0xff] }
 0x104   :  { %929 = vst.msk [vmem:[#allocation2 + $0xa8] sm:$0xff] %vm22_vm0, %v864_v27  ;;  %2741 = vst [vmem:[#allocation19_spill] sm:$0xff] %v2432_v34  ;;  %v1136_v16 = vld [vmem:[#allocation2 + $0x80] sm:$0xff]  ;;  %v1139_v9 = vld [vmem:[#allocation2 + $0x98] sm:$0xff] }
 0x105   :  { %2742 = vst [vmem:[#allocation20_spill] sm:$0xff] %v2434_v37  ;;  %v1729_v21 = vpop.f32.mrb[8].mxu0  ;;  %v1137_v12 = vld [vmem:[#allocation2 + $0x88] sm:$0xff] }
 0x106   :  { %v853_v39 = vadd.f32 %v1729_v21, %v145_v30  ;;  %v1761_v42 = vpop.f32.mrb[8].mxu1  ;;  %v377_v43 = vpop.f32.mrb[9].mxu0 }
 0x107   :  { %v869_v45 = vadd.f32 %v1761_v42, %v161_v35  ;;  %v851_v46 = vadd.f32 %v377_v43, %v143_v36  ;;  %v522_v17 = vpop.f32.mrb[9].mxu1  ;;  %v1730_v23 = vpop.f32.mrb[10].mxu0  ;;  %v1010_v36 = vld [vmem:[#allocation2 + $0x18] sm:$0xff]  ;;  %v1105_v42 = vmul.f32 %v2314_v48, %v1009_v41  ;;  %v1103_v43 = vmul.f32 %v2325_v14, %v1007_v15  ;;  %v992_v14 = vld [vmem:[%s2723_s2 + $0x8] sm:$0xff] }
 0x108   :  { %918 = vst.msk [vmem:[#allocation2 + $0x50] sm:$0xff] %vm22_vm0, %v853_v39  ;;  %v867_v25 = vadd.f32 %v522_v17, %v159_v38  ;;  %v854_v33 = vadd.f32 %v1730_v23, %v146_v4  ;;  %v1762_v27 = vpop.f32.mrb[10].mxu1  ;;  %v380_v6 = vpop.f32.mrb[11].mxu0  ;;  %v1008_v39 = vld [vmem:[#allocation2 + $0x8] sm:$0xff]  ;;  %v149_v38 = vld [vmem:[#allocation2 + $0x70] sm:$0xff]  ;;  %v1106_v23 = vmul.f32 %v2318_v26, %v1010_v36 }
 0x109   :  { %934 = vst.msk [vmem:[#allocation2 + $0xd0] sm:$0xff] %vm22_vm0, %v869_v45  ;;  %916 = vst.msk [vmem:[#allocation2 + $0x40] sm:$0xff] %vm22_vm0, %v851_v46  ;;  %v870_v30 = vadd.f32 %v1762_v27, %v162_v31  ;;  %v852_v21 = vadd.f32 %v380_v6, %v144_v44  ;;  %v525_v34 = vpop.f32.mrb[11].mxu1  ;;  %v993_v4 = vld [vmem:[%s2723_s2 + $0x10] sm:$0xff]  ;;  %v165_v6 = vld [vmem:[#allocation2 + $0xf0] sm:$0xff]  ;;  %v2452_v31 = vpop.permute.xlu0 %1379 }
 0x10a   :  { %932 = vst.msk [vmem:[#allocation2 + $0xc0] sm:$0xff] %vm22_vm0, %v867_v25  ;;  %919 = vst.msk [vmem:[#allocation2 + $0x58] sm:$0xff] %vm22_vm0, %v854_v33  ;;  %v868_v35 = vadd.f32 %v525_v34, %v160_v19  ;;  %v991_v34 = vld [vmem:[%s2723_s2] sm:$0xff]  ;;  %v147_v45 = vld [vmem:[#allocation2 + $0x60] sm:$0xff]  ;;  %v1104_v19 = vmul.f32 %v2331_v22, %v1008_v39  ;;  %v2459_v48 = vpop.permute.xlu1 %1387 }
 0x10b   :  { %935 = vst.msk [vmem:[#allocation2 + $0xd8] sm:$0xff] %vm22_vm0, %v870_v30  ;;  %917 = vst.msk [vmem:[#allocation2 + $0x48] sm:$0xff] %vm22_vm0, %v852_v21  ;;  %v163_v46 = vld [vmem:[#allocation2 + $0xe0] sm:$0xff]  ;;  %v994_v17 = vld [vmem:[%s2723_s2 + $0x18] sm:$0xff]  ;;  %v1119_v28 = vadd.f32 %v1103_v43, %v991_v34  ;;  %v1216_v34 = vmul.f32 %v2360_v56, %v1136_v16 }
 0x10c   :  { %933 = vst.msk [vmem:[#allocation2 + $0xc8] sm:$0xff] %vm22_vm0, %v868_v35  ;;  %v150_v33 = vld [vmem:[#allocation2 + $0x78] sm:$0xff]  ;;  %v148_v35 = vld [vmem:[#allocation2 + $0x68] sm:$0xff]  ;;  %v1013_v26 = vld [vmem:[#allocation2 + $0x30] sm:$0xff]  ;;  %v1122_v37 = vadd.f32 %v1106_v23, %v994_v17  ;;  %v1120_v8 = vadd.f32 %v1104_v19, %v992_v14  ;;  %v1217_v14 = vmul.f32 %v2350_v51, %v1137_v12 }
 0x10d   :  { %v1733_v44 = vpop.f32.mrb[12].mxu0  ;;  %v166_v27 = vld [vmem:[#allocation2 + $0xf8] sm:$0xff]  ;;  %v1109_v43 = vmul.f32 %v2340_v40, %v1013_v26  ;;  %v169_v23 = vld [vmem:[#allocation2 + $0x110] sm:$0xff] }
 0x10e   :  { %v857_v41 = vadd.f32 %v1733_v44, %v149_v38  ;;  %v1765_v25 = vpop.f32.mrb[12].mxu1  ;;  %v393_v30 = vpop.f32.mrb[13].mxu0  ;;  %v1121_v44 = vadd.f32 %v1105_v42, %v993_v4  ;;  %v1218_v42 = vmul.f32 %v2354_v52, %v1138_v18  ;;  %v185_v19 = vld [vmem:[#allocation2 + $0x190] sm:$0xff]  ;;  %v995_v52 = vld [vmem:[%s2723_s2 + $0x20] sm:$0xff] }
 0x10f   :  { %v873_v15 = vadd.f32 %v1765_v25, %v165_v6  ;;  %v538_v21 = vpop.f32.mrb[13].mxu1  ;;  %v855_v22 = vadd.f32 %v393_v30, %v147_v45  ;;  %v1734_v39 = vpop.f32.mrb[14].mxu0  ;;  %v1011_v45 = vld [vmem:[#allocation2 + $0x20] sm:$0xff]  ;;  %v998_v40 = vld [vmem:[%s2723_s2 + $0x38] sm:$0xff] }
 0x110   :  { %922 = vst.msk [vmem:[#allocation2 + $0x70] sm:$0xff] %vm22_vm0, %v857_v41  ;;  %v871_v36 = vadd.f32 %v538_v21, %v163_v46  ;;  %v1766_v38 = vpop.f32.mrb[14].mxu1  ;;  %v858_v6 = vadd.f32 %v1734_v39, %v150_v33  ;;  %v396_v10 = vpop.f32.mrb[15].mxu0  ;;  %v997_v41 = vld [vmem:[%s2723_s2 + $0x30] sm:$0xff]  ;;  %v1014_v46 = vld [vmem:[#allocation2 + $0x38] sm:$0xff]  ;;  %v1017_v56 = vld [vmem:[#allocation2 + $0x50] sm:$0xff] }
 0x111   :  { %938 = vst.msk [vmem:[#allocation2 + $0xf0] sm:$0xff] %vm22_vm0, %v873_v15  ;;  %v874_v25 = vadd.f32 %v1766_v38, %v166_v27  ;;  %v541_v13 = vpop.f32.mrb[15].mxu1  ;;  %920 = vst.msk [vmem:[#allocation2 + $0x60] sm:$0xff] %vm22_vm0, %v855_v22  ;;  %v856_v4 = vadd.f32 %v396_v10, %v148_v35  ;;  %v1012_v33 = vld [vmem:[#allocation2 + $0x28] sm:$0xff]  ;;  %v1219_v27 = vmul.f32 %v2364_v58, %v1139_v9  ;;  %v1142_v15 = vld [vmem:[#allocation2 + $0xb0] sm:$0xff]  ;;  %v2505_v26 = vpop.permute.xlu1 %1395 }
 0x112   :  { %936 = vst.msk [vmem:[#allocation2 + $0xe0] sm:$0xff] %vm22_vm0, %v871_v36  ;;  %923 = vst.msk [vmem:[#allocation2 + $0x78] sm:$0xff] %vm22_vm0, %v858_v6  ;;  %v872_v17 = vadd.f32 %v541_v13, %v164_v63  ;;  %v1015_v10 = vld [vmem:[#allocation2 + $0x40] sm:$0xff]  ;;  %v2485_v63 = vadd.f32 %v1218_v42, %v1121_v44  ;;  %v2487_v13 = vadd.f32 %v1216_v34, %v1119_v28  ;;  %v1018_v12 = vld [vmem:[#allocation2 + $0x58] sm:$0xff] }
 0x113   :  { %939 = vst.msk [vmem:[#allocation2 + $0xf8] sm:$0xff] %vm22_vm0, %v874_v25  ;;  %921 = vst.msk [vmem:[#allocation2 + $0x68] sm:$0xff] %vm22_vm0, %v856_v4  ;;  %v1107_v58 = vmul.f32 %v2336_v29, %v1011_v45  ;;  %v1110_v51 = vmul.f32 %v2328_v20, %v1014_v46  ;;  %v996_v9 = vld [vmem:[%s2723_s2 + $0x28] sm:$0xff]  ;;  %v1016_v16 = vld [vmem:[#allocation2 + $0x48] sm:$0xff]  ;;  %v2495_v21 = vadd.f32 %v1219_v27, %v1122_v37  ;;  %v2503_v29 = vpop.permute.xlu0 %1391 }
 0x114   :  { %937 = vst.msk [vmem:[#allocation2 + $0xe8] sm:$0xff] %vm22_vm0, %v872_v17  ;;  %v167_v30 = vld [vmem:[#allocation2 + $0x100] sm:$0xff]  ;;  %v2497_v35 = vadd.f32 %v1217_v14, %v1120_v8  ;;  %v1108_v28 = vmul.f32 %v2322_v11, %v1012_v33  ;;  %v1001_v20 = vld [vmem:[%s2723_s2 + $0x50] sm:$0xff]  ;;  %v170_v39 = vld [vmem:[#allocation2 + $0x118] sm:$0xff]  ;;  %v1125_v38 = vadd.f32 %v1109_v43, %v997_v41  ;;  %v1222_v44 = vmul.f32 %v2362_v57, %v1142_v15 }
 0x115   :  { %v1785_v18 = vpop.f32.mrb[16].mxu0  ;;  %v183_v36 = vld [vmem:[#allocation2 + $0x180] sm:$0xff]  ;;  %v1143_v6 = vld [vmem:[#allocation2 + $0xb8] sm:$0xff]  ;;  %v1113_v8 = vmul.f32 %v2348_v50, %v1017_v56  ;;  %v1111_v11 = vmul.f32 %v2344_v49, %v1015_v10  ;;  %v1114_v42 = vmul.f32 %v2338_v32, %v1018_v12  ;;  %v1112_v34 = vmul.f32 %v2334_v24, %v1016_v16  ;;  %v168_v50 = vld [vmem:[#allocation2 + $0x108] sm:$0xff] }
 0x116   :  { %v877_v22 = vadd.f32 %v1785_v18, %v169_v23  ;;  %v1140_v37 = vld [vmem:[#allocation2 + $0xa0] sm:$0xff]  ;;  %v1817_v25 = vpop.f32.mrb[16].mxu1  ;;  %v635_v45 = vpop.f32.mrb[17].mxu0  ;;  %v186_v46 = vld [vmem:[#allocation2 + $0x198] sm:$0xff]  ;;  %v184_v17 = vld [vmem:[#allocation2 + $0x188] sm:$0xff]  ;;  %v1123_v49 = vadd.f32 %v1107_v58, %v995_v52  ;;  %v1126_v23 = vadd.f32 %v1110_v51, %v998_v40  ;;  %v1223_v12 = vmul.f32 %v2372_v62, %v1143_v6 }
 0x117   :  { %v999_v4 = vld [vmem:[%s2723_s2 + $0x40] sm:$0xff]  ;;  %v893_v57 = vadd.f32 %v1817_v25, %v185_v19  ;;  %v875_v41 = vadd.f32 %v635_v45, %v167_v30  ;;  %v780_v43 = vpop.f32.mrb[17].mxu1  ;;  %v1786_v33 = vpop.f32.mrb[18].mxu0  ;;  %v1141_v27 = vld [vmem:[#allocation2 + $0xa8] sm:$0xff]  ;;  %v1002_v14 = vld [vmem:[%s2723_s2 + $0x58] sm:$0xff]  ;;  %v1220_v10 = vmul.f32 %v2358_v55, %v1140_v37  ;;  %v1124_v16 = vadd.f32 %v1108_v28, %v996_v9 }
 0x118   :  { %942 = vst.msk [vmem:[#allocation2 + $0x110] sm:$0xff] %vm22_vm0, %v877_v22  ;;  %v1000_v32 = vld [vmem:[%s2723_s2 + $0x48] sm:$0xff]  ;;  %v891_v24 = vadd.f32 %v780_v43, %v183_v36  ;;  %v878_v15 = vadd.f32 %v1786_v33, %v170_v39  ;;  %v1818_v56 = vpop.f32.mrb[18].mxu1  ;;  %v638_v19 = vpop.f32.mrb[19].mxu0  ;;  %v1146_v52 = vld [vmem:[#allocation2 + $0xd0] sm:$0xff]  ;;  %v1129_v18 = vadd.f32 %v1113_v8, %v1001_v20  ;;  %v1127_v30 = vadd.f32 %v1111_v11, %v999_v4  ;;  %v1147_v22 = vld [vmem:[#allocation2 + $0xd8] sm:$0xff] }
 0x119   :  { %v1144_v40 = vld [vmem:[#allocation2 + $0xc0] sm:$0xff]  ;;  %958 = vst.msk [vmem:[#allocation2 + $0x190] sm:$0xff] %vm22_vm0, %v893_v57  ;;  %940 = vst.msk [vmem:[#allocation2 + $0x100] sm:$0xff] %vm22_vm0, %v875_v41  ;;  %v894_v58 = vadd.f32 %v1818_v56, %v186_v46  ;;  %v783_v51 = vpop.f32.mrb[19].mxu1  ;;  %v1145_v36 = vld [vmem:[#allocation2 + $0xc8] sm:$0xff]  ;;  %v876_v55 = vadd.f32 %v638_v19, %v168_v50  ;;  %v2528_v9 = vadd.f32 %v1222_v44, %v1125_v38  ;;  %v2544_v57 = vpop.permute.xlu0 %1399 }
 0x11a   :  { %956 = vst.msk [vmem:[#allocation2 + $0x180] sm:$0xff] %vm22_vm0, %v891_v24  ;;  %943 = vst.msk [vmem:[#allocation2 + $0x118] sm:$0xff] %vm22_vm0, %v878_v15  ;;  %v892_v39 = vadd.f32 %v783_v51, %v184_v17  ;;  %v173_v62 = vld [vmem:[#allocation2 + $0x130] sm:$0xff]  ;;  %v1221_v28 = vmul.f32 %v2368_v60, %v1141_v27  ;;  %v1130_v37 = vadd.f32 %v1114_v42, %v1002_v14  ;;  %v171_v60 = vld [vmem:[#allocation2 + $0x120] sm:$0xff] }
 0x11b   :  { %v1128_v6 = vadd.f32 %v1112_v34, %v1000_v32  ;;  %v1021_v25 = vld [vmem:[#allocation2 + $0x70] sm:$0xff]  ;;  %959 = vst.msk [vmem:[#allocation2 + $0x198] sm:$0xff] %vm22_vm0, %v894_v58  ;;  %v2532_v8 = vadd.f32 %v1220_v10, %v1123_v49  ;;  %v2534_v11 = vadd.f32 %v1223_v12, %v1126_v23  ;;  %v1226_v45 = vmul.f32 %v2370_v61, %v1146_v52  ;;  %v187_v44 = vld [vmem:[#allocation2 + $0x1a0] sm:$0xff]  ;;  %v2551_v23 = vpop.permute.xlu1 %1403  ;;  %v1005_v15 = vld [vmem:[%s2723_s2 + $0x70] sm:$0xff] }
 0x11c   :  { %v189_v20 = vld [vmem:[#allocation2 + $0x1b0] sm:$0xff]  ;;  %v1224_v46 = vmul.f32 %v2366_v59, %v1144_v40  ;;  %941 = vst.msk [vmem:[#allocation2 + $0x108] sm:$0xff] %vm22_vm0, %v876_v55  ;;  %957 = vst.msk [vmem:[#allocation2 + $0x188] sm:$0xff] %vm22_vm0, %v892_v39  ;;  %v2540_v4 = vadd.f32 %v1221_v28, %v1124_v16  ;;  %v1227_v42 = vmul.f32 %v2380_v2, %v1147_v22  ;;  %v1019_v43 = vld [vmem:[#allocation2 + $0x60] sm:$0xff] }
 0x11d   :  { %v1789_v38 = vpop.f32.mrb[20].mxu0  ;;  %v1225_v34 = vmul.f32 %v2376_v0, %v1145_v36  ;;  %v1150_v41 = vld [vmem:[#allocation2 + $0xf0] sm:$0xff]  ;;  %v174_v59 = vld [vmem:[#allocation2 + $0x138] sm:$0xff]  ;;  %v2546_v50 = vadd.f32 %v1226_v45, %v1129_v18  ;;  %v1117_v49 = vmul.f32 %v2356_v54, %v1021_v25  ;;  %v172_v12 = vld [vmem:[#allocation2 + $0x128] sm:$0xff]  ;;  %v1115_v40 = vmul.f32 %v2352_v53, %v1019_v43 }
 0x11e   :  { %v881_v61 = vadd.f32 %v1789_v38, %v173_v62  ;;  %v1821_v33 = vpop.f32.mrb[20].mxu1  ;;  %v2548_v17 = vadd.f32 %v1224_v46, %v1127_v30  ;;  %v651_v14 = vpop.f32.mrb[21].mxu0  ;;  %v190_v0 = vld [vmem:[#allocation2 + $0x1b8] sm:$0xff]  ;;  %v2553_v32 = vadd.f32 %v1227_v42, %v1130_v37  ;;  %v188_v16 = vld [vmem:[#allocation2 + $0x1a8] sm:$0xff]  ;;  %v2563_v52 = vmul.f32 %v2378_v1, %v1150_v41  ;;  %v193_v38 = vld [vmem:[#allocation2 + $0x1d0] sm:$0xff] }
 0x11f   :  { %v1251_v27 = vld [vmem:[#allocation2 + $0x110] sm:$0xff]  ;;  %v897_v2 = vadd.f32 %v1821_v33, %v189_v20  ;;  %v2555_v24 = vadd.f32 %v1225_v34, %v1128_v6  ;;  %v879_v54 = vadd.f32 %v651_v14, %v171_v60  ;;  %v796_v19 = vpop.f32.mrb[21].mxu1  ;;  %v1790_v10 = vpop.f32.mrb[22].mxu0  ;;  %v1022_v58 = vld [vmem:[#allocation2 + $0x78] sm:$0xff]  ;;  %v2574_v25 = vadd.f32 %v1117_v49, %v1005_v15  ;;  %v175_v43 = vld [vmem:[#allocation2 + $0x140] sm:$0xff] }
 0x120   :  { %v1331_v56 = vmul.f32 %v2386_v5, %v1251_v27  ;;  %946 = vst.msk [vmem:[#allocation2 + $0x130] sm:$0xff] %vm22_vm0, %v881_v61  ;;  %v1364_v51 = vld [vmem:[#allocation2 + $0x190] sm:$0xff]  ;;  %v1249_v18 = vld [vmem:[#allocation2 + $0x100] sm:$0xff]  ;;  %v895_v30 = vadd.f32 %v796_v19, %v187_v44  ;;  %v882_v22 = vadd.f32 %v1790_v10, %v174_v59  ;;  %v1822_v5 = vpop.f32.mrb[22].mxu1  ;;  %v654_v36 = vpop.f32.mrb[23].mxu0  ;;  %v1003_v55 = vld [vmem:[%s2723_s2 + $0x60] sm:$0xff] }
 0x121   :  { %962 = vst.msk [vmem:[#allocation2 + $0x1b0] sm:$0xff] %vm22_vm0, %v897_v2  ;;  %v1444_v1 = vmul.f32 %v2459_v48, %v1364_v51  ;;  %v1329_v62 = vmul.f32 %v2382_v3, %v1249_v18  ;;  %v1362_v53 = vld [vmem:[#allocation2 + $0x180] sm:$0xff]  ;;  %v1252_v28 = vld [vmem:[#allocation2 + $0x118] sm:$0xff]  ;;  %944 = vst.msk [vmem:[#allocation2 + $0x120] sm:$0xff] %vm22_vm0, %v879_v54  ;;  %v898_v37 = vadd.f32 %v1822_v5, %v190_v0  ;;  %v799_v6 = vpop.f32.mrb[23].mxu1  ;;  %v2582_v60 = vpop.permute.xlu0 %1407 }
 0x122   :  { %v1347_v39 = vadd.f32 %v1331_v56, %v2485_v63  ;;  %v1332_v20 = vmul.f32 %v2390_v7, %v1252_v28  ;;  %v1365_v45 = vld [vmem:[#allocation2 + $0x198] sm:$0xff]  ;;  %960 = vst.msk [vmem:[#allocation2 + $0x1a0] sm:$0xff] %vm22_vm0, %v895_v30  ;;  %947 = vst.msk [vmem:[#allocation2 + $0x138] sm:$0xff] %vm22_vm0, %v882_v22  ;;  %v880_v63 = vadd.f32 %v654_v36, %v172_v12  ;;  %v177_v48 = vld [vmem:[#allocation2 + $0x150] sm:$0xff]  ;;  %v2589_v33 = vpop.permute.xlu1 %1411 }
 0x123   :  { %v896_v46 = vadd.f32 %v799_v6, %v188_v16  ;;  %v2580_v3 = vmul.f32 %v2346_v47, %v1022_v58  ;;  %v1345_v42 = vadd.f32 %v1329_v62, %v2487_v13  ;;  %v1442_v34 = vmul.f32 %v2452_v31, %v1362_v53  ;;  %v1250_v7 = vld [vmem:[#allocation2 + $0x108] sm:$0xff]  ;;  %963 = vst.msk [vmem:[#allocation2 + $0x1b8] sm:$0xff] %vm22_vm0, %v898_v37  ;;  %v2743_v49 = vld [vmem:[#allocation7_spill] sm:$0xff]  ;;  %v178_v10 = vld [vmem:[#allocation2 + $0x158] sm:$0xff] }
 0x124   :  { %v1460_v44 = vadd.f32 %v1444_v1, %v1347_v39  ;;  %v1363_v41 = vld [vmem:[#allocation2 + $0x188] sm:$0xff]  ;;  %v2587_v61 = vadd.f32 %v1115_v40, %v1003_v55  ;;  %v1348_v59 = vadd.f32 %v1332_v20, %v2495_v21  ;;  %v1445_v47 = vmul.f32 %v2503_v29, %v1365_v45  ;;  %945 = vst.msk [vmem:[#allocation2 + $0x128] sm:$0xff] %vm22_vm0, %v880_v63  ;;  %v191_v13 = vld [vmem:[#allocation2 + $0x1c0] sm:$0xff]  ;;  %v194_v18 = vld [vmem:[#allocation2 + $0x1d8] sm:$0xff] }
 0x125   :  { %v1330_v27 = vmul.f32 %v2743_v49, %v1250_v7  ;;  %961 = vst.msk [vmem:[#allocation2 + $0x1a8] sm:$0xff] %vm22_vm0, %v896_v46  ;;  %v1793_v31 = vpop.f32.mrb[24].mxu0  ;;  %v1458_v14 = vadd.f32 %v1442_v34, %v1345_v42  ;;  %v2744_v0 = vld [vmem:[#allocation20_spill] sm:$0xff]  ;;  %v2745_v5 = vld [vmem:[#allocation11_spill] sm:$0xff]  ;;  %v2610_v7 = vpop.permute.xlu0 %1415 }
 0x126   :  { %v1476_v2 = vmax.f32 %v1460_v44, 0.0  ;;  %v1443_v15 = vmul.f32 %v2744_v0, %v1363_v41  ;;  %v885_v56 = vadd.f32 %v1793_v31, %v177_v48  ;;  %v1825_v54 = vpop.f32.mrb[24].mxu1  ;;  %v667_v19 = vpop.f32.mrb[25].mxu0  ;;  %v1461_v12 = vadd.f32 %v1445_v47, %v1348_v59  ;;  %v176_v20 = vld [vmem:[#allocation2 + $0x148] sm:$0xff]  ;;  %v2746_v48 = vld [vmem:[#allocation9_spill] sm:$0xff]  ;;  %v2747_v47 = vld [vmem:[#allocation10_spill] sm:$0xff] }
 0x127   :  { %v1346_v21 = vadd.f32 %v1330_v27, %v2497_v35  ;;  %v1255_v29 = vld [vmem:[#allocation2 + $0x130] sm:$0xff]  ;;  %v901_v16 = vadd.f32 %v1825_v54, %v193_v38  ;;  %v883_v40 = vadd.f32 %v667_v19, %v175_v43  ;;  %v812_v58 = vpop.f32.mrb[25].mxu1  ;;  %v1794_v51 = vpop.f32.mrb[26].mxu0  ;;  %v1474_v22 = vmax.f32 %v1458_v14, 0.0  ;;  %v192_v34 = vld [vmem:[#allocation2 + $0x1c8] sm:$0xff] }
 0x128   :  { %v1625_v30 = vpack.c.bf16 %v1476_v2, %v1476_v2  ;;  %v1335_v36 = vmul.f32 %v2745_v5, %v1255_v29  ;;  %v1368_v55 = vld [vmem:[#allocation2 + $0x1b0] sm:$0xff]  ;;  %950 = vst.msk [vmem:[#allocation2 + $0x150] sm:$0xff] %vm22_vm0, %v885_v56  ;;  %v899_v39 = vadd.f32 %v812_v58, %v191_v13  ;;  %v1826_v1 = vpop.f32.mrb[26].mxu1  ;;  %v670_v62 = vpop.f32.mrb[27].mxu0  ;;  %v1477_v53 = vmax.f32 %v1461_v12, 0.0  ;;  %v1253_v37 = vld [vmem:[#allocation2 + $0x120] sm:$0xff] }
 0x129   :  { %v1459_v28 = vadd.f32 %v1443_v15, %v1346_v21  ;;  %v1448_v35 = vmul.f32 %v2551_v23, %v1368_v55  ;;  %966 = vst.msk [vmem:[#allocation2 + $0x1d0] sm:$0xff] %vm22_vm0, %v901_v16  ;;  %948 = vst.msk [vmem:[#allocation2 + $0x140] sm:$0xff] %vm22_vm0, %v883_v40  ;;  %v886_v6 = vadd.f32 %v1794_v51, %v178_v10  ;;  %v815_v45 = vpop.f32.mrb[27].mxu1  ;;  %v1366_v44 = vld [vmem:[#allocation2 + $0x1a0] sm:$0xff]  ;;  %v1256_v23 = vld [vmem:[#allocation2 + $0x138] sm:$0xff]  ;;  %v1420_v19 = vpop.permute.xlu1 %1419 }
 0x12a   :  { %1557 = vst.msk [vmem:[%s2724_s4 + $0x8] sm:$0xf] %vm1554_vm1, %v1625_v30  ;;  %v1623_v63 = vpack.c.bf16 %v1474_v22, %v1474_v22  ;;  %v1351_v46 = vadd.f32 %v1335_v36, %v2528_v9  ;;  %v1333_v38 = vmul.f32 %v2746_v48, %v1253_v37  ;;  %v902_v42 = vadd.f32 %v1826_v1, %v194_v18  ;;  %v1369_v27 = vld [vmem:[#allocation2 + $0x1b8] sm:$0xff]  ;;  %v181_v9 = vld [vmem:[#allocation2 + $0x170] sm:$0xff]  ;;  %v179_v56 = vld [vmem:[#allocation2 + $0x160] sm:$0xff] }
 0x12b   :  { %964 = vst.msk [vmem:[#allocation2 + $0x1c0] sm:$0xff] %vm22_vm0, %v899_v39  ;;  %v1626_v41 = vpack.c.bf16 %v1477_v53, %v1477_v53  ;;  %v1475_v43 = vmax.f32 %v1459_v28, 0.0  ;;  %v1446_v59 = vmul.f32 %v2505_v26, %v1366_v44  ;;  %v1336_v49 = vmul.f32 %v2747_v47, %v1256_v23  ;;  %951 = vst.msk [vmem:[#allocation2 + $0x158] sm:$0xff] %vm22_vm0, %v886_v6  ;;  %v197_v31 = vld [vmem:[#allocation2 + $0x1f0] sm:$0xff]  ;;  %v1254_v0 = vld [vmem:[#allocation2 + $0x128] sm:$0xff] }
 0x12c   :  { %1555 = vst.msk [vmem:[%s2724_s4] sm:$0xf] %vm1554_vm1, %v1623_v63  ;;  %v1464_v13 = vadd.f32 %v1448_v35, %v1351_v46  ;;  %v1349_v2 = vadd.f32 %v1333_v38, %v2532_v8  ;;  %v1449_v14 = vmul.f32 %v2582_v60, %v1369_v27  ;;  %v1367_v15 = vld [vmem:[#allocation2 + $0x1a8] sm:$0xff]  ;;  %v884_v26 = vadd.f32 %v670_v62, %v176_v20  ;;  %v195_v29 = vld [vmem:[#allocation2 + $0x1e0] sm:$0xff]  ;;  %v182_v39 = vld [vmem:[#allocation2 + $0x178] sm:$0xff] }
 0x12d   :  { %967 = vst.msk [vmem:[#allocation2 + $0x1d8] sm:$0xff] %vm22_vm0, %v902_v42  ;;  %v1624_v54 = vpack.c.bf16 %v1475_v43, %v1475_v43  ;;  %v1352_v10 = vadd.f32 %v1336_v49, %v2534_v11  ;;  %v2748_v12 = vld [vmem:[#allocation8_spill] sm:$0xff]  ;;  %v1447_v8 = vmul.f32 %v2544_v57, %v1367_v15  ;;  %v1797_v60 = vpop.f32.mrb[28].mxu0  ;;  %v900_v58 = vadd.f32 %v815_v45, %v192_v34  ;;  %v2749_v28 = vld [vmem:[#allocation15_spill] sm:$0xff]  ;;  %v2750_v44 = vld [vmem:[#allocation13_spill] sm:$0xff] }
 0x12e   :  { %1558 = vst.msk [vmem:[%s2724_s4 + $0xc] sm:$0xf] %vm1554_vm1, %v1626_v41  ;;  %v1334_v21 = vmul.f32 %v2748_v12, %v1254_v0  ;;  %v1480_v16 = vmax.f32 %v1464_v13, 0.0  ;;  %v1462_v40 = vadd.f32 %v1446_v59, %v1349_v2  ;;  %v889_v51 = vadd.f32 %v1797_v60, %v181_v9  ;;  %v1829_v18 = vpop.f32.mrb[28].mxu1  ;;  %v683_v30 = vpop.f32.mrb[29].mxu0  ;;  %v198_v34 = vld [vmem:[#allocation2 + $0x1f8] sm:$0xff] }
 0x12f   :  { %949 = vst.msk [vmem:[#allocation2 + $0x148] sm:$0xff] %vm22_vm0, %v884_v26  ;;  %v1465_v11 = vadd.f32 %v1449_v14, %v1352_v10  ;;  %v1259_v5 = vld [vmem:[#allocation2 + $0x150] sm:$0xff]  ;;  %v905_v57 = vadd.f32 %v1829_v18, %v197_v31  ;;  %v887_v36 = vadd.f32 %v683_v30, %v179_v56  ;;  %v828_v55 = vpop.f32.mrb[29].mxu1  ;;  %v1798_v1 = vpop.f32.mrb[30].mxu0  ;;  %965 = vst.msk [vmem:[#allocation2 + $0x1c8] sm:$0xff] %vm22_vm0, %v900_v58  ;;  %v180_v41 = vld [vmem:[#allocation2 + $0x168] sm:$0xff] }
 0x130   :  { %1556 = vst.msk [vmem:[%s2724_s4 + $0x4] sm:$0xf] %vm1554_vm1, %v1624_v54  ;;  %v1350_v22 = vadd.f32 %v1334_v21, %v2540_v4  ;;  %v1629_v62 = vpack.c.bf16 %v1480_v16, %v1480_v16  ;;  %v1478_v53 = vmax.f32 %v1462_v40, 0.0  ;;  %v1339_v35 = vmul.f32 %v2749_v28, %v1259_v5  ;;  %v1372_v37 = vld [vmem:[#allocation2 + $0x1d0] sm:$0xff]  ;;  %v1257_v6 = vld [vmem:[#allocation2 + $0x140] sm:$0xff]  ;;  %v1830_v45 = vpop.f32.mrb[30].mxu1  ;;  %v1424_v4 = vpop.permute.xlu0 %1423 }
 0x131   :  { %954 = vst.msk [vmem:[#allocation2 + $0x170] sm:$0xff] %vm22_vm0, %v889_v51  ;;  %v903_v20 = vadd.f32 %v828_v55, %v195_v29  ;;  %v686_v63 = vpop.f32.mrb[31].mxu0  ;;  %v1481_v46 = vmax.f32 %v1465_v11, 0.0  ;;  %v1452_v38 = vmul.f32 %v1420_v19, %v1372_v37  ;;  %v1337_v23 = vmul.f32 %v2750_v44, %v1257_v6  ;;  %970 = vst.msk [vmem:[#allocation2 + $0x1f0] sm:$0xff] %vm22_vm0, %v905_v57  ;;  %v831_v43 = vpop.f32.mrb[31].mxu1  ;;  %v196_v31 = vld [vmem:[#allocation2 + $0x1e8] sm:$0xff] }
 0x132   :  { %v1463_v48 = vadd.f32 %v1447_v8, %v1350_v22  ;;  %v1370_v42 = vld [vmem:[#allocation2 + $0x1c0] sm:$0xff]  ;;  %952 = vst.msk [vmem:[#allocation2 + $0x160] sm:$0xff] %vm22_vm0, %v887_v36  ;;  %v1627_v59 = vpack.c.bf16 %v1478_v53, %v1478_v53  ;;  %v1355_v47 = vadd.f32 %v1339_v35, %v2546_v50  ;;  %v1260_v27 = vld [vmem:[#allocation2 + $0x158] sm:$0xff]  ;;  %v890_v9 = vadd.f32 %v1798_v1, %v182_v39  ;;  %v1428_v2 = vpop.permute.xlu1 %1427  ;;  %v1006_v50 = vld [vmem:[%s2723_s2 + $0x78] sm:$0xff] }
 0x133   :  { %1561 = vst.msk [vmem:[%s2724_s4 + $0x18] sm:$0xf] %vm1554_vm1, %v1629_v62  ;;  %v1450_v49 = vmul.f32 %v2589_v33, %v1370_v42  ;;  %v1148_v13 = vld [vmem:[#allocation2 + $0xe0] sm:$0xff]  ;;  %v1630_v14 = vpack.c.bf16 %v1481_v46, %v1481_v46  ;;  %v1353_v15 = vadd.f32 %v1337_v23, %v2548_v17  ;;  %v2751_v26 = vld [vmem:[#allocation14_spill] sm:$0xff]  ;;  %v1020_v19 = vld [vmem:[#allocation2 + $0x68] sm:$0xff]  ;;  %v906_v12 = vadd.f32 %v1830_v45, %v198_v34 }
 0x134   :  { %968 = vst.msk [vmem:[#allocation2 + $0x1e0] sm:$0xff] %vm22_vm0, %v903_v20  ;;  %v1479_v0 = vmax.f32 %v1463_v48, 0.0  ;;  %v1340_v56 = vmul.f32 %v2751_v26, %v1260_v27  ;;  %v1373_v54 = vld [vmem:[#allocation2 + $0x1d8] sm:$0xff]  ;;  %v1468_v33 = vadd.f32 %v1452_v38, %v1355_v47  ;;  %955 = vst.msk [vmem:[#allocation2 + $0x178] sm:$0xff] %vm22_vm0, %v890_v9  ;;  %v888_v21 = vadd.f32 %v686_v63, %v180_v41  ;;  %v2752_v58 = vld [vmem:[#allocation4_spill] sm:$0xff] }
 0x135   :  { %1559 = vst.msk [vmem:[%s2724_s4 + $0x10] sm:$0xf] %vm1554_vm1, %v1627_v59  ;;  %v1453_v10 = vmul.f32 %v1424_v4, %v1373_v54  ;;  %1562 = vst.msk [vmem:[%s2724_s4 + $0x1c] sm:$0xf] %vm1554_vm1, %v1630_v14  ;;  %v1466_v8 = vadd.f32 %v1450_v49, %v1353_v15  ;;  %v904_v16 = vadd.f32 %v831_v43, %v196_v31  ;;  %v2753_v30 = vld [vmem:[#allocation12_spill] sm:$0xff]  ;;  %v1151_v5 = vld [vmem:[#allocation2 + $0xf8] sm:$0xff] }
 0x136   :  { %v1628_v17 = vpack.c.bf16 %v1479_v0, %v1479_v0  ;;  %v1356_v60 = vadd.f32 %v1340_v56, %v2553_v32  ;;  %v1258_v29 = vld [vmem:[#allocation2 + $0x148] sm:$0xff]  ;;  %v1246_v40 = vadd.f32 %v2563_v52, %v2574_v25  ;;  %v1228_v51 = vmul.f32 %v2752_v58, %v1148_v13  ;;  %971 = vst.msk [vmem:[#allocation2 + $0x1f8] sm:$0xff] %vm22_vm0, %v906_v12  ;;  %v2754_v57 = vld [vmem:[#allocation3_spill] sm:$0xff]  ;;  %v1432_v32 = vpop.permute.xlu0 %1431  ;;  %v1436_v45 = vpop.permute.xlu1 %1435  ;;  %v2756_v46 = vld [vmem:[#allocation17_spill] sm:$0xff] }
 0x137   :  { %v1484_v18 = vmax.f32 %v1468_v33, 0.0  ;;  %v1338_v11 = vmul.f32 %v2753_v30, %v1258_v29  ;;  %953 = vst.msk [vmem:[#allocation2 + $0x168] sm:$0xff] %vm22_vm0, %v888_v21  ;;  %v1134_v22 = vadd.f32 %v2580_v3, %v1006_v50  ;;  %v1116_v36 = vmul.f32 %v2754_v57, %v1020_v19  ;;  %v1371_v55 = vld [vmem:[#allocation2 + $0x1c8] sm:$0xff]  ;;  %969 = vst.msk [vmem:[#allocation2 + $0x1e8] sm:$0xff] %vm22_vm0, %v904_v16  ;;  %v1004_v1 = vld [vmem:[%s2723_s2 + $0x68] sm:$0xff] }
 0x138   :  { %1560 = vst.msk [vmem:[%s2724_s4 + $0x14] sm:$0xf] %vm1554_vm1, %v1628_v17  ;;  %v1482_v52 = vmax.f32 %v1466_v8, 0.0  ;;  %v1469_v25 = vadd.f32 %v1453_v10, %v1356_v60  ;;  %v1263_v39 = vld [vmem:[#allocation2 + $0x170] sm:$0xff]  ;;  %v1451_v53 = vmul.f32 %v2610_v7, %v1371_v55  ;;  %v2755_v28 = vld [vmem:[#allocation19_spill] sm:$0xff]  ;;  %v1244_v20 = vadd.f32 %v1228_v51, %v2587_v61  ;;  %v2757_v44 = vld [vmem:[#allocation6_spill] sm:$0xff] }
 0x139   :  { %v1633_v3 = vpack.c.bf16 %v1484_v18, %v1484_v18  ;;  %v1354_v62 = vadd.f32 %v1338_v11, %v2555_v24  ;;  %v1343_v35 = vmul.f32 %v2755_v28, %v1263_v39  ;;  %v1376_v37 = vld [vmem:[#allocation2 + $0x1f0] sm:$0xff]  ;;  %v1261_v6 = vld [vmem:[#allocation2 + $0x160] sm:$0xff]  ;;  %v1231_v23 = vmul.f32 %v2757_v44, %v1151_v5  ;;  %v1149_v42 = vld [vmem:[#allocation2 + $0xe8] sm:$0xff] }
 0x13a   :  { %v1631_v63 = vpack.c.bf16 %v1482_v52, %v1482_v52  ;;  %v1485_v4 = vmax.f32 %v1469_v25, 0.0  ;;  %v1341_v48 = vmul.f32 %v2756_v46, %v1261_v6  ;;  %v1456_v34 = vmul.f32 %v1436_v45, %v1376_v37  ;;  %v2758_v31 = vld [vmem:[#allocation18_spill] sm:$0xff]  ;;  %v2759_v14 = vld [vmem:[#allocation5_spill] sm:$0xff]  ;;  %v1440_v15 = vpop.permute.xlu0 %1439  ;;  %v2760_v17 = vld [vmem:[#allocation16_spill] sm:$0xff] }
 0x13b   :  { %v1374_v38 = vld [vmem:[#allocation2 + $0x1e0] sm:$0xff]  ;;  %1565 = vst.msk [vmem:[%s2724_s4 + $0x28] sm:$0xf] %vm1554_vm1, %v1633_v3  ;;  %v1467_v24 = vadd.f32 %v1451_v53, %v1354_v62  ;;  %v1359_v7 = vadd.f32 %v1343_v35, %v1246_v40  ;;  %v1132_v41 = vadd.f32 %v1116_v36, %v1004_v1  ;;  %v1264_v47 = vld [vmem:[#allocation2 + $0x178] sm:$0xff]  ;;  %v1247_v49 = vadd.f32 %v1231_v23, %v1134_v22 }
 0x13c   :  { %1563 = vst.msk [vmem:[%s2724_s4 + $0x20] sm:$0xf] %vm1554_vm1, %v1631_v63  ;;  %v1634_v61 = vpack.c.bf16 %v1485_v4, %v1485_v4  ;;  %v1357_v43 = vadd.f32 %v1341_v48, %v1244_v20  ;;  %v1454_v59 = vmul.f32 %v1428_v2, %v1374_v38  ;;  %v1344_v13 = vmul.f32 %v2758_v31, %v1264_v47 }
 0x13d   :  { %v1483_v27 = vmax.f32 %v1467_v24, 0.0  ;;  %v1472_v9 = vadd.f32 %v1456_v34, %v1359_v7  ;;  %v1229_v0 = vmul.f32 %v2759_v14, %v1149_v42  ;;  %v1377_v56 = vld [vmem:[#allocation2 + $0x1f8] sm:$0xff] }
 0x13e   :  { %1566 = vst.msk [vmem:[%s2724_s4 + $0x2c] sm:$0xf] %vm1554_vm1, %v1634_v61  ;;  %v1470_v26 = vadd.f32 %v1454_v59, %v1357_v43  ;;  %v1262_v54 = vld [vmem:[#allocation2 + $0x168] sm:$0xff]  ;;  %v1360_v2 = vadd.f32 %v1344_v13, %v1247_v49  ;;  %v1457_v33 = vmul.f32 %v1440_v15, %v1377_v56 }
 0x13f   :  { %v1632_v50 = vpack.c.bf16 %v1483_v27, %v1483_v27  ;;  %v1488_v19 = vmax.f32 %v1472_v9, 0.0  ;;  %v1375_v10 = vld [vmem:[#allocation2 + $0x1e8] sm:$0xff]  ;;  %v1245_v12 = vadd.f32 %v1229_v0, %v1132_v41  ;;  %v1342_v8 = vmul.f32 %v2760_v17, %v1262_v54 }
 0x140   :  { %v1486_v21 = vmax.f32 %v1470_v26, 0.0  ;;  %v1473_v29 = vadd.f32 %v1457_v33, %v1360_v2  ;;  %v1455_v58 = vmul.f32 %v1432_v32, %v1375_v10 }
 0x141   :  { %1564 = vst.msk [vmem:[%s2724_s4 + $0x24] sm:$0xf] %vm1554_vm1, %v1632_v50  ;;  %v1637_v60 = vpack.c.bf16 %v1488_v19, %v1488_v19  ;;  %v1358_v40 = vadd.f32 %v1342_v8, %v1245_v12 }
 0x142   :  { %v1635_v16 = vpack.c.bf16 %v1486_v21, %v1486_v21  ;;  %v1489_v51 = vmax.f32 %v1473_v29, 0.0 }
 0x143   :  { %1569 = vst.msk [vmem:[%s2724_s4 + $0x38] sm:$0xf] %vm1554_vm1, %v1637_v60  ;;  %v1471_v18 = vadd.f32 %v1455_v58, %v1358_v40 }
 0x144   :  { %1567 = vst.msk [vmem:[%s2724_s4 + $0x30] sm:$0xf] %vm1554_vm1, %v1635_v16  ;;  %v1638_v30 = vpack.c.bf16 %v1489_v51, %v1489_v51 }
 0x145   :  { %v1487_v11 = vmax.f32 %v1471_v18, 0.0 }
 0x146   :  { %1570 = vst.msk [vmem:[%s2724_s4 + $0x3c] sm:$0xf] %vm1554_vm1, %v1638_v30 }
 0x147   :  { %v1636_v22 = vpack.c.bf16 %v1487_v11, %v1487_v11 }
 0x149   :  { %1568 = vst.msk [vmem:[%s2724_s4 + $0x34] sm:$0xf] %vm1554_vm1, %v1636_v22 }

// kernel: gnn_forward.11
= control target key start
LH: loop header
LB: loop body
LE: loop exit
PB: predicated region body
PF: predicated region fallthrough
CT: control target
= control target key end

     0   :  { %v3463_v1 = vmov 0   ;;  %vm31_vm0 = vcmask 261120   ;;  %v3464_v3 = vmov 0.0   ;;  %v3465_v58 = vmov 1   ;;  %s3476_s29 = smov 96   ;;  %s3477_s30 = smov 32   ;;  %s4799_s1 = inlined_call_operand.vmem [shape: bf16[128,32], index: 1, kind: input, shape index: {}, may-alias: {1,2}]   ;;  %s4800_s0 = inlined_call_operand.vmem [shape: s8[128,128], index: 0, kind: input, shape index: {}]   ;;  %s4801_s3 = inlined_call_operand.vmem [shape: bf16[128,11], index: 3, kind: input, shape index: {}]   ;;  %s4802_s5 = inlined_call_operand.vmem [shape: bf16[32,352], index: 5, kind: input, shape index: {}]   ;;  %s4803_s4 = inlined_call_operand.vmem [shape: bf16[32,352], index: 4, kind: input, shape index: {}]   ;;  %s4804_s2 = inlined_call_operand.vmem [shape: bf16[128,32], index: 2, kind: input, shape index: {}, may-alias: {1,2}]   ;;  %s4805_s6 = inlined_call_operand.vmem [shape: f32[1,352], index: 6, kind: input, shape index: {}]   ;;  %s4806_s7 = inlined_call_operand.vmem [shape: bf16[128,32], index: 7, kind: output, shape index: {}]  }
   0x1   :  { %v3431_v0 = vld [vmem:[%s4799_s1] sm:$0xff]   ;;  %2980 = vset.pattern.permute.xlu1 %v3463_v1  ;;  %2969 = vset.pattern.permute.xlu0 %v3463_v1  ;;  %v3432_v2 = vld [vmem:[%s4799_s1 + $0x8] sm:$0xff]   ;;  %34 = vst.msk [vmem:[#allocation2 + $0x10] sm:$0xff] %vm31_vm0, %v3464_v3  ;;  %32 = vst.msk [vmem:[#allocation2] sm:$0xff] %vm31_vm0, %v3464_v3  ;;  %vm2646_vm1 = vcmask 257024  }
   0x2   :  { %457 = vmatprep.mubr.bf16.mxu1 %v3463_v1  ;;  %2834 = vmatprep.subr.bf16.mxu0 %v3431_v0  ;;  %33 = vst.msk [vmem:[#allocation2 + $0x8] sm:$0xff] %vm31_vm0, %v3464_v3  ;;  %35 = vst.msk [vmem:[#allocation2 + $0x18] sm:$0xff] %vm31_vm0, %v3464_v3  ;;  %v3433_v4 = vld [vmem:[%s4799_s1 + $0x10] sm:$0xff]   ;;  %v3434_v5 = vld [vmem:[%s4799_s1 + $0x18] sm:$0xff]  }
   0x3   :  { %2835 = vmatpush3.bf16.msra.mxu0 %v3431_v0  ;;  %36 = vst.msk [vmem:[#allocation2 + $0x20] sm:$0xff] %vm31_vm0, %v3464_v3  ;;  %37 = vst.msk [vmem:[#allocation2 + $0x28] sm:$0xff] %vm31_vm0, %v3464_v3  ;;  %v3552_v6 = vld [vmem:[%s4800_s0] sm:$0xff]  ;;  %v2792_v8 = vld [vmem:[%s4801_s3 + $0x10] sm:$0xff]  }
   0x4   :  { %38 = vst.msk [vmem:[#allocation2 + $0x30] sm:$0xff] %vm31_vm0, %v3464_v3  ;;  %39 = vst.msk [vmem:[#allocation2 + $0x38] sm:$0xff] %vm31_vm0, %v3464_v3  ;;  %2836 = vmatprep.subr.bf16.mxu0 %v3432_v2  ;;  %v68_v7 = vunpack.c.l.s8.bf16 %v3552_v6  ;;  %v2793_v9 = vld [vmem:[%s4801_s3 + $0x18] sm:$0xff]   ;;  %v3435_v10 = vld [vmem:[%s4799_s1 + $0x20] sm:$0xff]   ;;  %v2769_v11 = vunpack.c.l.bf16 %v2792_v8  ;;  %v2770_v12 = vunpack.c.h.bf16 %v2792_v8  ;;  %v69_v56 = vunpack.c.h.s8.bf16 %v3552_v6 }
   0x5   :  { %40 = vst.msk [vmem:[#allocation2 + $0x40] sm:$0xff] %vm31_vm0, %v3464_v3  ;;  %41 = vst.msk [vmem:[#allocation2 + $0x48] sm:$0xff] %vm31_vm0, %v3464_v3  ;;  %v2773_v13 = vunpack.c.l.bf16 %v2793_v9  ;;  %v2774_v14 = vunpack.c.h.bf16 %v2793_v9  ;;  %v2795_v15 = vld [vmem:[%s4801_s3 + $0x28] sm:$0xff]   ;;  %v3439_v16 = vld [vmem:[%s4802_s5 + $0x4] ss:$12 sps:$4 sm:$0xff]   ;;  %v3466_v6 = vmov 2  }
   0x6   :  { %42 = vst.msk [vmem:[#allocation2 + $0x50] sm:$0xff] %vm31_vm0, %v3464_v3  ;;  %43 = vst.msk [vmem:[#allocation2 + $0x58] sm:$0xff] %vm31_vm0, %v3464_v3  ;;  %2850 = vmatprep.mubr.bf16.mxu0 %v68_v7  ;;  %v3441_v17 = vld [vmem:[%s4802_s5] ss:$12 sps:$4 sm:$0xff]   ;;  %v3573_v18 = vpack.i.bf16 %v2770_v12, %v2769_v11  ;;  %425 = vmatprep.subr.bf16.mxu1 %v3439_v16  ;;  %v3442_v20 = vld [vmem:[%s4802_s5 + $0x1c] ss:$12 sps:$4 sm:$0xff]   ;;  %v2781_v23 = vunpack.c.l.bf16 %v2795_v15  ;;  %v2782_v24 = vunpack.c.h.bf16 %v2795_v15 }
   0x7   :  { %44 = vst.msk [vmem:[#allocation2 + $0x60] sm:$0xff] %vm31_vm0, %v3464_v3  ;;  %45 = vst.msk [vmem:[#allocation2 + $0x68] sm:$0xff] %vm31_vm0, %v3464_v3  ;;  %2837 = vmatpush3.bf16.msra.mxu0 %v3432_v2  ;;  %v2760_v19 = vld [vmem:[%s4801_s3] sm:$0xff]   ;;  %v3436_v21 = vld [vmem:[%s4799_s1 + $0x28] sm:$0xff]   ;;  %v3585_v22 = vpack.i.bf16 %v2774_v14, %v2773_v13  ;;  %426 = vmatpush1.bf16.msra.mxu1 %v3441_v17  ;;  %v3468_v11 = vmov 4   ;;  %v3469_v15 = vmov 5  }
   0x8   :  { %46 = vst.msk [vmem:[#allocation2 + $0x70] sm:$0xff] %vm31_vm0, %v3464_v3  ;;  %47 = vst.msk [vmem:[#allocation2 + $0x78] sm:$0xff] %vm31_vm0, %v3464_v3  ;;  %2838 = vmatprep.subr.bf16.mxu0 %v3433_v4  ;;  %2982 = vperm.xlu1 %2980, %v3573_v18   ;;  %v2791_v25 = vld [vmem:[%s4801_s3 + $0x8] sm:$0xff]   ;;  %v2797_v26 = vld [vmem:[%s4801_s3 + $0x38] sm:$0xff]   ;;  %v2761_v27 = vunpack.c.l.bf16 %v2760_v19  ;;  %v2762_v28 = vunpack.c.h.bf16 %v2760_v19  ;;  %v3602_v34 = vpack.i.bf16 %v2782_v24, %v2781_v23  ;;  %v3470_v16 = vmov 6  }
   0x9   :  { %427 = vmatprep.subr.bf16.mxu1 %v3442_v20  ;;  %v3444_v29 = vld [vmem:[%s4802_s5 + $0x18] ss:$12 sps:$4 sm:$0xff]   ;;  %v2765_v30 = vunpack.c.l.bf16 %v2791_v25  ;;  %v2766_v31 = vunpack.c.h.bf16 %v2791_v25  ;;  %v2789_v35 = vunpack.c.l.bf16 %v2797_v26  ;;  %v2790_v36 = vunpack.c.h.bf16 %v2797_v26  ;;  %v3437_v38 = vld [vmem:[%s4799_s1 + $0x30] sm:$0xff]   ;;  %v3445_v43 = vld [vmem:[%s4803_s4] ss:$12 sps:$4 sm:$0xff]  }
   0xa   :  { %v3596_v32 = vpack.i.bf16 %v2762_v28, %v2761_v27  ;;  %v3447_v33 = vld [vmem:[%s4803_s4 + $0x4] ss:$12 sps:$4 sm:$0xff]   ;;  %v3438_v46 = vld [vmem:[%s4799_s1 + $0x38] sm:$0xff]   ;;  %v65_v52 = vld [vmem:[%s4800_s0 + $0x8] sm:$0xff]  ;;  %v3471_v17 = vmov 7   ;;  %v3472_v19 = vmov 8  }
   0xb   :  { %2839 = vmatpush3.bf16.msra.mxu0 %v3433_v4  ;;  %v2794_v37 = vld [vmem:[%s4801_s3 + $0x20] sm:$0xff]   ;;  %v3611_v39 = vpack.i.bf16 %v2766_v31, %v2765_v30  ;;  %428 = vmatpush1.bf16.msra.mxu1 %v3444_v29  ;;  %v3622_v44 = vpack.i.bf16 %v2790_v36, %v2789_v35  ;;  %v2796_v45 = vld [vmem:[%s4801_s3 + $0x30] sm:$0xff]   ;;  %v3456_v48 = vld [vmem:[%s4803_s4 + $0x1c] ss:$12 sps:$4 sm:$0xff]   ;;  %v70_v57 = vunpack.c.l.s8.bf16 %v65_v52  ;;  %v71_v63 = vunpack.c.h.s8.bf16 %v65_v52 }
   0xc   :  { %2840 = vmatprep.subr.bf16.mxu0 %v3434_v5  ;;  %2987 = vperm.xlu1 %2980, %v3585_v22   ;;  %v3616_v40 = vld [vmem:[%s4804_s2] sm:$0xff]   ;;  %v2777_v41 = vunpack.c.l.bf16 %v2794_v37  ;;  %v2778_v42 = vunpack.c.h.bf16 %v2794_v37  ;;  %v2785_v49 = vunpack.c.l.bf16 %v2796_v45  ;;  %v2786_v50 = vunpack.c.h.bf16 %v2796_v45  ;;  %v3449_v54 = vld [vmem:[%s4802_s5 + $0x8] ss:$12 sps:$4 sm:$0xff]   ;;  %v67_v2 = vld [vmem:[%s4800_s0 + $0x18] sm:$0xff] }
   0xd   :  { %2971 = vperm.xlu0 %2969, %v3596_v32   ;;  %691 = vmatprep.subr.bf16.mxu1 %v3447_v33  ;;  %v3454_v51 = vld [vmem:[%s4803_s4 + $0x18] ss:$12 sps:$4 sm:$0xff]   ;;  %v3655_v55 = vld [vmem:[%s4804_s2 + $0x8] sm:$0xff]   ;;  %v66_v60 = vld [vmem:[%s4800_s0 + $0x10] sm:$0xff]  ;;  %v75_v7 = vunpack.c.h.s8.bf16 %v67_v2  ;;  %v3473_v20 = vmov 9  }
   0xe   :  { %v3631_v47 = vpack.i.bf16 %v2778_v42, %v2777_v41  ;;  %2689 = vmatmul.mubr.msk.bf16.vlgmr.msra.gmra.mrb[0].mxu1 %vm31_vm0, %v3616_v40  ;;  %v3647_v53 = vpack.i.bf16 %v2786_v50, %v2785_v49  ;;  %v3452_v59 = vld [vmem:[%s4802_s5 + $0x20] ss:$12 sps:$4 sm:$0xff]   ;;  %v3458_v61 = vld [vmem:[%s4803_s4 + $0x8] ss:$12 sps:$4 sm:$0xff]   ;;  %v72_v0 = vunpack.c.l.s8.bf16 %v66_v60  ;;  %v73_v3 = vunpack.c.h.s8.bf16 %v66_v60  ;;  %v3453_v4 = vld [vmem:[%s4804_s2 + $0x18] sm:$0xff]  }
   0xf   :  { %2841 = vmatpush3.bf16.msra.mxu0 %v3434_v5  ;;  %692 = vmatpush1.bf16.msra.mxu1 %v3445_v43  ;;  %v3451_v62 = vld [vmem:[%s4804_s2 + $0x10] sm:$0xff]   ;;  %v74_v5 = vunpack.c.l.s8.bf16 %v67_v2  ;;  %v3457_v8 = vld [vmem:[%s4804_s2 + $0x20] sm:$0xff]   ;;  %v3459_v9 = vld [vmem:[%s4804_s2 + $0x28] sm:$0xff]  }
  0x10   :  { %2842 = vmatprep.subr.bf16.mxu0 %v3435_v10  ;;  %2997 = vperm.xlu1 %2980, %v3602_v34   ;;  %v3460_v12 = vld [vmem:[%s4804_s2 + $0x30] sm:$0xff]   ;;  %v3461_v13 = vld [vmem:[%s4803_s4 + $0x20] ss:$12 sps:$4 sm:$0xff]   ;;  %v3462_v14 = vld [vmem:[%s4804_s2 + $0x38] sm:$0xff]  }
  0x11   :  { %2976 = vperm.xlu0 %2969, %v3611_v39   ;;  %467 = vmatprep.mubr.bf16.mxu1 %v3463_v1  ;;  %v50_v26 = vld [vmem:[#allocation2 + $0x10] sm:$0xff]  ;;  %v48_v27 = vld [vmem:[#allocation2] sm:$0xff]  ;;  %v51_v29 = vld [vmem:[#allocation2 + $0x18] sm:$0xff] }
  0x12   :  { %693 = vmatprep.subr.bf16.mxu1 %v3456_v48  ;;  %v55_v41 = vld [vmem:[#allocation2 + $0x38] sm:$0xff] }
  0x13   :  { %2843 = vmatpush3.bf16.msra.mxu0 %v3435_v10  ;;  %694 = vmatpush1.bf16.msra.mxu1 %v3454_v51  ;;  %v3467_v10 = vmov 3   ;;  %v59_v60 = vld [vmem:[#allocation2 + $0x58] sm:$0xff] }
  0x14   :  { %2844 = vmatprep.subr.bf16.mxu0 %v3436_v21  ;;  %3007 = vperm.xlu1 %2980, %v3622_v44  }
  0x15   :  { %2992 = vperm.xlu0 %2969, %v3631_v47  }
  0x16   :  { %2690 = vmatmul.mubr.msk.bf16.gmra.mrb[4].mxu1 %vm31_vm0, %v3655_v55 }
  0x17   :  { %2845 = vmatpush3.bf16.msra.mxu0 %v3436_v21  ;;  %477 = vmatprep.mubr.bf16.mxu1 %v3463_v1  ;;  %v3474_v21 = vmov 10  }
  0x18   :  { %2846 = vmatprep.subr.bf16.mxu0 %v3437_v38  ;;  %3017 = vset.pattern.permute.xlu1 %v3465_v58 }
  0x19   :  { %3019 = vperm.xlu1 %3017, %v3611_v39   ;;  %3002 = vperm.xlu0 %2969, %v3647_v53  }
  0x1b   :  { %2847 = vmatpush3.bf16.msra.mxu0 %v3437_v38  ;;  %v54_v38 = vld [vmem:[#allocation2 + $0x30] sm:$0xff] }
  0x1c   :  { %2848 = vmatprep.subr.bf16.mxu0 %v3438_v46 }
  0x1d   :  { %3024 = vperm.xlu1 %3017, %v3573_v18   ;;  %3011 = vset.pattern.permute.xlu0 %v3465_v58 }
  0x1e   :  { %3013 = vperm.xlu0 %3011, %v3596_v32   ;;  %2691 = vmatmul.mubr.msk.bf16.gmra.mrb[8].mxu1 %vm31_vm0, %v3451_v62 }
  0x1f   :  { %2849 = vmatpush3.bf16.msra.mxu0 %v3438_v46  ;;  %487 = vmatprep.mubr.bf16.mxu1 %v3463_v1 }
  0x20   :  { %2866 = vmatprep.subr.bf16.mxu0 %v3449_v54 }
  0x21   :  { %3034 = vperm.xlu1 %3017, %v3631_v47  }
  0x22   :  { %2851 = vmatmul.mubr.bf16.vlgmr.msra.gmra.mrb[0].mxu0 %v69_v56  ;;  %3029 = vperm.xlu0 %3011, %v3585_v22  }
  0x23   :  { %2854 = vmatprep.mubr.bf16.mxu0 %v70_v57  ;;  %2867 = vmatpush3.bf16.msra.mxu0 %v3449_v54  ;;  %v58_v54 = vld [vmem:[#allocation2 + $0x50] sm:$0xff]  ;;  %v56_v57 = vld [vmem:[#allocation2 + $0x40] sm:$0xff] }
  0x24   :  { %2868 = vmatprep.subr.bf16.mxu0 %v3452_v59 }
  0x25   :  { %3044 = vperm.xlu1 %3017, %v3647_v53  }
  0x26   :  { %3039 = vperm.xlu0 %3011, %v3602_v34   ;;  %2692 = vmatmul.mubr.msk.bf16.gmra.mrb[12].mxu1 %vm31_vm0, %v3453_v4 }
  0x27   :  { %2869 = vmatpush3.bf16.msra.mxu0 %v3452_v59  ;;  %497 = vmatprep.mubr.bf16.mxu1 %v3463_v1 }
  0x28   :  { %2886 = vmatprep.subr.bf16.mxu0 %v3458_v61 }
  0x29   :  { %3053 = vset.pattern.permute.xlu1 %v3466_v6 }
  0x2a   :  { %2855 = vmatmul.mubr.bf16.gmra.mrb[4].mxu0 %v71_v63  ;;  %3055 = vperm.xlu1 %3053, %v3596_v32   ;;  %v57_v63 = vld [vmem:[#allocation2 + $0x48] sm:$0xff] }
  0x2b   :  { %2858 = vmatprep.mubr.bf16.mxu0 %v72_v0  ;;  %3049 = vperm.xlu0 %3011, %v3622_v44  }
  0x2e   :  { %3066 = vperm.xlu1 %3053, %v3573_v18   ;;  %2693 = vmatmul.mubr.msk.bf16.gmra.mrb[16].mxu1 %vm31_vm0, %v3457_v8 }
  0x2f   :  { %3059 = vset.pattern.permute.xlu0 %v3466_v6  ;;  %507 = vmatprep.mubr.bf16.mxu1 %v3463_v1 }
  0x30   :  { %3061 = vperm.xlu0 %3059, %v3611_v39  }
  0x32   :  { %2859 = vmatmul.mubr.bf16.gmra.mrb[8].mxu0 %v73_v3  ;;  %3071 = vperm.xlu1 %3053, %v3585_v22  }
  0x33   :  { %2862 = vmatprep.mubr.bf16.mxu0 %v74_v5 }
  0x34   :  { %3076 = vperm.xlu0 %3059, %v3631_v47  }
  0x36   :  { %3081 = vperm.xlu1 %3053, %v3602_v34   ;;  %2694 = vmatmul.mubr.msk.bf16.gmra.mrb[20].mxu1 %vm31_vm0, %v3459_v9 }
  0x37   :  { %517 = vmatprep.mubr.bf16.mxu1 %v3463_v1 }
  0x38   :  { %3086 = vperm.xlu0 %3059, %v3647_v53  }
  0x3a   :  { %2863 = vmatmul.mubr.bf16.gmra.mrb[12].mxu0 %v75_v7  ;;  %3091 = vperm.xlu1 %3053, %v3622_v44  }
  0x3b   :  { %2870 = vmatprep.mubr.msk.bf16.mxu0 %vm31_vm0, %v3616_v40 }
  0x3c   :  { %3095 = vset.pattern.permute.xlu0 %v3467_v10 }
  0x3d   :  { %3097 = vperm.xlu0 %3095, %v3596_v32  }
  0x3e   :  { %3101 = vset.pattern.permute.xlu1 %v3467_v10  ;;  %2695 = vmatmul.mubr.msk.bf16.gmra.mrb[24].mxu1 %vm31_vm0, %v3460_v12 }
  0x3f   :  { %3103 = vperm.xlu1 %3101, %v3611_v39   ;;  %527 = vmatprep.mubr.bf16.mxu1 %v3463_v1 }
  0x41   :  { %3113 = vperm.xlu0 %3095, %v3585_v22  }
  0x42   :  { %2871 = vmatmul.mubr.msk.bf16.vlgmr.msra.gmra.mrb[16].mxu0 %vm31_vm0, %v3655_v55 }
  0x43   :  { %2874 = vmatprep.mubr.msk.bf16.mxu0 %vm31_vm0, %v3451_v62  ;;  %2887 = vmatpush3.bf16.msra.mxu0 %v3458_v61 }
  0x44   :  { %3108 = vperm.xlu1 %3101, %v3573_v18   ;;  %2888 = vmatprep.subr.bf16.mxu0 %v3461_v13 }
  0x45   :  { %3123 = vperm.xlu0 %3095, %v3602_v34  }
  0x46   :  { %2696 = vmatmul.mubr.msk.bf16.gmra.mrb[28].mxu1 %vm31_vm0, %v3462_v14 }
  0x47   :  { %2889 = vmatpush3.bf16.msra.mxu0 %v3461_v13  ;;  %723 = vmatprep.mubr.bf16.mxu1 %v3463_v1 }
  0x48   :  { %3118 = vperm.xlu1 %3101, %v3631_v47  }
  0x49   :  { %3133 = vperm.xlu0 %3095, %v3622_v44  }
  0x4a   :  { %2875 = vmatmul.mubr.msk.bf16.gmra.mrb[20].mxu0 %vm31_vm0, %v3453_v4 }
  0x4b   :  { %2878 = vmatprep.mubr.msk.bf16.mxu0 %vm31_vm0, %v3457_v8 }
  0x4c   :  { %3128 = vperm.xlu1 %3101, %v3647_v53  }
  0x4d   :  { %3143 = vset.pattern.permute.xlu0 %v3468_v11 }
  0x4e   :  { %3145 = vperm.xlu0 %3143, %v3611_v39  }
  0x50   :  { %3137 = vset.pattern.permute.xlu1 %v3468_v11 }
  0x51   :  { %3139 = vperm.xlu1 %3137, %v3596_v32  }
  0x52   :  { %2879 = vmatmul.mubr.msk.bf16.gmra.mrb[24].mxu0 %vm31_vm0, %v3459_v9  ;;  %3160 = vperm.xlu0 %3143, %v3631_v47  }
  0x53   :  { %2882 = vmatprep.mubr.msk.bf16.mxu0 %vm31_vm0, %v3460_v12  ;;  %v62_v12 = vld [vmem:[#allocation2 + $0x70] sm:$0xff] }
  0x55   :  { %3150 = vperm.xlu1 %3137, %v3573_v18  }
  0x56   :  { %3170 = vperm.xlu0 %3143, %v3647_v53  }
  0x59   :  { %3155 = vperm.xlu1 %3137, %v3585_v22  }
  0x5a   :  { %2883 = vmatmul.mubr.msk.bf16.gmra.mrb[28].mxu0 %vm31_vm0, %v3462_v14  ;;  %3179 = vset.pattern.permute.xlu0 %v3469_v15  ;;  %v60_v14 = vld [vmem:[#allocation2 + $0x60] sm:$0xff] }
  0x5b   :  { %3181 = vperm.xlu0 %3179, %v3596_v32  }
  0x5d   :  { %3165 = vperm.xlu1 %3137, %v3602_v34  }
  0x5f   :  { %3197 = vperm.xlu0 %3179, %v3585_v22  }
  0x61   :  { %3175 = vperm.xlu1 %3137, %v3622_v44  }
  0x63   :  { %3207 = vperm.xlu0 %3179, %v3602_v34  }
  0x65   :  { %3185 = vset.pattern.permute.xlu1 %v3469_v15 }
  0x66   :  { %3187 = vperm.xlu1 %3185, %v3611_v39  }
  0x67   :  { %3217 = vperm.xlu0 %3179, %v3622_v44  }
  0x6a   :  { %3192 = vperm.xlu1 %3185, %v3573_v18  }
  0x6b   :  { %3227 = vset.pattern.permute.xlu0 %v3470_v16 }
  0x6c   :  { %3229 = vperm.xlu0 %3227, %v3611_v39  }
  0x6e   :  { %3202 = vperm.xlu1 %3185, %v3631_v47  }
  0x70   :  { %3244 = vperm.xlu0 %3227, %v3631_v47  }
  0x72   :  { %3212 = vperm.xlu1 %3185, %v3647_v53  }
  0x74   :  { %3254 = vperm.xlu0 %3227, %v3647_v53  }
  0x76   :  { %3221 = vset.pattern.permute.xlu1 %v3470_v16 }
  0x77   :  { %3223 = vperm.xlu1 %3221, %v3596_v32  }
  0x78   :  { %3263 = vset.pattern.permute.xlu0 %v3471_v17 }
  0x79   :  { %3265 = vperm.xlu0 %3263, %v3596_v32  }
  0x7b   :  { %3234 = vperm.xlu1 %3221, %v3573_v18  }
  0x7d   :  { %3281 = vperm.xlu0 %3263, %v3585_v22  }
  0x7f   :  { %3239 = vperm.xlu1 %3221, %v3585_v22  }
  0x81   :  { %3291 = vperm.xlu0 %3263, %v3602_v34  }
  0x83   :  { %3249 = vperm.xlu1 %3221, %v3602_v34  }
  0x85   :  { %3301 = vperm.xlu0 %3263, %v3622_v44  }
  0x87   :  { %3259 = vperm.xlu1 %3221, %v3622_v44   ;;  %v3793_v23 = vpop.permute.xlu1 %2982 }
  0x88   :  { %4882 = vst [vmem:[#allocation3_spill] sm:$0xff] %v3793_v23 }
  0x89   :  { %3311 = vset.pattern.permute.xlu0 %v3472_v19 }
  0x8a   :  { %3313 = vperm.xlu0 %3311, %v3611_v39  }
  0x8b   :  { %3269 = vset.pattern.permute.xlu1 %v3471_v17  ;;  %v3798_v24 = vpop.permute.xlu1 %2987  ;;  %v63_v17 = vld [vmem:[#allocation2 + $0x78] sm:$0xff] }
  0x8c   :  { %3271 = vperm.xlu1 %3269, %v3611_v39   ;;  %4883 = vst [vmem:[#allocation4_spill] sm:$0xff] %v3798_v24 }
  0x8e   :  { %3328 = vperm.xlu0 %3311, %v3631_v47  }
  0x8f   :  { %v3801_v25 = vpop.permute.xlu1 %2997 }
  0x90   :  { %3276 = vperm.xlu1 %3269, %v3573_v18   ;;  %4884 = vst [vmem:[#allocation5_spill] sm:$0xff] %v3801_v25 }
  0x92   :  { %3338 = vperm.xlu0 %3311, %v3647_v53  }
  0x93   :  { %v3803_v28 = vpop.permute.xlu1 %3007 }
  0x94   :  { %3286 = vperm.xlu1 %3269, %v3631_v47   ;;  %4885 = vst [vmem:[#allocation6_spill] sm:$0xff] %v3803_v28 }
  0x96   :  { %3347 = vset.pattern.permute.xlu0 %v3473_v20 }
  0x97   :  { %3349 = vperm.xlu0 %3347, %v3596_v32  }
  0x98   :  { %3296 = vperm.xlu1 %3269, %v3647_v53   ;;  %v3808_v37 = vpop.permute.xlu1 %3019 }
  0x9b   :  { %3365 = vperm.xlu0 %3347, %v3585_v22  }
  0x9c   :  { %3305 = vset.pattern.permute.xlu1 %v3472_v19  ;;  %v3812_v49 = vpop.permute.xlu1 %3024 }
  0x9d   :  { %3307 = vperm.xlu1 %3305, %v3596_v32  }
  0x9f   :  { %3375 = vperm.xlu0 %3347, %v3602_v34  }
  0xa0   :  { %v3821_v0 = vpop.permute.xlu1 %3034 }
  0xa1   :  { %3318 = vperm.xlu1 %3305, %v3573_v18   ;;  %4886 = vst [vmem:[#allocation7_spill] sm:$0xff] %v3821_v0 }
  0xa3   :  { %3385 = vperm.xlu0 %3347, %v3622_v44  }
  0xa4   :  { %v3827_v15 = vpop.permute.xlu1 %3044 }
  0xa5   :  { %3323 = vperm.xlu1 %3305, %v3585_v22   ;;  %4887 = vst [vmem:[#allocation8_spill] sm:$0xff] %v3827_v15 }
  0xa7   :  { %3395 = vset.pattern.permute.xlu0 %v3474_v21 }
  0xa8   :  { %3397 = vperm.xlu0 %3395, %v3611_v39  }
  0xa9   :  { %3333 = vperm.xlu1 %3305, %v3602_v34  }
  0xac   :  { %3412 = vperm.xlu0 %3395, %v3631_v47  }
  0xad   :  { %3343 = vperm.xlu1 %3305, %v3622_v44  }
  0xb0   :  { %3422 = vperm.xlu0 %3395, %v3647_v53  }
  0xb1   :  { %3353 = vset.pattern.permute.xlu1 %v3473_v20 }
  0xb2   :  { %3355 = vperm.xlu1 %3353, %v3611_v39   ;;  %v52_v39 = vld [vmem:[#allocation2 + $0x20] sm:$0xff] }
  0xb6   :  { %3360 = vperm.xlu1 %3353, %v3573_v18  }
  0xba   :  { %3370 = vperm.xlu1 %3353, %v3631_v47  }
  0xbe   :  { %3380 = vperm.xlu1 %3353, %v3647_v53  }
  0xc2   :  { %3389 = vset.pattern.permute.xlu1 %v3474_v21  ;;  %v61_v21 = vld [vmem:[#allocation2 + $0x68] sm:$0xff] }
  0xc3   :  { %3391 = vperm.xlu1 %3389, %v3596_v32   ;;  %v49_v32 = vld [vmem:[#allocation2 + $0x8] sm:$0xff] }
  0xc7   :  { %3402 = vperm.xlu1 %3389, %v3573_v18  }
  0xcb   :  { %3407 = vperm.xlu1 %3389, %v3585_v22  }
  0xcf   :  { %3417 = vperm.xlu1 %3389, %v3602_v34  }
  0xd3   :  { %3427 = vperm.xlu1 %3389, %v3622_v44   ;;  %v53_v44 = vld [vmem:[#allocation2 + $0x28] sm:$0xff] }
  0xf5   :  { %v2852_v18 = vpop.f32.mrb[0].mxu0 }
  0xf6   :  { %v239_v30 = vadd.f32 %v2852_v18, %v50_v26  ;;  %v174_v31 = vpop.f32.mrb[1].mxu0 }
  0xf7   :  { %v237_v22 = vadd.f32 %v174_v31, %v48_v27  ;;  %v2853_v33 = vpop.f32.mrb[2].mxu0 }
  0xf8   :  { %256 = vst.msk [vmem:[#allocation2 + $0x10] sm:$0xff] %vm31_vm0, %v239_v30  ;;  %v240_v34 = vadd.f32 %v2853_v33, %v51_v29  ;;  %v177_v35 = vpop.f32.mrb[3].mxu0 }
  0xf9   :  { %254 = vst.msk [vmem:[#allocation2] sm:$0xff] %vm31_vm0, %v237_v22  ;;  %v238_v36 = vadd.f32 %v177_v35, %v49_v32  ;;  %v3836_v35 = vpop.permute.xlu0 %2971 }
  0xfa   :  { %257 = vst.msk [vmem:[#allocation2 + $0x18] sm:$0xff] %vm31_vm0, %v240_v34 }
  0xfb   :  { %255 = vst.msk [vmem:[#allocation2 + $0x8] sm:$0xff] %vm31_vm0, %v238_v36  ;;  %v3838_v36 = vpop.permute.xlu1 %3055 }
  0xfd   :  { %v2856_v40 = vpop.f32.mrb[4].mxu0 }
  0xfe   :  { %v243_v42 = vadd.f32 %v2856_v40, %v54_v38  ;;  %v190_v43 = vpop.f32.mrb[5].mxu0 }
  0xff   :  { %v241_v45 = vadd.f32 %v190_v43, %v52_v39  ;;  %v2857_v46 = vpop.f32.mrb[6].mxu0  ;;  %v275_v56 = vld [vmem:[#allocation2 + $0x10] sm:$0xff] }
 0x100   :  { %260 = vst.msk [vmem:[#allocation2 + $0x30] sm:$0xff] %vm31_vm0, %v243_v42  ;;  %v244_v47 = vadd.f32 %v2857_v46, %v55_v41  ;;  %v193_v48 = vpop.f32.mrb[7].mxu0  ;;  %v273_v52 = vld [vmem:[#allocation2] sm:$0xff]  ;;  %v3845_v41 = vpop.permute.xlu0 %2976 }
 0x101   :  { %258 = vst.msk [vmem:[#allocation2 + $0x20] sm:$0xff] %vm31_vm0, %v241_v45  ;;  %v242_v50 = vadd.f32 %v193_v48, %v53_v44  ;;  %v276_v51 = vld [vmem:[#allocation2 + $0x18] sm:$0xff]  ;;  %4888 = vst [vmem:[#allocation9_spill] sm:$0xff] %v3845_v41  ;;  %v3847_v42 = vpop.permute.xlu1 %3066 }
 0x102   :  { %261 = vst.msk [vmem:[#allocation2 + $0x38] sm:$0xff] %vm31_vm0, %v244_v47  ;;  %v274_v53 = vld [vmem:[#allocation2 + $0x8] sm:$0xff]  ;;  %v290_v58 = vpack.c.bf16 %v276_v51, %v275_v56 }
 0x103   :  { %259 = vst.msk [vmem:[#allocation2 + $0x28] sm:$0xff] %vm31_vm0, %v242_v50  ;;  %v289_v55 = vpack.c.bf16 %v274_v53, %v273_v52 }
 0x104   :  { %v3853_v47 = vpop.permute.xlu0 %2992 }
 0x105   :  { %v2860_v59 = vpop.f32.mrb[8].mxu0  ;;  %2711 = vmatmul.mubr.msk.bf16.vlgmr.msra.gmra.mrb[0].mxu1 %vm31_vm0, %v289_v55  ;;  %2890 = vmatprep.mubr.msk.bf16.mxu0 %vm31_vm0, %v289_v55  ;;  %4889 = vst [vmem:[#allocation10_spill] sm:$0xff] %v3853_v47  ;;  %v3855_v48 = vpop.permute.xlu1 %3071  ;;  %v903_v47 = vlaneseq }
 0x106   :  { %v247_v61 = vadd.f32 %v2860_v59, %v58_v54  ;;  %v206_v62 = vpop.f32.mrb[9].mxu0  ;;  %2891 = vmatmul.mubr.msk.bf16.vlgmr.msra.gmra.mrb[16].mxu0 %vm31_vm0, %v290_v58  ;;  %733 = vmatprep.mubr.bf16.mxu1 %v3463_v1 }
 0x107   :  { %v245_v2 = vadd.f32 %v206_v62, %v56_v57  ;;  %v2861_v3 = vpop.f32.mrb[10].mxu0  ;;  %v279_v4 = vld [vmem:[#allocation2 + $0x30] sm:$0xff] }
 0x108   :  { %264 = vst.msk [vmem:[#allocation2 + $0x50] sm:$0xff] %vm31_vm0, %v247_v61  ;;  %v248_v5 = vadd.f32 %v2861_v3, %v59_v60  ;;  %v209_v6 = vpop.f32.mrb[11].mxu0  ;;  %v277_v7 = vld [vmem:[#allocation2 + $0x20] sm:$0xff]  ;;  %v3857_v50 = vpop.permute.xlu0 %3002 }
 0x109   :  { %262 = vst.msk [vmem:[#allocation2 + $0x40] sm:$0xff] %vm31_vm0, %v245_v2  ;;  %v246_v8 = vadd.f32 %v209_v6, %v57_v63  ;;  %v280_v9 = vld [vmem:[#allocation2 + $0x38] sm:$0xff]  ;;  %4890 = vst [vmem:[#allocation11_spill] sm:$0xff] %v3857_v50  ;;  %v3859_v51 = vpop.permute.xlu1 %3081 }
 0x10a   :  { %265 = vst.msk [vmem:[#allocation2 + $0x58] sm:$0xff] %vm31_vm0, %v248_v5  ;;  %v278_v10 = vld [vmem:[#allocation2 + $0x28] sm:$0xff]  ;;  %v292_v11 = vpack.c.bf16 %v280_v9, %v279_v4  ;;  %4891 = vst [vmem:[#allocation12_spill] sm:$0xff] %v3859_v51 }
 0x10b   :  { %263 = vst.msk [vmem:[#allocation2 + $0x48] sm:$0xff] %vm31_vm0, %v246_v8  ;;  %v291_v13 = vpack.c.bf16 %v278_v10, %v277_v7 }
 0x10c   :  { %v3863_v52 = vpop.permute.xlu0 %3013 }
 0x10d   :  { %v2864_v16 = vpop.f32.mrb[12].mxu0  ;;  %2712 = vmatmul.mubr.msk.bf16.gmra.mrb[4].mxu1 %vm31_vm0, %v290_v58  ;;  %2894 = vmatprep.mubr.msk.bf16.mxu0 %vm31_vm0, %v291_v13  ;;  %v3865_v53 = vpop.permute.xlu1 %3091 }
 0x10e   :  { %v251_v19 = vadd.f32 %v2864_v16, %v62_v12  ;;  %v222_v20 = vpop.f32.mrb[13].mxu0  ;;  %2895 = vmatmul.mubr.msk.bf16.gmra.mrb[20].mxu0 %vm31_vm0, %v292_v11  ;;  %743 = vmatprep.mubr.bf16.mxu1 %v3463_v1  ;;  %4892 = vst [vmem:[#allocation13_spill] sm:$0xff] %v3865_v53 }
 0x10f   :  { %v249_v26 = vadd.f32 %v222_v20, %v60_v14  ;;  %v2865_v27 = vpop.f32.mrb[14].mxu0  ;;  %v283_v18 = vld [vmem:[#allocation2 + $0x50] sm:$0xff] }
 0x110   :  { %268 = vst.msk [vmem:[#allocation2 + $0x70] sm:$0xff] %vm31_vm0, %v251_v19  ;;  %v252_v29 = vadd.f32 %v2865_v27, %v63_v17  ;;  %v225_v30 = vpop.f32.mrb[15].mxu0  ;;  %v281_v31 = vld [vmem:[#allocation2 + $0x40] sm:$0xff]  ;;  %v3869_v54 = vpop.permute.xlu0 %3029 }
 0x111   :  { %266 = vst.msk [vmem:[#allocation2 + $0x60] sm:$0xff] %vm31_vm0, %v249_v26  ;;  %v250_v32 = vadd.f32 %v225_v30, %v61_v21  ;;  %v284_v22 = vld [vmem:[#allocation2 + $0x58] sm:$0xff]  ;;  %v3871_v55 = vpop.permute.xlu1 %3103 }
 0x112   :  { %269 = vst.msk [vmem:[#allocation2 + $0x78] sm:$0xff] %vm31_vm0, %v252_v29  ;;  %v282_v33 = vld [vmem:[#allocation2 + $0x48] sm:$0xff]  ;;  %v294_v34 = vpack.c.bf16 %v284_v22, %v283_v18 }
 0x113   :  { %267 = vst.msk [vmem:[#allocation2 + $0x68] sm:$0xff] %vm31_vm0, %v250_v32  ;;  %v293_v38 = vpack.c.bf16 %v282_v33, %v281_v31 }
 0x114   :  { %v3875_v56 = vpop.permute.xlu0 %3039 }
 0x115   :  { %2713 = vmatmul.mubr.msk.bf16.gmra.mrb[8].mxu1 %vm31_vm0, %v291_v13  ;;  %2898 = vmatprep.mubr.msk.bf16.mxu0 %vm31_vm0, %v293_v38  ;;  %4893 = vst [vmem:[#allocation14_spill] sm:$0xff] %v3875_v56  ;;  %v3877_v57 = vpop.permute.xlu1 %3108 }
 0x116   :  { %2899 = vmatmul.mubr.msk.bf16.gmra.mrb[24].mxu0 %vm31_vm0, %v294_v34  ;;  %753 = vmatprep.mubr.bf16.mxu1 %v3463_v1 }
 0x117   :  { %v287_v39 = vld [vmem:[#allocation2 + $0x70] sm:$0xff] }
 0x118   :  { %v285_v40 = vld [vmem:[#allocation2 + $0x60] sm:$0xff]  ;;  %v3879_v58 = vpop.permute.xlu0 %3049 }
 0x119   :  { %v288_v43 = vld [vmem:[#allocation2 + $0x78] sm:$0xff]  ;;  %4894 = vst [vmem:[#allocation15_spill] sm:$0xff] %v3879_v58  ;;  %v3881_v59 = vpop.permute.xlu1 %3118 }
 0x11a   :  { %v286_v44 = vld [vmem:[#allocation2 + $0x68] sm:$0xff]  ;;  %v296_v45 = vpack.c.bf16 %v288_v43, %v287_v39  ;;  %4895 = vst [vmem:[#allocation16_spill] sm:$0xff] %v3881_v59 }
 0x11b   :  { %v295_v46 = vpack.c.bf16 %v286_v44, %v285_v40 }
 0x11c   :  { %v3884_v60 = vpop.permute.xlu0 %3061 }
 0x11d   :  { %2714 = vmatmul.mubr.msk.bf16.gmra.mrb[12].mxu1 %vm31_vm0, %v292_v11  ;;  %2902 = vmatprep.mubr.msk.bf16.mxu0 %vm31_vm0, %v295_v46  ;;  %v3886_v61 = vpop.permute.xlu1 %3128 }
 0x11e   :  { %2903 = vmatmul.mubr.msk.bf16.gmra.mrb[28].mxu0 %vm31_vm0, %v296_v45  ;;  %763 = vmatprep.mubr.bf16.mxu1 %v3463_v1  ;;  %4896 = vst [vmem:[#allocation17_spill] sm:$0xff] %v3886_v61 }
 0x120   :  { %v3888_v62 = vpop.permute.xlu0 %3076 }
 0x121   :  { %4897 = vst [vmem:[#allocation18_spill] sm:$0xff] %v3888_v62  ;;  %v3890_v63 = vpop.permute.xlu1 %3139 }
 0x122   :  { %4898 = vst [vmem:[#allocation19_spill] sm:$0xff] %v3890_v63 }
 0x124   :  { %v3892_v2 = vpop.permute.xlu0 %3086 }
 0x125   :  { %2715 = vmatmul.mubr.msk.bf16.gmra.mrb[16].mxu1 %vm31_vm0, %v293_v38  ;;  %4899 = vst [vmem:[#allocation20_spill] sm:$0xff] %v3892_v2 }
 0x126   :  { %773 = vmatprep.mubr.bf16.mxu1 %v3463_v1 }
 0x128   :  { %v3896_v3 = vpop.permute.xlu0 %3097 }
 0x12c   :  { %v3900_v5 = vpop.permute.xlu0 %3113 }
 0x12d   :  { %2716 = vmatmul.mubr.msk.bf16.gmra.mrb[20].mxu1 %vm31_vm0, %v294_v34  ;;  %4902 = vst [vmem:[#allocation23_spill] sm:$0xff] %v3900_v5 }
 0x12e   :  { %783 = vmatprep.mubr.bf16.mxu1 %v3463_v1 }
 0x130   :  { %v3904_v7 = vpop.permute.xlu0 %3123 }
 0x131   :  { %4904 = vst [vmem:[#allocation25_spill] sm:$0xff] %v3904_v7 }
 0x134   :  { %v3908_v9 = vpop.permute.xlu0 %3133 }
 0x135   :  { %2717 = vmatmul.mubr.msk.bf16.gmra.mrb[24].mxu1 %vm31_vm0, %v295_v46  ;;  %4906 = vst [vmem:[#allocation27_spill] sm:$0xff] %v3908_v9 }
 0x136   :  { %793 = vmatprep.mubr.bf16.mxu1 %v3463_v1  ;;  %v3894_v1 = vpop.permute.xlu1 %3150 }
 0x137   :  { %4900 = vst [vmem:[#allocation21_spill] sm:$0xff] %v3894_v1 }
 0x138   :  { %v3912_v11 = vpop.permute.xlu0 %3145 }
 0x139   :  { %4907 = vst [vmem:[#allocation28_spill] sm:$0xff] %v3912_v11 }
 0x13a   :  { %v3898_v4 = vpop.permute.xlu1 %3155 }
 0x13b   :  { %4901 = vst [vmem:[#allocation22_spill] sm:$0xff] %v3898_v4 }
 0x13c   :  { %v3916_v13 = vpop.permute.xlu0 %3160 }
 0x13d   :  { %2718 = vmatmul.mubr.msk.bf16.gmra.mrb[28].mxu1 %vm31_vm0, %v296_v45  ;;  %4908 = vst [vmem:[#allocation29_spill] sm:$0xff] %v3916_v13 }
 0x13e   :  { %v3902_v6 = vpop.permute.xlu1 %3165 }
 0x13f   :  { %4903 = vst [vmem:[#allocation24_spill] sm:$0xff] %v3902_v6 }
 0x140   :  { %v3920_v16 = vpop.permute.xlu0 %3170 }
 0x141   :  { %4910 = vst [vmem:[#allocation31_spill] sm:$0xff] %v3920_v16 }
 0x142   :  { %v3906_v8 = vpop.permute.xlu1 %3175 }
 0x143   :  { %4905 = vst [vmem:[#allocation26_spill] sm:$0xff] %v3906_v8 }
 0x144   :  { %v3924_v19 = vpop.permute.xlu0 %3181 }
 0x146   :  { %v3910_v10 = vpop.permute.xlu1 %3187 }
 0x148   :  { %v3928_v21 = vpop.permute.xlu0 %3197 }
 0x149   :  { %4912 = vst [vmem:[#allocation33_spill] sm:$0xff] %v3928_v21 }
 0x14a   :  { %v3914_v12 = vpop.permute.xlu1 %3192 }
 0x14c   :  { %v3932_v27 = vpop.permute.xlu0 %3207 }
 0x14d   :  { %4913 = vst [vmem:[#allocation34_spill] sm:$0xff] %v3932_v27  ;;  %v3099_v27 = vunpack.i.l.bf16 %v3896_v3 }
 0x14e   :  { %v3918_v14 = vpop.permute.xlu1 %3202 }
 0x14f   :  { %4909 = vst [vmem:[#allocation30_spill] sm:$0xff] %v3918_v14 }
 0x150   :  { %v3936_v29 = vpop.permute.xlu0 %3217 }
 0x151   :  { %4915 = vst [vmem:[#allocation36_spill] sm:$0xff] %v3936_v29 }
 0x152   :  { %v3922_v17 = vpop.permute.xlu1 %3212 }
 0x153   :  { %4911 = vst [vmem:[#allocation32_spill] sm:$0xff] %v3922_v17 }
 0x154   :  { %v3940_v31 = vpop.permute.xlu0 %3229 }
 0x156   :  { %v3926_v20 = vpop.permute.xlu1 %3223 }
 0x157   :  { %v3225_v7 = vunpack.i.l.bf16 %v3926_v20 }
 0x158   :  { %v3944_v22 = vpop.permute.xlu0 %3244 }
 0x159   :  { %4918 = vst [vmem:[#allocation39_spill] sm:$0xff] %v3944_v22 }
 0x15a   :  { %v3930_v26 = vpop.permute.xlu1 %3234 }
 0x15c   :  { %v3948_v34 = vpop.permute.xlu0 %3254 }
 0x15d   :  { %4919 = vst [vmem:[#allocation40_spill] sm:$0xff] %v3948_v34 }
 0x15e   :  { %v3934_v18 = vpop.permute.xlu1 %3239 }
 0x15f   :  { %4914 = vst [vmem:[#allocation35_spill] sm:$0xff] %v3934_v18  ;;  %v3100_v18 = vunpack.i.h.bf16 %v3896_v3 }
 0x160   :  { %v3952_v39 = vpop.permute.xlu0 %3265 }
 0x162   :  { %v3938_v30 = vpop.permute.xlu1 %3249 }
 0x163   :  { %4916 = vst [vmem:[#allocation37_spill] sm:$0xff] %v3938_v30 }
 0x164   :  { %v3956_v43 = vpop.permute.xlu0 %3281 }
 0x165   :  { %4921 = vst [vmem:[#allocation42_spill] sm:$0xff] %v3956_v43 }
 0x166   :  { %v3942_v32 = vpop.permute.xlu1 %3259 }
 0x167   :  { %4917 = vst [vmem:[#allocation38_spill] sm:$0xff] %v3942_v32  ;;  %v904_v32 = vshrl.u32 %v903_v47, 7 }
 0x168   :  { %v3960_v45 = vpop.permute.xlu0 %3291 }
 0x169   :  { %4923 = vst [vmem:[#allocation44_spill] sm:$0xff] %v3960_v45  ;;  %v913_v58 = vsub.s32 2, %v904_v32 }
 0x16a   :  { %v3946_v33 = vpop.permute.xlu1 %3271 }
 0x16c   :  { %v3964_v8 = vpop.permute.xlu0 %3301 }
 0x16d   :  { %4925 = vst [vmem:[#allocation46_spill] sm:$0xff] %v3964_v8  ;;  %v905_v8 = vsub.s32 0, %v904_v32 }
 0x16e   :  { %v3950_v38 = vpop.permute.xlu1 %3276 }
 0x170   :  { %v3966_v28 = vpop.permute.xlu0 %3313 }
 0x171   :  { %4926 = vst [vmem:[#allocation47_spill] sm:$0xff] %v3966_v28 }
 0x172   :  { %v3954_v40 = vpop.permute.xlu1 %3286 }
 0x173   :  { %4920 = vst [vmem:[#allocation41_spill] sm:$0xff] %v3954_v40 }
 0x174   :  { %v3970_v50 = vpop.permute.xlu0 %3328 }
 0x175   :  { %4928 = vst [vmem:[#allocation49_spill] sm:$0xff] %v3970_v50  ;;  %v901_v50 = vld [vmem:[%s4805_s6] sm:$0x7]  ;;  %s3475_s6 = smov 64  }
 0x176   :  { %v3958_v44 = vpop.permute.xlu1 %3296  ;;  %v3989_v53 = vrot.slane %v901_v50, %v905_v8 }
 0x177   :  { %4922 = vst [vmem:[#allocation43_spill] sm:$0xff] %v3958_v44  ;;  %v3015_v44 = vunpack.i.l.bf16 %v3863_v52 }
 0x178   :  { %v3974_v25 = vpop.permute.xlu0 %3338 }
 0x179   :  { %4930 = vst [vmem:[#allocation51_spill] sm:$0xff] %v3974_v25 }
 0x17a   :  { %v3962_v46 = vpop.permute.xlu1 %3307 }
 0x17b   :  { %4924 = vst [vmem:[#allocation45_spill] sm:$0xff] %v3962_v46  ;;  %v3058_v46 = vunpack.i.h.bf16 %v3838_v36 }
 0x17c   :  { %v3978_v4 = vpop.permute.xlu0 %3349 }
 0x17e   :  { %v3968_v16 = vpop.permute.xlu1 %3318 }
 0x17f   :  { %4927 = vst [vmem:[#allocation48_spill] sm:$0xff] %v3968_v16 }
 0x180   :  { %v3982_v29 = vpop.permute.xlu0 %3365 }
 0x182   :  { %v3972_v6 = vpop.permute.xlu1 %3323 }
 0x183   :  { %4929 = vst [vmem:[#allocation50_spill] sm:$0xff] %v3972_v6  ;;  %v909_v6 = vsub.s32 1, %v904_v32 }
 0x184   :  { %v3991_v25 = vpop.permute.xlu0 %3375 }
 0x186   :  { %v3976_v13 = vpop.permute.xlu1 %3333 }
 0x187   :  { %4931 = vst [vmem:[#allocation52_spill] sm:$0xff] %v3976_v13  ;;  %v3993_v13 = vrot.slane %v901_v50, %v909_v6  ;;  %v4007_v6 = vrot.slane %v901_v50, %v913_v58 }
 0x188   :  { %v4013_v30 = vpop.permute.xlu0 %3385 }
 0x189   :  { %4934 = vst [vmem:[#allocation55_spill] sm:$0xff] %v4013_v30  ;;  %v3016_v30 = vunpack.i.h.bf16 %v3863_v52 }
 0x18a   :  { %v3980_v24 = vpop.permute.xlu1 %3343 }
 0x18b   :  { %4932 = vst [vmem:[#allocation53_spill] sm:$0xff] %v3980_v24  ;;  %v3057_v24 = vunpack.i.l.bf16 %v3838_v36 }
 0x18c   :  { %v4029_v51 = vpop.permute.xlu0 %3397 }
 0x18e   :  { %v3984_v9 = vpop.permute.xlu1 %3355 }
 0x18f   :  { %v3357_v50 = vunpack.i.l.bf16 %v3984_v9 }
 0x192   :  { %v3995_v16 = vpop.permute.xlu1 %3360 }
 0x196   :  { %v4022_v58 = vpop.permute.xlu1 %3370 }
 0x1d8   :  { %v725_v47 = vpop.f32.mrb[0].mxu1 }
 0x1d9   :  { %v4000_v34 = vadd.f32 %v3989_v53, %v725_v47  ;;  %v727_v17 = vpop.f32.mrb[1].mxu1  ;;  %v2892_v1 = vpop.f32.mrb[16].mxu0 }
 0x1da   :  { %v729_v2 = vpop.f32.mrb[2].mxu1  ;;  %v4002_v8 = vpop.f32.mrb[17].mxu0  ;;  %v4005_v61 = vadd.f32 %v3993_v13, %v727_v17 }
 0x1db   :  { %v731_v32 = vpop.f32.mrb[3].mxu1  ;;  %v4009_v15 = vpop.f32.mrb[18].mxu0  ;;  %v1318_v23 = vmul.f32 %v3057_v24, %v4000_v34  ;;  %v1158_v45 = vmul.f32 %v3015_v44, %v4000_v34  ;;  %v4025_v24 = vadd.f32 %v2892_v1, %v4007_v6  ;;  %v1478_v17 = vmul.f32 %v3099_v27, %v4000_v34 }
 0x1dc   :  { %4933 = vst [vmem:[#allocation54_spill] sm:$0xff] %v4005_v61  ;;  %v4015_v47 = vpop.f32.mrb[19].mxu0  ;;  %v1894_v44 = vmul.f32 %v3225_v7, %v4005_v61  ;;  %v3399_v7 = vunpack.i.l.bf16 %v4029_v51  ;;  %v4058_v62 = vadd.f32 %v3989_v53, %v729_v2 }
 0x1dd   :  { %1350 = vrot.lane.b32.xlu0 %v1318_v23, %s3475_s6  ;;  %1190 = vrot.lane.b32.xlu1 %v1158_v45, %s3476_s29  ;;  %4935 = vst [vmem:[#allocation56_spill] sm:$0xff] %v4025_v24  ;;  %v3183_v23 = vunpack.i.l.bf16 %v3924_v19 }
 0x1de   :  { %4936 = vst [vmem:[#allocation57_spill] sm:$0xff] %v4058_v62  ;;  %v2472_v0 = vmul.f32 %v3399_v7, %v4025_v24 }
 0x1df   :  { %v1734_v22 = vmul.f32 %v3183_v23, %v4005_v61  ;;  %v4062_v23 = vpop.permute.xlu1 %3380 }
 0x1e0   :  { %v4031_v56 = vpop.f32.mrb[4].mxu1  ;;  %4937 = vst [vmem:[#allocation58_spill] sm:$0xff] %v4062_v23  ;;  %v1319_v23 = vmul.f32 %v3058_v46, %v4058_v62 }
 0x1e1   :  { %1510 = vrot.lane.b32.xlu1 %v1478_v17, %s3477_s30  ;;  %1926 = vrot.lane.b32.xlu0 %v1894_v44, %s3475_s6  ;;  %v4036_v45 = vpop.f32.mrb[5].mxu1  ;;  %v4038_v28 = vpop.f32.mrb[20].mxu0  ;;  %v2312_v17 = vmul.f32 %v3357_v50, %v4025_v24  ;;  %v3267_v44 = vunpack.i.l.bf16 %v3952_v39 }
 0x1e2   :  { %v4040_v1 = vpop.f32.mrb[6].mxu1  ;;  %v4042_v27 = vpop.f32.mrb[21].mxu0 }
 0x1e3   :  { %v4045_v11 = vpop.f32.mrb[7].mxu1  ;;  %v4047_v40 = vpop.f32.mrb[22].mxu0  ;;  %v2054_v59 = vmul.f32 %v3267_v44, %v4005_v61 }
 0x1e4   :  { %v857_v14 = vpop.f32.mrb[23].mxu0  ;;  %v3392_v46 = vpop.permute.xlu1 %3391 }
 0x1e5   :  { %v4053_v41 = vadd.f32 %v4007_v6, %v857_v14  ;;  %1766 = vrot.lane.b32.xlu1 %v1734_v22, %s3476_s29  ;;  %2346 = vrot.lane.b32.xlu0 %v2312_v17, %s3476_s29  ;;  %v4072_v17 = vadd.f32 %v3993_v13, %v731_v32  ;;  %v1159_v32 = vmul.f32 %v3016_v30, %v4058_v62  ;;  %v3358_v30 = vunpack.i.h.bf16 %v3984_v9 }
 0x1e6   :  { %v3393_v21 = vunpack.i.l.bf16 %v3392_v46 }
 0x1e8   :  { %v745_v50 = vpop.f32.mrb[8].mxu1 }
 0x1e9   :  { %v4067_v14 = vadd.f32 %v3989_v53, %v745_v50  ;;  %2086 = vrot.lane.b32.xlu1 %v2054_v59, %s3477_s30  ;;  %v747_v22 = vpop.f32.mrb[9].mxu1  ;;  %2506 = vrot.lane.b32.xlu0 %v2472_v0, %s3475_s6  ;;  %v2900_v2 = vpop.f32.mrb[24].mxu0 }
 0x1ea   :  { %v4075_v7 = vadd.f32 %v3993_v13, %v747_v22  ;;  %v4078_v44 = vadd.f32 %v2900_v2, %v4007_v6  ;;  %v749_v36 = vpop.f32.mrb[10].mxu1  ;;  %v870_v52 = vpop.f32.mrb[25].mxu0 }
 0x1eb   :  { %v4081_v50 = vadd.f32 %v3989_v53, %v749_v36  ;;  %v4084_v59 = vadd.f32 %v4007_v6, %v870_v52  ;;  %v751_v24 = vpop.f32.mrb[11].mxu1  ;;  %v2901_v0 = vpop.f32.mrb[26].mxu0  ;;  %v3226_v36 = vunpack.i.h.bf16 %v3926_v20  ;;  %v1479_v20 = vmul.f32 %v3100_v18, %v4058_v62 }
 0x1ec   :  { %4938 = vst [vmem:[#allocation59_spill] sm:$0xff] %v4078_v44  ;;  %v4089_v22 = vadd.f32 %v3993_v13, %v751_v24  ;;  %v4092_v2 = vadd.f32 %v2901_v0, %v4007_v6  ;;  %v873_v43 = vpop.f32.mrb[27].mxu0  ;;  %v4104_v24 = vadd.f32 %v4007_v6, %v4002_v8  ;;  %v4108_v0 = vadd.f32 %v4009_v15, %v4007_v6 }
 0x1ed   :  { %4939 = vst [vmem:[#allocation60_spill] sm:$0xff] %v4084_v59  ;;  %v4097_v52 = vadd.f32 %v4007_v6, %v873_v43  ;;  %1352 = vrot.lane.b32.xlu1 %v1319_v23, %s3475_s6  ;;  %1192 = vrot.lane.b32.xlu0 %v1159_v32, %s3476_s29  ;;  %v1895_v3 = vmul.f32 %v3226_v36, %v4072_v17  ;;  %v3351_v23 = vunpack.i.l.bf16 %v3978_v4  ;;  %v3400_v15 = vunpack.i.h.bf16 %v4029_v51 }
 0x1ee   :  { %4941 = vst [vmem:[#allocation62_spill] sm:$0xff] %v4108_v0 }
 0x1ef   :  { %4940 = vst [vmem:[#allocation61_spill] sm:$0xff] %v4097_v52  ;;  %v2310_v51 = vmul.f32 %v3351_v23, %v4104_v24  ;;  %v2470_v23 = vmul.f32 %v3393_v21, %v4104_v24 }
 0x1f0   :  { %v755_v43 = vpop.f32.mrb[12].mxu1 }
 0x1f1   :  { %v4114_v32 = vadd.f32 %v3989_v53, %v755_v43  ;;  %1928 = vrot.lane.b32.xlu1 %v1895_v3, %s3475_s6  ;;  %v757_v9 = vpop.f32.mrb[13].mxu1  ;;  %1512 = vrot.lane.b32.xlu0 %v1479_v20, %s3477_s30  ;;  %v2904_v8 = vpop.f32.mrb[28].mxu0  ;;  %v2313_v43 = vmul.f32 %v3358_v30, %v4108_v0  ;;  %v4147_v30 = vadd.f32 %v4007_v6, %v4015_v47 }
 0x1f2   :  { %v4120_v61 = vadd.f32 %v3993_v13, %v757_v9  ;;  %v4123_v18 = vadd.f32 %v2904_v8, %v4007_v6  ;;  %v759_v36 = vpop.f32.mrb[14].mxu1  ;;  %v886_v62 = vpop.f32.mrb[29].mxu0 }
 0x1f3   :  { %v4127_v63 = vadd.f32 %v3989_v53, %v759_v36  ;;  %v4130_v3 = vadd.f32 %v4007_v6, %v886_v62  ;;  %v761_v20 = vpop.f32.mrb[15].mxu1  ;;  %v2905_v5 = vpop.f32.mrb[30].mxu0  ;;  %v2473_v62 = vmul.f32 %v3400_v15, %v4108_v0 }
 0x1f4   :  { %4942 = vst [vmem:[#allocation63_spill] sm:$0xff] %v4120_v61  ;;  %4943 = vst [vmem:[#allocation64_spill] sm:$0xff] %v4123_v18  ;;  %v4134_v9 = vadd.f32 %v3993_v13, %v761_v20  ;;  %v4137_v8 = vadd.f32 %v2905_v5, %v4007_v6  ;;  %v889_v18 = vpop.f32.mrb[31].mxu0  ;;  %v3184_v5 = vunpack.i.h.bf16 %v3924_v19  ;;  %v3352_v20 = vunpack.i.h.bf16 %v3978_v4 }
 0x1f5   :  { %v4140_v61 = vadd.f32 %v4007_v6, %v889_v18  ;;  %2342 = vrot.lane.b32.xlu0 %v2310_v51, %s3476_s29  ;;  %2348 = vrot.lane.b32.xlu1 %v2313_v43, %s3476_s29  ;;  %v3394_v43 = vunpack.i.h.bf16 %v3392_v46  ;;  %v4174_v46 = vadd.f32 %v3989_v53, %v4031_v56 }
 0x1f6   :  { %v2311_v21 = vmul.f32 %v3352_v20, %v4147_v30  ;;  %v1735_v4 = vmul.f32 %v3184_v5, %v4072_v17  ;;  %v3021_v5 = vunpack.i.l.bf16 %v3808_v37 }
 0x1f7   :  { %4944 = vst [vmem:[#allocation65_spill] sm:$0xff] %v4140_v61 }
 0x1f8   :  { %v765_v36 = vpop.f32.mrb[16].mxu1 }
 0x1f9   :  { %v4153_v18 = vadd.f32 %v3989_v53, %v765_v36  ;;  %v767_v61 = vpop.f32.mrb[17].mxu1  ;;  %2502 = vrot.lane.b32.xlu0 %v2470_v23, %s3475_s6  ;;  %2508 = vrot.lane.b32.xlu1 %v2473_v62, %s3475_s6  ;;  %v3268_v23 = vunpack.i.h.bf16 %v3952_v39 }
 0x1fa   :  { %v4158_v15 = vadd.f32 %v3993_v13, %v767_v61  ;;  %v769_v47 = vpop.f32.mrb[18].mxu1  ;;  %v2471_v61 = vmul.f32 %v3394_v43, %v4147_v30  ;;  %v4184_v43 = vpop.permute.xlu1 %3402 }
 0x1fb   :  { %v4162_v51 = vadd.f32 %v3989_v53, %v769_v47  ;;  %v771_v19 = vpop.f32.mrb[19].mxu1  ;;  %v2055_v62 = vmul.f32 %v3268_v23, %v4072_v17  ;;  %v3063_v47 = vunpack.i.l.bf16 %v3884_v60 }
 0x1fc   :  { %4945 = vst [vmem:[#allocation66_spill] sm:$0xff] %v4158_v15  ;;  %v4166_v36 = vadd.f32 %v3993_v13, %v771_v19 }
 0x1fd   :  { %4946 = vst [vmem:[#allocation67_spill] sm:$0xff] %v4162_v51  ;;  %1768 = vrot.lane.b32.xlu0 %v1735_v4, %s3476_s29  ;;  %2344 = vrot.lane.b32.xlu1 %v2311_v21, %s3476_s29  ;;  %v4191_v4 = vadd.f32 %v3993_v13, %v4036_v45  ;;  %v1320_v0 = vmul.f32 %v3063_v47, %v4174_v46 }
 0x1fe   :  { %4947 = vst [vmem:[#allocation68_spill] sm:$0xff] %v4166_v36  ;;  %v4207_v45 = vadd.f32 %v4038_v28, %v4007_v6 }
 0x200   :  { %v775_v20 = vpop.f32.mrb[20].mxu1 }
 0x201   :  { %v4180_v19 = vadd.f32 %v3989_v53, %v775_v20  ;;  %v777_v39 = vpop.f32.mrb[21].mxu1  ;;  %2088 = vrot.lane.b32.xlu0 %v2055_v62, %s3477_s30  ;;  %2504 = vrot.lane.b32.xlu1 %v2471_v61, %s3475_s6  ;;  %v1160_v62 = vmul.f32 %v3021_v5, %v4174_v46  ;;  %v3408_v5 = vpop.permute.xlu1 %3407 }
 0x202   :  { %v4187_v56 = vadd.f32 %v3993_v13, %v777_v39  ;;  %v779_v21 = vpop.f32.mrb[22].mxu1  ;;  %v3231_v39 = vunpack.i.l.bf16 %v3940_v31 }
 0x203   :  { %4948 = vst [vmem:[#allocation69_spill] sm:$0xff] %v4180_v19  ;;  %v4194_v23 = vadd.f32 %v3989_v53, %v779_v21  ;;  %v781_v20 = vpop.f32.mrb[23].mxu1  ;;  %v3105_v19 = vunpack.i.l.bf16 %v3871_v55 }
 0x204   :  { %4949 = vst [vmem:[#allocation70_spill] sm:$0xff] %v4187_v56  ;;  %v4199_v61 = vadd.f32 %v3993_v13, %v781_v20  ;;  %v1896_v21 = vmul.f32 %v3231_v39, %v4191_v4  ;;  %v3189_v20 = vunpack.i.l.bf16 %v3910_v10  ;;  %v3409_v39 = vunpack.i.l.bf16 %v3408_v5 }
 0x205   :  { %4950 = vst [vmem:[#allocation71_spill] sm:$0xff] %v4194_v23  ;;  %1354 = vrot.lane.b32.xlu0 %v1320_v0, %s3475_s6  ;;  %1194 = vrot.lane.b32.xlu1 %v1160_v62, %s3476_s29  ;;  %v1480_v47 = vmul.f32 %v3105_v19, %v4174_v46 }
 0x206   :  { %4951 = vst [vmem:[#allocation72_spill] sm:$0xff] %v4199_v61  ;;  %v3367_v61 = vunpack.i.l.bf16 %v3982_v29  ;;  %v1736_v15 = vmul.f32 %v3189_v20, %v4191_v4  ;;  %v3022_v20 = vunpack.i.h.bf16 %v3808_v37 }
 0x208   :  { %v785_v23 = vpop.f32.mrb[24].mxu1  ;;  %v2316_v19 = vmul.f32 %v3367_v61, %v4207_v45  ;;  %v4235_v61 = vadd.f32 %v3989_v53, %v4040_v1 }
 0x209   :  { %v4214_v56 = vadd.f32 %v3989_v53, %v785_v23  ;;  %1930 = vrot.lane.b32.xlu0 %v1896_v21, %s3475_s6  ;;  %1514 = vrot.lane.b32.xlu1 %v1480_v47, %s3477_s30  ;;  %v787_v0 = vpop.f32.mrb[25].mxu1  ;;  %v3273_v21 = vunpack.i.l.bf16 %v3946_v33  ;;  %v2476_v47 = vmul.f32 %v3409_v39, %v4207_v45 }
 0x20a   :  { %v4219_v28 = vadd.f32 %v3993_v13, %v787_v0  ;;  %v789_v62 = vpop.f32.mrb[26].mxu1 }
 0x20b   :  { %v4223_v36 = vadd.f32 %v3989_v53, %v789_v62  ;;  %v791_v51 = vpop.f32.mrb[27].mxu1  ;;  %v2056_v0 = vmul.f32 %v3273_v21, %v4191_v4 }
 0x20c   :  { %v4227_v23 = vadd.f32 %v3993_v13, %v791_v51  ;;  %v3064_v51 = vunpack.i.h.bf16 %v3884_v60 }
 0x20d   :  { %1770 = vrot.lane.b32.xlu1 %v1736_v15, %s3476_s29  ;;  %2354 = vrot.lane.b32.xlu0 %v2316_v19, %s3476_s29  ;;  %v4250_v19 = vadd.f32 %v3993_v13, %v4045_v11  ;;  %v4270_v11 = vadd.f32 %v4047_v40, %v4007_v6 }
 0x20e   :  { %4952 = vst [vmem:[#allocation73_spill] sm:$0xff] %v4227_v23  ;;  %v1321_v21 = vmul.f32 %v3064_v51, %v4235_v61  ;;  %v3404_v51 = vunpack.i.l.bf16 %v4184_v43 }
 0x210   :  { %v795_v62 = vpop.f32.mrb[28].mxu1 }
 0x211   :  { %v4241_v23 = vadd.f32 %v3989_v53, %v795_v62  ;;  %2090 = vrot.lane.b32.xlu1 %v2056_v0, %s3477_s30  ;;  %2514 = vrot.lane.b32.xlu0 %v2476_v47, %s3475_s6  ;;  %v797_v15 = vpop.f32.mrb[29].mxu1  ;;  %v1161_v62 = vmul.f32 %v3022_v20, %v4235_v61  ;;  %v3106_v47 = vunpack.i.h.bf16 %v3871_v55  ;;  %v3368_v55 = vunpack.i.h.bf16 %v3982_v29 }
 0x212   :  { %v4246_v39 = vadd.f32 %v3993_v13, %v797_v15  ;;  %v799_v1 = vpop.f32.mrb[30].mxu1  ;;  %v3232_v15 = vunpack.i.h.bf16 %v3940_v31  ;;  %v3362_v31 = vunpack.i.l.bf16 %v3995_v16 }
 0x213   :  { %v4253_v37 = vadd.f32 %v3989_v53, %v799_v1  ;;  %v801_v60 = vpop.f32.mrb[31].mxu1  ;;  %v4266_v53 = vadd.f32 %v4007_v6, %v4042_v27  ;;  %v3410_v27 = vunpack.i.h.bf16 %v3408_v5  ;;  %v2317_v40 = vmul.f32 %v3368_v55, %v4270_v11 }
 0x214   :  { %v4258_v0 = vadd.f32 %v3993_v13, %v801_v60  ;;  %v1897_v20 = vmul.f32 %v3232_v15, %v4250_v19  ;;  %v1481_v13 = vmul.f32 %v3106_v47, %v4235_v61  ;;  %v3190_v60 = vunpack.i.h.bf16 %v3910_v10 }
 0x215   :  { %1356 = vrot.lane.b32.xlu1 %v1321_v21, %s3475_s6  ;;  %1196 = vrot.lane.b32.xlu0 %v1161_v62, %s3476_s29  ;;  %v2314_v1 = vmul.f32 %v3362_v31, %v4266_v53  ;;  %v2474_v6 = vmul.f32 %v3404_v51, %v4266_v53  ;;  %v2477_v29 = vmul.f32 %v3410_v27, %v4270_v11  ;;  %v3363_v21 = vunpack.i.h.bf16 %v3995_v16 }
 0x216   :  { %v3405_v5 = vunpack.i.h.bf16 %v4184_v43  ;;  %v1737_v47 = vmul.f32 %v3190_v60, %v4250_v19  ;;  %v3274_v15 = vunpack.i.h.bf16 %v3946_v33  ;;  %v3110_v55 = vunpack.i.l.bf16 %v3877_v57 }
 0x217   :  { %v2315_v62 = vmul.f32 %v3363_v21, %v4053_v41  ;;  %v3236_v31 = vunpack.i.l.bf16 %v3930_v26 }
 0x218   :  { %v2475_v10 = vmul.f32 %v3405_v5, %v4053_v41  ;;  %v2057_v16 = vmul.f32 %v3274_v15, %v4250_v19  ;;  %v1482_v27 = vmul.f32 %v3110_v55, %v4067_v14  ;;  %v3278_v5 = vunpack.i.l.bf16 %v3950_v38 }
 0x219   :  { %1932 = vrot.lane.b32.xlu1 %v1897_v20, %s3475_s6  ;;  %1516 = vrot.lane.b32.xlu0 %v1481_v13, %s3477_s30  ;;  %v3026_v20 = vunpack.i.l.bf16 %v3812_v49  ;;  %v3068_v13 = vunpack.i.l.bf16 %v3847_v42  ;;  %v1898_v51 = vmul.f32 %v3236_v31, %v4075_v7  ;;  %v3027_v15 = vunpack.i.h.bf16 %v3812_v49  ;;  %v3413_v31 = vpop.permute.xlu0 %3412 }
 0x21a   :  { %v3372_v55 = vunpack.i.l.bf16 %v4022_v58 }
 0x21b   :  { %v1322_v43 = vmul.f32 %v3068_v13, %v4067_v14  ;;  %v1162_v33 = vmul.f32 %v3026_v20, %v4067_v14  ;;  %v1163_v20 = vmul.f32 %v3027_v15, %v4081_v50  ;;  %v3111_v13 = vunpack.i.h.bf16 %v3877_v57 }
 0x21c   :  { %v2318_v57 = vmul.f32 %v3372_v55, %v4084_v59  ;;  %v3279_v15 = vunpack.i.h.bf16 %v3950_v38  ;;  %v4954_v38 = vld [vmem:[#allocation19_spill] sm:$0xff] }
 0x21d   :  { %2350 = vrot.lane.b32.xlu0 %v2314_v1, %s3476_s29  ;;  %2356 = vrot.lane.b32.xlu1 %v2317_v40, %s3476_s29  ;;  %v4309_v1 = vpop.permute.xlu1 %3417  ;;  %v3194_v40 = vunpack.i.l.bf16 %v3914_v12  ;;  %v3141_v55 = vunpack.i.l.bf16 %v4954_v38 }
 0x21f   :  { %v1738_v21 = vmul.f32 %v3194_v40, %v4075_v7 }
 0x221   :  { %2510 = vrot.lane.b32.xlu0 %v2474_v6, %s3475_s6  ;;  %2516 = vrot.lane.b32.xlu1 %v2477_v29, %s3475_s6  ;;  %v3377_v6 = vunpack.i.l.bf16 %v3991_v25  ;;  %v3419_v29 = vunpack.i.l.bf16 %v4309_v1 }
 0x223   :  { %v2320_v60 = vmul.f32 %v3377_v6, %v4078_v44  ;;  %v3195_v6 = vunpack.i.h.bf16 %v3914_v12 }
 0x225   :  { %1772 = vrot.lane.b32.xlu0 %v1737_v47, %s3476_s29  ;;  %2352 = vrot.lane.b32.xlu1 %v2315_v62, %s3476_s29  ;;  %v2480_v62 = vmul.f32 %v3419_v29, %v4078_v44  ;;  %v2058_v47 = vmul.f32 %v3278_v5, %v4075_v7  ;;  %v3415_v29 = vunpack.i.h.bf16 %v3413_v31  ;;  %v1739_v5 = vmul.f32 %v3195_v6, %v4089_v22  ;;  %v4956_v6 = vld [vmem:[#allocation33_spill] sm:$0xff] }
 0x229   :  { %2092 = vrot.lane.b32.xlu0 %v2057_v16, %s3477_s30  ;;  %2512 = vrot.lane.b32.xlu1 %v2475_v10, %s3475_s6  ;;  %v3069_v10 = vunpack.i.h.bf16 %v3847_v42  ;;  %v1483_v42 = vmul.f32 %v3111_v13, %v4081_v50 }
 0x22b   :  { %v1323_v16 = vmul.f32 %v3069_v10, %v4081_v50 }
 0x22d   :  { %1358 = vrot.lane.b32.xlu0 %v1322_v43, %s3475_s6  ;;  %1198 = vrot.lane.b32.xlu1 %v1162_v33, %s3476_s29  ;;  %v3237_v43 = vunpack.i.h.bf16 %v3930_v26  ;;  %v3378_v33 = vunpack.i.h.bf16 %v3991_v25 }
 0x22f   :  { %v1899_v49 = vmul.f32 %v3237_v43, %v4089_v22  ;;  %v2321_v26 = vmul.f32 %v3378_v33, %v4092_v2 }
 0x231   :  { %1934 = vrot.lane.b32.xlu0 %v1898_v51, %s3475_s6  ;;  %1518 = vrot.lane.b32.xlu1 %v1482_v27, %s3477_s30  ;;  %v3373_v51 = vunpack.i.h.bf16 %v4022_v58  ;;  %v3414_v27 = vunpack.i.l.bf16 %v3413_v31  ;;  %v2479_v58 = vmul.f32 %v3415_v29, %v4097_v52  ;;  %v3199_v29 = vunpack.i.l.bf16 %v4956_v6 }
 0x233   :  { %v2478_v25 = vmul.f32 %v3414_v27, %v4084_v59  ;;  %v2319_v40 = vmul.f32 %v3373_v51, %v4097_v52  ;;  %v4975_v59 = vld [vmem:[#allocation67_spill] sm:$0xff] }
 0x235   :  { %1774 = vrot.lane.b32.xlu1 %v1738_v21, %s3476_s29  ;;  %2362 = vrot.lane.b32.xlu0 %v2320_v60, %s3476_s29  ;;  %v4349_v60 = vpop.permute.xlu0 %3422  ;;  %v4352_v21 = vpop.permute.xlu1 %3427 }
 0x239   :  { %2094 = vrot.lane.b32.xlu1 %v2058_v47, %s3477_s30  ;;  %2522 = vrot.lane.b32.xlu0 %v2480_v62, %s3475_s6  ;;  %v2973_v62 = vunpack.i.l.bf16 %v3836_v35  ;;  %v3031_v47 = vunpack.i.l.bf16 %v3869_v54 }
 0x23b   :  { %v1078_v12 = vmul.f32 %v2973_v62, %v4000_v34  ;;  %v1164_v13 = vmul.f32 %v3031_v47, %v4114_v32 }
 0x23d   :  { %1360 = vrot.lane.b32.xlu1 %v1323_v16, %s3475_s6  ;;  %1200 = vrot.lane.b32.xlu0 %v1163_v20, %s3476_s29  ;;  %v2059_v20 = vmul.f32 %v3279_v15, %v4089_v22 }
 0x241   :  { %1936 = vrot.lane.b32.xlu1 %v1899_v49, %s3475_s6  ;;  %1520 = vrot.lane.b32.xlu0 %v1483_v42, %s3477_s30  ;;  %v3073_v49 = vunpack.i.l.bf16 %v3855_v48  ;;  %v4953_v42 = vld [vmem:[#allocation23_spill] sm:$0xff] }
 0x242   :  { %v3115_v33 = vunpack.i.l.bf16 %v4953_v42 }
 0x243   :  { %v1324_v31 = vmul.f32 %v3073_v49, %v4114_v32  ;;  %v4960_v49 = vld [vmem:[#allocation55_spill] sm:$0xff] }
 0x244   :  { %v1484_v51 = vmul.f32 %v3115_v33, %v4114_v32  ;;  %v3387_v33 = vunpack.i.l.bf16 %v4960_v49 }
 0x245   :  { %2358 = vrot.lane.b32.xlu0 %v2318_v57, %s3476_s29  ;;  %2364 = vrot.lane.b32.xlu1 %v2321_v26, %s3476_s29 }
 0x249   :  { %2518 = vrot.lane.b32.xlu0 %v2478_v25, %s3475_s6  ;;  %2360 = vrot.lane.b32.xlu1 %v2319_v40, %s3476_s29  ;;  %v4955_v25 = vld [vmem:[#allocation54_spill] sm:$0xff] }
 0x24a   :  { %v1638_v40 = vmul.f32 %v3141_v55, %v4955_v25  ;;  %v4961_v55 = vld [vmem:[#allocation45_spill] sm:$0xff] }
 0x24d   :  { %1776 = vrot.lane.b32.xlu0 %v1739_v5, %s3476_s29  ;;  %2520 = vrot.lane.b32.xlu1 %v2479_v58, %s3475_s6  ;;  %v4957_v58 = vld [vmem:[#allocation35_spill] sm:$0xff] }
 0x24e   :  { %v3241_v5 = vunpack.i.l.bf16 %v4957_v58 }
 0x24f   :  { %v1351_v10 = vpop.permute.xlu0 %1350  ;;  %v1191_v16 = vpop.permute.xlu1 %1190 }
 0x250   :  { %v1238_v43 = vadd.f32 %v1191_v16, %v1078_v12  ;;  %v4958_v12 = vld [vmem:[#allocation63_spill] sm:$0xff] }
 0x251   :  { %2096 = vrot.lane.b32.xlu0 %v2059_v20, %s3477_s30  ;;  %1202 = vrot.lane.b32.xlu1 %v1164_v13, %s3476_s29  ;;  %v1740_v16 = vmul.f32 %v3199_v29, %v4958_v12  ;;  %v4959_v13 = vld [vmem:[#allocation42_spill] sm:$0xff]  ;;  %v2974_v29 = vunpack.i.h.bf16 %v3836_v35 }
 0x252   :  { %v1398_v57 = vadd.f32 %v1351_v10, %v1238_v43  ;;  %v1900_v10 = vmul.f32 %v3241_v5, %v4958_v12  ;;  %v3283_v43 = vunpack.i.l.bf16 %v4959_v13 }
 0x253   :  { %v1511_v26 = vpop.permute.xlu1 %1510  ;;  %v1927_v34 = vpop.permute.xlu0 %1926 }
 0x254   :  { %v1558_v27 = vadd.f32 %v1511_v26, %v1398_v57  ;;  %v3309_v57 = vunpack.i.l.bf16 %v4961_v55 }
 0x255   :  { %1362 = vrot.lane.b32.xlu0 %v1324_v31, %s3475_s6  ;;  %1522 = vrot.lane.b32.xlu1 %v1484_v51, %s3477_s30  ;;  %v4962_v31 = vld [vmem:[#allocation64_spill] sm:$0xff] }
 0x256   :  { %v1654_v62 = vadd.f32 %v1638_v40, %v1558_v27  ;;  %v2324_v51 = vmul.f32 %v3387_v33, %v4962_v31  ;;  %v2060_v40 = vmul.f32 %v3283_v43, %v4958_v12  ;;  %v2214_v5 = vmul.f32 %v3309_v57, %v4104_v24 }
 0x257   :  { %v1767_v47 = vpop.permute.xlu1 %1766  ;;  %v4375_v15 = vpop.permute.xlu0 %2346  ;;  %v3116_v24 = vunpack.i.h.bf16 %v4953_v42  ;;  %v3388_v42 = vunpack.i.h.bf16 %v4960_v49 }
 0x258   :  { %v1814_v20 = vadd.f32 %v1767_v47, %v1654_v62  ;;  %v3074_v47 = vunpack.i.h.bf16 %v3855_v48  ;;  %v3242_v48 = vunpack.i.h.bf16 %v4957_v58 }
 0x259   :  { %1938 = vrot.lane.b32.xlu0 %v1900_v10, %s3475_s6  ;;  %1778 = vrot.lane.b32.xlu1 %v1740_v16, %s3476_s29  ;;  %v3032_v10 = vunpack.i.h.bf16 %v3869_v54  ;;  %v3142_v54 = vunpack.i.h.bf16 %v4954_v38  ;;  %v2325_v38 = vmul.f32 %v3388_v42, %v4137_v8 }
 0x25a   :  { %v1974_v26 = vadd.f32 %v1927_v34, %v1814_v20  ;;  %v4963_v34 = vld [vmem:[#allocation57_spill] sm:$0xff]  ;;  %v1325_v43 = vmul.f32 %v3074_v47, %v4127_v63 }
 0x25b   :  { %v2087_v27 = vpop.permute.xlu1 %2086  ;;  %v4385_v25 = vpop.permute.xlu0 %2506  ;;  %v1079_v16 = vmul.f32 %v2974_v29, %v4963_v34  ;;  %v1165_v35 = vmul.f32 %v3032_v10, %v4127_v63  ;;  %v3200_v34 = vunpack.i.h.bf16 %v4956_v6 }
 0x25c   :  { %v2134_v62 = vadd.f32 %v2087_v27, %v1974_v26  ;;  %v1901_v27 = vmul.f32 %v3242_v48, %v4134_v9 }
 0x25d   :  { %2098 = vrot.lane.b32.xlu1 %v2060_v40, %s3477_s30  ;;  %2370 = vrot.lane.b32.xlu0 %v2324_v51, %s3476_s29  ;;  %v1485_v40 = vmul.f32 %v3116_v24, %v4127_v63  ;;  %v1741_v24 = vmul.f32 %v3200_v34, %v4134_v9 }
 0x25e   :  { %v2230_v20 = vadd.f32 %v2214_v5, %v2134_v62  ;;  %v4964_v5 = vld [vmem:[#allocation58_spill] sm:$0xff] }
 0x25f   :  { %v1353_v33 = vpop.permute.xlu1 %1352  ;;  %v1193_v44 = vpop.permute.xlu0 %1192  ;;  %v3382_v58 = vunpack.i.l.bf16 %v4964_v5 }
 0x260   :  { %v1239_v52 = vadd.f32 %v1193_v44, %v1079_v16  ;;  %v1639_v44 = vmul.f32 %v3142_v54, %v4072_v17  ;;  %v3383_v17 = vunpack.i.h.bf16 %v4964_v5  ;;  %v4965_v16 = vld [vmem:[#allocation65_spill] sm:$0xff]  ;;  %v4966_v54 = vld [vmem:[#allocation7_spill] sm:$0xff]  ;;  %v4967_v5 = vld [vmem:[#allocation16_spill] sm:$0xff] }
 0x261   :  { %1364 = vrot.lane.b32.xlu1 %v1325_v43, %s3475_s6  ;;  %1204 = vrot.lane.b32.xlu0 %v1165_v35, %s3476_s29 }
 0x262   :  { %v1399_v57 = vadd.f32 %v1353_v33, %v1239_v52  ;;  %v2322_v52 = vmul.f32 %v3382_v58, %v4130_v3  ;;  %v2323_v33 = vmul.f32 %v3383_v17, %v4965_v16  ;;  %v3120_v58 = vunpack.i.l.bf16 %v4967_v5 }
 0x263   :  { %v1929_v26 = vpop.permute.xlu1 %1928  ;;  %v1513_v51 = vpop.permute.xlu0 %1512 }
 0x264   :  { %v1559_v29 = vadd.f32 %v1513_v51, %v1399_v57  ;;  %v3036_v57 = vunpack.i.l.bf16 %v4966_v54  ;;  %v3284_v51 = vunpack.i.h.bf16 %v4959_v13  ;;  %v3310_v13 = vunpack.i.h.bf16 %v4961_v55  ;;  %v4971_v55 = vld [vmem:[#allocation39_spill] sm:$0xff] }
 0x265   :  { %1940 = vrot.lane.b32.xlu1 %v1901_v27, %s3475_s6  ;;  %1524 = vrot.lane.b32.xlu0 %v1485_v40, %s3477_s30 }
 0x266   :  { %v1655_v62 = vadd.f32 %v1639_v44, %v1559_v29  ;;  %v2061_v40 = vmul.f32 %v3284_v51, %v4134_v9  ;;  %v1166_v29 = vmul.f32 %v3036_v57, %v4153_v18  ;;  %v4970_v57 = vld [vmem:[#allocation30_spill] sm:$0xff] }
 0x267   :  { %v2343_v47 = vpop.permute.xlu0 %2342  ;;  %v4411_v10 = vpop.permute.xlu1 %2348  ;;  %v3204_v51 = vunpack.i.l.bf16 %v4970_v57 }
 0x268   :  { %v2390_v49 = vadd.f32 %v2343_v47, %v2230_v20 }
 0x269   :  { %2366 = vrot.lane.b32.xlu0 %v2322_v52, %s3476_s29  ;;  %2372 = vrot.lane.b32.xlu1 %v2325_v38, %s3476_s29  ;;  %v4968_v52 = vld [vmem:[#allocation18_spill] sm:$0xff] }
 0x26a   :  { %v3078_v38 = vunpack.i.l.bf16 %v4968_v52 }
 0x26b   :  { %v2503_v43 = vpop.permute.xlu0 %2502  ;;  %v4418_v35 = vpop.permute.xlu1 %2508 }
 0x26c   :  { %v2550_v48 = vadd.f32 %v2503_v43, %v2390_v49  ;;  %v1486_v49 = vmul.f32 %v3120_v58, %v4153_v18 }
 0x26d   :  { %1780 = vrot.lane.b32.xlu0 %v1741_v24, %s3476_s29  ;;  %2368 = vrot.lane.b32.xlu1 %v2323_v33, %s3476_s29  ;;  %v4969_v33 = vld [vmem:[#allocation9_spill] sm:$0xff]  ;;  %v2215_v24 = vmul.f32 %v3310_v13, %v4147_v30  ;;  %v3037_v13 = vunpack.i.h.bf16 %v4966_v54 }
 0x26e   :  { %v2566_v6 = vmax.f32 %v2550_v48, 0.0  ;;  %v2978_v43 = vunpack.i.l.bf16 %v4969_v33 }
 0x26f   :  { %v1769_v27 = vpop.permute.xlu0 %1768  ;;  %v2345_v20 = vpop.permute.xlu1 %2344 }
 0x270   :  { %v2743_v44 = vpack.c.bf16 %v2566_v6, %v2566_v6  ;;  %v1815_v42 = vadd.f32 %v1769_v27, %v1655_v62  ;;  %v1326_v62 = vmul.f32 %v3078_v38, %v4153_v18  ;;  %v3246_v6 = vunpack.i.l.bf16 %v4971_v55 }
 0x271   :  { %2100 = vrot.lane.b32.xlu0 %v2061_v40, %s3477_s30  ;;  %1206 = vrot.lane.b32.xlu1 %v1166_v29, %s3476_s29  ;;  %v1080_v27 = vmul.f32 %v2978_v43, %v4174_v46 }
 0x272   :  { %2647 = vst.msk [vmem:[%s4806_s7] sm:$0xf] %vm2646_vm1, %v2743_v44  ;;  %v1975_v47 = vadd.f32 %v1929_v26, %v1815_v42  ;;  %v4972_v44 = vld [vmem:[#allocation66_spill] sm:$0xff] }
 0x273   :  { %v2089_v34 = vpop.permute.xlu0 %2088  ;;  %v2505_v17 = vpop.permute.xlu1 %2504  ;;  %v1902_v42 = vmul.f32 %v3246_v6, %v4972_v44  ;;  %v1742_v58 = vmul.f32 %v3204_v51, %v4972_v44  ;;  %v1167_v6 = vmul.f32 %v3037_v13, %v4975_v59  ;;  %v4976_v13 = vld [vmem:[#allocation47_spill] sm:$0xff] }
 0x274   :  { %v2135_v48 = vadd.f32 %v2089_v34, %v1975_v47  ;;  %v4973_v47 = vld [vmem:[#allocation41_spill] sm:$0xff] }
 0x275   :  { %1366 = vrot.lane.b32.xlu0 %v1326_v62, %s3475_s6  ;;  %1526 = vrot.lane.b32.xlu1 %v1486_v49, %s3477_s30  ;;  %v3288_v34 = vunpack.i.l.bf16 %v4973_v47  ;;  %v4974_v62 = vld [vmem:[#allocation28_spill] sm:$0xff] }
 0x276   :  { %v2231_v26 = vadd.f32 %v2215_v24, %v2135_v48  ;;  %v3147_v49 = vunpack.i.l.bf16 %v4974_v62 }
 0x277   :  { %v1355_v40 = vpop.permute.xlu0 %1354  ;;  %v1195_v29 = vpop.permute.xlu1 %1194  ;;  %v2062_v51 = vmul.f32 %v3288_v34, %v4972_v44  ;;  %v3315_v34 = vunpack.i.l.bf16 %v4976_v13 }
 0x278   :  { %v2391_v38 = vadd.f32 %v2345_v20, %v2231_v26  ;;  %v1240_v30 = vadd.f32 %v1195_v29, %v1080_v27  ;;  %v1640_v54 = vmul.f32 %v3147_v49, %v4191_v4  ;;  %v3121_v27 = vunpack.i.h.bf16 %v4967_v5 }
 0x279   :  { %1942 = vrot.lane.b32.xlu0 %v1902_v42, %s3475_s6  ;;  %1782 = vrot.lane.b32.xlu1 %v1742_v58, %s3476_s29  ;;  %v3079_v29 = vunpack.i.h.bf16 %v4968_v52  ;;  %v3205_v5 = vunpack.i.h.bf16 %v4970_v57  ;;  %v3247_v52 = vunpack.i.h.bf16 %v4971_v55  ;;  %v4979_v55 = vld [vmem:[#allocation14_spill] sm:$0xff] }
 0x27a   :  { %v2551_v24 = vadd.f32 %v2505_v17, %v2391_v38  ;;  %v1400_v46 = vadd.f32 %v1355_v40, %v1240_v30  ;;  %v1487_v38 = vmul.f32 %v3121_v27, %v4975_v59  ;;  %v3041_v27 = vunpack.i.l.bf16 %v4979_v55 }
 0x27b   :  { %v1931_v43 = vpop.permute.xlu0 %1930  ;;  %v1515_v48 = vpop.permute.xlu1 %1514  ;;  %v1327_v30 = vmul.f32 %v3079_v29, %v4975_v59  ;;  %v3289_v29 = vunpack.i.h.bf16 %v4973_v47 }
 0x27c   :  { %v2567_v20 = vmax.f32 %v2551_v24, 0.0  ;;  %v1560_v26 = vadd.f32 %v1515_v48, %v1400_v46  ;;  %v4977_v48 = vld [vmem:[#allocation68_spill] sm:$0xff] }
 0x27d   :  { %1208 = vrot.lane.b32.xlu0 %v1167_v6, %s3476_s29  ;;  %2102 = vrot.lane.b32.xlu1 %v2062_v51, %s3477_s30  ;;  %v1743_v6 = vmul.f32 %v3205_v5, %v4977_v48  ;;  %v1903_v51 = vmul.f32 %v3247_v52, %v4977_v48  ;;  %v4981_v52 = vld [vmem:[#allocation12_spill] sm:$0xff] }
 0x27e   :  { %v2744_v17 = vpack.c.bf16 %v2567_v20, %v2567_v20  ;;  %v1656_v40 = vadd.f32 %v1640_v54, %v1560_v26  ;;  %v2979_v20 = vunpack.i.h.bf16 %v4969_v33  ;;  %v4978_v26 = vld [vmem:[#allocation56_spill] sm:$0xff] }
 0x27f   :  { %v1771_v42 = vpop.permute.xlu1 %1770  ;;  %v4459_v58 = vpop.permute.xlu0 %2354  ;;  %v2216_v57 = vmul.f32 %v3315_v34, %v4978_v26  ;;  %v3083_v34 = vunpack.i.l.bf16 %v4981_v52 }
 0x280   :  { %2648 = vst.msk [vmem:[%s4806_s7 + $0x4] sm:$0xf] %vm2646_vm1, %v2744_v17  ;;  %v1816_v4 = vadd.f32 %v1771_v42, %v1656_v40  ;;  %v1081_v17 = vmul.f32 %v2979_v20, %v4235_v61 }
 0x281   :  { %1528 = vrot.lane.b32.xlu0 %v1487_v38, %s3477_s30  ;;  %1368 = vrot.lane.b32.xlu1 %v1327_v30, %s3475_s6  ;;  %v2063_v38 = vmul.f32 %v3289_v29, %v4977_v48  ;;  %v4980_v30 = vld [vmem:[#allocation69_spill] sm:$0xff]  ;;  %v4983_v29 = vld [vmem:[#allocation34_spill] sm:$0xff] }
 0x282   :  { %v1976_v49 = vadd.f32 %v1931_v43, %v1816_v4  ;;  %v1168_v33 = vmul.f32 %v3041_v27, %v4980_v30  ;;  %v1328_v26 = vmul.f32 %v3083_v34, %v4980_v30  ;;  %v4986_v34 = vld [vmem:[#allocation44_spill] sm:$0xff] }
 0x283   :  { %v2091_v24 = vpop.permute.xlu1 %2090  ;;  %v4472_v46 = vpop.permute.xlu0 %2514 }
 0x284   :  { %v2136_v54 = vadd.f32 %v2091_v24, %v1976_v49  ;;  %v4982_v49 = vld [vmem:[#allocation25_spill] sm:$0xff]  ;;  %v3148_v24 = vunpack.i.h.bf16 %v4974_v62 }
 0x285   :  { %1784 = vrot.lane.b32.xlu0 %v1743_v6, %s3476_s29  ;;  %1944 = vrot.lane.b32.xlu1 %v1903_v51, %s3475_s6  ;;  %v3125_v47 = vunpack.i.l.bf16 %v4982_v49 }
 0x286   :  { %v2232_v43 = vadd.f32 %v2216_v57, %v2136_v54  ;;  %v1641_v27 = vmul.f32 %v3148_v24, %v4250_v19  ;;  %v3042_v19 = vunpack.i.h.bf16 %v4979_v55 }
 0x287   :  { %v1357_v40 = vpop.permute.xlu1 %1356  ;;  %v1197_v42 = vpop.permute.xlu0 %1196 }
 0x288   :  { %v2392_v4 = vadd.f32 %v4375_v15, %v2232_v43  ;;  %v1241_v5 = vadd.f32 %v1197_v42, %v1081_v17  ;;  %v1488_v15 = vmul.f32 %v3125_v47, %v4980_v30  ;;  %v3209_v43 = vunpack.i.l.bf16 %v4983_v29  ;;  %v4984_v17 = vld [vmem:[#allocation37_spill] sm:$0xff] }
 0x289   :  { %2104 = vrot.lane.b32.xlu0 %v2063_v38, %s3477_s30  ;;  %1210 = vrot.lane.b32.xlu1 %v1168_v33, %s3476_s29  ;;  %v3251_v42 = vunpack.i.l.bf16 %v4984_v17  ;;  %v4985_v33 = vld [vmem:[#allocation70_spill] sm:$0xff]  ;;  %v3293_v47 = vunpack.i.l.bf16 %v4986_v34 }
 0x28a   :  { %v2552_v61 = vadd.f32 %v4385_v25, %v2392_v4  ;;  %v1401_v6 = vadd.f32 %v1357_v40, %v1241_v5  ;;  %v1744_v5 = vmul.f32 %v3209_v43, %v4985_v33 }
 0x28b   :  { %v1933_v51 = vpop.permute.xlu1 %1932  ;;  %v1517_v20 = vpop.permute.xlu0 %1516  ;;  %v1904_v4 = vmul.f32 %v3251_v42, %v4985_v33 }
 0x28c   :  { %v2568_v57 = vmax.f32 %v2552_v61, 0.0  ;;  %v1561_v54 = vadd.f32 %v1517_v20, %v1401_v6  ;;  %v4987_v6 = vld [vmem:[#allocation71_spill] sm:$0xff] }
 0x28d   :  { %1370 = vrot.lane.b32.xlu0 %v1328_v26, %s3475_s6  ;;  %1530 = vrot.lane.b32.xlu1 %v1488_v15, %s3477_s30  ;;  %v1169_v20 = vmul.f32 %v3042_v19, %v4987_v6  ;;  %v2064_v26 = vmul.f32 %v3293_v47, %v4985_v33  ;;  %v3084_v15 = vunpack.i.h.bf16 %v4981_v52  ;;  %v3316_v52 = vunpack.i.h.bf16 %v4976_v13  ;;  %v4988_v47 = vld [vmem:[#allocation72_spill] sm:$0xff] }
 0x28e   :  { %v2745_v25 = vpack.c.bf16 %v2568_v57, %v2568_v57  ;;  %v1657_v62 = vadd.f32 %v1641_v27, %v1561_v54  ;;  %v3126_v57 = vunpack.i.h.bf16 %v4982_v49  ;;  %v4993_v33 = vld [vmem:[#allocation20_spill] sm:$0xff] }
 0x28f   :  { %v4499_v40 = vpop.permute.xlu0 %2350  ;;  %v4501_v38 = vpop.permute.xlu1 %2356  ;;  %v1329_v43 = vmul.f32 %v3084_v15, %v4987_v6  ;;  %v4989_v15 = vld [vmem:[#allocation3_spill] sm:$0xff] }
 0x290   :  { %2649 = vst.msk [vmem:[%s4806_s7 + $0x8] sm:$0xf] %vm2646_vm1, %v2745_v25  ;;  %v1489_v27 = vmul.f32 %v3126_v57, %v4987_v6  ;;  %v3210_v25 = vunpack.i.h.bf16 %v4983_v29  ;;  %v4990_v57 = vld [vmem:[#allocation62_spill] sm:$0xff] }
 0x291   :  { %1946 = vrot.lane.b32.xlu0 %v1904_v4, %s3475_s6  ;;  %1786 = vrot.lane.b32.xlu1 %v1744_v5, %s3476_s29  ;;  %v3252_v4 = vunpack.i.h.bf16 %v4984_v17  ;;  %v2217_v29 = vmul.f32 %v3316_v52, %v4990_v57  ;;  %v4991_v17 = vld [vmem:[#allocation8_spill] sm:$0xff] }
 0x292   :  { %v3046_v6 = vunpack.i.l.bf16 %v4991_v17 }
 0x293   :  { %v4513_v24 = vpop.permute.xlu0 %2510  ;;  %v4515_v61 = vpop.permute.xlu1 %2516 }
 0x295   :  { %1212 = vrot.lane.b32.xlu0 %v1169_v20, %s3476_s29  ;;  %2106 = vrot.lane.b32.xlu1 %v2064_v26, %s3477_s30  ;;  %v1745_v20 = vmul.f32 %v3210_v25, %v4988_v47  ;;  %v1905_v26 = vmul.f32 %v3252_v4, %v4988_v47  ;;  %v1170_v4 = vmul.f32 %v3046_v6, %v4214_v56 }
 0x297   :  { %v1773_v55 = vpop.permute.xlu0 %1772  ;;  %v4523_v54 = vpop.permute.xlu1 %2352 }
 0x298   :  { %v1817_v42 = vadd.f32 %v1773_v55, %v1657_v62  ;;  %v2984_v62 = vunpack.i.l.bf16 %v4989_v15 }
 0x299   :  { %1532 = vrot.lane.b32.xlu0 %v1489_v27, %s3477_s30  ;;  %1372 = vrot.lane.b32.xlu1 %v1329_v43, %s3475_s6  ;;  %v3294_v27 = vunpack.i.h.bf16 %v4986_v34  ;;  %v3088_v34 = vunpack.i.l.bf16 %v4993_v33 }
 0x29a   :  { %v1977_v49 = vadd.f32 %v1933_v51, %v1817_v42  ;;  %v1082_v51 = vmul.f32 %v2984_v62, %v4067_v14 }
 0x29b   :  { %v2093_v5 = vpop.permute.xlu0 %2092  ;;  %v4532_v19 = vpop.permute.xlu1 %2512  ;;  %v2065_v25 = vmul.f32 %v3294_v27, %v4988_v47  ;;  %v1330_v6 = vmul.f32 %v3088_v34, %v4214_v56  ;;  %v3047_v34 = vunpack.i.h.bf16 %v4991_v17 }
 0x29c   :  { %v2137_v55 = vadd.f32 %v2093_v5, %v1977_v49  ;;  %v4992_v5 = vld [vmem:[#allocation17_spill] sm:$0xff] }
 0x29d   :  { %1788 = vrot.lane.b32.xlu0 %v1745_v20, %s3476_s29  ;;  %1948 = vrot.lane.b32.xlu1 %v1905_v26, %s3475_s6  ;;  %v3130_v57 = vunpack.i.l.bf16 %v4992_v5  ;;  %v4994_v20 = vld [vmem:[#allocation21_spill] sm:$0xff] }
 0x29e   :  { %v2233_v13 = vadd.f32 %v2217_v29, %v2137_v55  ;;  %v3152_v26 = vunpack.i.l.bf16 %v4994_v20 }
 0x29f   :  { %v1359_v43 = vpop.permute.xlu0 %1358  ;;  %v1199_v42 = vpop.permute.xlu1 %1198 }
 0x2a0   :  { %v2393_v52 = vadd.f32 %v4411_v10, %v2233_v13  ;;  %v1242_v49 = vadd.f32 %v1199_v42, %v1082_v51  ;;  %v1490_v10 = vmul.f32 %v3130_v57, %v4214_v56  ;;  %v1642_v51 = vmul.f32 %v3152_v26, %v4075_v7  ;;  %v4995_v42 = vld [vmem:[#allocation32_spill] sm:$0xff]  ;;  %v4997_v26 = vld [vmem:[#allocation43_spill] sm:$0xff] }
 0x2a1   :  { %2108 = vrot.lane.b32.xlu0 %v2065_v25, %s3477_s30  ;;  %1214 = vrot.lane.b32.xlu1 %v1170_v4, %s3476_s29  ;;  %v3214_v47 = vunpack.i.l.bf16 %v4995_v42  ;;  %v4996_v25 = vld [vmem:[#allocation40_spill] sm:$0xff] }
 0x2a2   :  { %v2553_v14 = vadd.f32 %v4418_v35, %v2393_v52  ;;  %v1402_v62 = vadd.f32 %v1359_v43, %v1242_v49  ;;  %v3256_v30 = vunpack.i.l.bf16 %v4996_v25 }
 0x2a3   :  { %v1935_v29 = vpop.permute.xlu0 %1934  ;;  %v1519_v55 = vpop.permute.xlu1 %1518  ;;  %v1746_v57 = vmul.f32 %v3214_v47, %v4219_v28 }
 0x2a4   :  { %v2569_v27 = vmax.f32 %v2553_v14, 0.0  ;;  %v1562_v13 = vadd.f32 %v1519_v55, %v1402_v62  ;;  %v1906_v49 = vmul.f32 %v3256_v30, %v4219_v28  ;;  %v3298_v14 = vunpack.i.l.bf16 %v4997_v26  ;;  %v4998_v62 = vld [vmem:[#allocation48_spill] sm:$0xff] }
 0x2a5   :  { %1374 = vrot.lane.b32.xlu0 %v1330_v6, %s3475_s6  ;;  %1534 = vrot.lane.b32.xlu1 %v1490_v10, %s3477_s30  ;;  %v3320_v55 = vunpack.i.l.bf16 %v4998_v62 }
 0x2a6   :  { %v2746_v35 = vpack.c.bf16 %v2569_v27, %v2569_v27  ;;  %v1658_v43 = vadd.f32 %v1642_v51, %v1562_v13  ;;  %v2066_v47 = vmul.f32 %v3298_v14, %v4219_v28  ;;  %v1171_v27 = vmul.f32 %v3047_v34, %v4223_v36 }
 0x2a7   :  { %v1775_v4 = vpop.permute.xlu1 %1774  ;;  %v4559_v52 = vpop.permute.xlu0 %2362  ;;  %v2985_v13 = vunpack.i.h.bf16 %v4989_v15  ;;  %v2218_v17 = vmul.f32 %v3320_v55, %v4266_v53  ;;  %v3153_v14 = vunpack.i.h.bf16 %v4994_v20 }
 0x2a8   :  { %2650 = vst.msk [vmem:[%s4806_s7 + $0xc] sm:$0xf] %vm2646_vm1, %v2746_v35  ;;  %v1818_v7 = vadd.f32 %v1775_v4, %v1658_v43  ;;  %v3131_v35 = vunpack.i.h.bf16 %v4992_v5  ;;  %v3089_v43 = vunpack.i.h.bf16 %v4993_v33  ;;  %v3215_v5 = vunpack.i.h.bf16 %v4995_v42 }
 0x2a9   :  { %1950 = vrot.lane.b32.xlu0 %v1906_v49, %s3475_s6  ;;  %1790 = vrot.lane.b32.xlu1 %v1746_v57, %s3476_s29  ;;  %v1083_v4 = vmul.f32 %v2985_v13, %v4081_v50  ;;  %v3257_v33 = vunpack.i.h.bf16 %v4996_v25  ;;  %v1643_v42 = vmul.f32 %v3153_v14, %v4089_v22  ;;  %v5000_v25 = vld [vmem:[#allocation15_spill] sm:$0xff]  ;;  %v5001_v22 = vld [vmem:[#allocation13_spill] sm:$0xff] }
 0x2aa   :  { %v1978_v6 = vadd.f32 %v1935_v29, %v1818_v7  ;;  %v1331_v7 = vmul.f32 %v3089_v43, %v4223_v36  ;;  %v1491_v15 = vmul.f32 %v3131_v35, %v4223_v36  ;;  %v3299_v35 = vunpack.i.h.bf16 %v4997_v26 }
 0x2ab   :  { %v2095_v30 = vpop.permute.xlu1 %2094  ;;  %v4572_v10 = vpop.permute.xlu0 %2522  ;;  %v3093_v26 = vunpack.i.l.bf16 %v5001_v22 }
 0x2ac   :  { %v2138_v51 = vadd.f32 %v2095_v30, %v1978_v6 }
 0x2ad   :  { %2110 = vrot.lane.b32.xlu1 %v2066_v47, %s3477_s30  ;;  %1216 = vrot.lane.b32.xlu0 %v1171_v27, %s3476_s29  ;;  %v4999_v47 = vld [vmem:[#allocation73_spill] sm:$0xff] }
 0x2ae   :  { %v2234_v29 = vadd.f32 %v2218_v17, %v2138_v51  ;;  %v1907_v27 = vmul.f32 %v3257_v33, %v4999_v47  ;;  %v3051_v51 = vunpack.i.l.bf16 %v5000_v25  ;;  %v5003_v33 = vld [vmem:[#allocation36_spill] sm:$0xff] }
 0x2af   :  { %v1361_v49 = vpop.permute.xlu1 %1360  ;;  %v1201_v57 = vpop.permute.xlu0 %1200  ;;  %v3219_v14 = vunpack.i.l.bf16 %v5003_v33 }
 0x2b0   :  { %v2394_v53 = vadd.f32 %v4499_v40, %v2234_v29  ;;  %v1243_v34 = vadd.f32 %v1201_v57, %v1083_v4  ;;  %v1747_v40 = vmul.f32 %v3215_v5, %v4999_v47  ;;  %v2067_v4 = vmul.f32 %v3299_v35, %v4999_v47  ;;  %v5002_v57 = vld [vmem:[#allocation27_spill] sm:$0xff] }
 0x2b1   :  { %1376 = vrot.lane.b32.xlu1 %v1331_v7, %s3475_s6  ;;  %1536 = vrot.lane.b32.xlu0 %v1491_v15, %s3477_s30  ;;  %v3135_v7 = vunpack.i.l.bf16 %v5002_v57 }
 0x2b2   :  { %v2554_v50 = vadd.f32 %v4513_v24, %v2394_v53  ;;  %v1403_v55 = vadd.f32 %v1361_v49, %v1243_v34  ;;  %v1172_v49 = vmul.f32 %v3051_v51, %v4241_v23  ;;  %v1332_v34 = vmul.f32 %v3093_v26, %v4241_v23  ;;  %v5005_v51 = vld [vmem:[#allocation46_spill] sm:$0xff] }
 0x2b3   :  { %v1937_v6 = vpop.permute.xlu1 %1936  ;;  %v1521_v30 = vpop.permute.xlu0 %1520  ;;  %v1492_v5 = vmul.f32 %v3135_v7, %v4241_v23  ;;  %v3303_v35 = vunpack.i.l.bf16 %v5005_v51 }
 0x2b4   :  { %v2570_v13 = vmax.f32 %v2554_v50, 0.0  ;;  %v1563_v17 = vadd.f32 %v1521_v30, %v1403_v55  ;;  %v5004_v50 = vld [vmem:[#allocation38_spill] sm:$0xff] }
 0x2b5   :  { %1952 = vrot.lane.b32.xlu1 %v1907_v27, %s3475_s6  ;;  %1792 = vrot.lane.b32.xlu0 %v1747_v40, %s3476_s29  ;;  %v3261_v55 = vunpack.i.l.bf16 %v5004_v50 }
 0x2b6   :  { %v2747_v24 = vpack.c.bf16 %v2570_v13, %v2570_v13  ;;  %v1659_v20 = vadd.f32 %v1643_v42, %v1563_v17  ;;  %v1748_v13 = vmul.f32 %v3219_v14, %v4246_v39  ;;  %v3052_v42 = vunpack.i.h.bf16 %v5000_v25 }
 0x2b7   :  { %v4599_v43 = vpop.permute.xlu0 %2358  ;;  %v4601_v29 = vpop.permute.xlu1 %2364  ;;  %v1908_v40 = vmul.f32 %v3261_v55, %v4246_v39 }
 0x2b8   :  { %2651 = vst.msk [vmem:[%s4806_s7 + $0x10] sm:$0xf] %vm2646_vm1, %v2747_v24  ;;  %v5006_v24 = vld [vmem:[#allocation4_spill] sm:$0xff]  ;;  %v1173_v14 = vmul.f32 %v3052_v42, %v4253_v37 }
 0x2b9   :  { %2112 = vrot.lane.b32.xlu0 %v2067_v4, %s3477_s30  ;;  %1218 = vrot.lane.b32.xlu1 %v1172_v49, %s3476_s29  ;;  %v2989_v4 = vunpack.i.l.bf16 %v5006_v24  ;;  %v3321_v49 = vunpack.i.h.bf16 %v4998_v62 }
 0x2bb   :  { %v4613_v15 = vpop.permute.xlu0 %2518  ;;  %v4615_v53 = vpop.permute.xlu1 %2360  ;;  %v1084_v55 = vmul.f32 %v2989_v4, %v4114_v32 }
 0x2bd   :  { %1378 = vrot.lane.b32.xlu0 %v1332_v34, %s3475_s6  ;;  %1538 = vrot.lane.b32.xlu1 %v1492_v5, %s3477_s30  ;;  %v2068_v5 = vmul.f32 %v3303_v35, %v4246_v39 }
 0x2bf   :  { %v1777_v30 = vpop.permute.xlu0 %1776  ;;  %v4623_v27 = vpop.permute.xlu1 %2520 }
 0x2c0   :  { %v1819_v17 = vadd.f32 %v1777_v30, %v1659_v20  ;;  %v2219_v20 = vmul.f32 %v3321_v49, %v4053_v41  ;;  %v3094_v30 = vunpack.i.h.bf16 %v5001_v22  ;;  %v5007_v49 = vld [vmem:[#allocation22_spill] sm:$0xff] }
 0x2c1   :  { %1954 = vrot.lane.b32.xlu0 %v1908_v40, %s3475_s6  ;;  %1794 = vrot.lane.b32.xlu1 %v1748_v13, %s3476_s29  ;;  %v3136_v40 = vunpack.i.h.bf16 %v5002_v57  ;;  %v3420_v13 = vunpack.i.h.bf16 %v4309_v1  ;;  %v3157_v32 = vunpack.i.l.bf16 %v5007_v49  ;;  %v3220_v57 = vunpack.i.h.bf16 %v5003_v33 }
 0x2c2   :  { %v1979_v26 = vadd.f32 %v1937_v6, %v1819_v17  ;;  %v1333_v42 = vmul.f32 %v3094_v30, %v4253_v37  ;;  %v3304_v33 = vunpack.i.h.bf16 %v5005_v51  ;;  %v3425_v51 = vunpack.i.h.bf16 %v4349_v60 }
 0x2c3   :  { %v2097_v7 = vpop.permute.xlu0 %2096  ;;  %v1203_v34 = vpop.permute.xlu1 %1202  ;;  %v1493_v41 = vmul.f32 %v3136_v40, %v4253_v37 }
 0x2c4   :  { %v2139_v25 = vadd.f32 %v2097_v7, %v1979_v26  ;;  %v1244_v6 = vadd.f32 %v1203_v34, %v1084_v55  ;;  %v1644_v7 = vmul.f32 %v3157_v32, %v4958_v12  ;;  %v2481_v34 = vmul.f32 %v3420_v13, %v4092_v2 }
 0x2c5   :  { %2114 = vrot.lane.b32.xlu1 %v2068_v5, %s3477_s30  ;;  %1220 = vrot.lane.b32.xlu0 %v1173_v14, %s3476_s29  ;;  %v3262_v55 = vunpack.i.h.bf16 %v5004_v50  ;;  %v2990_v13 = vunpack.i.h.bf16 %v5006_v24 }
 0x2c6   :  { %v2235_v62 = vadd.f32 %v2219_v20, %v2139_v25  ;;  %v1749_v20 = vmul.f32 %v3220_v57, %v4258_v0 }
 0x2c7   :  { %v1363_v17 = vpop.permute.xlu0 %1362  ;;  %v1523_v35 = vpop.permute.xlu1 %1522  ;;  %v1085_v24 = vmul.f32 %v2990_v13, %v4127_v63 }
 0x2c8   :  { %v2395_v22 = vadd.f32 %v4523_v54, %v2235_v62  ;;  %v1404_v4 = vadd.f32 %v1363_v17, %v1244_v6  ;;  %v1909_v62 = vmul.f32 %v3262_v55, %v4258_v0  ;;  %v2069_v6 = vmul.f32 %v3304_v33, %v4258_v0  ;;  %v5008_v17 = vld [vmem:[#allocation50_spill] sm:$0xff] }
 0x2c9   :  { %1380 = vrot.lane.b32.xlu1 %v1333_v42, %s3475_s6  ;;  %1540 = vrot.lane.b32.xlu0 %v1493_v41, %s3477_s30  ;;  %v3424_v42 = vunpack.i.l.bf16 %v4349_v60 }
 0x2ca   :  { %v2555_v26 = vadd.f32 %v4532_v19, %v2395_v22  ;;  %v1564_v1 = vadd.f32 %v1523_v35, %v1404_v4  ;;  %v3325_v35 = vunpack.i.l.bf16 %v5008_v17  ;;  %v3430_v22 = vunpack.i.h.bf16 %v4352_v21 }
 0x2cb   :  { %v1939_v5 = vpop.permute.xlu0 %1938  ;;  %v1779_v14 = vpop.permute.xlu1 %1778  ;;  %v3429_v4 = vunpack.i.l.bf16 %v4352_v21  ;;  %v2482_v57 = vmul.f32 %v3424_v42, %v4130_v3 }
 0x2cc   :  { %v2571_v25 = vmax.f32 %v2555_v26, 0.0  ;;  %v1660_v54 = vadd.f32 %v1644_v7, %v1564_v1  ;;  %v2220_v41 = vmul.f32 %v3325_v35, %v4207_v45  ;;  %v2483_v26 = vmul.f32 %v3425_v51, %v4965_v16 }
 0x2cd   :  { %2524 = vrot.lane.b32.xlu1 %v2481_v34, %s3475_s6  ;;  %1796 = vrot.lane.b32.xlu0 %v1749_v20, %s3476_s29  ;;  %v3158_v45 = vunpack.i.h.bf16 %v5007_v49  ;;  %v2485_v21 = vmul.f32 %v3430_v22, %v4137_v8  ;;  %v3326_v35 = vunpack.i.h.bf16 %v5008_v17 }
 0x2ce   :  { %v2748_v19 = vpack.c.bf16 %v2571_v25, %v2571_v25  ;;  %v1820_v30 = vadd.f32 %v1779_v14, %v1660_v54  ;;  %v2484_v14 = vmul.f32 %v3429_v4, %v4962_v31 }
 0x2cf   :  { %v2099_v40 = vpop.permute.xlu1 %2098  ;;  %v4657_v12 = vpop.permute.xlu0 %2370  ;;  %v1645_v33 = vmul.f32 %v3158_v45, %v4134_v9 }
 0x2d0   :  { %2652 = vst.msk [vmem:[%s4806_s7 + $0x14] sm:$0xf] %vm2646_vm1, %v2748_v19  ;;  %v1980_v50 = vadd.f32 %v1939_v5, %v1820_v30 }
 0x2d1   :  { %1956 = vrot.lane.b32.xlu1 %v1909_v62, %s3475_s6  ;;  %2116 = vrot.lane.b32.xlu0 %v2069_v6, %s3477_s30  ;;  %v5009_v6 = vld [vmem:[#allocation10_spill] sm:$0xff] }
 0x2d2   :  { %v2140_v32 = vadd.f32 %v2099_v40, %v1980_v50  ;;  %v2994_v13 = vunpack.i.l.bf16 %v5009_v6 }
 0x2d3   :  { %v1365_v1 = vpop.permute.xlu1 %1364  ;;  %v1205_v7 = vpop.permute.xlu0 %1204 }
 0x2d4   :  { %v2236_v60 = vadd.f32 %v2220_v41, %v2140_v32  ;;  %v1245_v34 = vadd.f32 %v1205_v7, %v1085_v24  ;;  %v2221_v41 = vmul.f32 %v3326_v35, %v4270_v11  ;;  %v1086_v24 = vmul.f32 %v2994_v13, %v4153_v18 }
 0x2d5   :  { %2528 = vrot.lane.b32.xlu1 %v2483_v26, %s3475_s6  ;;  %2526 = vrot.lane.b32.xlu0 %v2482_v57, %s3475_s6  ;;  %v2995_v18 = vunpack.i.h.bf16 %v5009_v6 }
 0x2d6   :  { %v2396_v63 = vadd.f32 %v4459_v58, %v2236_v60  ;;  %v1405_v5 = vadd.f32 %v1365_v1, %v1245_v34  ;;  %v5010_v1 = vld [vmem:[#allocation29_spill] sm:$0xff] }
 0x2d7   :  { %v1941_v20 = vpop.permute.xlu1 %1940  ;;  %v1525_v25 = vpop.permute.xlu0 %1524  ;;  %v3162_v7 = vunpack.i.l.bf16 %v5010_v1  ;;  %v3163_v13 = vunpack.i.h.bf16 %v5010_v1 }
 0x2d8   :  { %v2556_v54 = vadd.f32 %v4472_v46, %v2396_v63  ;;  %v1565_v55 = vadd.f32 %v1525_v25, %v1405_v5 }
 0x2d9   :  { %2532 = vrot.lane.b32.xlu1 %v2485_v21, %s3475_s6  ;;  %2530 = vrot.lane.b32.xlu0 %v2484_v14, %s3475_s6  ;;  %v1646_v63 = vmul.f32 %v3162_v7, %v4972_v44 }
 0x2da   :  { %v2572_v19 = vmax.f32 %v2556_v54, 0.0  ;;  %v1661_v49 = vadd.f32 %v1645_v33, %v1565_v55  ;;  %v5011_v33 = vld [vmem:[#allocation49_spill] sm:$0xff] }
 0x2db   :  { %v4687_v30 = vpop.permute.xlu0 %2366  ;;  %v4689_v58 = vpop.permute.xlu1 %2372  ;;  %v3331_v1 = vunpack.i.h.bf16 %v5011_v33 }
 0x2dc   :  { %v2749_v40 = vpack.c.bf16 %v2572_v19, %v2572_v19  ;;  %v3330_v19 = vunpack.i.l.bf16 %v5011_v33 }
 0x2de   :  { %2653 = vst.msk [vmem:[%s4806_s7 + $0x18] sm:$0xf] %vm2646_vm1, %v2749_v40 }
 0x2df   :  { %v1781_v46 = vpop.permute.xlu0 %1780  ;;  %v4695_v62 = vpop.permute.xlu1 %2368 }
 0x2e0   :  { %v1821_v9 = vadd.f32 %v1781_v46, %v1661_v49  ;;  %v5012_v49 = vld [vmem:[#allocation60_spill] sm:$0xff] }
 0x2e1   :  { %v2222_v40 = vmul.f32 %v3330_v19, %v5012_v49  ;;  %v5017_v19 = vld [vmem:[#allocation70_spill] sm:$0xff] }
 0x2e2   :  { %v1981_v50 = vadd.f32 %v1941_v20, %v1821_v9 }
 0x2e3   :  { %v2101_v51 = vpop.permute.xlu0 %2100  ;;  %v1207_v42 = vpop.permute.xlu1 %1206 }
 0x2e4   :  { %v2141_v32 = vadd.f32 %v2101_v51, %v1981_v50  ;;  %v1246_v4 = vadd.f32 %v1207_v42, %v1086_v24 }
 0x2e6   :  { %v2237_v22 = vadd.f32 %v2221_v41, %v2141_v32  ;;  %v1647_v41 = vmul.f32 %v3163_v13, %v4977_v48  ;;  %v5015_v48 = vld [vmem:[#allocation61_spill] sm:$0xff] }
 0x2e7   :  { %v1367_v57 = vpop.permute.xlu0 %1366  ;;  %v1527_v26 = vpop.permute.xlu1 %1526 }
 0x2e8   :  { %v2397_v60 = vadd.f32 %v4501_v38, %v2237_v22  ;;  %v1406_v34 = vadd.f32 %v1367_v57, %v1246_v4  ;;  %v1087_v38 = vmul.f32 %v2995_v18, %v4975_v59  ;;  %v5013_v4 = vld [vmem:[#allocation5_spill] sm:$0xff]  ;;  %v5016_v18 = vld [vmem:[#allocation24_spill] sm:$0xff] }
 0x2e9   :  { %v2999_v57 = vunpack.i.l.bf16 %v5013_v4 }
 0x2ea   :  { %v2557_v45 = vadd.f32 %v4515_v61, %v2397_v60  ;;  %v1566_v17 = vadd.f32 %v1527_v26, %v1406_v34 }
 0x2eb   :  { %v1943_v5 = vpop.permute.xlu0 %1942  ;;  %v1783_v14 = vpop.permute.xlu1 %1782 }
 0x2ec   :  { %v2573_v11 = vmax.f32 %v2557_v45, 0.0  ;;  %v1662_v21 = vadd.f32 %v1646_v63, %v1566_v17  ;;  %v5014_v63 = vld [vmem:[#allocation69_spill] sm:$0xff] }
 0x2ee   :  { %v2750_v20 = vpack.c.bf16 %v2573_v11, %v2573_v11  ;;  %v1822_v25 = vadd.f32 %v1783_v14, %v1662_v21 }
 0x2ef   :  { %v1209_v54 = vpop.permute.xlu0 %1208  ;;  %v2103_v55 = vpop.permute.xlu1 %2102 }
 0x2f0   :  { %2654 = vst.msk [vmem:[%s4806_s7 + $0x1c] sm:$0xf] %vm2646_vm1, %v2750_v20  ;;  %v1982_v44 = vadd.f32 %v1943_v5, %v1822_v25  ;;  %v1247_v61 = vadd.f32 %v1209_v54, %v1087_v38  ;;  %v3167_v20 = vunpack.i.l.bf16 %v5016_v18 }
 0x2f2   :  { %v2142_v46 = vadd.f32 %v2103_v55, %v1982_v44  ;;  %v1648_v38 = vmul.f32 %v3167_v20, %v5017_v19 }
 0x2f3   :  { %v1529_v9 = vpop.permute.xlu0 %1528  ;;  %v1369_v6 = vpop.permute.xlu1 %1368 }
 0x2f4   :  { %v2238_v35 = vadd.f32 %v2222_v40, %v2142_v46  ;;  %v1407_v50 = vadd.f32 %v1369_v6, %v1247_v61  ;;  %v3000_v46 = vunpack.i.h.bf16 %v5013_v4 }
 0x2f6   :  { %v2398_v51 = vadd.f32 %v4599_v43, %v2238_v35  ;;  %v1567_v42 = vadd.f32 %v1529_v9, %v1407_v50  ;;  %v1088_v43 = vmul.f32 %v2999_v57, %v5014_v63  ;;  %v5018_v50 = vld [vmem:[#allocation52_spill] sm:$0xff] }
 0x2f7   :  { %v1785_v32 = vpop.permute.xlu0 %1784  ;;  %v1945_v24 = vpop.permute.xlu1 %1944 }
 0x2f8   :  { %v2558_v59 = vadd.f32 %v4613_v15, %v2398_v51  ;;  %v1663_v22 = vadd.f32 %v1647_v41, %v1567_v42  ;;  %v2223_v15 = vmul.f32 %v3331_v1, %v5015_v48  ;;  %v3335_v51 = vunpack.i.l.bf16 %v5018_v50  ;;  %v5019_v41 = vld [vmem:[#allocation71_spill] sm:$0xff] }
 0x2fa   :  { %v2574_v26 = vmax.f32 %v2558_v59, 0.0  ;;  %v1823_v7 = vadd.f32 %v1785_v32, %v1663_v22  ;;  %v1089_v32 = vmul.f32 %v3000_v46, %v5019_v41  ;;  %v5024_v41 = vld [vmem:[#allocation51_spill] sm:$0xff] }
 0x2fb   :  { %v2105_v60 = vpop.permute.xlu0 %2104  ;;  %v1211_v34 = vpop.permute.xlu1 %1210 }
 0x2fc   :  { %v2751_v45 = vpack.c.bf16 %v2574_v26, %v2574_v26  ;;  %v1983_v17 = vadd.f32 %v1945_v24, %v1823_v7  ;;  %v1248_v14 = vadd.f32 %v1211_v34, %v1088_v43  ;;  %v3168_v26 = vunpack.i.h.bf16 %v5016_v18 }
 0x2fd   :  { %v3336_v18 = vunpack.i.h.bf16 %v5018_v50 }
 0x2fe   :  { %2655 = vst.msk [vmem:[%s4806_s7 + $0x20] sm:$0xf] %vm2646_vm1, %v2751_v45  ;;  %v2143_v5 = vadd.f32 %v2105_v60, %v1983_v17  ;;  %v5021_v45 = vld [vmem:[#allocation72_spill] sm:$0xff] }
 0x2ff   :  { %v1371_v11 = vpop.permute.xlu0 %1370  ;;  %v1531_v21 = vpop.permute.xlu1 %1530  ;;  %v1649_v17 = vmul.f32 %v3168_v26, %v5021_v45 }
 0x300   :  { %v2239_v25 = vadd.f32 %v2223_v15, %v2143_v5  ;;  %v1408_v54 = vadd.f32 %v1371_v11, %v1248_v14  ;;  %v5022_v5 = vld [vmem:[#allocation11_spill] sm:$0xff] }
 0x301   :  { %v3004_v14 = vunpack.i.l.bf16 %v5022_v5  ;;  %v3005_v50 = vunpack.i.h.bf16 %v5022_v5 }
 0x302   :  { %v2399_v55 = vadd.f32 %v4615_v53, %v2239_v25  ;;  %v1568_v33 = vadd.f32 %v1531_v21, %v1408_v54 }
 0x303   :  { %v1947_v44 = vpop.permute.xlu0 %1946  ;;  %v1787_v61 = vpop.permute.xlu1 %1786 }
 0x304   :  { %v2559_v49 = vadd.f32 %v4623_v27, %v2399_v55  ;;  %v1664_v40 = vadd.f32 %v1648_v38, %v1568_v33  ;;  %v5020_v27 = vld [vmem:[#allocation59_spill] sm:$0xff] }
 0x305   :  { %v2224_v59 = vmul.f32 %v3335_v51, %v5020_v27 }
 0x306   :  { %v2575_v9 = vmax.f32 %v2559_v49, 0.0  ;;  %v1824_v6 = vadd.f32 %v1787_v61, %v1664_v40  ;;  %v5023_v61 = vld [vmem:[#allocation31_spill] sm:$0xff] }
 0x307   :  { %v1213_v13 = vpop.permute.xlu0 %1212  ;;  %v2107_v35 = vpop.permute.xlu1 %2106  ;;  %v3172_v49 = vunpack.i.l.bf16 %v5023_v61 }
 0x308   :  { %v2752_v42 = vpack.c.bf16 %v2575_v9, %v2575_v9  ;;  %v1984_v53 = vadd.f32 %v1947_v44, %v1824_v6  ;;  %v1249_v24 = vadd.f32 %v1213_v13, %v1089_v32  ;;  %v3340_v32 = vunpack.i.l.bf16 %v5024_v41 }
 0x309   :  { %v1650_v6 = vmul.f32 %v3172_v49, %v4219_v28  ;;  %v3173_v28 = vunpack.i.h.bf16 %v5023_v61 }
 0x30a   :  { %2656 = vst.msk [vmem:[%s4806_s7 + $0x24] sm:$0xf] %vm2646_vm1, %v2752_v42  ;;  %v2144_v22 = vadd.f32 %v2107_v35, %v1984_v53  ;;  %v2226_v27 = vmul.f32 %v3340_v32, %v4130_v3  ;;  %v3341_v3 = vunpack.i.h.bf16 %v5024_v41 }
 0x30b   :  { %v1533_v4 = vpop.permute.xlu0 %1532  ;;  %v1373_v57 = vpop.permute.xlu1 %1372 }
 0x30c   :  { %v2240_v7 = vadd.f32 %v2224_v59, %v2144_v22  ;;  %v1409_v60 = vadd.f32 %v1373_v57, %v1249_v24  ;;  %v1091_v24 = vmul.f32 %v3005_v50, %v4223_v36 }
 0x30e   :  { %v2400_v34 = vadd.f32 %v4559_v52, %v2240_v7  ;;  %v1569_v1 = vadd.f32 %v1533_v4, %v1409_v60  ;;  %v1090_v52 = vmul.f32 %v3004_v14, %v4214_v56 }
 0x30f   :  { %v1789_v63 = vpop.permute.xlu0 %1788  ;;  %v1949_v43 = vpop.permute.xlu1 %1948 }
 0x310   :  { %v2560_v48 = vadd.f32 %v4572_v10, %v2400_v34  ;;  %v1665_v15 = vadd.f32 %v1649_v17, %v1569_v1  ;;  %v2225_v10 = vmul.f32 %v3336_v18, %v4092_v2  ;;  %v1651_v34 = vmul.f32 %v3173_v28, %v4999_v47  ;;  %v5026_v47 = vld [vmem:[#allocation26_spill] sm:$0xff] }
 0x312   :  { %v2576_v11 = vmax.f32 %v2560_v48, 0.0  ;;  %v1825_v21 = vadd.f32 %v1789_v63, %v1665_v15  ;;  %v5025_v63 = vld [vmem:[#allocation6_spill] sm:$0xff] }
 0x313   :  { %v2109_v20 = vpop.permute.xlu0 %2108  ;;  %v1215_v25 = vpop.permute.xlu1 %1214  ;;  %v3010_v61 = vunpack.i.h.bf16 %v5025_v63 }
 0x314   :  { %v2753_v54 = vpack.c.bf16 %v2576_v11, %v2576_v11  ;;  %v1985_v55 = vadd.f32 %v1949_v43, %v1825_v21  ;;  %v1250_v19 = vadd.f32 %v1215_v25, %v1090_v52  ;;  %v3009_v43 = vunpack.i.l.bf16 %v5025_v63 }
 0x315   :  { %v2227_v11 = vmul.f32 %v3341_v3, %v4965_v16  ;;  %v5027_v16 = vld [vmem:[#allocation53_spill] sm:$0xff] }
 0x316   :  { %2657 = vst.msk [vmem:[%s4806_s7 + $0x28] sm:$0xf] %vm2646_vm1, %v2753_v54  ;;  %v2145_v33 = vadd.f32 %v2109_v20, %v1985_v55  ;;  %v1092_v14 = vmul.f32 %v3009_v43, %v4241_v23  ;;  %v3177_v54 = vunpack.i.l.bf16 %v5026_v47 }
 0x317   :  { %v1375_v38 = vpop.permute.xlu0 %1374  ;;  %v1535_v44 = vpop.permute.xlu1 %1534 }
 0x318   :  { %v4750_v40 = vadd.f32 %v2225_v10, %v2145_v33  ;;  %v1410_v46 = vadd.f32 %v1375_v38, %v1250_v19  ;;  %v1652_v33 = vmul.f32 %v3177_v54, %v4246_v39  ;;  %v3178_v39 = vunpack.i.h.bf16 %v5026_v47 }
 0x31a   :  { %v1570_v9 = vadd.f32 %v1535_v44, %v1410_v46 }
 0x31b   :  { %v1951_v56 = vpop.permute.xlu0 %1950  ;;  %v1791_v13 = vpop.permute.xlu1 %1790 }
 0x31c   :  { %v1666_v35 = vadd.f32 %v1650_v6, %v1570_v9  ;;  %v3345_v9 = vunpack.i.l.bf16 %v5027_v16 }
 0x31e   :  { %v1826_v51 = vadd.f32 %v1791_v13, %v1666_v35  ;;  %v2228_v13 = vmul.f32 %v3345_v9, %v4962_v31 }
 0x31f   :  { %v2111_v42 = vpop.permute.xlu1 %2110  ;;  %v1217_v2 = vpop.permute.xlu0 %1216 }
 0x320   :  { %v1986_v53 = vadd.f32 %v1951_v56, %v1826_v51  ;;  %v1251_v22 = vadd.f32 %v1217_v2, %v1091_v24  ;;  %v1093_v56 = vmul.f32 %v3010_v61, %v4253_v37  ;;  %v1653_v24 = vmul.f32 %v3178_v39, %v4258_v0 }
 0x322   :  { %v2146_v59 = vadd.f32 %v2111_v42, %v1986_v53  ;;  %v2401_v53 = vadd.f32 %v4601_v29, %v4750_v40 }
 0x323   :  { %v1377_v4 = vpop.permute.xlu1 %1376  ;;  %v1537_v57 = vpop.permute.xlu0 %1536 }
 0x324   :  { %v2242_v26 = vadd.f32 %v2226_v27, %v2146_v59  ;;  %v1411_v7 = vadd.f32 %v1377_v4, %v1251_v22 }
 0x326   :  { %v1571_v60 = vadd.f32 %v1537_v57, %v1411_v7  ;;  %v3346_v7 = vunpack.i.h.bf16 %v5027_v16 }
 0x327   :  { %v1953_v1 = vpop.permute.xlu1 %1952  ;;  %v1793_v45 = vpop.permute.xlu0 %1792 }
 0x328   :  { %v1667_v17 = vadd.f32 %v1651_v34, %v1571_v60  ;;  %v2229_v29 = vmul.f32 %v3346_v7, %v4137_v8 }
 0x32a   :  { %v1827_v48 = vadd.f32 %v1793_v45, %v1667_v17 }
 0x32b   :  { %v2113_v36 = vpop.permute.xlu0 %2112  ;;  %v1219_v15 = vpop.permute.xlu1 %1218 }
 0x32c   :  { %v1987_v5 = vadd.f32 %v1953_v1, %v1827_v48  ;;  %v1252_v20 = vadd.f32 %v1219_v15, %v1092_v14  ;;  %v2402_v1 = vadd.f32 %v4687_v30, %v2242_v26 }
 0x32e   :  { %v2147_v21 = vadd.f32 %v2113_v36, %v1987_v5 }
 0x32f   :  { %v1379_v25 = vpop.permute.xlu0 %1378  ;;  %v1539_v18 = vpop.permute.xlu1 %1538 }
 0x330   :  { %v2243_v55 = vadd.f32 %v2227_v11, %v2147_v21  ;;  %v1412_v52 = vadd.f32 %v1379_v25, %v1252_v20 }
 0x332   :  { %v1572_v10 = vadd.f32 %v1539_v18, %v1412_v52  ;;  %v2403_v40 = vadd.f32 %v4695_v62, %v2243_v55 }
 0x333   :  { %v1955_v19 = vpop.permute.xlu0 %1954  ;;  %v1795_v38 = vpop.permute.xlu1 %1794 }
 0x334   :  { %v1668_v44 = vadd.f32 %v1652_v33, %v1572_v10 }
 0x336   :  { %v1828_v49 = vadd.f32 %v1795_v38, %v1668_v44 }
 0x337   :  { %v2115_v23 = vpop.permute.xlu1 %2114  ;;  %v1221_v46 = vpop.permute.xlu0 %1220 }
 0x338   :  { %v1988_v6 = vadd.f32 %v1955_v19, %v1828_v49  ;;  %v1253_v50 = vadd.f32 %v1221_v46, %v1093_v56 }
 0x33a   :  { %v2148_v35 = vadd.f32 %v2115_v23, %v1988_v6 }
 0x33b   :  { %v1381_v51 = vpop.permute.xlu1 %1380  ;;  %v1541_v42 = vpop.permute.xlu0 %1540 }
 0x33c   :  { %v2244_v2 = vadd.f32 %v2228_v13, %v2148_v35  ;;  %v1413_v41 = vadd.f32 %v1381_v51, %v1253_v50 }
 0x33e   :  { %v1573_v32 = vadd.f32 %v1541_v42, %v1413_v41  ;;  %v2404_v5 = vadd.f32 %v4657_v12, %v2244_v2 }
 0x33f   :  { %v2525_v27 = vpop.permute.xlu1 %2524  ;;  %v1797_v59 = vpop.permute.xlu0 %1796 }
 0x340   :  { %v2561_v22 = vadd.f32 %v2525_v27, %v2401_v53  ;;  %v1669_v37 = vadd.f32 %v1653_v24, %v1573_v32 }
 0x342   :  { %v2577_v4 = vmax.f32 %v2561_v22, 0.0  ;;  %v1829_v31 = vadd.f32 %v1797_v59, %v1669_v37 }
 0x343   :  { %v1957_v57 = vpop.permute.xlu1 %1956  ;;  %v2117_v28 = vpop.permute.xlu0 %2116 }
 0x344   :  { %v2754_v60 = vpack.c.bf16 %v2577_v4, %v2577_v4  ;;  %v1989_v34 = vadd.f32 %v1957_v57, %v1829_v31 }
 0x346   :  { %2658 = vst.msk [vmem:[%s4806_s7 + $0x2c] sm:$0xf] %vm2646_vm1, %v2754_v60  ;;  %v2149_v0 = vadd.f32 %v2117_v28, %v1989_v34 }
 0x347   :  { %v2529_v45 = vpop.permute.xlu1 %2528  ;;  %v2527_v17 = vpop.permute.xlu0 %2526 }
 0x348   :  { %v2245_v63 = vadd.f32 %v2229_v29, %v2149_v0  ;;  %v2563_v43 = vadd.f32 %v2529_v45, %v2403_v40  ;;  %v2562_v48 = vadd.f32 %v2527_v17, %v2402_v1 }
 0x34a   :  { %v2579_v36 = vmax.f32 %v2563_v43, 0.0  ;;  %v2578_v15 = vmax.f32 %v2562_v48, 0.0  ;;  %v2405_v3 = vadd.f32 %v4689_v58, %v2245_v63 }
 0x34b   :  { %v2533_v14 = vpop.permute.xlu1 %2532  ;;  %v2531_v11 = vpop.permute.xlu0 %2530 }
 0x34c   :  { %v2756_v21 = vpack.c.bf16 %v2579_v36, %v2579_v36  ;;  %v2755_v8 = vpack.c.bf16 %v2578_v15, %v2578_v15  ;;  %v2565_v20 = vadd.f32 %v2533_v14, %v2405_v3  ;;  %v2564_v25 = vadd.f32 %v2531_v11, %v2404_v5 }
 0x34e   :  { %2660 = vst.msk [vmem:[%s4806_s7 + $0x34] sm:$0xf] %vm2646_vm1, %v2756_v21  ;;  %2659 = vst.msk [vmem:[%s4806_s7 + $0x30] sm:$0xf] %vm2646_vm1, %v2755_v8  ;;  %v2581_v30 = vmax.f32 %v2565_v20, 0.0  ;;  %v2580_v58 = vmax.f32 %v2564_v25, 0.0 }
 0x350   :  { %v2758_v62 = vpack.c.bf16 %v2581_v30, %v2581_v30  ;;  %v2757_v12 = vpack.c.bf16 %v2580_v58, %v2580_v58 }
 0x352   :  { %2662 = vst.msk [vmem:[%s4806_s7 + $0x3c] sm:$0xf] %vm2646_vm1, %v2758_v62  ;;  %2661 = vst.msk [vmem:[%s4806_s7 + $0x38] sm:$0xf] %vm2646_vm1, %v2757_v12 }

// kernel: gnn_forward.14
= control target key start
LH: loop header
LB: loop body
LE: loop exit
PB: predicated region body
PF: predicated region fallthrough
CT: control target
= control target key end

     0   :  { %v3447_v1 = vmov 0   ;;  %vm31_vm0 = vcmask 261120   ;;  %v3448_v3 = vmov 0.0   ;;  %v3449_v58 = vmov 1   ;;  %s3460_s29 = smov 96   ;;  %s3461_s30 = smov 32   ;;  %s4783_s1 = inlined_call_operand.vmem [shape: bf16[128,32], index: 1, kind: input, shape index: {}, may-alias: {1,2}]   ;;  %s4784_s0 = inlined_call_operand.vmem [shape: s8[128,128], index: 0, kind: input, shape index: {}]   ;;  %s4785_s3 = inlined_call_operand.vmem [shape: bf16[128,11], index: 3, kind: input, shape index: {}]   ;;  %s4786_s5 = inlined_call_operand.vmem [shape: bf16[32,352], index: 5, kind: input, shape index: {}]   ;;  %s4787_s4 = inlined_call_operand.vmem [shape: bf16[32,352], index: 4, kind: input, shape index: {}]   ;;  %s4788_s2 = inlined_call_operand.vmem [shape: bf16[128,32], index: 2, kind: input, shape index: {}, may-alias: {1,2}]   ;;  %s4789_s6 = inlined_call_operand.vmem [shape: f32[1,352], index: 6, kind: input, shape index: {}]   ;;  %s4790_s7 = inlined_call_operand.vmem [shape: bf16[128,32], index: 7, kind: output, shape index: {}]  }
   0x1   :  { %v3415_v0 = vld [vmem:[%s4783_s1] sm:$0xff]   ;;  %2964 = vset.pattern.permute.xlu1 %v3447_v1  ;;  %2953 = vset.pattern.permute.xlu0 %v3447_v1  ;;  %v3416_v2 = vld [vmem:[%s4783_s1 + $0x8] sm:$0xff]   ;;  %34 = vst.msk [vmem:[#allocation2 + $0x10] sm:$0xff] %vm31_vm0, %v3448_v3  ;;  %32 = vst.msk [vmem:[#allocation2] sm:$0xff] %vm31_vm0, %v3448_v3  ;;  %vm2630_vm1 = vcmask 257024  }
   0x2   :  { %457 = vmatprep.mubr.bf16.mxu1 %v3447_v1  ;;  %2818 = vmatprep.subr.bf16.mxu0 %v3415_v0  ;;  %33 = vst.msk [vmem:[#allocation2 + $0x8] sm:$0xff] %vm31_vm0, %v3448_v3  ;;  %35 = vst.msk [vmem:[#allocation2 + $0x18] sm:$0xff] %vm31_vm0, %v3448_v3  ;;  %v3417_v4 = vld [vmem:[%s4783_s1 + $0x10] sm:$0xff]   ;;  %v3418_v5 = vld [vmem:[%s4783_s1 + $0x18] sm:$0xff]  }
   0x3   :  { %2819 = vmatpush3.bf16.msra.mxu0 %v3415_v0  ;;  %36 = vst.msk [vmem:[#allocation2 + $0x20] sm:$0xff] %vm31_vm0, %v3448_v3  ;;  %37 = vst.msk [vmem:[#allocation2 + $0x28] sm:$0xff] %vm31_vm0, %v3448_v3  ;;  %v3536_v6 = vld [vmem:[%s4784_s0] sm:$0xff]  ;;  %v2776_v8 = vld [vmem:[%s4785_s3 + $0x10] sm:$0xff]  }
   0x4   :  { %38 = vst.msk [vmem:[#allocation2 + $0x30] sm:$0xff] %vm31_vm0, %v3448_v3  ;;  %39 = vst.msk [vmem:[#allocation2 + $0x38] sm:$0xff] %vm31_vm0, %v3448_v3  ;;  %2820 = vmatprep.subr.bf16.mxu0 %v3416_v2  ;;  %v68_v7 = vunpack.c.l.s8.bf16 %v3536_v6  ;;  %v2777_v9 = vld [vmem:[%s4785_s3 + $0x18] sm:$0xff]   ;;  %v3419_v10 = vld [vmem:[%s4783_s1 + $0x20] sm:$0xff]   ;;  %v2753_v11 = vunpack.c.l.bf16 %v2776_v8  ;;  %v2754_v12 = vunpack.c.h.bf16 %v2776_v8  ;;  %v69_v56 = vunpack.c.h.s8.bf16 %v3536_v6 }
   0x5   :  { %40 = vst.msk [vmem:[#allocation2 + $0x40] sm:$0xff] %vm31_vm0, %v3448_v3  ;;  %41 = vst.msk [vmem:[#allocation2 + $0x48] sm:$0xff] %vm31_vm0, %v3448_v3  ;;  %v2757_v13 = vunpack.c.l.bf16 %v2777_v9  ;;  %v2758_v14 = vunpack.c.h.bf16 %v2777_v9  ;;  %v2779_v15 = vld [vmem:[%s4785_s3 + $0x28] sm:$0xff]   ;;  %v3423_v16 = vld [vmem:[%s4786_s5 + $0x4] ss:$12 sps:$4 sm:$0xff]   ;;  %v3450_v6 = vmov 2  }
   0x6   :  { %42 = vst.msk [vmem:[#allocation2 + $0x50] sm:$0xff] %vm31_vm0, %v3448_v3  ;;  %43 = vst.msk [vmem:[#allocation2 + $0x58] sm:$0xff] %vm31_vm0, %v3448_v3  ;;  %2834 = vmatprep.mubr.bf16.mxu0 %v68_v7  ;;  %v3425_v17 = vld [vmem:[%s4786_s5] ss:$12 sps:$4 sm:$0xff]   ;;  %v3557_v18 = vpack.i.bf16 %v2754_v12, %v2753_v11  ;;  %425 = vmatprep.subr.bf16.mxu1 %v3423_v16  ;;  %v3426_v20 = vld [vmem:[%s4786_s5 + $0x1c] ss:$12 sps:$4 sm:$0xff]   ;;  %v2765_v23 = vunpack.c.l.bf16 %v2779_v15  ;;  %v2766_v24 = vunpack.c.h.bf16 %v2779_v15 }
   0x7   :  { %44 = vst.msk [vmem:[#allocation2 + $0x60] sm:$0xff] %vm31_vm0, %v3448_v3  ;;  %45 = vst.msk [vmem:[#allocation2 + $0x68] sm:$0xff] %vm31_vm0, %v3448_v3  ;;  %2821 = vmatpush3.bf16.msra.mxu0 %v3416_v2  ;;  %v2744_v19 = vld [vmem:[%s4785_s3] sm:$0xff]   ;;  %v3420_v21 = vld [vmem:[%s4783_s1 + $0x28] sm:$0xff]   ;;  %v3569_v22 = vpack.i.bf16 %v2758_v14, %v2757_v13  ;;  %426 = vmatpush1.bf16.msra.mxu1 %v3425_v17  ;;  %v3452_v11 = vmov 4   ;;  %v3453_v15 = vmov 5  }
   0x8   :  { %46 = vst.msk [vmem:[#allocation2 + $0x70] sm:$0xff] %vm31_vm0, %v3448_v3  ;;  %47 = vst.msk [vmem:[#allocation2 + $0x78] sm:$0xff] %vm31_vm0, %v3448_v3  ;;  %2822 = vmatprep.subr.bf16.mxu0 %v3417_v4  ;;  %2966 = vperm.xlu1 %2964, %v3557_v18   ;;  %v2775_v25 = vld [vmem:[%s4785_s3 + $0x8] sm:$0xff]   ;;  %v2781_v26 = vld [vmem:[%s4785_s3 + $0x38] sm:$0xff]   ;;  %v2745_v27 = vunpack.c.l.bf16 %v2744_v19  ;;  %v2746_v28 = vunpack.c.h.bf16 %v2744_v19  ;;  %v3586_v34 = vpack.i.bf16 %v2766_v24, %v2765_v23  ;;  %v3454_v16 = vmov 6  }
   0x9   :  { %427 = vmatprep.subr.bf16.mxu1 %v3426_v20  ;;  %v3428_v29 = vld [vmem:[%s4786_s5 + $0x18] ss:$12 sps:$4 sm:$0xff]   ;;  %v2749_v30 = vunpack.c.l.bf16 %v2775_v25  ;;  %v2750_v31 = vunpack.c.h.bf16 %v2775_v25  ;;  %v2773_v35 = vunpack.c.l.bf16 %v2781_v26  ;;  %v2774_v36 = vunpack.c.h.bf16 %v2781_v26  ;;  %v3421_v38 = vld [vmem:[%s4783_s1 + $0x30] sm:$0xff]   ;;  %v3429_v43 = vld [vmem:[%s4787_s4] ss:$12 sps:$4 sm:$0xff]  }
   0xa   :  { %v3580_v32 = vpack.i.bf16 %v2746_v28, %v2745_v27  ;;  %v3431_v33 = vld [vmem:[%s4787_s4 + $0x4] ss:$12 sps:$4 sm:$0xff]   ;;  %v3422_v46 = vld [vmem:[%s4783_s1 + $0x38] sm:$0xff]   ;;  %v65_v52 = vld [vmem:[%s4784_s0 + $0x8] sm:$0xff]  ;;  %v3455_v17 = vmov 7   ;;  %v3456_v19 = vmov 8  }
   0xb   :  { %2823 = vmatpush3.bf16.msra.mxu0 %v3417_v4  ;;  %v2778_v37 = vld [vmem:[%s4785_s3 + $0x20] sm:$0xff]   ;;  %v3595_v39 = vpack.i.bf16 %v2750_v31, %v2749_v30  ;;  %428 = vmatpush1.bf16.msra.mxu1 %v3428_v29  ;;  %v3606_v44 = vpack.i.bf16 %v2774_v36, %v2773_v35  ;;  %v2780_v45 = vld [vmem:[%s4785_s3 + $0x30] sm:$0xff]   ;;  %v3440_v48 = vld [vmem:[%s4787_s4 + $0x1c] ss:$12 sps:$4 sm:$0xff]   ;;  %v70_v57 = vunpack.c.l.s8.bf16 %v65_v52  ;;  %v71_v63 = vunpack.c.h.s8.bf16 %v65_v52 }
   0xc   :  { %2824 = vmatprep.subr.bf16.mxu0 %v3418_v5  ;;  %2971 = vperm.xlu1 %2964, %v3569_v22   ;;  %v3600_v40 = vld [vmem:[%s4788_s2] sm:$0xff]   ;;  %v2761_v41 = vunpack.c.l.bf16 %v2778_v37  ;;  %v2762_v42 = vunpack.c.h.bf16 %v2778_v37  ;;  %v2769_v49 = vunpack.c.l.bf16 %v2780_v45  ;;  %v2770_v50 = vunpack.c.h.bf16 %v2780_v45  ;;  %v3433_v54 = vld [vmem:[%s4786_s5 + $0x8] ss:$12 sps:$4 sm:$0xff]   ;;  %v67_v2 = vld [vmem:[%s4784_s0 + $0x18] sm:$0xff] }
   0xd   :  { %2955 = vperm.xlu0 %2953, %v3580_v32   ;;  %691 = vmatprep.subr.bf16.mxu1 %v3431_v33  ;;  %v3438_v51 = vld [vmem:[%s4787_s4 + $0x18] ss:$12 sps:$4 sm:$0xff]   ;;  %v3639_v55 = vld [vmem:[%s4788_s2 + $0x8] sm:$0xff]   ;;  %v66_v60 = vld [vmem:[%s4784_s0 + $0x10] sm:$0xff]  ;;  %v75_v7 = vunpack.c.h.s8.bf16 %v67_v2  ;;  %v3457_v20 = vmov 9  }
   0xe   :  { %v3615_v47 = vpack.i.bf16 %v2762_v42, %v2761_v41  ;;  %2673 = vmatmul.mubr.msk.bf16.vlgmr.msra.gmra.mrb[0].mxu1 %vm31_vm0, %v3600_v40  ;;  %v3631_v53 = vpack.i.bf16 %v2770_v50, %v2769_v49  ;;  %v3436_v59 = vld [vmem:[%s4786_s5 + $0x20] ss:$12 sps:$4 sm:$0xff]   ;;  %v3442_v61 = vld [vmem:[%s4787_s4 + $0x8] ss:$12 sps:$4 sm:$0xff]   ;;  %v72_v0 = vunpack.c.l.s8.bf16 %v66_v60  ;;  %v73_v3 = vunpack.c.h.s8.bf16 %v66_v60  ;;  %v3437_v4 = vld [vmem:[%s4788_s2 + $0x18] sm:$0xff]  }
   0xf   :  { %2825 = vmatpush3.bf16.msra.mxu0 %v3418_v5  ;;  %692 = vmatpush1.bf16.msra.mxu1 %v3429_v43  ;;  %v3435_v62 = vld [vmem:[%s4788_s2 + $0x10] sm:$0xff]   ;;  %v74_v5 = vunpack.c.l.s8.bf16 %v67_v2  ;;  %v3441_v8 = vld [vmem:[%s4788_s2 + $0x20] sm:$0xff]   ;;  %v3443_v9 = vld [vmem:[%s4788_s2 + $0x28] sm:$0xff]  }
  0x10   :  { %2826 = vmatprep.subr.bf16.mxu0 %v3419_v10  ;;  %2981 = vperm.xlu1 %2964, %v3586_v34   ;;  %v3444_v12 = vld [vmem:[%s4788_s2 + $0x30] sm:$0xff]   ;;  %v3445_v13 = vld [vmem:[%s4787_s4 + $0x20] ss:$12 sps:$4 sm:$0xff]   ;;  %v3446_v14 = vld [vmem:[%s4788_s2 + $0x38] sm:$0xff]  }
  0x11   :  { %2960 = vperm.xlu0 %2953, %v3595_v39   ;;  %467 = vmatprep.mubr.bf16.mxu1 %v3447_v1  ;;  %v50_v26 = vld [vmem:[#allocation2 + $0x10] sm:$0xff]  ;;  %v48_v27 = vld [vmem:[#allocation2] sm:$0xff]  ;;  %v51_v29 = vld [vmem:[#allocation2 + $0x18] sm:$0xff] }
  0x12   :  { %693 = vmatprep.subr.bf16.mxu1 %v3440_v48  ;;  %v55_v41 = vld [vmem:[#allocation2 + $0x38] sm:$0xff] }
  0x13   :  { %2827 = vmatpush3.bf16.msra.mxu0 %v3419_v10  ;;  %694 = vmatpush1.bf16.msra.mxu1 %v3438_v51  ;;  %v3451_v10 = vmov 3   ;;  %v59_v60 = vld [vmem:[#allocation2 + $0x58] sm:$0xff] }
  0x14   :  { %2828 = vmatprep.subr.bf16.mxu0 %v3420_v21  ;;  %2991 = vperm.xlu1 %2964, %v3606_v44  }
  0x15   :  { %2976 = vperm.xlu0 %2953, %v3615_v47  }
  0x16   :  { %2674 = vmatmul.mubr.msk.bf16.gmra.mrb[4].mxu1 %vm31_vm0, %v3639_v55 }
  0x17   :  { %2829 = vmatpush3.bf16.msra.mxu0 %v3420_v21  ;;  %477 = vmatprep.mubr.bf16.mxu1 %v3447_v1  ;;  %v3458_v21 = vmov 10  }
  0x18   :  { %2830 = vmatprep.subr.bf16.mxu0 %v3421_v38  ;;  %3001 = vset.pattern.permute.xlu1 %v3449_v58 }
  0x19   :  { %3003 = vperm.xlu1 %3001, %v3595_v39   ;;  %2986 = vperm.xlu0 %2953, %v3631_v53  }
  0x1b   :  { %2831 = vmatpush3.bf16.msra.mxu0 %v3421_v38  ;;  %v54_v38 = vld [vmem:[#allocation2 + $0x30] sm:$0xff] }
  0x1c   :  { %2832 = vmatprep.subr.bf16.mxu0 %v3422_v46 }
  0x1d   :  { %3008 = vperm.xlu1 %3001, %v3557_v18   ;;  %2995 = vset.pattern.permute.xlu0 %v3449_v58 }
  0x1e   :  { %2997 = vperm.xlu0 %2995, %v3580_v32   ;;  %2675 = vmatmul.mubr.msk.bf16.gmra.mrb[8].mxu1 %vm31_vm0, %v3435_v62 }
  0x1f   :  { %2833 = vmatpush3.bf16.msra.mxu0 %v3422_v46  ;;  %487 = vmatprep.mubr.bf16.mxu1 %v3447_v1 }
  0x20   :  { %2850 = vmatprep.subr.bf16.mxu0 %v3433_v54 }
  0x21   :  { %3018 = vperm.xlu1 %3001, %v3615_v47  }
  0x22   :  { %2835 = vmatmul.mubr.bf16.vlgmr.msra.gmra.mrb[0].mxu0 %v69_v56  ;;  %3013 = vperm.xlu0 %2995, %v3569_v22  }
  0x23   :  { %2838 = vmatprep.mubr.bf16.mxu0 %v70_v57  ;;  %2851 = vmatpush3.bf16.msra.mxu0 %v3433_v54  ;;  %v58_v54 = vld [vmem:[#allocation2 + $0x50] sm:$0xff]  ;;  %v56_v57 = vld [vmem:[#allocation2 + $0x40] sm:$0xff] }
  0x24   :  { %2852 = vmatprep.subr.bf16.mxu0 %v3436_v59 }
  0x25   :  { %3028 = vperm.xlu1 %3001, %v3631_v53  }
  0x26   :  { %3023 = vperm.xlu0 %2995, %v3586_v34   ;;  %2676 = vmatmul.mubr.msk.bf16.gmra.mrb[12].mxu1 %vm31_vm0, %v3437_v4 }
  0x27   :  { %2853 = vmatpush3.bf16.msra.mxu0 %v3436_v59  ;;  %497 = vmatprep.mubr.bf16.mxu1 %v3447_v1 }
  0x28   :  { %2870 = vmatprep.subr.bf16.mxu0 %v3442_v61 }
  0x29   :  { %3037 = vset.pattern.permute.xlu1 %v3450_v6 }
  0x2a   :  { %2839 = vmatmul.mubr.bf16.gmra.mrb[4].mxu0 %v71_v63  ;;  %3039 = vperm.xlu1 %3037, %v3580_v32   ;;  %v57_v63 = vld [vmem:[#allocation2 + $0x48] sm:$0xff] }
  0x2b   :  { %2842 = vmatprep.mubr.bf16.mxu0 %v72_v0  ;;  %3033 = vperm.xlu0 %2995, %v3606_v44  }
  0x2e   :  { %3050 = vperm.xlu1 %3037, %v3557_v18   ;;  %2677 = vmatmul.mubr.msk.bf16.gmra.mrb[16].mxu1 %vm31_vm0, %v3441_v8 }
  0x2f   :  { %3043 = vset.pattern.permute.xlu0 %v3450_v6  ;;  %507 = vmatprep.mubr.bf16.mxu1 %v3447_v1 }
  0x30   :  { %3045 = vperm.xlu0 %3043, %v3595_v39  }
  0x32   :  { %2843 = vmatmul.mubr.bf16.gmra.mrb[8].mxu0 %v73_v3  ;;  %3055 = vperm.xlu1 %3037, %v3569_v22  }
  0x33   :  { %2846 = vmatprep.mubr.bf16.mxu0 %v74_v5 }
  0x34   :  { %3060 = vperm.xlu0 %3043, %v3615_v47  }
  0x36   :  { %3065 = vperm.xlu1 %3037, %v3586_v34   ;;  %2678 = vmatmul.mubr.msk.bf16.gmra.mrb[20].mxu1 %vm31_vm0, %v3443_v9 }
  0x37   :  { %517 = vmatprep.mubr.bf16.mxu1 %v3447_v1 }
  0x38   :  { %3070 = vperm.xlu0 %3043, %v3631_v53  }
  0x3a   :  { %2847 = vmatmul.mubr.bf16.gmra.mrb[12].mxu0 %v75_v7  ;;  %3075 = vperm.xlu1 %3037, %v3606_v44  }
  0x3b   :  { %2854 = vmatprep.mubr.msk.bf16.mxu0 %vm31_vm0, %v3600_v40 }
  0x3c   :  { %3079 = vset.pattern.permute.xlu0 %v3451_v10 }
  0x3d   :  { %3081 = vperm.xlu0 %3079, %v3580_v32  }
  0x3e   :  { %3085 = vset.pattern.permute.xlu1 %v3451_v10  ;;  %2679 = vmatmul.mubr.msk.bf16.gmra.mrb[24].mxu1 %vm31_vm0, %v3444_v12 }
  0x3f   :  { %3087 = vperm.xlu1 %3085, %v3595_v39   ;;  %527 = vmatprep.mubr.bf16.mxu1 %v3447_v1 }
  0x41   :  { %3097 = vperm.xlu0 %3079, %v3569_v22  }
  0x42   :  { %2855 = vmatmul.mubr.msk.bf16.vlgmr.msra.gmra.mrb[16].mxu0 %vm31_vm0, %v3639_v55 }
  0x43   :  { %2858 = vmatprep.mubr.msk.bf16.mxu0 %vm31_vm0, %v3435_v62  ;;  %2871 = vmatpush3.bf16.msra.mxu0 %v3442_v61 }
  0x44   :  { %3092 = vperm.xlu1 %3085, %v3557_v18   ;;  %2872 = vmatprep.subr.bf16.mxu0 %v3445_v13 }
  0x45   :  { %3107 = vperm.xlu0 %3079, %v3586_v34  }
  0x46   :  { %2680 = vmatmul.mubr.msk.bf16.gmra.mrb[28].mxu1 %vm31_vm0, %v3446_v14 }
  0x47   :  { %2873 = vmatpush3.bf16.msra.mxu0 %v3445_v13  ;;  %723 = vmatprep.mubr.bf16.mxu1 %v3447_v1 }
  0x48   :  { %3102 = vperm.xlu1 %3085, %v3615_v47  }
  0x49   :  { %3117 = vperm.xlu0 %3079, %v3606_v44  }
  0x4a   :  { %2859 = vmatmul.mubr.msk.bf16.gmra.mrb[20].mxu0 %vm31_vm0, %v3437_v4 }
  0x4b   :  { %2862 = vmatprep.mubr.msk.bf16.mxu0 %vm31_vm0, %v3441_v8 }
  0x4c   :  { %3112 = vperm.xlu1 %3085, %v3631_v53  }
  0x4d   :  { %3127 = vset.pattern.permute.xlu0 %v3452_v11 }
  0x4e   :  { %3129 = vperm.xlu0 %3127, %v3595_v39  }
  0x50   :  { %3121 = vset.pattern.permute.xlu1 %v3452_v11 }
  0x51   :  { %3123 = vperm.xlu1 %3121, %v3580_v32  }
  0x52   :  { %2863 = vmatmul.mubr.msk.bf16.gmra.mrb[24].mxu0 %vm31_vm0, %v3443_v9  ;;  %3144 = vperm.xlu0 %3127, %v3615_v47  }
  0x53   :  { %2866 = vmatprep.mubr.msk.bf16.mxu0 %vm31_vm0, %v3444_v12  ;;  %v62_v12 = vld [vmem:[#allocation2 + $0x70] sm:$0xff] }
  0x55   :  { %3134 = vperm.xlu1 %3121, %v3557_v18  }
  0x56   :  { %3154 = vperm.xlu0 %3127, %v3631_v53  }
  0x59   :  { %3139 = vperm.xlu1 %3121, %v3569_v22  }
  0x5a   :  { %2867 = vmatmul.mubr.msk.bf16.gmra.mrb[28].mxu0 %vm31_vm0, %v3446_v14  ;;  %3163 = vset.pattern.permute.xlu0 %v3453_v15  ;;  %v60_v14 = vld [vmem:[#allocation2 + $0x60] sm:$0xff] }
  0x5b   :  { %3165 = vperm.xlu0 %3163, %v3580_v32  }
  0x5d   :  { %3149 = vperm.xlu1 %3121, %v3586_v34  }
  0x5f   :  { %3181 = vperm.xlu0 %3163, %v3569_v22  }
  0x61   :  { %3159 = vperm.xlu1 %3121, %v3606_v44  }
  0x63   :  { %3191 = vperm.xlu0 %3163, %v3586_v34  }
  0x65   :  { %3169 = vset.pattern.permute.xlu1 %v3453_v15 }
  0x66   :  { %3171 = vperm.xlu1 %3169, %v3595_v39  }
  0x67   :  { %3201 = vperm.xlu0 %3163, %v3606_v44  }
  0x6a   :  { %3176 = vperm.xlu1 %3169, %v3557_v18  }
  0x6b   :  { %3211 = vset.pattern.permute.xlu0 %v3454_v16 }
  0x6c   :  { %3213 = vperm.xlu0 %3211, %v3595_v39  }
  0x6e   :  { %3186 = vperm.xlu1 %3169, %v3615_v47  }
  0x70   :  { %3228 = vperm.xlu0 %3211, %v3615_v47  }
  0x72   :  { %3196 = vperm.xlu1 %3169, %v3631_v53  }
  0x74   :  { %3238 = vperm.xlu0 %3211, %v3631_v53  }
  0x76   :  { %3205 = vset.pattern.permute.xlu1 %v3454_v16 }
  0x77   :  { %3207 = vperm.xlu1 %3205, %v3580_v32  }
  0x78   :  { %3247 = vset.pattern.permute.xlu0 %v3455_v17 }
  0x79   :  { %3249 = vperm.xlu0 %3247, %v3580_v32  }
  0x7b   :  { %3218 = vperm.xlu1 %3205, %v3557_v18  }
  0x7d   :  { %3265 = vperm.xlu0 %3247, %v3569_v22  }
  0x7f   :  { %3223 = vperm.xlu1 %3205, %v3569_v22  }
  0x81   :  { %3275 = vperm.xlu0 %3247, %v3586_v34  }
  0x83   :  { %3233 = vperm.xlu1 %3205, %v3586_v34  }
  0x85   :  { %3285 = vperm.xlu0 %3247, %v3606_v44  }
  0x87   :  { %3243 = vperm.xlu1 %3205, %v3606_v44   ;;  %v3777_v23 = vpop.permute.xlu1 %2966 }
  0x88   :  { %4866 = vst [vmem:[#allocation3_spill] sm:$0xff] %v3777_v23 }
  0x89   :  { %3295 = vset.pattern.permute.xlu0 %v3456_v19 }
  0x8a   :  { %3297 = vperm.xlu0 %3295, %v3595_v39  }
  0x8b   :  { %3253 = vset.pattern.permute.xlu1 %v3455_v17  ;;  %v3782_v24 = vpop.permute.xlu1 %2971  ;;  %v63_v17 = vld [vmem:[#allocation2 + $0x78] sm:$0xff] }
  0x8c   :  { %3255 = vperm.xlu1 %3253, %v3595_v39   ;;  %4867 = vst [vmem:[#allocation4_spill] sm:$0xff] %v3782_v24 }
  0x8e   :  { %3312 = vperm.xlu0 %3295, %v3615_v47  }
  0x8f   :  { %v3785_v25 = vpop.permute.xlu1 %2981 }
  0x90   :  { %3260 = vperm.xlu1 %3253, %v3557_v18   ;;  %4868 = vst [vmem:[#allocation5_spill] sm:$0xff] %v3785_v25 }
  0x92   :  { %3322 = vperm.xlu0 %3295, %v3631_v53  }
  0x93   :  { %v3787_v28 = vpop.permute.xlu1 %2991 }
  0x94   :  { %3270 = vperm.xlu1 %3253, %v3615_v47   ;;  %4869 = vst [vmem:[#allocation6_spill] sm:$0xff] %v3787_v28 }
  0x96   :  { %3331 = vset.pattern.permute.xlu0 %v3457_v20 }
  0x97   :  { %3333 = vperm.xlu0 %3331, %v3580_v32  }
  0x98   :  { %3280 = vperm.xlu1 %3253, %v3631_v53   ;;  %v3792_v37 = vpop.permute.xlu1 %3003 }
  0x9b   :  { %3349 = vperm.xlu0 %3331, %v3569_v22  }
  0x9c   :  { %3289 = vset.pattern.permute.xlu1 %v3456_v19  ;;  %v3796_v49 = vpop.permute.xlu1 %3008 }
  0x9d   :  { %3291 = vperm.xlu1 %3289, %v3580_v32  }
  0x9f   :  { %3359 = vperm.xlu0 %3331, %v3586_v34  }
  0xa0   :  { %v3805_v0 = vpop.permute.xlu1 %3018 }
  0xa1   :  { %3302 = vperm.xlu1 %3289, %v3557_v18   ;;  %4870 = vst [vmem:[#allocation7_spill] sm:$0xff] %v3805_v0 }
  0xa3   :  { %3369 = vperm.xlu0 %3331, %v3606_v44  }
  0xa4   :  { %v3811_v15 = vpop.permute.xlu1 %3028 }
  0xa5   :  { %3307 = vperm.xlu1 %3289, %v3569_v22   ;;  %4871 = vst [vmem:[#allocation8_spill] sm:$0xff] %v3811_v15 }
  0xa7   :  { %3379 = vset.pattern.permute.xlu0 %v3458_v21 }
  0xa8   :  { %3381 = vperm.xlu0 %3379, %v3595_v39  }
  0xa9   :  { %3317 = vperm.xlu1 %3289, %v3586_v34  }
  0xac   :  { %3396 = vperm.xlu0 %3379, %v3615_v47  }
  0xad   :  { %3327 = vperm.xlu1 %3289, %v3606_v44  }
  0xb0   :  { %3406 = vperm.xlu0 %3379, %v3631_v53  }
  0xb1   :  { %3337 = vset.pattern.permute.xlu1 %v3457_v20 }
  0xb2   :  { %3339 = vperm.xlu1 %3337, %v3595_v39   ;;  %v52_v39 = vld [vmem:[#allocation2 + $0x20] sm:$0xff] }
  0xb6   :  { %3344 = vperm.xlu1 %3337, %v3557_v18  }
  0xba   :  { %3354 = vperm.xlu1 %3337, %v3615_v47  }
  0xbe   :  { %3364 = vperm.xlu1 %3337, %v3631_v53  }
  0xc2   :  { %3373 = vset.pattern.permute.xlu1 %v3458_v21  ;;  %v61_v21 = vld [vmem:[#allocation2 + $0x68] sm:$0xff] }
  0xc3   :  { %3375 = vperm.xlu1 %3373, %v3580_v32   ;;  %v49_v32 = vld [vmem:[#allocation2 + $0x8] sm:$0xff] }
  0xc7   :  { %3386 = vperm.xlu1 %3373, %v3557_v18  }
  0xcb   :  { %3391 = vperm.xlu1 %3373, %v3569_v22  }
  0xcf   :  { %3401 = vperm.xlu1 %3373, %v3586_v34  }
  0xd3   :  { %3411 = vperm.xlu1 %3373, %v3606_v44   ;;  %v53_v44 = vld [vmem:[#allocation2 + $0x28] sm:$0xff] }
  0xf5   :  { %v2836_v18 = vpop.f32.mrb[0].mxu0 }
  0xf6   :  { %v239_v30 = vadd.f32 %v2836_v18, %v50_v26  ;;  %v174_v31 = vpop.f32.mrb[1].mxu0 }
  0xf7   :  { %v237_v22 = vadd.f32 %v174_v31, %v48_v27  ;;  %v2837_v33 = vpop.f32.mrb[2].mxu0 }
  0xf8   :  { %256 = vst.msk [vmem:[#allocation2 + $0x10] sm:$0xff] %vm31_vm0, %v239_v30  ;;  %v240_v34 = vadd.f32 %v2837_v33, %v51_v29  ;;  %v177_v35 = vpop.f32.mrb[3].mxu0 }
  0xf9   :  { %254 = vst.msk [vmem:[#allocation2] sm:$0xff] %vm31_vm0, %v237_v22  ;;  %v238_v36 = vadd.f32 %v177_v35, %v49_v32  ;;  %v3820_v35 = vpop.permute.xlu0 %2955 }
  0xfa   :  { %257 = vst.msk [vmem:[#allocation2 + $0x18] sm:$0xff] %vm31_vm0, %v240_v34 }
  0xfb   :  { %255 = vst.msk [vmem:[#allocation2 + $0x8] sm:$0xff] %vm31_vm0, %v238_v36  ;;  %v3822_v36 = vpop.permute.xlu1 %3039 }
  0xfd   :  { %v2840_v40 = vpop.f32.mrb[4].mxu0 }
  0xfe   :  { %v243_v42 = vadd.f32 %v2840_v40, %v54_v38  ;;  %v190_v43 = vpop.f32.mrb[5].mxu0 }
  0xff   :  { %v241_v45 = vadd.f32 %v190_v43, %v52_v39  ;;  %v2841_v46 = vpop.f32.mrb[6].mxu0  ;;  %v275_v56 = vld [vmem:[#allocation2 + $0x10] sm:$0xff] }
 0x100   :  { %260 = vst.msk [vmem:[#allocation2 + $0x30] sm:$0xff] %vm31_vm0, %v243_v42  ;;  %v244_v47 = vadd.f32 %v2841_v46, %v55_v41  ;;  %v193_v48 = vpop.f32.mrb[7].mxu0  ;;  %v273_v52 = vld [vmem:[#allocation2] sm:$0xff]  ;;  %v3829_v41 = vpop.permute.xlu0 %2960 }
 0x101   :  { %258 = vst.msk [vmem:[#allocation2 + $0x20] sm:$0xff] %vm31_vm0, %v241_v45  ;;  %v242_v50 = vadd.f32 %v193_v48, %v53_v44  ;;  %v276_v51 = vld [vmem:[#allocation2 + $0x18] sm:$0xff]  ;;  %4872 = vst [vmem:[#allocation9_spill] sm:$0xff] %v3829_v41  ;;  %v3831_v42 = vpop.permute.xlu1 %3050 }
 0x102   :  { %261 = vst.msk [vmem:[#allocation2 + $0x38] sm:$0xff] %vm31_vm0, %v244_v47  ;;  %v274_v53 = vld [vmem:[#allocation2 + $0x8] sm:$0xff]  ;;  %v290_v58 = vpack.c.bf16 %v276_v51, %v275_v56 }
 0x103   :  { %259 = vst.msk [vmem:[#allocation2 + $0x28] sm:$0xff] %vm31_vm0, %v242_v50  ;;  %v289_v55 = vpack.c.bf16 %v274_v53, %v273_v52 }
 0x104   :  { %v3837_v47 = vpop.permute.xlu0 %2976 }
 0x105   :  { %v2844_v59 = vpop.f32.mrb[8].mxu0  ;;  %2695 = vmatmul.mubr.msk.bf16.vlgmr.msra.gmra.mrb[0].mxu1 %vm31_vm0, %v289_v55  ;;  %2874 = vmatprep.mubr.msk.bf16.mxu0 %vm31_vm0, %v289_v55  ;;  %4873 = vst [vmem:[#allocation10_spill] sm:$0xff] %v3837_v47  ;;  %v3839_v48 = vpop.permute.xlu1 %3055  ;;  %v903_v47 = vlaneseq }
 0x106   :  { %v247_v61 = vadd.f32 %v2844_v59, %v58_v54  ;;  %v206_v62 = vpop.f32.mrb[9].mxu0  ;;  %2875 = vmatmul.mubr.msk.bf16.vlgmr.msra.gmra.mrb[16].mxu0 %vm31_vm0, %v290_v58  ;;  %733 = vmatprep.mubr.bf16.mxu1 %v3447_v1 }
 0x107   :  { %v245_v2 = vadd.f32 %v206_v62, %v56_v57  ;;  %v2845_v3 = vpop.f32.mrb[10].mxu0  ;;  %v279_v4 = vld [vmem:[#allocation2 + $0x30] sm:$0xff] }
 0x108   :  { %264 = vst.msk [vmem:[#allocation2 + $0x50] sm:$0xff] %vm31_vm0, %v247_v61  ;;  %v248_v5 = vadd.f32 %v2845_v3, %v59_v60  ;;  %v209_v6 = vpop.f32.mrb[11].mxu0  ;;  %v277_v7 = vld [vmem:[#allocation2 + $0x20] sm:$0xff]  ;;  %v3841_v50 = vpop.permute.xlu0 %2986 }
 0x109   :  { %262 = vst.msk [vmem:[#allocation2 + $0x40] sm:$0xff] %vm31_vm0, %v245_v2  ;;  %v246_v8 = vadd.f32 %v209_v6, %v57_v63  ;;  %v280_v9 = vld [vmem:[#allocation2 + $0x38] sm:$0xff]  ;;  %4874 = vst [vmem:[#allocation11_spill] sm:$0xff] %v3841_v50  ;;  %v3843_v51 = vpop.permute.xlu1 %3065 }
 0x10a   :  { %265 = vst.msk [vmem:[#allocation2 + $0x58] sm:$0xff] %vm31_vm0, %v248_v5  ;;  %v278_v10 = vld [vmem:[#allocation2 + $0x28] sm:$0xff]  ;;  %v292_v11 = vpack.c.bf16 %v280_v9, %v279_v4  ;;  %4875 = vst [vmem:[#allocation12_spill] sm:$0xff] %v3843_v51 }
 0x10b   :  { %263 = vst.msk [vmem:[#allocation2 + $0x48] sm:$0xff] %vm31_vm0, %v246_v8  ;;  %v291_v13 = vpack.c.bf16 %v278_v10, %v277_v7 }
 0x10c   :  { %v3847_v52 = vpop.permute.xlu0 %2997 }
 0x10d   :  { %v2848_v16 = vpop.f32.mrb[12].mxu0  ;;  %2696 = vmatmul.mubr.msk.bf16.gmra.mrb[4].mxu1 %vm31_vm0, %v290_v58  ;;  %2878 = vmatprep.mubr.msk.bf16.mxu0 %vm31_vm0, %v291_v13  ;;  %v3849_v53 = vpop.permute.xlu1 %3075 }
 0x10e   :  { %v251_v19 = vadd.f32 %v2848_v16, %v62_v12  ;;  %v222_v20 = vpop.f32.mrb[13].mxu0  ;;  %2879 = vmatmul.mubr.msk.bf16.gmra.mrb[20].mxu0 %vm31_vm0, %v292_v11  ;;  %743 = vmatprep.mubr.bf16.mxu1 %v3447_v1  ;;  %4876 = vst [vmem:[#allocation13_spill] sm:$0xff] %v3849_v53 }
 0x10f   :  { %v249_v26 = vadd.f32 %v222_v20, %v60_v14  ;;  %v2849_v27 = vpop.f32.mrb[14].mxu0  ;;  %v283_v18 = vld [vmem:[#allocation2 + $0x50] sm:$0xff] }
 0x110   :  { %268 = vst.msk [vmem:[#allocation2 + $0x70] sm:$0xff] %vm31_vm0, %v251_v19  ;;  %v252_v29 = vadd.f32 %v2849_v27, %v63_v17  ;;  %v225_v30 = vpop.f32.mrb[15].mxu0  ;;  %v281_v31 = vld [vmem:[#allocation2 + $0x40] sm:$0xff]  ;;  %v3853_v54 = vpop.permute.xlu0 %3013 }
 0x111   :  { %266 = vst.msk [vmem:[#allocation2 + $0x60] sm:$0xff] %vm31_vm0, %v249_v26  ;;  %v250_v32 = vadd.f32 %v225_v30, %v61_v21  ;;  %v284_v22 = vld [vmem:[#allocation2 + $0x58] sm:$0xff]  ;;  %v3855_v55 = vpop.permute.xlu1 %3087 }
 0x112   :  { %269 = vst.msk [vmem:[#allocation2 + $0x78] sm:$0xff] %vm31_vm0, %v252_v29  ;;  %v282_v33 = vld [vmem:[#allocation2 + $0x48] sm:$0xff]  ;;  %v294_v34 = vpack.c.bf16 %v284_v22, %v283_v18 }
 0x113   :  { %267 = vst.msk [vmem:[#allocation2 + $0x68] sm:$0xff] %vm31_vm0, %v250_v32  ;;  %v293_v38 = vpack.c.bf16 %v282_v33, %v281_v31 }
 0x114   :  { %v3859_v56 = vpop.permute.xlu0 %3023 }
 0x115   :  { %2697 = vmatmul.mubr.msk.bf16.gmra.mrb[8].mxu1 %vm31_vm0, %v291_v13  ;;  %2882 = vmatprep.mubr.msk.bf16.mxu0 %vm31_vm0, %v293_v38  ;;  %4877 = vst [vmem:[#allocation14_spill] sm:$0xff] %v3859_v56  ;;  %v3861_v57 = vpop.permute.xlu1 %3092 }
 0x116   :  { %2883 = vmatmul.mubr.msk.bf16.gmra.mrb[24].mxu0 %vm31_vm0, %v294_v34  ;;  %753 = vmatprep.mubr.bf16.mxu1 %v3447_v1 }
 0x117   :  { %v287_v39 = vld [vmem:[#allocation2 + $0x70] sm:$0xff] }
 0x118   :  { %v285_v40 = vld [vmem:[#allocation2 + $0x60] sm:$0xff]  ;;  %v3863_v58 = vpop.permute.xlu0 %3033 }
 0x119   :  { %v288_v43 = vld [vmem:[#allocation2 + $0x78] sm:$0xff]  ;;  %4878 = vst [vmem:[#allocation15_spill] sm:$0xff] %v3863_v58  ;;  %v3865_v59 = vpop.permute.xlu1 %3102 }
 0x11a   :  { %v286_v44 = vld [vmem:[#allocation2 + $0x68] sm:$0xff]  ;;  %v296_v45 = vpack.c.bf16 %v288_v43, %v287_v39  ;;  %4879 = vst [vmem:[#allocation16_spill] sm:$0xff] %v3865_v59 }
 0x11b   :  { %v295_v46 = vpack.c.bf16 %v286_v44, %v285_v40 }
 0x11c   :  { %v3868_v60 = vpop.permute.xlu0 %3045 }
 0x11d   :  { %2698 = vmatmul.mubr.msk.bf16.gmra.mrb[12].mxu1 %vm31_vm0, %v292_v11  ;;  %2886 = vmatprep.mubr.msk.bf16.mxu0 %vm31_vm0, %v295_v46  ;;  %v3870_v61 = vpop.permute.xlu1 %3112 }
 0x11e   :  { %2887 = vmatmul.mubr.msk.bf16.gmra.mrb[28].mxu0 %vm31_vm0, %v296_v45  ;;  %763 = vmatprep.mubr.bf16.mxu1 %v3447_v1  ;;  %4880 = vst [vmem:[#allocation17_spill] sm:$0xff] %v3870_v61 }
 0x120   :  { %v3872_v62 = vpop.permute.xlu0 %3060 }
 0x121   :  { %4881 = vst [vmem:[#allocation18_spill] sm:$0xff] %v3872_v62  ;;  %v3874_v63 = vpop.permute.xlu1 %3123 }
 0x122   :  { %4882 = vst [vmem:[#allocation19_spill] sm:$0xff] %v3874_v63 }
 0x124   :  { %v3876_v2 = vpop.permute.xlu0 %3070 }
 0x125   :  { %2699 = vmatmul.mubr.msk.bf16.gmra.mrb[16].mxu1 %vm31_vm0, %v293_v38  ;;  %4883 = vst [vmem:[#allocation20_spill] sm:$0xff] %v3876_v2 }
 0x126   :  { %773 = vmatprep.mubr.bf16.mxu1 %v3447_v1 }
 0x128   :  { %v3880_v3 = vpop.permute.xlu0 %3081 }
 0x12c   :  { %v3884_v5 = vpop.permute.xlu0 %3097 }
 0x12d   :  { %2700 = vmatmul.mubr.msk.bf16.gmra.mrb[20].mxu1 %vm31_vm0, %v294_v34  ;;  %4886 = vst [vmem:[#allocation23_spill] sm:$0xff] %v3884_v5 }
 0x12e   :  { %783 = vmatprep.mubr.bf16.mxu1 %v3447_v1 }
 0x130   :  { %v3888_v7 = vpop.permute.xlu0 %3107 }
 0x131   :  { %4888 = vst [vmem:[#allocation25_spill] sm:$0xff] %v3888_v7 }
 0x134   :  { %v3892_v9 = vpop.permute.xlu0 %3117 }
 0x135   :  { %2701 = vmatmul.mubr.msk.bf16.gmra.mrb[24].mxu1 %vm31_vm0, %v295_v46  ;;  %4890 = vst [vmem:[#allocation27_spill] sm:$0xff] %v3892_v9 }
 0x136   :  { %793 = vmatprep.mubr.bf16.mxu1 %v3447_v1  ;;  %v3878_v1 = vpop.permute.xlu1 %3134 }
 0x137   :  { %4884 = vst [vmem:[#allocation21_spill] sm:$0xff] %v3878_v1 }
 0x138   :  { %v3896_v11 = vpop.permute.xlu0 %3129 }
 0x139   :  { %4891 = vst [vmem:[#allocation28_spill] sm:$0xff] %v3896_v11 }
 0x13a   :  { %v3882_v4 = vpop.permute.xlu1 %3139 }
 0x13b   :  { %4885 = vst [vmem:[#allocation22_spill] sm:$0xff] %v3882_v4 }
 0x13c   :  { %v3900_v13 = vpop.permute.xlu0 %3144 }
 0x13d   :  { %2702 = vmatmul.mubr.msk.bf16.gmra.mrb[28].mxu1 %vm31_vm0, %v296_v45  ;;  %4892 = vst [vmem:[#allocation29_spill] sm:$0xff] %v3900_v13 }
 0x13e   :  { %v3886_v6 = vpop.permute.xlu1 %3149 }
 0x13f   :  { %4887 = vst [vmem:[#allocation24_spill] sm:$0xff] %v3886_v6 }
 0x140   :  { %v3904_v16 = vpop.permute.xlu0 %3154 }
 0x141   :  { %4894 = vst [vmem:[#allocation31_spill] sm:$0xff] %v3904_v16 }
 0x142   :  { %v3890_v8 = vpop.permute.xlu1 %3159 }
 0x143   :  { %4889 = vst [vmem:[#allocation26_spill] sm:$0xff] %v3890_v8 }
 0x144   :  { %v3908_v19 = vpop.permute.xlu0 %3165 }
 0x146   :  { %v3894_v10 = vpop.permute.xlu1 %3171 }
 0x148   :  { %v3912_v21 = vpop.permute.xlu0 %3181 }
 0x149   :  { %4896 = vst [vmem:[#allocation33_spill] sm:$0xff] %v3912_v21 }
 0x14a   :  { %v3898_v12 = vpop.permute.xlu1 %3176 }
 0x14c   :  { %v3916_v27 = vpop.permute.xlu0 %3191 }
 0x14d   :  { %4897 = vst [vmem:[#allocation34_spill] sm:$0xff] %v3916_v27  ;;  %v3083_v27 = vunpack.i.l.bf16 %v3880_v3 }
 0x14e   :  { %v3902_v14 = vpop.permute.xlu1 %3186 }
 0x14f   :  { %4893 = vst [vmem:[#allocation30_spill] sm:$0xff] %v3902_v14 }
 0x150   :  { %v3920_v29 = vpop.permute.xlu0 %3201 }
 0x151   :  { %4899 = vst [vmem:[#allocation36_spill] sm:$0xff] %v3920_v29 }
 0x152   :  { %v3906_v17 = vpop.permute.xlu1 %3196 }
 0x153   :  { %4895 = vst [vmem:[#allocation32_spill] sm:$0xff] %v3906_v17 }
 0x154   :  { %v3924_v31 = vpop.permute.xlu0 %3213 }
 0x156   :  { %v3910_v20 = vpop.permute.xlu1 %3207 }
 0x157   :  { %v3209_v7 = vunpack.i.l.bf16 %v3910_v20 }
 0x158   :  { %v3928_v22 = vpop.permute.xlu0 %3228 }
 0x159   :  { %4902 = vst [vmem:[#allocation39_spill] sm:$0xff] %v3928_v22 }
 0x15a   :  { %v3914_v26 = vpop.permute.xlu1 %3218 }
 0x15c   :  { %v3932_v34 = vpop.permute.xlu0 %3238 }
 0x15d   :  { %4903 = vst [vmem:[#allocation40_spill] sm:$0xff] %v3932_v34 }
 0x15e   :  { %v3918_v18 = vpop.permute.xlu1 %3223 }
 0x15f   :  { %4898 = vst [vmem:[#allocation35_spill] sm:$0xff] %v3918_v18  ;;  %v3084_v18 = vunpack.i.h.bf16 %v3880_v3 }
 0x160   :  { %v3936_v39 = vpop.permute.xlu0 %3249 }
 0x162   :  { %v3922_v30 = vpop.permute.xlu1 %3233 }
 0x163   :  { %4900 = vst [vmem:[#allocation37_spill] sm:$0xff] %v3922_v30 }
 0x164   :  { %v3940_v43 = vpop.permute.xlu0 %3265 }
 0x165   :  { %4905 = vst [vmem:[#allocation42_spill] sm:$0xff] %v3940_v43 }
 0x166   :  { %v3926_v32 = vpop.permute.xlu1 %3243 }
 0x167   :  { %4901 = vst [vmem:[#allocation38_spill] sm:$0xff] %v3926_v32  ;;  %v904_v32 = vshrl.u32 %v903_v47, 7 }
 0x168   :  { %v3944_v45 = vpop.permute.xlu0 %3275 }
 0x169   :  { %4907 = vst [vmem:[#allocation44_spill] sm:$0xff] %v3944_v45  ;;  %v913_v58 = vsub.s32 2, %v904_v32 }
 0x16a   :  { %v3930_v33 = vpop.permute.xlu1 %3255 }
 0x16c   :  { %v3948_v8 = vpop.permute.xlu0 %3285 }
 0x16d   :  { %4909 = vst [vmem:[#allocation46_spill] sm:$0xff] %v3948_v8  ;;  %v905_v8 = vsub.s32 0, %v904_v32 }
 0x16e   :  { %v3934_v38 = vpop.permute.xlu1 %3260 }
 0x170   :  { %v3950_v28 = vpop.permute.xlu0 %3297 }
 0x171   :  { %4910 = vst [vmem:[#allocation47_spill] sm:$0xff] %v3950_v28 }
 0x172   :  { %v3938_v40 = vpop.permute.xlu1 %3270 }
 0x173   :  { %4904 = vst [vmem:[#allocation41_spill] sm:$0xff] %v3938_v40 }
 0x174   :  { %v3954_v50 = vpop.permute.xlu0 %3312 }
 0x175   :  { %4912 = vst [vmem:[#allocation49_spill] sm:$0xff] %v3954_v50  ;;  %v901_v50 = vld [vmem:[%s4789_s6] sm:$0x7]  ;;  %s3459_s6 = smov 64  }
 0x176   :  { %v3942_v44 = vpop.permute.xlu1 %3280  ;;  %v3973_v53 = vrot.slane %v901_v50, %v905_v8 }
 0x177   :  { %4906 = vst [vmem:[#allocation43_spill] sm:$0xff] %v3942_v44  ;;  %v2999_v44 = vunpack.i.l.bf16 %v3847_v52 }
 0x178   :  { %v3958_v25 = vpop.permute.xlu0 %3322 }
 0x179   :  { %4914 = vst [vmem:[#allocation51_spill] sm:$0xff] %v3958_v25 }
 0x17a   :  { %v3946_v46 = vpop.permute.xlu1 %3291 }
 0x17b   :  { %4908 = vst [vmem:[#allocation45_spill] sm:$0xff] %v3946_v46  ;;  %v3042_v46 = vunpack.i.h.bf16 %v3822_v36 }
 0x17c   :  { %v3962_v4 = vpop.permute.xlu0 %3333 }
 0x17e   :  { %v3952_v16 = vpop.permute.xlu1 %3302 }
 0x17f   :  { %4911 = vst [vmem:[#allocation48_spill] sm:$0xff] %v3952_v16 }
 0x180   :  { %v3966_v29 = vpop.permute.xlu0 %3349 }
 0x182   :  { %v3956_v6 = vpop.permute.xlu1 %3307 }
 0x183   :  { %4913 = vst [vmem:[#allocation50_spill] sm:$0xff] %v3956_v6  ;;  %v909_v6 = vsub.s32 1, %v904_v32 }
 0x184   :  { %v3975_v25 = vpop.permute.xlu0 %3359 }
 0x186   :  { %v3960_v13 = vpop.permute.xlu1 %3317 }
 0x187   :  { %4915 = vst [vmem:[#allocation52_spill] sm:$0xff] %v3960_v13  ;;  %v3977_v13 = vrot.slane %v901_v50, %v909_v6  ;;  %v3991_v6 = vrot.slane %v901_v50, %v913_v58 }
 0x188   :  { %v3997_v30 = vpop.permute.xlu0 %3369 }
 0x189   :  { %4918 = vst [vmem:[#allocation55_spill] sm:$0xff] %v3997_v30  ;;  %v3000_v30 = vunpack.i.h.bf16 %v3847_v52 }
 0x18a   :  { %v3964_v24 = vpop.permute.xlu1 %3327 }
 0x18b   :  { %4916 = vst [vmem:[#allocation53_spill] sm:$0xff] %v3964_v24  ;;  %v3041_v24 = vunpack.i.l.bf16 %v3822_v36 }
 0x18c   :  { %v4013_v51 = vpop.permute.xlu0 %3381 }
 0x18e   :  { %v3968_v9 = vpop.permute.xlu1 %3339 }
 0x18f   :  { %v3341_v50 = vunpack.i.l.bf16 %v3968_v9 }
 0x192   :  { %v3979_v16 = vpop.permute.xlu1 %3344 }
 0x196   :  { %v4006_v58 = vpop.permute.xlu1 %3354 }
 0x1d8   :  { %v725_v47 = vpop.f32.mrb[0].mxu1 }
 0x1d9   :  { %v3984_v34 = vadd.f32 %v3973_v53, %v725_v47  ;;  %v727_v17 = vpop.f32.mrb[1].mxu1  ;;  %v2876_v1 = vpop.f32.mrb[16].mxu0 }
 0x1da   :  { %v729_v2 = vpop.f32.mrb[2].mxu1  ;;  %v3986_v8 = vpop.f32.mrb[17].mxu0  ;;  %v3989_v61 = vadd.f32 %v3977_v13, %v727_v17 }
 0x1db   :  { %v731_v32 = vpop.f32.mrb[3].mxu1  ;;  %v3993_v15 = vpop.f32.mrb[18].mxu0  ;;  %v1318_v23 = vmul.f32 %v3041_v24, %v3984_v34  ;;  %v1158_v45 = vmul.f32 %v2999_v44, %v3984_v34  ;;  %v4009_v24 = vadd.f32 %v2876_v1, %v3991_v6  ;;  %v1478_v17 = vmul.f32 %v3083_v27, %v3984_v34 }
 0x1dc   :  { %4917 = vst [vmem:[#allocation54_spill] sm:$0xff] %v3989_v61  ;;  %v3999_v47 = vpop.f32.mrb[19].mxu0  ;;  %v1894_v44 = vmul.f32 %v3209_v7, %v3989_v61  ;;  %v3383_v7 = vunpack.i.l.bf16 %v4013_v51  ;;  %v4042_v62 = vadd.f32 %v3973_v53, %v729_v2 }
 0x1dd   :  { %1350 = vrot.lane.b32.xlu0 %v1318_v23, %s3459_s6  ;;  %1190 = vrot.lane.b32.xlu1 %v1158_v45, %s3460_s29  ;;  %4919 = vst [vmem:[#allocation56_spill] sm:$0xff] %v4009_v24  ;;  %v3167_v23 = vunpack.i.l.bf16 %v3908_v19 }
 0x1de   :  { %4920 = vst [vmem:[#allocation57_spill] sm:$0xff] %v4042_v62  ;;  %v2472_v0 = vmul.f32 %v3383_v7, %v4009_v24 }
 0x1df   :  { %v1734_v22 = vmul.f32 %v3167_v23, %v3989_v61  ;;  %v4046_v23 = vpop.permute.xlu1 %3364 }
 0x1e0   :  { %v4015_v56 = vpop.f32.mrb[4].mxu1  ;;  %4921 = vst [vmem:[#allocation58_spill] sm:$0xff] %v4046_v23  ;;  %v1319_v23 = vmul.f32 %v3042_v46, %v4042_v62 }
 0x1e1   :  { %1510 = vrot.lane.b32.xlu1 %v1478_v17, %s3461_s30  ;;  %1926 = vrot.lane.b32.xlu0 %v1894_v44, %s3459_s6  ;;  %v4020_v45 = vpop.f32.mrb[5].mxu1  ;;  %v4022_v28 = vpop.f32.mrb[20].mxu0  ;;  %v2312_v17 = vmul.f32 %v3341_v50, %v4009_v24  ;;  %v3251_v44 = vunpack.i.l.bf16 %v3936_v39 }
 0x1e2   :  { %v4024_v1 = vpop.f32.mrb[6].mxu1  ;;  %v4026_v27 = vpop.f32.mrb[21].mxu0 }
 0x1e3   :  { %v4029_v11 = vpop.f32.mrb[7].mxu1  ;;  %v4031_v40 = vpop.f32.mrb[22].mxu0  ;;  %v2054_v59 = vmul.f32 %v3251_v44, %v3989_v61 }
 0x1e4   :  { %v857_v14 = vpop.f32.mrb[23].mxu0  ;;  %v3376_v46 = vpop.permute.xlu1 %3375 }
 0x1e5   :  { %v4037_v41 = vadd.f32 %v3991_v6, %v857_v14  ;;  %1766 = vrot.lane.b32.xlu1 %v1734_v22, %s3460_s29  ;;  %2346 = vrot.lane.b32.xlu0 %v2312_v17, %s3460_s29  ;;  %v4056_v17 = vadd.f32 %v3977_v13, %v731_v32  ;;  %v1159_v32 = vmul.f32 %v3000_v30, %v4042_v62  ;;  %v3342_v30 = vunpack.i.h.bf16 %v3968_v9 }
 0x1e6   :  { %v3377_v21 = vunpack.i.l.bf16 %v3376_v46 }
 0x1e8   :  { %v745_v50 = vpop.f32.mrb[8].mxu1 }
 0x1e9   :  { %v4051_v14 = vadd.f32 %v3973_v53, %v745_v50  ;;  %2086 = vrot.lane.b32.xlu1 %v2054_v59, %s3461_s30  ;;  %v747_v22 = vpop.f32.mrb[9].mxu1  ;;  %2506 = vrot.lane.b32.xlu0 %v2472_v0, %s3459_s6  ;;  %v2884_v2 = vpop.f32.mrb[24].mxu0 }
 0x1ea   :  { %v4059_v7 = vadd.f32 %v3977_v13, %v747_v22  ;;  %v4062_v44 = vadd.f32 %v2884_v2, %v3991_v6  ;;  %v749_v36 = vpop.f32.mrb[10].mxu1  ;;  %v870_v52 = vpop.f32.mrb[25].mxu0 }
 0x1eb   :  { %v4065_v50 = vadd.f32 %v3973_v53, %v749_v36  ;;  %v4068_v59 = vadd.f32 %v3991_v6, %v870_v52  ;;  %v751_v24 = vpop.f32.mrb[11].mxu1  ;;  %v2885_v0 = vpop.f32.mrb[26].mxu0  ;;  %v3210_v36 = vunpack.i.h.bf16 %v3910_v20  ;;  %v1479_v20 = vmul.f32 %v3084_v18, %v4042_v62 }
 0x1ec   :  { %4922 = vst [vmem:[#allocation59_spill] sm:$0xff] %v4062_v44  ;;  %v4073_v22 = vadd.f32 %v3977_v13, %v751_v24  ;;  %v4076_v2 = vadd.f32 %v2885_v0, %v3991_v6  ;;  %v873_v43 = vpop.f32.mrb[27].mxu0  ;;  %v4088_v24 = vadd.f32 %v3991_v6, %v3986_v8  ;;  %v4092_v0 = vadd.f32 %v3993_v15, %v3991_v6 }
 0x1ed   :  { %4923 = vst [vmem:[#allocation60_spill] sm:$0xff] %v4068_v59  ;;  %v4081_v52 = vadd.f32 %v3991_v6, %v873_v43  ;;  %1352 = vrot.lane.b32.xlu1 %v1319_v23, %s3459_s6  ;;  %1192 = vrot.lane.b32.xlu0 %v1159_v32, %s3460_s29  ;;  %v1895_v3 = vmul.f32 %v3210_v36, %v4056_v17  ;;  %v3335_v23 = vunpack.i.l.bf16 %v3962_v4  ;;  %v3384_v15 = vunpack.i.h.bf16 %v4013_v51 }
 0x1ee   :  { %4925 = vst [vmem:[#allocation62_spill] sm:$0xff] %v4092_v0 }
 0x1ef   :  { %4924 = vst [vmem:[#allocation61_spill] sm:$0xff] %v4081_v52  ;;  %v2310_v51 = vmul.f32 %v3335_v23, %v4088_v24  ;;  %v2470_v23 = vmul.f32 %v3377_v21, %v4088_v24 }
 0x1f0   :  { %v755_v43 = vpop.f32.mrb[12].mxu1 }
 0x1f1   :  { %v4098_v32 = vadd.f32 %v3973_v53, %v755_v43  ;;  %1928 = vrot.lane.b32.xlu1 %v1895_v3, %s3459_s6  ;;  %v757_v9 = vpop.f32.mrb[13].mxu1  ;;  %1512 = vrot.lane.b32.xlu0 %v1479_v20, %s3461_s30  ;;  %v2888_v8 = vpop.f32.mrb[28].mxu0  ;;  %v2313_v43 = vmul.f32 %v3342_v30, %v4092_v0  ;;  %v4131_v30 = vadd.f32 %v3991_v6, %v3999_v47 }
 0x1f2   :  { %v4104_v61 = vadd.f32 %v3977_v13, %v757_v9  ;;  %v4107_v18 = vadd.f32 %v2888_v8, %v3991_v6  ;;  %v759_v36 = vpop.f32.mrb[14].mxu1  ;;  %v886_v62 = vpop.f32.mrb[29].mxu0 }
 0x1f3   :  { %v4111_v63 = vadd.f32 %v3973_v53, %v759_v36  ;;  %v4114_v3 = vadd.f32 %v3991_v6, %v886_v62  ;;  %v761_v20 = vpop.f32.mrb[15].mxu1  ;;  %v2889_v5 = vpop.f32.mrb[30].mxu0  ;;  %v2473_v62 = vmul.f32 %v3384_v15, %v4092_v0 }
 0x1f4   :  { %4926 = vst [vmem:[#allocation63_spill] sm:$0xff] %v4104_v61  ;;  %4927 = vst [vmem:[#allocation64_spill] sm:$0xff] %v4107_v18  ;;  %v4118_v9 = vadd.f32 %v3977_v13, %v761_v20  ;;  %v4121_v8 = vadd.f32 %v2889_v5, %v3991_v6  ;;  %v889_v18 = vpop.f32.mrb[31].mxu0  ;;  %v3168_v5 = vunpack.i.h.bf16 %v3908_v19  ;;  %v3336_v20 = vunpack.i.h.bf16 %v3962_v4 }
 0x1f5   :  { %v4124_v61 = vadd.f32 %v3991_v6, %v889_v18  ;;  %2342 = vrot.lane.b32.xlu0 %v2310_v51, %s3460_s29  ;;  %2348 = vrot.lane.b32.xlu1 %v2313_v43, %s3460_s29  ;;  %v3378_v43 = vunpack.i.h.bf16 %v3376_v46  ;;  %v4158_v46 = vadd.f32 %v3973_v53, %v4015_v56 }
 0x1f6   :  { %v2311_v21 = vmul.f32 %v3336_v20, %v4131_v30  ;;  %v1735_v4 = vmul.f32 %v3168_v5, %v4056_v17  ;;  %v3005_v5 = vunpack.i.l.bf16 %v3792_v37 }
 0x1f7   :  { %4928 = vst [vmem:[#allocation65_spill] sm:$0xff] %v4124_v61 }
 0x1f8   :  { %v765_v36 = vpop.f32.mrb[16].mxu1 }
 0x1f9   :  { %v4137_v18 = vadd.f32 %v3973_v53, %v765_v36  ;;  %v767_v61 = vpop.f32.mrb[17].mxu1  ;;  %2502 = vrot.lane.b32.xlu0 %v2470_v23, %s3459_s6  ;;  %2508 = vrot.lane.b32.xlu1 %v2473_v62, %s3459_s6  ;;  %v3252_v23 = vunpack.i.h.bf16 %v3936_v39 }
 0x1fa   :  { %v4142_v15 = vadd.f32 %v3977_v13, %v767_v61  ;;  %v769_v47 = vpop.f32.mrb[18].mxu1  ;;  %v2471_v61 = vmul.f32 %v3378_v43, %v4131_v30  ;;  %v4168_v43 = vpop.permute.xlu1 %3386 }
 0x1fb   :  { %v4146_v51 = vadd.f32 %v3973_v53, %v769_v47  ;;  %v771_v19 = vpop.f32.mrb[19].mxu1  ;;  %v2055_v62 = vmul.f32 %v3252_v23, %v4056_v17  ;;  %v3047_v47 = vunpack.i.l.bf16 %v3868_v60 }
 0x1fc   :  { %4929 = vst [vmem:[#allocation66_spill] sm:$0xff] %v4142_v15  ;;  %v4150_v36 = vadd.f32 %v3977_v13, %v771_v19 }
 0x1fd   :  { %4930 = vst [vmem:[#allocation67_spill] sm:$0xff] %v4146_v51  ;;  %1768 = vrot.lane.b32.xlu0 %v1735_v4, %s3460_s29  ;;  %2344 = vrot.lane.b32.xlu1 %v2311_v21, %s3460_s29  ;;  %v4175_v4 = vadd.f32 %v3977_v13, %v4020_v45  ;;  %v1320_v0 = vmul.f32 %v3047_v47, %v4158_v46 }
 0x1fe   :  { %4931 = vst [vmem:[#allocation68_spill] sm:$0xff] %v4150_v36  ;;  %v4191_v45 = vadd.f32 %v4022_v28, %v3991_v6 }
 0x200   :  { %v775_v20 = vpop.f32.mrb[20].mxu1 }
 0x201   :  { %v4164_v19 = vadd.f32 %v3973_v53, %v775_v20  ;;  %v777_v39 = vpop.f32.mrb[21].mxu1  ;;  %2088 = vrot.lane.b32.xlu0 %v2055_v62, %s3461_s30  ;;  %2504 = vrot.lane.b32.xlu1 %v2471_v61, %s3459_s6  ;;  %v1160_v62 = vmul.f32 %v3005_v5, %v4158_v46  ;;  %v3392_v5 = vpop.permute.xlu1 %3391 }
 0x202   :  { %v4171_v56 = vadd.f32 %v3977_v13, %v777_v39  ;;  %v779_v21 = vpop.f32.mrb[22].mxu1  ;;  %v3215_v39 = vunpack.i.l.bf16 %v3924_v31 }
 0x203   :  { %4932 = vst [vmem:[#allocation69_spill] sm:$0xff] %v4164_v19  ;;  %v4178_v23 = vadd.f32 %v3973_v53, %v779_v21  ;;  %v781_v20 = vpop.f32.mrb[23].mxu1  ;;  %v3089_v19 = vunpack.i.l.bf16 %v3855_v55 }
 0x204   :  { %4933 = vst [vmem:[#allocation70_spill] sm:$0xff] %v4171_v56  ;;  %v4183_v61 = vadd.f32 %v3977_v13, %v781_v20  ;;  %v1896_v21 = vmul.f32 %v3215_v39, %v4175_v4  ;;  %v3173_v20 = vunpack.i.l.bf16 %v3894_v10  ;;  %v3393_v39 = vunpack.i.l.bf16 %v3392_v5 }
 0x205   :  { %4934 = vst [vmem:[#allocation71_spill] sm:$0xff] %v4178_v23  ;;  %1354 = vrot.lane.b32.xlu0 %v1320_v0, %s3459_s6  ;;  %1194 = vrot.lane.b32.xlu1 %v1160_v62, %s3460_s29  ;;  %v1480_v47 = vmul.f32 %v3089_v19, %v4158_v46 }
 0x206   :  { %4935 = vst [vmem:[#allocation72_spill] sm:$0xff] %v4183_v61  ;;  %v3351_v61 = vunpack.i.l.bf16 %v3966_v29  ;;  %v1736_v15 = vmul.f32 %v3173_v20, %v4175_v4  ;;  %v3006_v20 = vunpack.i.h.bf16 %v3792_v37 }
 0x208   :  { %v785_v23 = vpop.f32.mrb[24].mxu1  ;;  %v2316_v19 = vmul.f32 %v3351_v61, %v4191_v45  ;;  %v4219_v61 = vadd.f32 %v3973_v53, %v4024_v1 }
 0x209   :  { %v4198_v56 = vadd.f32 %v3973_v53, %v785_v23  ;;  %1930 = vrot.lane.b32.xlu0 %v1896_v21, %s3459_s6  ;;  %1514 = vrot.lane.b32.xlu1 %v1480_v47, %s3461_s30  ;;  %v787_v0 = vpop.f32.mrb[25].mxu1  ;;  %v3257_v21 = vunpack.i.l.bf16 %v3930_v33  ;;  %v2476_v47 = vmul.f32 %v3393_v39, %v4191_v45 }
 0x20a   :  { %v4203_v28 = vadd.f32 %v3977_v13, %v787_v0  ;;  %v789_v62 = vpop.f32.mrb[26].mxu1 }
 0x20b   :  { %v4207_v36 = vadd.f32 %v3973_v53, %v789_v62  ;;  %v791_v51 = vpop.f32.mrb[27].mxu1  ;;  %v2056_v0 = vmul.f32 %v3257_v21, %v4175_v4 }
 0x20c   :  { %v4211_v23 = vadd.f32 %v3977_v13, %v791_v51  ;;  %v3048_v51 = vunpack.i.h.bf16 %v3868_v60 }
 0x20d   :  { %1770 = vrot.lane.b32.xlu1 %v1736_v15, %s3460_s29  ;;  %2354 = vrot.lane.b32.xlu0 %v2316_v19, %s3460_s29  ;;  %v4234_v19 = vadd.f32 %v3977_v13, %v4029_v11  ;;  %v4254_v11 = vadd.f32 %v4031_v40, %v3991_v6 }
 0x20e   :  { %4936 = vst [vmem:[#allocation73_spill] sm:$0xff] %v4211_v23  ;;  %v1321_v21 = vmul.f32 %v3048_v51, %v4219_v61  ;;  %v3388_v51 = vunpack.i.l.bf16 %v4168_v43 }
 0x210   :  { %v795_v62 = vpop.f32.mrb[28].mxu1 }
 0x211   :  { %v4225_v23 = vadd.f32 %v3973_v53, %v795_v62  ;;  %2090 = vrot.lane.b32.xlu1 %v2056_v0, %s3461_s30  ;;  %2514 = vrot.lane.b32.xlu0 %v2476_v47, %s3459_s6  ;;  %v797_v15 = vpop.f32.mrb[29].mxu1  ;;  %v1161_v62 = vmul.f32 %v3006_v20, %v4219_v61  ;;  %v3090_v47 = vunpack.i.h.bf16 %v3855_v55  ;;  %v3352_v55 = vunpack.i.h.bf16 %v3966_v29 }
 0x212   :  { %v4230_v39 = vadd.f32 %v3977_v13, %v797_v15  ;;  %v799_v1 = vpop.f32.mrb[30].mxu1  ;;  %v3216_v15 = vunpack.i.h.bf16 %v3924_v31  ;;  %v3346_v31 = vunpack.i.l.bf16 %v3979_v16 }
 0x213   :  { %v4237_v37 = vadd.f32 %v3973_v53, %v799_v1  ;;  %v801_v60 = vpop.f32.mrb[31].mxu1  ;;  %v4250_v53 = vadd.f32 %v3991_v6, %v4026_v27  ;;  %v3394_v27 = vunpack.i.h.bf16 %v3392_v5  ;;  %v2317_v40 = vmul.f32 %v3352_v55, %v4254_v11 }
 0x214   :  { %v4242_v0 = vadd.f32 %v3977_v13, %v801_v60  ;;  %v1897_v20 = vmul.f32 %v3216_v15, %v4234_v19  ;;  %v1481_v13 = vmul.f32 %v3090_v47, %v4219_v61  ;;  %v3174_v60 = vunpack.i.h.bf16 %v3894_v10 }
 0x215   :  { %1356 = vrot.lane.b32.xlu1 %v1321_v21, %s3459_s6  ;;  %1196 = vrot.lane.b32.xlu0 %v1161_v62, %s3460_s29  ;;  %v2314_v1 = vmul.f32 %v3346_v31, %v4250_v53  ;;  %v2474_v6 = vmul.f32 %v3388_v51, %v4250_v53  ;;  %v2477_v29 = vmul.f32 %v3394_v27, %v4254_v11  ;;  %v3347_v21 = vunpack.i.h.bf16 %v3979_v16 }
 0x216   :  { %v3389_v5 = vunpack.i.h.bf16 %v4168_v43  ;;  %v1737_v47 = vmul.f32 %v3174_v60, %v4234_v19  ;;  %v3258_v15 = vunpack.i.h.bf16 %v3930_v33  ;;  %v3094_v55 = vunpack.i.l.bf16 %v3861_v57 }
 0x217   :  { %v2315_v62 = vmul.f32 %v3347_v21, %v4037_v41  ;;  %v3220_v31 = vunpack.i.l.bf16 %v3914_v26 }
 0x218   :  { %v2475_v10 = vmul.f32 %v3389_v5, %v4037_v41  ;;  %v2057_v16 = vmul.f32 %v3258_v15, %v4234_v19  ;;  %v1482_v27 = vmul.f32 %v3094_v55, %v4051_v14  ;;  %v3262_v5 = vunpack.i.l.bf16 %v3934_v38 }
 0x219   :  { %1932 = vrot.lane.b32.xlu1 %v1897_v20, %s3459_s6  ;;  %1516 = vrot.lane.b32.xlu0 %v1481_v13, %s3461_s30  ;;  %v3010_v20 = vunpack.i.l.bf16 %v3796_v49  ;;  %v3052_v13 = vunpack.i.l.bf16 %v3831_v42  ;;  %v1898_v51 = vmul.f32 %v3220_v31, %v4059_v7  ;;  %v3011_v15 = vunpack.i.h.bf16 %v3796_v49  ;;  %v3397_v31 = vpop.permute.xlu0 %3396 }
 0x21a   :  { %v3356_v55 = vunpack.i.l.bf16 %v4006_v58 }
 0x21b   :  { %v1322_v43 = vmul.f32 %v3052_v13, %v4051_v14  ;;  %v1162_v33 = vmul.f32 %v3010_v20, %v4051_v14  ;;  %v1163_v20 = vmul.f32 %v3011_v15, %v4065_v50  ;;  %v3095_v13 = vunpack.i.h.bf16 %v3861_v57 }
 0x21c   :  { %v2318_v57 = vmul.f32 %v3356_v55, %v4068_v59  ;;  %v3263_v15 = vunpack.i.h.bf16 %v3934_v38  ;;  %v4938_v38 = vld [vmem:[#allocation19_spill] sm:$0xff] }
 0x21d   :  { %2350 = vrot.lane.b32.xlu0 %v2314_v1, %s3460_s29  ;;  %2356 = vrot.lane.b32.xlu1 %v2317_v40, %s3460_s29  ;;  %v4293_v1 = vpop.permute.xlu1 %3401  ;;  %v3178_v40 = vunpack.i.l.bf16 %v3898_v12  ;;  %v3125_v55 = vunpack.i.l.bf16 %v4938_v38 }
 0x21f   :  { %v1738_v21 = vmul.f32 %v3178_v40, %v4059_v7 }
 0x221   :  { %2510 = vrot.lane.b32.xlu0 %v2474_v6, %s3459_s6  ;;  %2516 = vrot.lane.b32.xlu1 %v2477_v29, %s3459_s6  ;;  %v3361_v6 = vunpack.i.l.bf16 %v3975_v25  ;;  %v3403_v29 = vunpack.i.l.bf16 %v4293_v1 }
 0x223   :  { %v2320_v60 = vmul.f32 %v3361_v6, %v4062_v44  ;;  %v3179_v6 = vunpack.i.h.bf16 %v3898_v12 }
 0x225   :  { %1772 = vrot.lane.b32.xlu0 %v1737_v47, %s3460_s29  ;;  %2352 = vrot.lane.b32.xlu1 %v2315_v62, %s3460_s29  ;;  %v2480_v62 = vmul.f32 %v3403_v29, %v4062_v44  ;;  %v2058_v47 = vmul.f32 %v3262_v5, %v4059_v7  ;;  %v3399_v29 = vunpack.i.h.bf16 %v3397_v31  ;;  %v1739_v5 = vmul.f32 %v3179_v6, %v4073_v22  ;;  %v4940_v6 = vld [vmem:[#allocation33_spill] sm:$0xff] }
 0x229   :  { %2092 = vrot.lane.b32.xlu0 %v2057_v16, %s3461_s30  ;;  %2512 = vrot.lane.b32.xlu1 %v2475_v10, %s3459_s6  ;;  %v3053_v10 = vunpack.i.h.bf16 %v3831_v42  ;;  %v1483_v42 = vmul.f32 %v3095_v13, %v4065_v50 }
 0x22b   :  { %v1323_v16 = vmul.f32 %v3053_v10, %v4065_v50 }
 0x22d   :  { %1358 = vrot.lane.b32.xlu0 %v1322_v43, %s3459_s6  ;;  %1198 = vrot.lane.b32.xlu1 %v1162_v33, %s3460_s29  ;;  %v3221_v43 = vunpack.i.h.bf16 %v3914_v26  ;;  %v3362_v33 = vunpack.i.h.bf16 %v3975_v25 }
 0x22f   :  { %v1899_v49 = vmul.f32 %v3221_v43, %v4073_v22  ;;  %v2321_v26 = vmul.f32 %v3362_v33, %v4076_v2 }
 0x231   :  { %1934 = vrot.lane.b32.xlu0 %v1898_v51, %s3459_s6  ;;  %1518 = vrot.lane.b32.xlu1 %v1482_v27, %s3461_s30  ;;  %v3357_v51 = vunpack.i.h.bf16 %v4006_v58  ;;  %v3398_v27 = vunpack.i.l.bf16 %v3397_v31  ;;  %v2479_v58 = vmul.f32 %v3399_v29, %v4081_v52  ;;  %v3183_v29 = vunpack.i.l.bf16 %v4940_v6 }
 0x233   :  { %v2478_v25 = vmul.f32 %v3398_v27, %v4068_v59  ;;  %v2319_v40 = vmul.f32 %v3357_v51, %v4081_v52  ;;  %v4959_v59 = vld [vmem:[#allocation67_spill] sm:$0xff] }
 0x235   :  { %1774 = vrot.lane.b32.xlu1 %v1738_v21, %s3460_s29  ;;  %2362 = vrot.lane.b32.xlu0 %v2320_v60, %s3460_s29  ;;  %v4333_v60 = vpop.permute.xlu0 %3406  ;;  %v4336_v21 = vpop.permute.xlu1 %3411 }
 0x239   :  { %2094 = vrot.lane.b32.xlu1 %v2058_v47, %s3461_s30  ;;  %2522 = vrot.lane.b32.xlu0 %v2480_v62, %s3459_s6  ;;  %v2957_v62 = vunpack.i.l.bf16 %v3820_v35  ;;  %v3015_v47 = vunpack.i.l.bf16 %v3853_v54 }
 0x23b   :  { %v1078_v12 = vmul.f32 %v2957_v62, %v3984_v34  ;;  %v1164_v13 = vmul.f32 %v3015_v47, %v4098_v32 }
 0x23d   :  { %1360 = vrot.lane.b32.xlu1 %v1323_v16, %s3459_s6  ;;  %1200 = vrot.lane.b32.xlu0 %v1163_v20, %s3460_s29  ;;  %v2059_v20 = vmul.f32 %v3263_v15, %v4073_v22 }
 0x241   :  { %1936 = vrot.lane.b32.xlu1 %v1899_v49, %s3459_s6  ;;  %1520 = vrot.lane.b32.xlu0 %v1483_v42, %s3461_s30  ;;  %v3057_v49 = vunpack.i.l.bf16 %v3839_v48  ;;  %v4937_v42 = vld [vmem:[#allocation23_spill] sm:$0xff] }
 0x242   :  { %v3099_v33 = vunpack.i.l.bf16 %v4937_v42 }
 0x243   :  { %v1324_v31 = vmul.f32 %v3057_v49, %v4098_v32  ;;  %v4944_v49 = vld [vmem:[#allocation55_spill] sm:$0xff] }
 0x244   :  { %v1484_v51 = vmul.f32 %v3099_v33, %v4098_v32  ;;  %v3371_v33 = vunpack.i.l.bf16 %v4944_v49 }
 0x245   :  { %2358 = vrot.lane.b32.xlu0 %v2318_v57, %s3460_s29  ;;  %2364 = vrot.lane.b32.xlu1 %v2321_v26, %s3460_s29 }
 0x249   :  { %2518 = vrot.lane.b32.xlu0 %v2478_v25, %s3459_s6  ;;  %2360 = vrot.lane.b32.xlu1 %v2319_v40, %s3460_s29  ;;  %v4939_v25 = vld [vmem:[#allocation54_spill] sm:$0xff] }
 0x24a   :  { %v1638_v40 = vmul.f32 %v3125_v55, %v4939_v25  ;;  %v4945_v55 = vld [vmem:[#allocation45_spill] sm:$0xff] }
 0x24d   :  { %1776 = vrot.lane.b32.xlu0 %v1739_v5, %s3460_s29  ;;  %2520 = vrot.lane.b32.xlu1 %v2479_v58, %s3459_s6  ;;  %v4941_v58 = vld [vmem:[#allocation35_spill] sm:$0xff] }
 0x24e   :  { %v3225_v5 = vunpack.i.l.bf16 %v4941_v58 }
 0x24f   :  { %v1351_v10 = vpop.permute.xlu0 %1350  ;;  %v1191_v16 = vpop.permute.xlu1 %1190 }
 0x250   :  { %v1238_v43 = vadd.f32 %v1191_v16, %v1078_v12  ;;  %v4942_v12 = vld [vmem:[#allocation63_spill] sm:$0xff] }
 0x251   :  { %2096 = vrot.lane.b32.xlu0 %v2059_v20, %s3461_s30  ;;  %1202 = vrot.lane.b32.xlu1 %v1164_v13, %s3460_s29  ;;  %v1740_v16 = vmul.f32 %v3183_v29, %v4942_v12  ;;  %v4943_v13 = vld [vmem:[#allocation42_spill] sm:$0xff]  ;;  %v2958_v29 = vunpack.i.h.bf16 %v3820_v35 }
 0x252   :  { %v1398_v57 = vadd.f32 %v1351_v10, %v1238_v43  ;;  %v1900_v10 = vmul.f32 %v3225_v5, %v4942_v12  ;;  %v3267_v43 = vunpack.i.l.bf16 %v4943_v13 }
 0x253   :  { %v1511_v26 = vpop.permute.xlu1 %1510  ;;  %v1927_v34 = vpop.permute.xlu0 %1926 }
 0x254   :  { %v1558_v27 = vadd.f32 %v1511_v26, %v1398_v57  ;;  %v3293_v57 = vunpack.i.l.bf16 %v4945_v55 }
 0x255   :  { %1362 = vrot.lane.b32.xlu0 %v1324_v31, %s3459_s6  ;;  %1522 = vrot.lane.b32.xlu1 %v1484_v51, %s3461_s30  ;;  %v4946_v31 = vld [vmem:[#allocation64_spill] sm:$0xff] }
 0x256   :  { %v1654_v62 = vadd.f32 %v1638_v40, %v1558_v27  ;;  %v2324_v51 = vmul.f32 %v3371_v33, %v4946_v31  ;;  %v2060_v40 = vmul.f32 %v3267_v43, %v4942_v12  ;;  %v2214_v5 = vmul.f32 %v3293_v57, %v4088_v24 }
 0x257   :  { %v1767_v47 = vpop.permute.xlu1 %1766  ;;  %v4359_v15 = vpop.permute.xlu0 %2346  ;;  %v3100_v24 = vunpack.i.h.bf16 %v4937_v42  ;;  %v3372_v42 = vunpack.i.h.bf16 %v4944_v49 }
 0x258   :  { %v1814_v20 = vadd.f32 %v1767_v47, %v1654_v62  ;;  %v3058_v47 = vunpack.i.h.bf16 %v3839_v48  ;;  %v3226_v48 = vunpack.i.h.bf16 %v4941_v58 }
 0x259   :  { %1938 = vrot.lane.b32.xlu0 %v1900_v10, %s3459_s6  ;;  %1778 = vrot.lane.b32.xlu1 %v1740_v16, %s3460_s29  ;;  %v3016_v10 = vunpack.i.h.bf16 %v3853_v54  ;;  %v3126_v54 = vunpack.i.h.bf16 %v4938_v38  ;;  %v2325_v38 = vmul.f32 %v3372_v42, %v4121_v8  ;;  %v4951_v42 = vld [vmem:[#allocation16_spill] sm:$0xff] }
 0x25a   :  { %v1974_v26 = vadd.f32 %v1927_v34, %v1814_v20  ;;  %v4947_v34 = vld [vmem:[#allocation57_spill] sm:$0xff]  ;;  %v1325_v43 = vmul.f32 %v3058_v47, %v4111_v63 }
 0x25b   :  { %v2087_v27 = vpop.permute.xlu1 %2086  ;;  %v4369_v25 = vpop.permute.xlu0 %2506  ;;  %v1079_v16 = vmul.f32 %v2958_v29, %v4947_v34  ;;  %v1165_v35 = vmul.f32 %v3016_v10, %v4111_v63  ;;  %v3184_v34 = vunpack.i.h.bf16 %v4940_v6 }
 0x25c   :  { %v2134_v62 = vadd.f32 %v2087_v27, %v1974_v26  ;;  %v1901_v27 = vmul.f32 %v3226_v48, %v4118_v9 }
 0x25d   :  { %2098 = vrot.lane.b32.xlu1 %v2060_v40, %s3461_s30  ;;  %2370 = vrot.lane.b32.xlu0 %v2324_v51, %s3460_s29  ;;  %v1485_v40 = vmul.f32 %v3100_v24, %v4111_v63  ;;  %v1741_v24 = vmul.f32 %v3184_v34, %v4118_v9 }
 0x25e   :  { %v2230_v20 = vadd.f32 %v2214_v5, %v2134_v62  ;;  %v4948_v5 = vld [vmem:[#allocation58_spill] sm:$0xff] }
 0x25f   :  { %v1353_v33 = vpop.permute.xlu1 %1352  ;;  %v1193_v44 = vpop.permute.xlu0 %1192  ;;  %v3366_v58 = vunpack.i.l.bf16 %v4948_v5 }
 0x260   :  { %v1239_v52 = vadd.f32 %v1193_v44, %v1079_v16  ;;  %v1639_v44 = vmul.f32 %v3126_v54, %v4056_v17  ;;  %v3367_v17 = vunpack.i.h.bf16 %v4948_v5  ;;  %v4949_v16 = vld [vmem:[#allocation65_spill] sm:$0xff]  ;;  %v4950_v54 = vld [vmem:[#allocation7_spill] sm:$0xff]  ;;  %v4952_v5 = vld [vmem:[#allocation18_spill] sm:$0xff] }
 0x261   :  { %1364 = vrot.lane.b32.xlu1 %v1325_v43, %s3459_s6  ;;  %1204 = vrot.lane.b32.xlu0 %v1165_v35, %s3460_s29 }
 0x262   :  { %v1399_v57 = vadd.f32 %v1353_v33, %v1239_v52  ;;  %v2322_v52 = vmul.f32 %v3366_v58, %v4114_v3  ;;  %v2323_v33 = vmul.f32 %v3367_v17, %v4949_v16  ;;  %v3062_v58 = vunpack.i.l.bf16 %v4952_v5 }
 0x263   :  { %v1929_v26 = vpop.permute.xlu1 %1928  ;;  %v1513_v51 = vpop.permute.xlu0 %1512 }
 0x264   :  { %v1559_v29 = vadd.f32 %v1513_v51, %v1399_v57  ;;  %v3020_v57 = vunpack.i.l.bf16 %v4950_v54  ;;  %v3268_v51 = vunpack.i.h.bf16 %v4943_v13  ;;  %v3104_v13 = vunpack.i.l.bf16 %v4951_v42 }
 0x265   :  { %1940 = vrot.lane.b32.xlu1 %v1901_v27, %s3459_s6  ;;  %1524 = vrot.lane.b32.xlu0 %v1485_v40, %s3461_s30  ;;  %v1326_v17 = vmul.f32 %v3062_v58, %v4137_v18 }
 0x266   :  { %v1655_v62 = vadd.f32 %v1639_v44, %v1559_v29  ;;  %v2061_v40 = vmul.f32 %v3268_v51, %v4118_v9  ;;  %v1166_v29 = vmul.f32 %v3020_v57, %v4137_v18  ;;  %v4955_v51 = vld [vmem:[#allocation39_spill] sm:$0xff] }
 0x267   :  { %v2343_v47 = vpop.permute.xlu0 %2342  ;;  %v4395_v10 = vpop.permute.xlu1 %2348 }
 0x268   :  { %v2390_v49 = vadd.f32 %v2343_v47, %v2230_v20 }
 0x269   :  { %2366 = vrot.lane.b32.xlu0 %v2322_v52, %s3460_s29  ;;  %2372 = vrot.lane.b32.xlu1 %v2325_v38, %s3460_s29  ;;  %v3294_v52 = vunpack.i.h.bf16 %v4945_v55 }
 0x26b   :  { %v2503_v43 = vpop.permute.xlu0 %2502  ;;  %v4402_v35 = vpop.permute.xlu1 %2508 }
 0x26c   :  { %v2550_v48 = vadd.f32 %v2503_v43, %v2390_v49  ;;  %v1486_v49 = vmul.f32 %v3104_v13, %v4137_v18 }
 0x26d   :  { %1780 = vrot.lane.b32.xlu0 %v1741_v24, %s3460_s29  ;;  %2368 = vrot.lane.b32.xlu1 %v2323_v33, %s3460_s29  ;;  %v4953_v33 = vld [vmem:[#allocation9_spill] sm:$0xff] }
 0x26e   :  { %v2727_v6 = vpack.c.bf16 %v2550_v48, %v2550_v48  ;;  %v2962_v43 = vunpack.i.l.bf16 %v4953_v33  ;;  %v4954_v48 = vld [vmem:[#allocation30_spill] sm:$0xff] }
 0x26f   :  { %v1769_v27 = vpop.permute.xlu0 %1768  ;;  %v2345_v20 = vpop.permute.xlu1 %2344  ;;  %v3188_v57 = vunpack.i.l.bf16 %v4954_v48 }
 0x270   :  { %2631 = vst.msk [vmem:[%s4790_s7] sm:$0xf] %vm2630_vm1, %v2727_v6  ;;  %v1815_v44 = vadd.f32 %v1769_v27, %v1655_v62  ;;  %v2215_v62 = vmul.f32 %v3294_v52, %v4131_v30  ;;  %v3230_v6 = vunpack.i.l.bf16 %v4955_v51  ;;  %v3021_v52 = vunpack.i.h.bf16 %v4950_v54 }
 0x271   :  { %2100 = vrot.lane.b32.xlu0 %v2061_v40, %s3461_s30  ;;  %1206 = vrot.lane.b32.xlu1 %v1166_v29, %s3460_s29  ;;  %v4956_v29 = vld [vmem:[#allocation66_spill] sm:$0xff] }
 0x272   :  { %v1975_v38 = vadd.f32 %v1929_v26, %v1815_v44  ;;  %v1080_v26 = vmul.f32 %v2962_v43, %v4158_v46  ;;  %v1902_v44 = vmul.f32 %v3230_v6, %v4956_v29  ;;  %v1742_v13 = vmul.f32 %v3188_v57, %v4956_v29 }
 0x273   :  { %v2089_v47 = vpop.permute.xlu0 %2088  ;;  %v2505_v34 = vpop.permute.xlu1 %2504  ;;  %v1167_v6 = vmul.f32 %v3021_v52, %v4959_v59 }
 0x274   :  { %v2135_v24 = vadd.f32 %v2089_v47, %v1975_v38  ;;  %v4957_v38 = vld [vmem:[#allocation41_spill] sm:$0xff] }
 0x275   :  { %1366 = vrot.lane.b32.xlu0 %v1326_v17, %s3459_s6  ;;  %1526 = vrot.lane.b32.xlu1 %v1486_v49, %s3461_s30  ;;  %v3272_v47 = vunpack.i.l.bf16 %v4957_v38  ;;  %v4958_v17 = vld [vmem:[#allocation28_spill] sm:$0xff] }
 0x276   :  { %v2231_v55 = vadd.f32 %v2215_v62, %v2135_v24  ;;  %v3131_v49 = vunpack.i.l.bf16 %v4958_v17 }
 0x277   :  { %v1355_v27 = vpop.permute.xlu0 %1354  ;;  %v1195_v40 = vpop.permute.xlu1 %1194  ;;  %v2062_v57 = vmul.f32 %v3272_v47, %v4956_v29 }
 0x278   :  { %v2391_v58 = vadd.f32 %v2345_v20, %v2231_v55  ;;  %v1240_v30 = vadd.f32 %v1195_v40, %v1080_v26  ;;  %v1640_v54 = vmul.f32 %v3131_v49, %v4175_v4  ;;  %v3105_v26 = vunpack.i.h.bf16 %v4951_v42 }
 0x279   :  { %1942 = vrot.lane.b32.xlu0 %v1902_v44, %s3459_s6  ;;  %1782 = vrot.lane.b32.xlu1 %v1742_v13, %s3460_s29  ;;  %v3063_v40 = vunpack.i.h.bf16 %v4952_v5  ;;  %v3189_v5 = vunpack.i.h.bf16 %v4954_v48 }
 0x27a   :  { %v2551_v62 = vadd.f32 %v2505_v34, %v2391_v58  ;;  %v1400_v46 = vadd.f32 %v1355_v27, %v1240_v30  ;;  %v1487_v13 = vmul.f32 %v3105_v26, %v4959_v59  ;;  %v3231_v58 = vunpack.i.h.bf16 %v4955_v51  ;;  %v4960_v30 = vld [vmem:[#allocation47_spill] sm:$0xff]  ;;  %v4963_v51 = vld [vmem:[#allocation14_spill] sm:$0xff] }
 0x27b   :  { %v1931_v43 = vpop.permute.xlu0 %1930  ;;  %v1515_v24 = vpop.permute.xlu1 %1514  ;;  %v1327_v4 = vmul.f32 %v3063_v40, %v4959_v59  ;;  %v3299_v52 = vunpack.i.l.bf16 %v4960_v30  ;;  %v3273_v26 = vunpack.i.h.bf16 %v4957_v38 }
 0x27c   :  { %v2728_v20 = vpack.c.bf16 %v2551_v62, %v2551_v62  ;;  %v1560_v55 = vadd.f32 %v1515_v24, %v1400_v46  ;;  %v4961_v46 = vld [vmem:[#allocation68_spill] sm:$0xff] }
 0x27d   :  { %1208 = vrot.lane.b32.xlu0 %v1167_v6, %s3460_s29  ;;  %2102 = vrot.lane.b32.xlu1 %v2062_v57, %s3461_s30  ;;  %v1743_v24 = vmul.f32 %v3189_v5, %v4961_v46  ;;  %v1903_v6 = vmul.f32 %v3231_v58, %v4961_v46  ;;  %v2963_v57 = vunpack.i.h.bf16 %v4953_v33  ;;  %v4965_v58 = vld [vmem:[#allocation12_spill] sm:$0xff] }
 0x27e   :  { %2632 = vst.msk [vmem:[%s4790_s7 + $0x4] sm:$0xf] %vm2630_vm1, %v2728_v20  ;;  %v1656_v34 = vadd.f32 %v1640_v54, %v1560_v55  ;;  %v4962_v20 = vld [vmem:[#allocation56_spill] sm:$0xff]  ;;  %v3025_v54 = vunpack.i.l.bf16 %v4963_v51 }
 0x27f   :  { %v1771_v27 = vpop.permute.xlu1 %1770  ;;  %v4447_v44 = vpop.permute.xlu0 %2354  ;;  %v2216_v48 = vmul.f32 %v3299_v52, %v4962_v20  ;;  %v1081_v40 = vmul.f32 %v2963_v57, %v4219_v61  ;;  %v3067_v52 = vunpack.i.l.bf16 %v4965_v58 }
 0x280   :  { %v1816_v42 = vadd.f32 %v1771_v27, %v1656_v34 }
 0x281   :  { %1528 = vrot.lane.b32.xlu0 %v1487_v13, %s3461_s30  ;;  %1368 = vrot.lane.b32.xlu1 %v1327_v4, %s3459_s6  ;;  %v2063_v13 = vmul.f32 %v3273_v26, %v4961_v46  ;;  %v4964_v4 = vld [vmem:[#allocation69_spill] sm:$0xff]  ;;  %v4967_v26 = vld [vmem:[#allocation34_spill] sm:$0xff] }
 0x282   :  { %v1976_v47 = vadd.f32 %v1931_v43, %v1816_v42  ;;  %v1168_v33 = vmul.f32 %v3025_v54, %v4964_v4  ;;  %v1328_v20 = vmul.f32 %v3067_v52, %v4964_v4 }
 0x283   :  { %v2091_v49 = vpop.permute.xlu1 %2090  ;;  %v4456_v62 = vpop.permute.xlu0 %2514 }
 0x284   :  { %v2136_v55 = vadd.f32 %v2091_v49, %v1976_v47  ;;  %v4966_v47 = vld [vmem:[#allocation25_spill] sm:$0xff]  ;;  %v3132_v49 = vunpack.i.h.bf16 %v4958_v17 }
 0x285   :  { %1784 = vrot.lane.b32.xlu0 %v1743_v24, %s3460_s29  ;;  %1944 = vrot.lane.b32.xlu1 %v1903_v6, %s3459_s6  ;;  %v3109_v38 = vunpack.i.l.bf16 %v4966_v47 }
 0x286   :  { %v2232_v43 = vadd.f32 %v2216_v48, %v2136_v55  ;;  %v1641_v54 = vmul.f32 %v3132_v49, %v4234_v19 }
 0x287   :  { %v1357_v34 = vpop.permute.xlu1 %1356  ;;  %v1197_v27 = vpop.permute.xlu0 %1196 }
 0x288   :  { %v2392_v42 = vadd.f32 %v4359_v15, %v2232_v43  ;;  %v1241_v5 = vadd.f32 %v1197_v27, %v1081_v40  ;;  %v1488_v15 = vmul.f32 %v3109_v38, %v4964_v4  ;;  %v3193_v43 = vunpack.i.l.bf16 %v4967_v26  ;;  %v4968_v40 = vld [vmem:[#allocation37_spill] sm:$0xff] }
 0x289   :  { %2104 = vrot.lane.b32.xlu0 %v2063_v13, %s3461_s30  ;;  %1210 = vrot.lane.b32.xlu1 %v1168_v33, %s3460_s29  ;;  %v3235_v27 = vunpack.i.l.bf16 %v4968_v40  ;;  %v4969_v13 = vld [vmem:[#allocation70_spill] sm:$0xff] }
 0x28a   :  { %v2552_v61 = vadd.f32 %v4369_v25, %v2392_v42  ;;  %v1401_v24 = vadd.f32 %v1357_v34, %v1241_v5  ;;  %v1744_v33 = vmul.f32 %v3193_v43, %v4969_v13  ;;  %v3026_v42 = vunpack.i.h.bf16 %v4963_v51  ;;  %v4970_v5 = vld [vmem:[#allocation44_spill] sm:$0xff] }
 0x28b   :  { %v1933_v6 = vpop.permute.xlu1 %1932  ;;  %v1517_v57 = vpop.permute.xlu0 %1516  ;;  %v1904_v19 = vmul.f32 %v3235_v27, %v4969_v13  ;;  %v3277_v52 = vunpack.i.l.bf16 %v4970_v5  ;;  %v3194_v27 = vunpack.i.h.bf16 %v4967_v26 }
 0x28c   :  { %v2729_v48 = vpack.c.bf16 %v2552_v61, %v2552_v61  ;;  %v1561_v55 = vadd.f32 %v1517_v57, %v1401_v24  ;;  %v4971_v61 = vld [vmem:[#allocation71_spill] sm:$0xff] }
 0x28d   :  { %1370 = vrot.lane.b32.xlu0 %v1328_v20, %s3459_s6  ;;  %1530 = vrot.lane.b32.xlu1 %v1488_v15, %s3461_s30  ;;  %v1169_v24 = vmul.f32 %v3026_v42, %v4971_v61  ;;  %v2064_v57 = vmul.f32 %v3277_v52, %v4969_v13  ;;  %v3068_v20 = vunpack.i.h.bf16 %v4965_v58  ;;  %v3110_v15 = vunpack.i.h.bf16 %v4966_v47  ;;  %v4972_v52 = vld [vmem:[#allocation72_spill] sm:$0xff] }
 0x28e   :  { %2633 = vst.msk [vmem:[%s4790_s7 + $0x8] sm:$0xf] %vm2630_vm1, %v2729_v48  ;;  %v1657_v25 = vadd.f32 %v1641_v54, %v1561_v55  ;;  %v3300_v58 = vunpack.i.h.bf16 %v4960_v30  ;;  %v4977_v13 = vld [vmem:[#allocation20_spill] sm:$0xff] }
 0x28f   :  { %v4487_v17 = vpop.permute.xlu0 %2350  ;;  %v4489_v34 = vpop.permute.xlu1 %2356  ;;  %v1489_v55 = vmul.f32 %v3110_v15, %v4971_v61  ;;  %v1329_v54 = vmul.f32 %v3068_v20, %v4971_v61  ;;  %v4973_v20 = vld [vmem:[#allocation3_spill] sm:$0xff]  ;;  %v4974_v15 = vld [vmem:[#allocation62_spill] sm:$0xff] }
 0x290   :  { %v2217_v26 = vmul.f32 %v3300_v58, %v4974_v15 }
 0x291   :  { %1946 = vrot.lane.b32.xlu0 %v1904_v19, %s3459_s6  ;;  %1786 = vrot.lane.b32.xlu1 %v1744_v33, %s3460_s29  ;;  %v3236_v19 = vunpack.i.h.bf16 %v4968_v40  ;;  %v4975_v40 = vld [vmem:[#allocation8_spill] sm:$0xff] }
 0x292   :  { %v3030_v61 = vunpack.i.l.bf16 %v4975_v40 }
 0x293   :  { %v4497_v38 = vpop.permute.xlu0 %2510  ;;  %v4499_v49 = vpop.permute.xlu1 %2516 }
 0x295   :  { %1212 = vrot.lane.b32.xlu0 %v1169_v24, %s3460_s29  ;;  %2106 = vrot.lane.b32.xlu1 %v2064_v57, %s3461_s30  ;;  %v1745_v24 = vmul.f32 %v3194_v27, %v4972_v52  ;;  %v1905_v57 = vmul.f32 %v3236_v19, %v4972_v52  ;;  %v1170_v19 = vmul.f32 %v3030_v61, %v4198_v56 }
 0x297   :  { %v1773_v51 = vpop.permute.xlu0 %1772  ;;  %v4507_v48 = vpop.permute.xlu1 %2352 }
 0x298   :  { %v1817_v43 = vadd.f32 %v1773_v51, %v1657_v25  ;;  %v2968_v25 = vunpack.i.l.bf16 %v4973_v20 }
 0x299   :  { %1532 = vrot.lane.b32.xlu0 %v1489_v55, %s3461_s30  ;;  %1372 = vrot.lane.b32.xlu1 %v1329_v54, %s3459_s6  ;;  %v3278_v55 = vunpack.i.h.bf16 %v4970_v5  ;;  %v3072_v5 = vunpack.i.l.bf16 %v4977_v13 }
 0x29a   :  { %v1977_v47 = vadd.f32 %v1933_v6, %v1817_v43  ;;  %v1082_v6 = vmul.f32 %v2968_v25, %v4051_v14 }
 0x29b   :  { %v2093_v33 = vpop.permute.xlu0 %2092  ;;  %v4516_v42 = vpop.permute.xlu1 %2512  ;;  %v2065_v27 = vmul.f32 %v3278_v55, %v4972_v52  ;;  %v1330_v61 = vmul.f32 %v3072_v5, %v4198_v56  ;;  %v4981_v5 = vld [vmem:[#allocation43_spill] sm:$0xff] }
 0x29c   :  { %v2137_v51 = vadd.f32 %v2093_v33, %v1977_v47  ;;  %v4976_v33 = vld [vmem:[#allocation17_spill] sm:$0xff] }
 0x29d   :  { %1788 = vrot.lane.b32.xlu0 %v1745_v24, %s3460_s29  ;;  %1948 = vrot.lane.b32.xlu1 %v1905_v57, %s3459_s6  ;;  %v3114_v15 = vunpack.i.l.bf16 %v4976_v33  ;;  %v4978_v24 = vld [vmem:[#allocation21_spill] sm:$0xff] }
 0x29e   :  { %v2233_v30 = vadd.f32 %v2217_v26, %v2137_v51  ;;  %v3136_v57 = vunpack.i.l.bf16 %v4978_v24 }
 0x29f   :  { %v1359_v54 = vpop.permute.xlu0 %1358  ;;  %v1199_v43 = vpop.permute.xlu1 %1198 }
 0x2a0   :  { %v2393_v58 = vadd.f32 %v4395_v10, %v2233_v30  ;;  %v1242_v47 = vadd.f32 %v1199_v43, %v1082_v6  ;;  %v1490_v10 = vmul.f32 %v3114_v15, %v4198_v56  ;;  %v1642_v6 = vmul.f32 %v3136_v57, %v4059_v7  ;;  %v4979_v43 = vld [vmem:[#allocation32_spill] sm:$0xff] }
 0x2a1   :  { %2108 = vrot.lane.b32.xlu0 %v2065_v27, %s3461_s30  ;;  %1214 = vrot.lane.b32.xlu1 %v1170_v19, %s3460_s29  ;;  %v3198_v52 = vunpack.i.l.bf16 %v4979_v43  ;;  %v4980_v27 = vld [vmem:[#allocation40_spill] sm:$0xff]  ;;  %v3031_v15 = vunpack.i.h.bf16 %v4975_v40  ;;  %v3282_v57 = vunpack.i.l.bf16 %v4981_v5 }
 0x2a2   :  { %v2553_v14 = vadd.f32 %v4402_v35, %v2393_v58  ;;  %v1402_v25 = vadd.f32 %v1359_v54, %v1242_v47  ;;  %v3240_v4 = vunpack.i.l.bf16 %v4980_v27 }
 0x2a3   :  { %v1935_v26 = vpop.permute.xlu0 %1934  ;;  %v1519_v51 = vpop.permute.xlu1 %1518  ;;  %v1746_v7 = vmul.f32 %v3198_v52, %v4203_v28  ;;  %v2969_v52 = vunpack.i.h.bf16 %v4973_v20 }
 0x2a4   :  { %v2730_v55 = vpack.c.bf16 %v2553_v14, %v2553_v14  ;;  %v1562_v30 = vadd.f32 %v1519_v51, %v1402_v25  ;;  %v1906_v58 = vmul.f32 %v3240_v4, %v4203_v28  ;;  %v4982_v14 = vld [vmem:[#allocation48_spill] sm:$0xff]  ;;  %v1171_v4 = vmul.f32 %v3031_v15, %v4207_v36 }
 0x2a5   :  { %1374 = vrot.lane.b32.xlu0 %v1330_v61, %s3459_s6  ;;  %1534 = vrot.lane.b32.xlu1 %v1490_v10, %s3461_s30  ;;  %v3304_v25 = vunpack.i.l.bf16 %v4982_v14 }
 0x2a6   :  { %2634 = vst.msk [vmem:[%s4790_s7 + $0xc] sm:$0xf] %vm2630_vm1, %v2730_v55  ;;  %v1658_v35 = vadd.f32 %v1642_v6, %v1562_v30  ;;  %v2066_v55 = vmul.f32 %v3282_v57, %v4203_v28  ;;  %v3115_v6 = vunpack.i.h.bf16 %v4976_v33  ;;  %v3199_v33 = vunpack.i.h.bf16 %v4979_v43 }
 0x2a7   :  { %v1775_v54 = vpop.permute.xlu1 %1774  ;;  %v4547_v19 = vpop.permute.xlu0 %2362  ;;  %v2218_v40 = vmul.f32 %v3304_v25, %v4250_v53  ;;  %v3137_v57 = vunpack.i.h.bf16 %v4978_v24 }
 0x2a8   :  { %v1818_v47 = vadd.f32 %v1775_v54, %v1658_v35  ;;  %v3073_v35 = vunpack.i.h.bf16 %v4977_v13  ;;  %v1083_v54 = vmul.f32 %v2969_v52, %v4065_v50  ;;  %v1491_v20 = vmul.f32 %v3115_v6, %v4207_v36 }
 0x2a9   :  { %1950 = vrot.lane.b32.xlu0 %v1906_v58, %s3459_s6  ;;  %1790 = vrot.lane.b32.xlu1 %v1746_v7, %s3460_s29  ;;  %v3241_v13 = vunpack.i.h.bf16 %v4980_v27  ;;  %v1643_v43 = vmul.f32 %v3137_v57, %v4073_v22  ;;  %v4984_v27 = vld [vmem:[#allocation15_spill] sm:$0xff]  ;;  %v3283_v6 = vunpack.i.h.bf16 %v4981_v5  ;;  %v4988_v57 = vld [vmem:[#allocation38_spill] sm:$0xff] }
 0x2aa   :  { %v1978_v51 = vadd.f32 %v1935_v26, %v1818_v47  ;;  %v1331_v47 = vmul.f32 %v3073_v35, %v4207_v36 }
 0x2ab   :  { %v2095_v61 = vpop.permute.xlu1 %2094  ;;  %v4556_v10 = vpop.permute.xlu0 %2522 }
 0x2ac   :  { %v2138_v30 = vadd.f32 %v2095_v61, %v1978_v51 }
 0x2ad   :  { %2110 = vrot.lane.b32.xlu1 %v2066_v55, %s3461_s30  ;;  %1216 = vrot.lane.b32.xlu0 %v1171_v4, %s3460_s29  ;;  %v4983_v55 = vld [vmem:[#allocation73_spill] sm:$0xff] }
 0x2ae   :  { %v2234_v26 = vadd.f32 %v2218_v40, %v2138_v30  ;;  %v1907_v4 = vmul.f32 %v3241_v13, %v4983_v55  ;;  %v3035_v30 = vunpack.i.l.bf16 %v4984_v27  ;;  %v2067_v22 = vmul.f32 %v3283_v6, %v4983_v55  ;;  %v4990_v6 = vld [vmem:[#allocation4_spill] sm:$0xff] }
 0x2af   :  { %v1361_v58 = vpop.permute.xlu1 %1360  ;;  %v1201_v7 = vpop.permute.xlu0 %1200 }
 0x2b0   :  { %v2394_v53 = vadd.f32 %v4487_v17, %v2234_v26  ;;  %v1243_v15 = vadd.f32 %v1201_v7, %v1083_v54  ;;  %v1747_v17 = vmul.f32 %v3199_v33, %v4983_v55  ;;  %v1172_v26 = vmul.f32 %v3035_v30, %v4225_v23  ;;  %v4985_v54 = vld [vmem:[#allocation13_spill] sm:$0xff]  ;;  %v4987_v33 = vld [vmem:[#allocation36_spill] sm:$0xff] }
 0x2b1   :  { %1376 = vrot.lane.b32.xlu1 %v1331_v47, %s3459_s6  ;;  %1536 = vrot.lane.b32.xlu0 %v1491_v20, %s3461_s30  ;;  %v3077_v5 = vunpack.i.l.bf16 %v4985_v54  ;;  %v3203_v13 = vunpack.i.l.bf16 %v4987_v33 }
 0x2b2   :  { %v2554_v50 = vadd.f32 %v4497_v38, %v2394_v53  ;;  %v1403_v25 = vadd.f32 %v1361_v58, %v1243_v15  ;;  %v4986_v58 = vld [vmem:[#allocation27_spill] sm:$0xff] }
 0x2b3   :  { %v1937_v51 = vpop.permute.xlu1 %1936  ;;  %v1521_v61 = vpop.permute.xlu0 %1520  ;;  %v3119_v7 = vunpack.i.l.bf16 %v4986_v58  ;;  %v1332_v53 = vmul.f32 %v3077_v5, %v4225_v23 }
 0x2b4   :  { %v2731_v52 = vpack.c.bf16 %v2554_v50, %v2554_v50  ;;  %v1563_v40 = vadd.f32 %v1521_v61, %v1403_v25  ;;  %v3245_v50 = vunpack.i.l.bf16 %v4988_v57 }
 0x2b5   :  { %1952 = vrot.lane.b32.xlu1 %v1907_v4, %s3459_s6  ;;  %1792 = vrot.lane.b32.xlu0 %v1747_v17, %s3460_s29  ;;  %v1492_v15 = vmul.f32 %v3119_v7, %v4225_v23  ;;  %v1748_v17 = vmul.f32 %v3203_v13, %v4230_v39 }
 0x2b6   :  { %2635 = vst.msk [vmem:[%s4790_s7 + $0x10] sm:$0xf] %vm2630_vm1, %v2731_v52  ;;  %v1659_v38 = vadd.f32 %v1643_v43, %v1563_v40  ;;  %v1908_v4 = vmul.f32 %v3245_v50, %v4230_v39  ;;  %v3036_v40 = vunpack.i.h.bf16 %v4984_v27  ;;  %v4989_v43 = vld [vmem:[#allocation46_spill] sm:$0xff] }
 0x2b7   :  { %v4587_v24 = vpop.permute.xlu0 %2358  ;;  %v4589_v35 = vpop.permute.xlu1 %2364  ;;  %v3287_v30 = vunpack.i.l.bf16 %v4989_v43 }
 0x2b8   :  { %v1173_v13 = vmul.f32 %v3036_v40, %v4237_v37 }
 0x2b9   :  { %2112 = vrot.lane.b32.xlu0 %v2067_v22, %s3461_s30  ;;  %1218 = vrot.lane.b32.xlu1 %v1172_v26, %s3460_s29  ;;  %v2973_v22 = vunpack.i.l.bf16 %v4990_v6  ;;  %v3305_v26 = vunpack.i.h.bf16 %v4982_v14 }
 0x2bb   :  { %v4597_v47 = vpop.permute.xlu0 %2518  ;;  %v4599_v20 = vpop.permute.xlu1 %2360  ;;  %v1084_v50 = vmul.f32 %v2973_v22, %v4098_v32 }
 0x2bd   :  { %1378 = vrot.lane.b32.xlu0 %v1332_v53, %s3459_s6  ;;  %1538 = vrot.lane.b32.xlu1 %v1492_v15, %s3461_s30  ;;  %v2068_v15 = vmul.f32 %v3287_v30, %v4230_v39 }
 0x2bf   :  { %v1777_v25 = vpop.permute.xlu0 %1776  ;;  %v4607_v61 = vpop.permute.xlu1 %2520 }
 0x2c0   :  { %v1819_v52 = vadd.f32 %v1777_v25, %v1659_v38  ;;  %v2219_v38 = vmul.f32 %v3305_v26, %v4037_v41  ;;  %v3078_v25 = vunpack.i.h.bf16 %v4985_v54  ;;  %v4991_v26 = vld [vmem:[#allocation22_spill] sm:$0xff] }
 0x2c1   :  { %1954 = vrot.lane.b32.xlu0 %v1908_v4, %s3459_s6  ;;  %1794 = vrot.lane.b32.xlu1 %v1748_v17, %s3460_s29  ;;  %v3120_v4 = vunpack.i.h.bf16 %v4986_v58  ;;  %v3404_v17 = vunpack.i.h.bf16 %v4293_v1  ;;  %v3141_v32 = vunpack.i.l.bf16 %v4991_v26  ;;  %v3204_v58 = vunpack.i.h.bf16 %v4987_v33 }
 0x2c2   :  { %v1979_v5 = vadd.f32 %v1937_v51, %v1819_v52  ;;  %v1333_v40 = vmul.f32 %v3078_v25, %v4237_v37  ;;  %v3288_v33 = vunpack.i.h.bf16 %v4989_v43  ;;  %v4992_v43 = vld [vmem:[#allocation50_spill] sm:$0xff] }
 0x2c3   :  { %v2097_v7 = vpop.permute.xlu0 %2096  ;;  %v1203_v53 = vpop.permute.xlu1 %1202  ;;  %v1493_v41 = vmul.f32 %v3120_v4, %v4237_v37 }
 0x2c4   :  { %v2139_v27 = vadd.f32 %v2097_v7, %v1979_v5  ;;  %v1244_v51 = vadd.f32 %v1203_v53, %v1084_v50  ;;  %v1644_v7 = vmul.f32 %v3141_v32, %v4942_v12  ;;  %v2481_v53 = vmul.f32 %v3404_v17, %v4076_v2 }
 0x2c5   :  { %2114 = vrot.lane.b32.xlu1 %v2068_v15, %s3461_s30  ;;  %1220 = vrot.lane.b32.xlu0 %v1173_v13, %s3460_s29  ;;  %v3246_v50 = vunpack.i.h.bf16 %v4988_v57  ;;  %v2974_v57 = vunpack.i.h.bf16 %v4990_v6  ;;  %v3413_v6 = vunpack.i.l.bf16 %v4336_v21 }
 0x2c6   :  { %v2235_v14 = vadd.f32 %v2219_v38, %v2139_v27  ;;  %v1749_v38 = vmul.f32 %v3204_v58, %v4242_v0 }
 0x2c7   :  { %v1363_v52 = vpop.permute.xlu0 %1362  ;;  %v1523_v30 = vpop.permute.xlu1 %1522  ;;  %v1909_v4 = vmul.f32 %v3246_v50, %v4242_v0  ;;  %v1085_v32 = vmul.f32 %v2974_v57, %v4111_v63  ;;  %v3310_v57 = vunpack.i.h.bf16 %v4992_v43 }
 0x2c8   :  { %v2395_v54 = vadd.f32 %v4507_v48, %v2235_v14  ;;  %v1404_v22 = vadd.f32 %v1363_v52, %v1244_v51  ;;  %v2069_v14 = vmul.f32 %v3288_v33, %v4242_v0  ;;  %v3309_v51 = vunpack.i.l.bf16 %v4992_v43 }
 0x2c9   :  { %1380 = vrot.lane.b32.xlu1 %v1333_v40, %s3459_s6  ;;  %1540 = vrot.lane.b32.xlu0 %v1493_v41, %s3461_s30  ;;  %v3409_v52 = vunpack.i.h.bf16 %v4333_v60 }
 0x2ca   :  { %v2555_v5 = vadd.f32 %v4516_v42, %v2395_v54  ;;  %v1564_v1 = vadd.f32 %v1523_v30, %v1404_v22  ;;  %v3408_v30 = vunpack.i.l.bf16 %v4333_v60  ;;  %v2220_v40 = vmul.f32 %v3309_v51, %v4191_v45 }
 0x2cb   :  { %v1939_v15 = vpop.permute.xlu0 %1938  ;;  %v1779_v13 = vpop.permute.xlu1 %1778  ;;  %v3414_v54 = vunpack.i.h.bf16 %v4336_v21  ;;  %v2483_v58 = vmul.f32 %v3409_v52, %v4949_v16  ;;  %v3142_v45 = vunpack.i.h.bf16 %v4991_v26 }
 0x2cc   :  { %v2732_v27 = vpack.c.bf16 %v2555_v5, %v2555_v5  ;;  %v1660_v48 = vadd.f32 %v1644_v7, %v1564_v1  ;;  %v2482_v22 = vmul.f32 %v3408_v30, %v4114_v3  ;;  %v2221_v30 = vmul.f32 %v3310_v57, %v4254_v11 }
 0x2cd   :  { %2524 = vrot.lane.b32.xlu1 %v2481_v53, %s3459_s6  ;;  %1796 = vrot.lane.b32.xlu0 %v1749_v38, %s3460_s29  ;;  %v2485_v21 = vmul.f32 %v3414_v54, %v4121_v8  ;;  %v1645_v50 = vmul.f32 %v3142_v45, %v4118_v9  ;;  %v4993_v9 = vld [vmem:[#allocation10_spill] sm:$0xff] }
 0x2ce   :  { %2636 = vst.msk [vmem:[%s4790_s7 + $0x14] sm:$0xf] %vm2630_vm1, %v2732_v27  ;;  %v1820_v12 = vadd.f32 %v1779_v13, %v1660_v48 }
 0x2cf   :  { %v2099_v42 = vpop.permute.xlu1 %2098  ;;  %v4645_v25 = vpop.permute.xlu0 %2370 }
 0x2d0   :  { %v1980_v17 = vadd.f32 %v1939_v15, %v1820_v12  ;;  %v2484_v15 = vmul.f32 %v3413_v6, %v4946_v31 }
 0x2d1   :  { %1956 = vrot.lane.b32.xlu1 %v1909_v4, %s3459_s6  ;;  %2116 = vrot.lane.b32.xlu0 %v2069_v14, %s3461_s30  ;;  %v2978_v14 = vunpack.i.l.bf16 %v4993_v9 }
 0x2d2   :  { %v2140_v41 = vadd.f32 %v2099_v42, %v1980_v17 }
 0x2d3   :  { %v1365_v5 = vpop.permute.xlu1 %1364  ;;  %v1205_v1 = vpop.permute.xlu0 %1204 }
 0x2d4   :  { %v2236_v60 = vadd.f32 %v2220_v40, %v2140_v41  ;;  %v1245_v7 = vadd.f32 %v1205_v1, %v1085_v32  ;;  %v1086_v41 = vmul.f32 %v2978_v14, %v4137_v18  ;;  %v2979_v18 = vunpack.i.h.bf16 %v4993_v9 }
 0x2d5   :  { %2528 = vrot.lane.b32.xlu1 %v2483_v58, %s3459_s6  ;;  %2526 = vrot.lane.b32.xlu0 %v2482_v22, %s3459_s6  ;;  %v4994_v58 = vld [vmem:[#allocation29_spill] sm:$0xff] }
 0x2d6   :  { %v2396_v63 = vadd.f32 %v4447_v44, %v2236_v60  ;;  %v1405_v53 = vadd.f32 %v1365_v5, %v1245_v7  ;;  %v3146_v5 = vunpack.i.l.bf16 %v4994_v58  ;;  %v3147_v9 = vunpack.i.h.bf16 %v4994_v58 }
 0x2d7   :  { %v1941_v13 = vpop.permute.xlu1 %1940  ;;  %v1525_v38 = vpop.permute.xlu0 %1524 }
 0x2d8   :  { %v2556_v27 = vadd.f32 %v4456_v62, %v2396_v63  ;;  %v1565_v48 = vadd.f32 %v1525_v38, %v1405_v53  ;;  %v1646_v45 = vmul.f32 %v3146_v5, %v4956_v29  ;;  %v4995_v38 = vld [vmem:[#allocation49_spill] sm:$0xff] }
 0x2d9   :  { %2532 = vrot.lane.b32.xlu1 %v2485_v21, %s3459_s6  ;;  %2530 = vrot.lane.b32.xlu0 %v2484_v15, %s3459_s6  ;;  %v3315_v58 = vunpack.i.h.bf16 %v4995_v38 }
 0x2da   :  { %v2733_v33 = vpack.c.bf16 %v2556_v27, %v2556_v27  ;;  %v1661_v26 = vadd.f32 %v1645_v50, %v1565_v48  ;;  %v3314_v27 = vunpack.i.l.bf16 %v4995_v38  ;;  %v4996_v50 = vld [vmem:[#allocation60_spill] sm:$0xff]  ;;  %v5001_v38 = vld [vmem:[#allocation70_spill] sm:$0xff] }
 0x2db   :  { %v4671_v12 = vpop.permute.xlu0 %2366  ;;  %v4673_v44 = vpop.permute.xlu1 %2372 }
 0x2dc   :  { %2637 = vst.msk [vmem:[%s4790_s7 + $0x18] sm:$0xf] %vm2630_vm1, %v2733_v33  ;;  %v2222_v33 = vmul.f32 %v3314_v27, %v4996_v50 }
 0x2df   :  { %v1781_v42 = vpop.permute.xlu0 %1780  ;;  %v4679_v62 = vpop.permute.xlu1 %2368 }
 0x2e0   :  { %v1821_v4 = vadd.f32 %v1781_v42, %v1661_v26 }
 0x2e2   :  { %v1981_v51 = vadd.f32 %v1941_v13, %v1821_v4 }
 0x2e3   :  { %v2101_v17 = vpop.permute.xlu0 %2100  ;;  %v1207_v52 = vpop.permute.xlu1 %1206 }
 0x2e4   :  { %v2141_v40 = vadd.f32 %v2101_v17, %v1981_v51  ;;  %v1246_v54 = vadd.f32 %v1207_v52, %v1086_v41  ;;  %v1647_v52 = vmul.f32 %v3147_v9, %v4961_v46  ;;  %v4998_v46 = vld [vmem:[#allocation69_spill] sm:$0xff] }
 0x2e6   :  { %v2237_v32 = vadd.f32 %v2221_v30, %v2141_v40 }
 0x2e7   :  { %v1367_v6 = vpop.permute.xlu0 %1366  ;;  %v1527_v22 = vpop.permute.xlu1 %1526 }
 0x2e8   :  { %v2397_v1 = vadd.f32 %v4489_v34, %v2237_v32  ;;  %v1406_v60 = vadd.f32 %v1367_v6, %v1246_v54  ;;  %v4997_v32 = vld [vmem:[#allocation5_spill] sm:$0xff] }
 0x2e9   :  { %v2983_v54 = vunpack.i.l.bf16 %v4997_v32 }
 0x2ea   :  { %v2557_v7 = vadd.f32 %v4499_v49, %v2397_v1  ;;  %v1566_v43 = vadd.f32 %v1527_v22, %v1406_v60  ;;  %v1087_v49 = vmul.f32 %v2979_v18, %v4959_v59 }
 0x2eb   :  { %v1943_v63 = vpop.permute.xlu0 %1942  ;;  %v1783_v53 = vpop.permute.xlu1 %1782  ;;  %v1088_v60 = vmul.f32 %v2983_v54, %v4998_v46 }
 0x2ec   :  { %v2734_v11 = vpack.c.bf16 %v2557_v7, %v2557_v7  ;;  %v1662_v15 = vadd.f32 %v1646_v45, %v1566_v43  ;;  %v4999_v7 = vld [vmem:[#allocation61_spill] sm:$0xff] }
 0x2ed   :  { %v2223_v43 = vmul.f32 %v3315_v58, %v4999_v7 }
 0x2ee   :  { %2638 = vst.msk [vmem:[%s4790_s7 + $0x1c] sm:$0xf] %vm2630_vm1, %v2734_v11  ;;  %v1822_v21 = vadd.f32 %v1783_v53, %v1662_v15  ;;  %v5000_v11 = vld [vmem:[#allocation24_spill] sm:$0xff] }
 0x2ef   :  { %v1209_v13 = vpop.permute.xlu0 %1208  ;;  %v2103_v34 = vpop.permute.xlu1 %2102  ;;  %v3151_v15 = vunpack.i.l.bf16 %v5000_v11 }
 0x2f0   :  { %v1982_v48 = vadd.f32 %v1943_v63, %v1822_v21  ;;  %v1247_v29 = vadd.f32 %v1209_v13, %v1087_v49 }
 0x2f1   :  { %v1648_v27 = vmul.f32 %v3151_v15, %v5001_v38 }
 0x2f2   :  { %v2142_v26 = vadd.f32 %v2103_v34, %v1982_v48 }
 0x2f3   :  { %v1529_v42 = vpop.permute.xlu0 %1528  ;;  %v1369_v4 = vpop.permute.xlu1 %1368 }
 0x2f4   :  { %v2238_v14 = vadd.f32 %v2222_v33, %v2142_v26  ;;  %v1407_v57 = vadd.f32 %v1369_v4, %v1247_v29  ;;  %v2984_v33 = vunpack.i.h.bf16 %v4997_v32  ;;  %v3152_v32 = vunpack.i.h.bf16 %v5000_v11 }
 0x2f6   :  { %v2398_v51 = vadd.f32 %v4587_v24, %v2238_v14  ;;  %v1567_v17 = vadd.f32 %v1529_v42, %v1407_v57  ;;  %v5002_v14 = vld [vmem:[#allocation52_spill] sm:$0xff] }
 0x2f7   :  { %v1785_v30 = vpop.permute.xlu0 %1784  ;;  %v1945_v40 = vpop.permute.xlu1 %1944  ;;  %v3319_v57 = vunpack.i.l.bf16 %v5002_v14  ;;  %v3320_v11 = vunpack.i.h.bf16 %v5002_v14 }
 0x2f8   :  { %v2558_v59 = vadd.f32 %v4597_v47, %v2398_v51  ;;  %v1663_v41 = vadd.f32 %v1647_v52, %v1567_v17 }
 0x2fa   :  { %v2735_v6 = vpack.c.bf16 %v2558_v59, %v2558_v59  ;;  %v1823_v22 = vadd.f32 %v1785_v30, %v1663_v41  ;;  %v5004_v30 = vld [vmem:[#allocation59_spill] sm:$0xff] }
 0x2fb   :  { %v2105_v5 = vpop.permute.xlu0 %2104  ;;  %v1211_v1 = vpop.permute.xlu1 %1210 }
 0x2fc   :  { %2639 = vst.msk [vmem:[%s4790_s7 + $0x20] sm:$0xf] %vm2630_vm1, %v2735_v6  ;;  %v1983_v24 = vadd.f32 %v1945_v40, %v1823_v22  ;;  %v1248_v45 = vadd.f32 %v1211_v1, %v1088_v60  ;;  %v5005_v1 = vld [vmem:[#allocation72_spill] sm:$0xff] }
 0x2fd   :  { %v1649_v58 = vmul.f32 %v3152_v32, %v5005_v1 }
 0x2fe   :  { %v2143_v47 = vadd.f32 %v2105_v5, %v1983_v24 }
 0x2ff   :  { %v1371_v63 = vpop.permute.xlu0 %1370  ;;  %v1531_v53 = vpop.permute.xlu1 %1530 }
 0x300   :  { %v2239_v18 = vadd.f32 %v2223_v43, %v2143_v47  ;;  %v1408_v21 = vadd.f32 %v1371_v63, %v1248_v45  ;;  %v5006_v43 = vld [vmem:[#allocation11_spill] sm:$0xff] }
 0x301   :  { %v2988_v47 = vunpack.i.l.bf16 %v5006_v43 }
 0x302   :  { %v2399_v13 = vadd.f32 %v4599_v20, %v2239_v18  ;;  %v1568_v34 = vadd.f32 %v1531_v53, %v1408_v21  ;;  %v5003_v20 = vld [vmem:[#allocation71_spill] sm:$0xff]  ;;  %v2225_v21 = vmul.f32 %v3320_v11, %v4076_v2 }
 0x303   :  { %v1947_v49 = vpop.permute.xlu0 %1946  ;;  %v1787_v48 = vpop.permute.xlu1 %1786  ;;  %v1089_v51 = vmul.f32 %v2984_v33, %v5003_v20  ;;  %v1090_v18 = vmul.f32 %v2988_v47, %v4198_v56 }
 0x304   :  { %v2559_v29 = vadd.f32 %v4607_v61, %v2399_v13  ;;  %v1664_v50 = vadd.f32 %v1648_v27, %v1568_v34  ;;  %v2224_v61 = vmul.f32 %v3319_v57, %v5004_v30  ;;  %v5007_v27 = vld [vmem:[#allocation31_spill] sm:$0xff] }
 0x305   :  { %v5008_v57 = vld [vmem:[#allocation51_spill] sm:$0xff] }
 0x306   :  { %v2736_v26 = vpack.c.bf16 %v2559_v29, %v2559_v29  ;;  %v1824_v42 = vadd.f32 %v1787_v48, %v1664_v50  ;;  %v3324_v20 = vunpack.i.l.bf16 %v5008_v57 }
 0x307   :  { %v1213_v4 = vpop.permute.xlu0 %1212  ;;  %v2107_v9 = vpop.permute.xlu1 %2106 }
 0x308   :  { %2640 = vst.msk [vmem:[%s4790_s7 + $0x24] sm:$0xf] %vm2630_vm1, %v2736_v26  ;;  %v1984_v17 = vadd.f32 %v1947_v49, %v1824_v42  ;;  %v1249_v52 = vadd.f32 %v1213_v4, %v1089_v51  ;;  %v3156_v49 = vunpack.i.l.bf16 %v5007_v27 }
 0x30a   :  { %v2144_v40 = vadd.f32 %v2107_v9, %v1984_v17  ;;  %v1650_v33 = vmul.f32 %v3156_v49, %v4203_v28  ;;  %v2989_v9 = vunpack.i.h.bf16 %v5006_v43  ;;  %v3157_v28 = vunpack.i.h.bf16 %v5007_v27 }
 0x30b   :  { %v1533_v59 = vpop.permute.xlu0 %1532  ;;  %v1373_v41 = vpop.permute.xlu1 %1372 }
 0x30c   :  { %v2240_v54 = vadd.f32 %v2224_v61, %v2144_v40  ;;  %v1409_v6 = vadd.f32 %v1373_v41, %v1249_v52  ;;  %v1091_v17 = vmul.f32 %v2989_v9, %v4207_v36  ;;  %v2226_v52 = vmul.f32 %v3324_v20, %v4114_v3 }
 0x30d   :  { %v3325_v3 = vunpack.i.h.bf16 %v5008_v57 }
 0x30e   :  { %v2400_v22 = vadd.f32 %v4547_v19, %v2240_v54  ;;  %v1569_v5 = vadd.f32 %v1533_v59, %v1409_v6  ;;  %v1651_v6 = vmul.f32 %v3157_v28, %v4983_v55  ;;  %v5010_v55 = vld [vmem:[#allocation26_spill] sm:$0xff] }
 0x30f   :  { %v1789_v24 = vpop.permute.xlu0 %1788  ;;  %v1949_v46 = vpop.permute.xlu1 %1948  ;;  %v2227_v47 = vmul.f32 %v3325_v3, %v4949_v16  ;;  %v3161_v11 = vunpack.i.l.bf16 %v5010_v55  ;;  %v5011_v16 = vld [vmem:[#allocation53_spill] sm:$0xff] }
 0x310   :  { %v2560_v60 = vadd.f32 %v4556_v10, %v2400_v22  ;;  %v1665_v7 = vadd.f32 %v1649_v58, %v1569_v5  ;;  %v5009_v58 = vld [vmem:[#allocation6_spill] sm:$0xff] }
 0x311   :  { %v2994_v27 = vunpack.i.h.bf16 %v5009_v58 }
 0x312   :  { %v2737_v45 = vpack.c.bf16 %v2560_v60, %v2560_v60  ;;  %v1825_v63 = vadd.f32 %v1789_v24, %v1665_v7  ;;  %v2993_v24 = vunpack.i.l.bf16 %v5009_v58 }
 0x313   :  { %v2109_v53 = vpop.permute.xlu0 %2108  ;;  %v1215_v15 = vpop.permute.xlu1 %1214 }
 0x314   :  { %2641 = vst.msk [vmem:[%s4790_s7 + $0x28] sm:$0xf] %vm2630_vm1, %v2737_v45  ;;  %v1985_v19 = vadd.f32 %v1949_v46, %v1825_v63  ;;  %v1250_v13 = vadd.f32 %v1215_v15, %v1090_v18  ;;  %v1092_v43 = vmul.f32 %v2993_v24, %v4225_v23 }
 0x316   :  { %v2145_v10 = vadd.f32 %v2109_v53, %v1985_v19 }
 0x317   :  { %v1375_v34 = vpop.permute.xlu0 %1374  ;;  %v1535_v38 = vpop.permute.xlu1 %1534 }
 0x318   :  { %v4734_v48 = vadd.f32 %v2225_v21, %v2145_v10  ;;  %v1410_v29 = vadd.f32 %v1375_v34, %v1250_v13  ;;  %v1652_v10 = vmul.f32 %v3161_v11, %v4230_v39  ;;  %v3162_v39 = vunpack.i.h.bf16 %v5010_v55 }
 0x31a   :  { %v1570_v50 = vadd.f32 %v1535_v38, %v1410_v29 }
 0x31b   :  { %v1951_v26 = vpop.permute.xlu0 %1950  ;;  %v1791_v42 = vpop.permute.xlu1 %1790 }
 0x31c   :  { %v1666_v4 = vadd.f32 %v1650_v33, %v1570_v50  ;;  %v3329_v50 = vunpack.i.l.bf16 %v5011_v16 }
 0x31e   :  { %v1826_v56 = vadd.f32 %v1791_v42, %v1666_v4  ;;  %v2228_v42 = vmul.f32 %v3329_v50, %v4946_v31 }
 0x31f   :  { %v2111_v14 = vpop.permute.xlu1 %2110  ;;  %v1217_v2 = vpop.permute.xlu0 %1216 }
 0x320   :  { %v1986_v51 = vadd.f32 %v1951_v26, %v1826_v56  ;;  %v1251_v61 = vadd.f32 %v1217_v2, %v1091_v17  ;;  %v1093_v26 = vmul.f32 %v2994_v27, %v4237_v37  ;;  %v1653_v17 = vmul.f32 %v3162_v39, %v4242_v0 }
 0x322   :  { %v2146_v30 = vadd.f32 %v2111_v14, %v1986_v51  ;;  %v2401_v51 = vadd.f32 %v4589_v35, %v4734_v48 }
 0x323   :  { %v1377_v40 = vpop.permute.xlu1 %1376  ;;  %v1537_v59 = vpop.permute.xlu0 %1536 }
 0x324   :  { %v2242_v41 = vadd.f32 %v2226_v52, %v2146_v30  ;;  %v1411_v32 = vadd.f32 %v1377_v40, %v1251_v61 }
 0x326   :  { %v1571_v54 = vadd.f32 %v1537_v59, %v1411_v32  ;;  %v3330_v32 = vunpack.i.h.bf16 %v5011_v16 }
 0x327   :  { %v1953_v22 = vpop.permute.xlu1 %1952  ;;  %v1793_v5 = vpop.permute.xlu0 %1792 }
 0x328   :  { %v1667_v1 = vadd.f32 %v1651_v6, %v1571_v54  ;;  %v2229_v35 = vmul.f32 %v3330_v32, %v4121_v8  ;;  %v2402_v6 = vadd.f32 %v4671_v12, %v2242_v41 }
 0x32a   :  { %v1827_v46 = vadd.f32 %v1793_v5, %v1667_v1 }
 0x32b   :  { %v2113_v36 = vpop.permute.xlu0 %2112  ;;  %v1219_v60 = vpop.permute.xlu1 %1218 }
 0x32c   :  { %v1987_v7 = vadd.f32 %v1953_v22, %v1827_v46  ;;  %v1252_v63 = vadd.f32 %v1219_v60, %v1092_v43 }
 0x32e   :  { %v2147_v45 = vadd.f32 %v2113_v36, %v1987_v7 }
 0x32f   :  { %v1379_v53 = vpop.permute.xlu0 %1378  ;;  %v1539_v15 = vpop.permute.xlu1 %1538 }
 0x330   :  { %v2243_v19 = vadd.f32 %v2227_v47, %v2147_v45  ;;  %v1412_v18 = vadd.f32 %v1379_v53, %v1252_v63 }
 0x332   :  { %v1572_v21 = vadd.f32 %v1539_v15, %v1412_v18  ;;  %v2403_v0 = vadd.f32 %v4679_v62, %v2243_v19 }
 0x333   :  { %v1955_v13 = vpop.permute.xlu0 %1954  ;;  %v1795_v34 = vpop.permute.xlu1 %1794 }
 0x334   :  { %v1668_v38 = vadd.f32 %v1652_v10, %v1572_v21 }
 0x336   :  { %v1828_v49 = vadd.f32 %v1795_v34, %v1668_v38 }
 0x337   :  { %v2115_v23 = vpop.permute.xlu1 %2114  ;;  %v1221_v29 = vpop.permute.xlu0 %1220 }
 0x338   :  { %v1988_v33 = vadd.f32 %v1955_v13, %v1828_v49  ;;  %v1253_v9 = vadd.f32 %v1221_v29, %v1093_v26 }
 0x33a   :  { %v2148_v4 = vadd.f32 %v2115_v23, %v1988_v33 }
 0x33b   :  { %v1381_v56 = vpop.permute.xlu1 %1380  ;;  %v1541_v14 = vpop.permute.xlu0 %1540 }
 0x33c   :  { %v2244_v2 = vadd.f32 %v2228_v42, %v2148_v4  ;;  %v1413_v57 = vadd.f32 %v1381_v56, %v1253_v9 }
 0x33e   :  { %v1573_v20 = vadd.f32 %v1541_v14, %v1413_v57  ;;  %v2404_v3 = vadd.f32 %v4645_v25, %v2244_v2 }
 0x33f   :  { %v2525_v52 = vpop.permute.xlu1 %2524  ;;  %v1797_v30 = vpop.permute.xlu0 %1796 }
 0x340   :  { %v2561_v61 = vadd.f32 %v2525_v52, %v2401_v51  ;;  %v1669_v37 = vadd.f32 %v1653_v17, %v1573_v20 }
 0x342   :  { %v2738_v40 = vpack.c.bf16 %v2561_v61, %v2561_v61  ;;  %v1829_v31 = vadd.f32 %v1797_v30, %v1669_v37 }
 0x343   :  { %v1957_v59 = vpop.permute.xlu1 %1956  ;;  %v2117_v28 = vpop.permute.xlu0 %2116 }
 0x344   :  { %2642 = vst.msk [vmem:[%s4790_s7 + $0x2c] sm:$0xf] %vm2630_vm1, %v2738_v40  ;;  %v1989_v54 = vadd.f32 %v1957_v59, %v1829_v31 }
 0x346   :  { %v2149_v48 = vadd.f32 %v2117_v28, %v1989_v54 }
 0x347   :  { %v2529_v22 = vpop.permute.xlu1 %2528  ;;  %v2527_v5 = vpop.permute.xlu0 %2526 }
 0x348   :  { %v2245_v1 = vadd.f32 %v2229_v35, %v2149_v48  ;;  %v2563_v58 = vadd.f32 %v2529_v22, %v2403_v0  ;;  %v2562_v24 = vadd.f32 %v2527_v5, %v2402_v6 }
 0x34a   :  { %v2740_v46 = vpack.c.bf16 %v2563_v58, %v2563_v58  ;;  %v2739_v36 = vpack.c.bf16 %v2562_v24, %v2562_v24  ;;  %v2405_v60 = vadd.f32 %v4673_v44, %v2245_v1 }
 0x34b   :  { %v2533_v7 = vpop.permute.xlu1 %2532  ;;  %v2531_v43 = vpop.permute.xlu0 %2530 }
 0x34c   :  { %2644 = vst.msk [vmem:[%s4790_s7 + $0x34] sm:$0xf] %vm2630_vm1, %v2740_v46  ;;  %2643 = vst.msk [vmem:[%s4790_s7 + $0x30] sm:$0xf] %vm2630_vm1, %v2739_v36  ;;  %v2565_v8 = vadd.f32 %v2533_v7, %v2405_v60  ;;  %v2564_v12 = vadd.f32 %v2531_v43, %v2404_v3 }
 0x34e   :  { %v2742_v62 = vpack.c.bf16 %v2565_v8, %v2565_v8  ;;  %v2741_v41 = vpack.c.bf16 %v2564_v12, %v2564_v12 }
 0x350   :  { %2646 = vst.msk [vmem:[%s4790_s7 + $0x3c] sm:$0xf] %vm2630_vm1, %v2742_v62  ;;  %2645 = vst.msk [vmem:[%s4790_s7 + $0x38] sm:$0xf] %vm2630_vm1, %v2741_v41 }

</bundles_post_ra>
